<compile_context>
chip_gen: v6e
topology: v6e:2x2x1
jax: 0.10.0
libtpu: 0.0.40
codegen_flags: <defaults>
</compile_context>

<pallas_src>
import functools

import jax
import jax.numpy as jnp
from jax.experimental import pallas as pl
from jax.experimental.pallas import tpu as pltpu

_VMEM_LIMIT = 32 * 1024 * 1024  # safe on v5e/v6e (128 MiB phys) and v7x (64 MiB)


# ---------------------------------------------------------------------------
# Tile-size helper
# ---------------------------------------------------------------------------

def _pick_tile(dim, target, align):
    """Largest tile <= target that divides dim and is a multiple of align,
    falling back to the full dim (full-dim blocks always satisfy (8,128))."""
    if dim <= target:
        return dim
    t = (target // align) * align
    while t >= align:
        if dim % t == 0:
            return t
        t -= align
    return dim


# ---------------------------------------------------------------------------
# Tiled matmul + bias + activation (used by the 2-D conv stack)
# ---------------------------------------------------------------------------

def _mm_kernel(x_ref, w_ref, b_ref, o_ref, acc_ref, *, act):
    k = pl.program_id(2)

    @pl.when(k == 0)
    def _():
        acc_ref[...] = jnp.zeros_like(acc_ref)

    acc_ref[...] += jnp.dot(x_ref[...], w_ref[...],
                            preferred_element_type=jnp.float32)

    @pl.when(k == pl.num_programs(2) - 1)
    def _():
        r = acc_ref[...] + b_ref[...]
        if act == "relu":
            r = jnp.maximum(r, 0.0)
        o_ref[...] = r.astype(o_ref.dtype)


def matmul_bias_act(x, w, b, act="relu", tm=256, tn=256, tk=512):
    """out = act(x @ w + b); bf16 operands, f32 accumulation, tiled + pipelined."""
    M, K = x.shape
    K2, N = w.shape
    assert K == K2
    tm = _pick_tile(M, tm, 8)
    tn = _pick_tile(N, tn, 128)
    tk = _pick_tile(K, tk, 128)
    kernel = functools.partial(_mm_kernel, act=act)
    return pl.pallas_call(
        kernel,
        out_shape=jax.ShapeDtypeStruct((M, N), jnp.float32),
        grid_spec=pltpu.PrefetchScalarGridSpec(
            num_scalar_prefetch=0,
            grid=(M // tm, N // tn, K // tk),
            in_specs=[pl.BlockSpec((tm, tk), lambda i, j, k: (i, k)),
                      pl.BlockSpec((tk, tn), lambda i, j, k: (k, j)),
                      pl.BlockSpec((1, tn), lambda i, j, k: (0, j))],
            out_specs=pl.BlockSpec((tm, tn), lambda i, j, k: (i, j)),
            scratch_shapes=[pltpu.VMEM((tm, tn), jnp.float32)]),
        compiler_params=pltpu.CompilerParams(
            dimension_semantics=("parallel", "parallel", "arbitrary"),
            vmem_limit_bytes=_VMEM_LIMIT),
    )(x.astype(jnp.bfloat16), w.astype(jnp.bfloat16),
      b.reshape(1, N).astype(jnp.float32))


# ---------------------------------------------------------------------------
# Fused 15-block dilated-conv residual stack
# ---------------------------------------------------------------------------

_DILS = (1, 4, 7)
_KSIZE = 5
_NBLOCKS = 15


def _dilated_kernel(x0_ref, w01_ref, w02_ref, w03_ref, b0_ref,
                    wr1_ref, wr2_ref, wr3_ref, br_ref,
                    o_ref, slab_ref, *, halo):
    blk = pl.program_id(1)
    T = o_ref.shape[1]

    def dilated_conv(x_slice_fn, w_list, cin):
        # y[:, cat over dilations] = sum_tap x_shift(tap, dil) @ W_dil[tap]
        parts = []
        for w_full, dil in zip(w_list, _DILS):
            acc = None
            for tap in range(_KSIZE):
                off = halo - 2 * dil + tap * dil          # static python int
                xs = x_slice_fn(off)                      # (T, cin) bf16
                wt = w_full[tap * cin:(tap + 1) * cin, :]  # (cin, c_d) bf16
                p = jnp.dot(xs, wt, preferred_element_type=jnp.float32)
                acc = p if acc is None else acc + p
            parts.append(acc)
        return jnp.concatenate(parts, axis=-1)            # (T, cdim) f32

    @pl.when(blk == 0)
    def _():
        # block 1 of the reference: relu(cat(conv1d_1_*(x))) — no residual
        slab_ref[...] = jnp.zeros_like(slab_ref)          # zero halos once per batch
        cin0 = x0_ref.shape[2]
        y = dilated_conv(lambda off: x0_ref[0, off:off + T, :],
                         [w01_ref[...], w02_ref[...], w03_ref[...]], cin0)
        slab_ref[halo:halo + T, :] = jnp.maximum(y + b0_ref[...], 0.0)

    @pl.when(blk > 0)
    def _():
        # blocks 2..15: relu(old + cat(conv1d_k_*(old)))
        cdim = slab_ref.shape[1]
        y = dilated_conv(
            lambda off: slab_ref[off:off + T, :].astype(jnp.bfloat16),
            [wr1_ref[0], wr2_ref[0], wr3_ref[0]], cdim)
        old = slab_ref[halo:halo + T, :]
        slab_ref[halo:halo + T, :] = jnp.maximum(old + y + br_ref[0], 0.0)

    @pl.when(blk == _NBLOCKS - 1)
    def _():
        o_ref[0] = slab_ref[halo:halo + T, :]


def dilated_stack(x, params, cdim, halo=16):
    """x: (B, T, cdim_mid) f32 -> (B, T, cdim) f32 through the 15 residual blocks.

    halo=16 (>= max needed 14 = (k-1)*dil_max//2) keeps the resident-slab
    writes sublane-aligned; the extra padding rows are zeros and never read
    at an offset that would change the result.
    """
    B, T, cin0 = x.shape
    w0 = [wi.astype(jnp.bfloat16) for wi in params["w0"]]
    wr = [wi.astype(jnp.bfloat16) for wi in params["wr"]]
    b0 = params["b0"].astype(jnp.float32)
    br = params["br"].astype(jnp.float32)
    c1, c2, c3 = (wi.shape[-1] for wi in w0)
    t_pad = T + 2 * halo
    x0 = jnp.pad(x, ((0, 0), (halo, halo), (0, 0))).astype(jnp.bfloat16)

    kernel = functools.partial(_dilated_kernel, halo=halo)
    const2 = lambda b, blk: (0, 0)
    rest_idx = lambda b, blk: (jnp.maximum(blk - 1, 0), 0, 0)

    return pl.pallas_call(
        kernel,
        out_shape=jax.ShapeDtypeStruct((B, T, cdim), jnp.float32),
        grid_spec=pltpu.PrefetchScalarGridSpec(
            num_scalar_prefetch=0,
            grid=(B, _NBLOCKS),
            in_specs=[
                pl.BlockSpec((1, t_pad, cin0), lambda b, blk: (b, 0, 0)),
                pl.BlockSpec((_KSIZE * cin0, c1), const2),
                pl.BlockSpec((_KSIZE * cin0, c2), const2),
                pl.BlockSpec((_KSIZE * cin0, c3), const2),
                pl.BlockSpec((1, cdim), const2),
                pl.BlockSpec((1, _KSIZE * cdim, c1), rest_idx),
                pl.BlockSpec((1, _KSIZE * cdim, c2), rest_idx),
                pl.BlockSpec((1, _KSIZE * cdim, c3), rest_idx),
                pl.BlockSpec((1, 1, cdim), rest_idx),
            ],
            out_specs=pl.BlockSpec((1, T, cdim), lambda b, blk: (b, 0, 0)),
            scratch_shapes=[pltpu.VMEM((t_pad, cdim), jnp.float32)]),
        compiler_params=pltpu.CompilerParams(
            dimension_semantics=("parallel", "arbitrary"),
            vmem_limit_bytes=_VMEM_LIMIT),
    )(x0, w0[0], w0[1], w0[2], b0, wr[0], wr[1], wr[2], br)


# ---------------------------------------------------------------------------
# Fused head: fc1 + ReLU, l_last + tanh (intermediate h never leaves VMEM)
# ---------------------------------------------------------------------------

def _head_kernel(x_ref, w1_ref, b1_ref, w2_ref, b2_ref, o_ref):
    h = jnp.dot(x_ref[...], w1_ref[...],
                preferred_element_type=jnp.float32) + b1_ref[...]
    h = jnp.maximum(h, 0.0)
    y = jnp.dot(h.astype(jnp.bfloat16), w2_ref[...],
                preferred_element_type=jnp.float32) + b2_ref[...]
    o_ref[...] = jnp.tanh(y).astype(o_ref.dtype)


def head_fc(x, w1, b1, w2, b2, tm_target=512):
    M, C = x.shape
    H = w2.shape[1]
    tm = _pick_tile(M, tm_target, 8)
    return pl.pallas_call(
        _head_kernel,
        out_shape=jax.ShapeDtypeStruct((M, H), jnp.float32),
        grid_spec=pltpu.PrefetchScalarGridSpec(
            num_scalar_prefetch=0,
            grid=(M // tm,),
            in_specs=[pl.BlockSpec((tm, C), lambda i: (i, 0)),
                      pl.BlockSpec((C, C), lambda i: (0, 0)),
                      pl.BlockSpec((1, C), lambda i: (0, 0)),
                      pl.BlockSpec((C, H), lambda i: (0, 0)),
                      pl.BlockSpec((1, H), lambda i: (0, 0))],
            out_specs=pl.BlockSpec((tm, H), lambda i: (i, 0))),
        compiler_params=pltpu.CompilerParams(
            dimension_semantics=("parallel",),
            vmem_limit_bytes=_VMEM_LIMIT),
    )(x.astype(jnp.bfloat16), w1.astype(jnp.bfloat16),
      b1.reshape(1, C).astype(jnp.float32),
      w2.astype(jnp.bfloat16), b2.reshape(1, H).astype(jnp.float32))


# ---------------------------------------------------------------------------
# im2col glue for the small 2-D stack (plain JAX; matmul is the Pallas kernel)
# ---------------------------------------------------------------------------

def im2col_2d(x, kh, kw, sh, sw, pad):
    """x: (B, H, W, C) NHWC -> (B*Hout*Wout, kh*kw*C), taps ordered (kh, kw, C)."""
    B, H, W, C = x.shape
    xp = jnp.pad(x, ((0, 0), (pad, pad), (pad, pad), (0, 0)))
    Hout = (H + 2 * pad - kh) // sh + 1
    Wout = (W + 2 * pad - kw) // sw + 1
    cols = []
    for i in range(kh):
        for j in range(kw):
            patch = xp[:, i:i + sh * (Hout - 1) + 1:sh,
                       j:j + sw * (Wout - 1) + 1:sw, :]
            cols.append(patch)
    col = jnp.concatenate(cols, axis=-1)
    return col.reshape(B * Hout * Wout, kh * kw * C), (B, Hout, Wout)


# ---------------------------------------------------------------------------
# Parameter construction (deterministic, synthetic)
# ---------------------------------------------------------------------------

def init_params(key, idim, cdim, hdim):
    dim1, dim2 = 128, 256                      # fixed in the reference module
    cdim_mid = (dim2 * idim) // 8
    c1 = cdim // 2
    c2 = cdim // 4
    c3 = cdim - c1 - c2
    keys = iter(jax.random.split(key, 128))

    def w(shape, scale=0.02):
        return scale * jax.random.normal(next(keys), shape, jnp.float32)

    p = {}
    # conv2d weights stored as im2col matrices (kh*kw*Cin, Cout)
    chans = [(1, dim1), (dim1, dim2), (dim2, dim2), (dim2, dim2), (dim2, dim2)]
    p["c2d_w"] = [w((9 * cin, cout)) for cin, cout in chans]
    p["c2d_b"] = [w((cout,)) for _, cout in chans]

    # dilated conv1d block 1 (cin = cdim_mid), per-dilation weights (no zeros)
    p["w0"] = [w((_KSIZE * cdim_mid, c)) for c in (c1, c2, c3)]
    p["b0"] = w((1, cdim))
    # blocks 2..15 (cin = cdim), stacked along a leading block axis
    p["wr"] = [w((_NBLOCKS - 1, _KSIZE * cdim, c)) for c in (c1, c2, c3)]
    p["br"] = w((_NBLOCKS - 1, 1, cdim))

    p["fc1_w"], p["fc1_b"] = w((cdim, cdim)), w((cdim,))
    p["ll_w"], p["ll_b"] = w((cdim, hdim)), w((hdim,))
    return p


# ---------------------------------------------------------------------------
# Forward pass (mirrors CNN.forward / Encoder.forward, inference semantics)
# ---------------------------------------------------------------------------

def encoder_forward(params, xs_pad, ilens):
    B, T, D = xs_pad.shape
    cdim = params["fc1_w"].shape[0]

    # ---- 2-D conv stack (NHWC, im2col + tiled Pallas matmul) ---------------
    # TODO(synk): special-case the first conv (Cin=1, K=9) as a VPU stencil to
    # avoid a mostly-empty K dimension on the MXU.
    x = xs_pad.reshape(B, T, D, 1).astype(jnp.float32)      # C = 1
    strides_w = [1, 1, 2, 2, 2]                             # stride (1,2) on W
    for wmat, b, sw in zip(params["c2d_w"], params["c2d_b"], strides_w):
        col, (B_, Hout, Wout) = im2col_2d(x, 3, 3, 1, sw, 1)
        y = matmul_bias_act(col, wmat, b, act="relu")       # Dropout == identity
        x = y.reshape(B_, Hout, Wout, wmat.shape[1])

    # match PyTorch: (B,C,T,F) -> transpose(1,2) -> view (B,T,C*F)
    # TODO(synk): fold this transpose into the last conv's out_spec index_map.
    Bx, Tx, Fx, Cx = x.shape
    x = jnp.transpose(x, (0, 1, 3, 2)).reshape(Bx, Tx, Cx * Fx)  # (B, T, cdim_mid)

    # ---- fused 15-block dilated-conv residual stack ------------------------
    act = dilated_stack(x, params, cdim)                    # (B, T, cdim) f32

    # ---- fused fc1 + relu, l_last + tanh -----------------------------------
    proj = head_fc(act.reshape(Bx * Tx, cdim),
                   params["fc1_w"], params["fc1_b"],
                   params["ll_w"], params["ll_b"])
    xs_out = proj.reshape(Bx, Tx, -1)

    # TODO(synk): reference Encoder.forward builds make_pad_mask(ilens) but
    # never applies it to the output, so it is intentionally omitted here.
    return xs_out, ilens, [None]


# ---------------------------------------------------------------------------

if __name__ == "__main__":
    B, T, D = 2, 8, 16            # idim=16 (divisible by 8 as the module requires)
    cdim, hdim = 32, 32           # eunits, eprojs

    key = jax.random.PRNGKey(0)
    kx, kp = jax.random.split(key)
    xs_pad = jax.random.normal(kx, (B, T, D), jnp.float32)
    ilens = jnp.array([T, T - 2], jnp.int32)

    params = init_params(kp, D, cdim, hdim)

    fwd = jax.jit(encoder_forward)
    xs_out, olens, states = fwd(params, xs_pad, ilens)
    jax.block_until_ready(xs_out)

    assert xs_out.shape == (B, T, hdim), xs_out.shape
    assert xs_out.dtype == jnp.float32
    assert bool(jnp.all(jnp.isfinite(xs_out)))
    print("KERNEL_OK")
</pallas_src>

<mosaic_0001>
module attributes {stable_mosaic.version = 11 : i64} {
  func.func @_mm_kernel(%arg0: i32, %arg1: i32, %arg2: i32, %arg3: memref<256x9xbf16, #tpu.memory_space<vmem>>, %arg4: memref<9x128xbf16, #tpu.memory_space<vmem>>, %arg5: memref<1x128xf32, #tpu.memory_space<vmem>>, %arg6: memref<256x128xf32, #tpu.memory_space<vmem>>, %arg7: memref<256x128xf32, #tpu.memory_space<vmem>>) attributes {dimension_semantics = [#tpu.dimension_semantics<parallel>, #tpu.dimension_semantics<parallel>, #tpu.dimension_semantics<arbitrary>], iteration_bounds = array<i64: 1, 1, 1>, scalar_prefetch = 0 : i64, scratch_operands = 1 : i64, tpu.core_type = #tpu.core_type<tc>, window_params = [{transform_indices = @transform_0, window_bounds = array<i64: 256, 9>}, {transform_indices = @transform_1, window_bounds = array<i64: 9, 128>}, {transform_indices = @transform_2, window_bounds = array<i64: 1, 128>}, {transform_indices = @transform_3, window_bounds = array<i64: 256, 128>}]} {
    %c0_i32 = arith.constant 0 : i32
    %0 = arith.cmpi eq, %arg2, %c0_i32 : i32
    %1 = arith.extui %0 : i1 to i32
    %c0_i32_0 = arith.constant 0 : i32
    %2 = arith.cmpi ne, %1, %c0_i32_0 : i32
    scf.if %2 {
      %cst_10 = arith.constant 0.000000e+00 : f32
      %12 = vector.broadcast %cst_10 : f32 to vector<256x128xf32>
      %c0_11 = arith.constant 0 : index
      %c0_12 = arith.constant 0 : index
      %13 = vector.load %arg7[%c0_11, %c0_12] : memref<256x128xf32, #tpu.memory_space<vmem>>, vector<256x128xf32>
      tpu.vector_store %arg7[%c0_11, %c0_12], %12 {strides = array<i32>} : memref<256x128xf32, #tpu.memory_space<vmem>>, vector<256x128xf32>,
    } else {
    }
    %c0 = arith.constant 0 : index
    %c0_1 = arith.constant 0 : index
    %3 = vector.load %arg7[%c0, %c0_1] : memref<256x128xf32, #tpu.memory_space<vmem>>, vector<256x128xf32>
    %c0_2 = arith.constant 0 : index
    %c0_3 = arith.constant 0 : index
    %4 = vector.load %arg3[%c0_2, %c0_3] : memref<256x9xbf16, #tpu.memory_space<vmem>>, vector<256x9xbf16>
    %c0_4 = arith.constant 0 : index
    %c0_5 = arith.constant 0 : index
    %5 = vector.load %arg4[%c0_4, %c0_5] : memref<9x128xbf16, #tpu.memory_space<vmem>>, vector<9x128xbf16>
    %cst = arith.constant dense<0.000000e+00> : vector<256x128xf32>
    %6 = tpu.matmul %4, %5, %cst {dimension_numbers = #tpu.dot_dimension_numbers<[1], [0], [0], [1], [0, 0, 1, 1], [], []>} : vector<256x9xbf16>, vector<9x128xbf16>, vector<256x128xf32> -> vector<256x128xf32>
    %7 = arith.addf %3, %6 : vector<256x128xf32>
    %c0_6 = arith.constant 0 : index
    %c0_7 = arith.constant 0 : index
    %8 = vector.load %arg7[%c0_6, %c0_7] : memref<256x128xf32, #tpu.memory_space<vmem>>, vector<256x128xf32>
    tpu.vector_store %arg7[%c0_6, %c0_7], %7 {strides = array<i32>} : memref<256x128xf32, #tpu.memory_space<vmem>>, vector<256x128xf32>,
    %c0_i32_8 = arith.constant 0 : i32
    %9 = arith.cmpi eq, %arg2, %c0_i32_8 : i32
    %10 = arith.extui %9 : i1 to i32
    %c0_i32_9 = arith.constant 0 : i32
    %11 = arith.cmpi ne, %10, %c0_i32_9 : i32
    scf.if %11 {
      %c0_10 = arith.constant 0 : index
      %c0_11 = arith.constant 0 : index
      %12 = vector.load %arg7[%c0_10, %c0_11] : memref<256x128xf32, #tpu.memory_space<vmem>>, vector<256x128xf32>
      %c0_12 = arith.constant 0 : index
      %c0_13 = arith.constant 0 : index
      %13 = vector.load %arg5[%c0_12, %c0_13] : memref<1x128xf32, #tpu.memory_space<vmem>>, vector<1x128xf32>
      %14 = vector.broadcast %13 : vector<1x128xf32> to vector<256x128xf32>
      %15 = arith.addf %12, %14 : vector<256x128xf32>
      %cst_14 = arith.constant 0.000000e+00 : f32
      %16 = vector.broadcast %cst_14 : f32 to vector<256x128xf32>
      %17 = arith.maximumf %15, %16 : vector<256x128xf32>
      %c0_15 = arith.constant 0 : index
      %c0_16 = arith.constant 0 : index
      %18 = vector.load %arg6[%c0_15, %c0_16] : memref<256x128xf32, #tpu.memory_space<vmem>>, vector<256x128xf32>
      tpu.vector_store %arg6[%c0_15, %c0_16], %17 {strides = array<i32>} : memref<256x128xf32, #tpu.memory_space<vmem>>, vector<256x128xf32>,
    } else {
    }
    return
  }
  func.func @transform_0(%arg0: i32, %arg1: i32, %arg2: i32) -> (i32, i32) {
    %c0_i32 = arith.constant 0 : i32
    return %arg0, %arg2 : i32, i32
  }
  func.func @transform_1(%arg0: i32, %arg1: i32, %arg2: i32) -> (i32, i32) {
    %c0_i32 = arith.constant 0 : i32
    return %arg2, %arg1 : i32, i32
  }
  func.func @transform_2(%arg0: i32, %arg1: i32, %arg2: i32) -> (i32, i32) {
    %c0_i32 = arith.constant 0 : i32
    %c0_i32_0 = arith.constant 0 : i32
    return %c0_i32, %arg1 : i32, i32
  }
  func.func @transform_3(%arg0: i32, %arg1: i32, %arg2: i32) -> (i32, i32) {
    %c0_i32 = arith.constant 0 : i32
    return %arg0, %arg1 : i32, i32
  }
}

module attributes {stable_mosaic.version = 11 : i64} {
  func.func @_mm_kernel(%arg0: i32, %arg1: i32, %arg2: i32, %arg3: memref<256x384xbf16, #tpu.memory_space<vmem>>, %arg4: memref<384x256xbf16, #tpu.memory_space<vmem>>, %arg5: memref<1x256xf32, #tpu.memory_space<vmem>>, %arg6: memref<256x256xf32, #tpu.memory_space<vmem>>, %arg7: memref<256x256xf32, #tpu.memory_space<vmem>>) attributes {dimension_semantics = [#tpu.dimension_semantics<parallel>, #tpu.dimension_semantics<parallel>, #tpu.dimension_semantics<arbitrary>], iteration_bounds = array<i64: 1, 1, 3>, scalar_prefetch = 0 : i64, scratch_operands = 1 : i64, tpu.core_type = #tpu.core_type<tc>, window_params = [{transform_indices = @transform_0, window_bounds = array<i64: 256, 384>}, {transform_indices = @transform_1, window_bounds = array<i64: 384, 256>}, {transform_indices = @transform_2, window_bounds = array<i64: 1, 256>}, {transform_indices = @transform_3, window_bounds = array<i64: 256, 256>}]} {
    %c0_i32 = arith.constant 0 : i32
    %0 = arith.cmpi eq, %arg2, %c0_i32 : i32
    %1 = arith.extui %0 : i1 to i32
    %c0_i32_0 = arith.constant 0 : i32
    %2 = arith.cmpi ne, %1, %c0_i32_0 : i32
    scf.if %2 {
      %cst_9 = arith.constant 0.000000e+00 : f32
      %12 = vector.broadcast %cst_9 : f32 to vector<256x256xf32>
      %c0_10 = arith.constant 0 : index
      %c0_11 = arith.constant 0 : index
      %13 = vector.load %arg7[%c0_10, %c0_11] : memref<256x256xf32, #tpu.memory_space<vmem>>, vector<256x256xf32>
      tpu.vector_store %arg7[%c0_10, %c0_11], %12 {strides = array<i32>} : memref<256x256xf32, #tpu.memory_space<vmem>>, vector<256x256xf32>,
    } else {
    }
    %c0 = arith.constant 0 : index
    %c0_1 = arith.constant 0 : index
    %3 = vector.load %arg7[%c0, %c0_1] : memref<256x256xf32, #tpu.memory_space<vmem>>, vector<256x256xf32>
    %c0_2 = arith.constant 0 : index
    %c0_3 = arith.constant 0 : index
    %4 = vector.load %arg3[%c0_2, %c0_3] : memref<256x384xbf16, #tpu.memory_space<vmem>>, vector<256x384xbf16>
    %c0_4 = arith.constant 0 : index
    %c0_5 = arith.constant 0 : index
    %5 = vector.load %arg4[%c0_4, %c0_5] : memref<384x256xbf16, #tpu.memory_space<vmem>>, vector<384x256xbf16>
    %cst = arith.constant dense<0.000000e+00> : vector<256x256xf32>
    %6 = tpu.matmul %4, %5, %cst {dimension_numbers = #tpu.dot_dimension_numbers<[1], [0], [0], [1], [0, 0, 1, 1], [], []>} : vector<256x384xbf16>, vector<384x256xbf16>, vector<256x256xf32> -> vector<256x256xf32>
    %7 = arith.addf %3, %6 : vector<256x256xf32>
    %c0_6 = arith.constant 0 : index
    %c0_7 = arith.constant 0 : index
    %8 = vector.load %arg7[%c0_6, %c0_7] : memref<256x256xf32, #tpu.memory_space<vmem>>, vector<256x256xf32>
    tpu.vector_store %arg7[%c0_6, %c0_7], %7 {strides = array<i32>} : memref<256x256xf32, #tpu.memory_space<vmem>>, vector<256x256xf32>,
    %c2_i32 = arith.constant 2 : i32
    %9 = arith.cmpi eq, %arg2, %c2_i32 : i32
    %10 = arith.extui %9 : i1 to i32
    %c0_i32_8 = arith.constant 0 : i32
    %11 = arith.cmpi ne, %10, %c0_i32_8 : i32
    scf.if %11 {
      %c0_9 = arith.constant 0 : index
      %c0_10 = arith.constant 0 : index
      %12 = vector.load %arg7[%c0_9, %c0_10] : memref<256x256xf32, #tpu.memory_space<vmem>>, vector<256x256xf32>
      %c0_11 = arith.constant 0 : index
      %c0_12 = arith.constant 0 : index
      %13 = vector.load %arg5[%c0_11, %c0_12] : memref<1x256xf32, #tpu.memory_space<vmem>>, vector<1x256xf32>
      %14 = vector.broadcast %13 : vector<1x256xf32> to vector<256x256xf32>
      %15 = arith.addf %12, %14 : vector<256x256xf32>
      %cst_13 = arith.constant 0.000000e+00 : f32
      %16 = vector.broadcast %cst_13 : f32 to vector<256x256xf32>
      %17 = arith.maximumf %15, %16 : vector<256x256xf32>
      %c0_14 = arith.constant 0 : index
      %c0_15 = arith.constant 0 : index
      %18 = vector.load %arg6[%c0_14, %c0_15] : memref<256x256xf32, #tpu.memory_space<vmem>>, vector<256x256xf32>
      tpu.vector_store %arg6[%c0_14, %c0_15], %17 {strides = array<i32>} : memref<256x256xf32, #tpu.memory_space<vmem>>, vector<256x256xf32>,
    } else {
    }
    return
  }
  func.func @transform_0(%arg0: i32, %arg1: i32, %arg2: i32) -> (i32, i32) {
    %c0_i32 = arith.constant 0 : i32
    return %arg0, %arg2 : i32, i32
  }
  func.func @transform_1(%arg0: i32, %arg1: i32, %arg2: i32) -> (i32, i32) {
    %c0_i32 = arith.constant 0 : i32
    return %arg2, %arg1 : i32, i32
  }
  func.func @transform_2(%arg0: i32, %arg1: i32, %arg2: i32) -> (i32, i32) {
    %c0_i32 = arith.constant 0 : i32
    %c0_i32_0 = arith.constant 0 : i32
    return %c0_i32, %arg1 : i32, i32
  }
  func.func @transform_3(%arg0: i32, %arg1: i32, %arg2: i32) -> (i32, i32) {
    %c0_i32 = arith.constant 0 : i32
    return %arg0, %arg1 : i32, i32
  }
}

module attributes {stable_mosaic.version = 11 : i64} {
  func.func @_mm_kernel(%arg0: i32, %arg1: i32, %arg2: i32, %arg3: memref<128x384xbf16, #tpu.memory_space<vmem>>, %arg4: memref<384x256xbf16, #tpu.memory_space<vmem>>, %arg5: memref<1x256xf32, #tpu.memory_space<vmem>>, %arg6: memref<128x256xf32, #tpu.memory_space<vmem>>, %arg7: memref<128x256xf32, #tpu.memory_space<vmem>>) attributes {dimension_semantics = [#tpu.dimension_semantics<parallel>, #tpu.dimension_semantics<parallel>, #tpu.dimension_semantics<arbitrary>], iteration_bounds = array<i64: 1, 1, 6>, scalar_prefetch = 0 : i64, scratch_operands = 1 : i64, tpu.core_type = #tpu.core_type<tc>, window_params = [{transform_indices = @transform_0, window_bounds = array<i64: 128, 384>}, {transform_indices = @transform_1, window_bounds = array<i64: 384, 256>}, {transform_indices = @transform_2, window_bounds = array<i64: 1, 256>}, {transform_indices = @transform_3, window_bounds = array<i64: 128, 256>}]} {
    %c0_i32 = arith.constant 0 : i32
    %0 = arith.cmpi eq, %arg2, %c0_i32 : i32
    %1 = arith.extui %0 : i1 to i32
    %c0_i32_0 = arith.constant 0 : i32
    %2 = arith.cmpi ne, %1, %c0_i32_0 : i32
    scf.if %2 {
      %cst_9 = arith.constant 0.000000e+00 : f32
      %12 = vector.broadcast %cst_9 : f32 to vector<128x256xf32>
      %c0_10 = arith.constant 0 : index
      %c0_11 = arith.constant 0 : index
      %13 = vector.load %arg7[%c0_10, %c0_11] : memref<128x256xf32, #tpu.memory_space<vmem>>, vector<128x256xf32>
      tpu.vector_store %arg7[%c0_10, %c0_11], %12 {strides = array<i32>} : memref<128x256xf32, #tpu.memory_space<vmem>>, vector<128x256xf32>,
    } else {
    }
    %c0 = arith.constant 0 : index
    %c0_1 = arith.constant 0 : index
    %3 = vector.load %arg7[%c0, %c0_1] : memref<128x256xf32, #tpu.memory_space<vmem>>, vector<128x256xf32>
    %c0_2 = arith.constant 0 : index
    %c0_3 = arith.constant 0 : index
    %4 = vector.load %arg3[%c0_2, %c0_3] : memref<128x384xbf16, #tpu.memory_space<vmem>>, vector<128x384xbf16>
    %c0_4 = arith.constant 0 : index
    %c0_5 = arith.constant 0 : index
    %5 = vector.load %arg4[%c0_4, %c0_5] : memref<384x256xbf16, #tpu.memory_space<vmem>>, vector<384x256xbf16>
    %cst = arith.constant dense<0.000000e+00> : vector<128x256xf32>
    %6 = tpu.matmul %4, %5, %cst {dimension_numbers = #tpu.dot_dimension_numbers<[1], [0], [0], [1], [0, 0, 1, 1], [], []>} : vector<128x384xbf16>, vector<384x256xbf16>, vector<128x256xf32> -> vector<128x256xf32>
    %7 = arith.addf %3, %6 : vector<128x256xf32>
    %c0_6 = arith.constant 0 : index
    %c0_7 = arith.constant 0 : index
    %8 = vector.load %arg7[%c0_6, %c0_7] : memref<128x256xf32, #tpu.memory_space<vmem>>, vector<128x256xf32>
    tpu.vector_store %arg7[%c0_6, %c0_7], %7 {strides = array<i32>} : memref<128x256xf32, #tpu.memory_space<vmem>>, vector<128x256xf32>,
    %c5_i32 = arith.constant 5 : i32
    %9 = arith.cmpi eq, %arg2, %c5_i32 : i32
    %10 = arith.extui %9 : i1 to i32
    %c0_i32_8 = arith.constant 0 : i32
    %11 = arith.cmpi ne, %10, %c0_i32_8 : i32
    scf.if %11 {
      %c0_9 = arith.constant 0 : index
      %c0_10 = arith.constant 0 : index
      %12 = vector.load %arg7[%c0_9, %c0_10] : memref<128x256xf32, #tpu.memory_space<vmem>>, vector<128x256xf32>
      %c0_11 = arith.constant 0 : index
      %c0_12 = arith.constant 0 : index
      %13 = vector.load %arg5[%c0_11, %c0_12] : memref<1x256xf32, #tpu.memory_space<vmem>>, vector<1x256xf32>
      %14 = vector.broadcast %13 : vector<1x256xf32> to vector<128x256xf32>
      %15 = arith.addf %12, %14 : vector<128x256xf32>
      %cst_13 = arith.constant 0.000000e+00 : f32
      %16 = vector.broadcast %cst_13 : f32 to vector<128x256xf32>
      %17 = arith.maximumf %15, %16 : vector<128x256xf32>
      %c0_14 = arith.constant 0 : index
      %c0_15 = arith.constant 0 : index
      %18 = vector.load %arg6[%c0_14, %c0_15] : memref<128x256xf32, #tpu.memory_space<vmem>>, vector<128x256xf32>
      tpu.vector_store %arg6[%c0_14, %c0_15], %17 {strides = array<i32>} : memref<128x256xf32, #tpu.memory_space<vmem>>, vector<128x256xf32>,
    } else {
    }
    return
  }
  func.func @transform_0(%arg0: i32, %arg1: i32, %arg2: i32) -> (i32, i32) {
    %c0_i32 = arith.constant 0 : i32
    return %arg0, %arg2 : i32, i32
  }
  func.func @transform_1(%arg0: i32, %arg1: i32, %arg2: i32) -> (i32, i32) {
    %c0_i32 = arith.constant 0 : i32
    return %arg2, %arg1 : i32, i32
  }
  func.func @transform_2(%arg0: i32, %arg1: i32, %arg2: i32) -> (i32, i32) {
    %c0_i32 = arith.constant 0 : i32
    %c0_i32_0 = arith.constant 0 : i32
    return %c0_i32, %arg1 : i32, i32
  }
  func.func @transform_3(%arg0: i32, %arg1: i32, %arg2: i32) -> (i32, i32) {
    %c0_i32 = arith.constant 0 : i32
    return %arg0, %arg1 : i32, i32
  }
}

module attributes {stable_mosaic.version = 11 : i64} {
  func.func @_mm_kernel(%arg0: i32, %arg1: i32, %arg2: i32, %arg3: memref<64x384xbf16, #tpu.memory_space<vmem>>, %arg4: memref<384x256xbf16, #tpu.memory_space<vmem>>, %arg5: memref<1x256xf32, #tpu.memory_space<vmem>>, %arg6: memref<64x256xf32, #tpu.memory_space<vmem>>, %arg7: memref<64x256xf32, #tpu.memory_space<vmem>>) attributes {dimension_semantics = [#tpu.dimension_semantics<parallel>, #tpu.dimension_semantics<parallel>, #tpu.dimension_semantics<arbitrary>], iteration_bounds = array<i64: 1, 1, 6>, scalar_prefetch = 0 : i64, scratch_operands = 1 : i64, tpu.core_type = #tpu.core_type<tc>, window_params = [{transform_indices = @transform_0, window_bounds = array<i64: 64, 384>}, {transform_indices = @transform_1, window_bounds = array<i64: 384, 256>}, {transform_indices = @transform_2, window_bounds = array<i64: 1, 256>}, {transform_indices = @transform_3, window_bounds = array<i64: 64, 256>}]} {
    %c0_i32 = arith.constant 0 : i32
    %0 = arith.cmpi eq, %arg2, %c0_i32 : i32
    %1 = arith.extui %0 : i1 to i32
    %c0_i32_0 = arith.constant 0 : i32
    %2 = arith.cmpi ne, %1, %c0_i32_0 : i32
    scf.if %2 {
      %cst_9 = arith.constant 0.000000e+00 : f32
      %12 = vector.broadcast %cst_9 : f32 to vector<64x256xf32>
      %c0_10 = arith.constant 0 : index
      %c0_11 = arith.constant 0 : index
      %13 = vector.load %arg7[%c0_10, %c0_11] : memref<64x256xf32, #tpu.memory_space<vmem>>, vector<64x256xf32>
      tpu.vector_store %arg7[%c0_10, %c0_11], %12 {strides = array<i32>} : memref<64x256xf32, #tpu.memory_space<vmem>>, vector<64x256xf32>,
    } else {
    }
    %c0 = arith.constant 0 : index
    %c0_1 = arith.constant 0 : index
    %3 = vector.load %arg7[%c0, %c0_1] : memref<64x256xf32, #tpu.memory_space<vmem>>, vector<64x256xf32>
    %c0_2 = arith.constant 0 : index
    %c0_3 = arith.constant 0 : index
    %4 = vector.load %arg3[%c0_2, %c0_3] : memref<64x384xbf16, #tpu.memory_space<vmem>>, vector<64x384xbf16>
    %c0_4 = arith.constant 0 : index
    %c0_5 = arith.constant 0 : index
    %5 = vector.load %arg4[%c0_4, %c0_5] : memref<384x256xbf16, #tpu.memory_space<vmem>>, vector<384x256xbf16>
    %cst = arith.constant dense<0.000000e+00> : vector<64x256xf32>
    %6 = tpu.matmul %4, %5, %cst {dimension_numbers = #tpu.dot_dimension_numbers<[1], [0], [0], [1], [0, 0, 1, 1], [], []>} : vector<64x384xbf16>, vector<384x256xbf16>, vector<64x256xf32> -> vector<64x256xf32>
    %7 = arith.addf %3, %6 : vector<64x256xf32>
    %c0_6 = arith.constant 0 : index
    %c0_7 = arith.constant 0 : index
    %8 = vector.load %arg7[%c0_6, %c0_7] : memref<64x256xf32, #tpu.memory_space<vmem>>, vector<64x256xf32>
    tpu.vector_store %arg7[%c0_6, %c0_7], %7 {strides = array<i32>} : memref<64x256xf32, #tpu.memory_space<vmem>>, vector<64x256xf32>,
    %c5_i32 = arith.constant 5 : i32
    %9 = arith.cmpi eq, %arg2, %c5_i32 : i32
    %10 = arith.extui %9 : i1 to i32
    %c0_i32_8 = arith.constant 0 : i32
    %11 = arith.cmpi ne, %10, %c0_i32_8 : i32
    scf.if %11 {
      %c0_9 = arith.constant 0 : index
      %c0_10 = arith.constant 0 : index
      %12 = vector.load %arg7[%c0_9, %c0_10] : memref<64x256xf32, #tpu.memory_space<vmem>>, vector<64x256xf32>
      %c0_11 = arith.constant 0 : index
      %c0_12 = arith.constant 0 : index
      %13 = vector.load %arg5[%c0_11, %c0_12] : memref<1x256xf32, #tpu.memory_space<vmem>>, vector<1x256xf32>
      %14 = vector.broadcast %13 : vector<1x256xf32> to vector<64x256xf32>
      %15 = arith.addf %12, %14 : vector<64x256xf32>
      %cst_13 = arith.constant 0.000000e+00 : f32
      %16 = vector.broadcast %cst_13 : f32 to vector<64x256xf32>
      %17 = arith.maximumf %15, %16 : vector<64x256xf32>
      %c0_14 = arith.constant 0 : index
      %c0_15 = arith.constant 0 : index
      %18 = vector.load %arg6[%c0_14, %c0_15] : memref<64x256xf32, #tpu.memory_space<vmem>>, vector<64x256xf32>
      tpu.vector_store %arg6[%c0_14, %c0_15], %17 {strides = array<i32>} : memref<64x256xf32, #tpu.memory_space<vmem>>, vector<64x256xf32>,
    } else {
    }
    return
  }
  func.func @transform_0(%arg0: i32, %arg1: i32, %arg2: i32) -> (i32, i32) {
    %c0_i32 = arith.constant 0 : i32
    return %arg0, %arg2 : i32, i32
  }
  func.func @transform_1(%arg0: i32, %arg1: i32, %arg2: i32) -> (i32, i32) {
    %c0_i32 = arith.constant 0 : i32
    return %arg2, %arg1 : i32, i32
  }
  func.func @transform_2(%arg0: i32, %arg1: i32, %arg2: i32) -> (i32, i32) {
    %c0_i32 = arith.constant 0 : i32
    %c0_i32_0 = arith.constant 0 : i32
    return %c0_i32, %arg1 : i32, i32
  }
  func.func @transform_3(%arg0: i32, %arg1: i32, %arg2: i32) -> (i32, i32) {
    %c0_i32 = arith.constant 0 : i32
    return %arg0, %arg1 : i32, i32
  }
}

module attributes {stable_mosaic.version = 11 : i64} {
  func.func @_mm_kernel(%arg0: i32, %arg1: i32, %arg2: i32, %arg3: memref<32x384xbf16, #tpu.memory_space<vmem>>, %arg4: memref<384x256xbf16, #tpu.memory_space<vmem>>, %arg5: memref<1x256xf32, #tpu.memory_space<vmem>>, %arg6: memref<32x256xf32, #tpu.memory_space<vmem>>, %arg7: memref<32x256xf32, #tpu.memory_space<vmem>>) attributes {dimension_semantics = [#tpu.dimension_semantics<parallel>, #tpu.dimension_semantics<parallel>, #tpu.dimension_semantics<arbitrary>], iteration_bounds = array<i64: 1, 1, 6>, scalar_prefetch = 0 : i64, scratch_operands = 1 : i64, tpu.core_type = #tpu.core_type<tc>, window_params = [{transform_indices = @transform_0, window_bounds = array<i64: 32, 384>}, {transform_indices = @transform_1, window_bounds = array<i64: 384, 256>}, {transform_indices = @transform_2, window_bounds = array<i64: 1, 256>}, {transform_indices = @transform_3, window_bounds = array<i64: 32, 256>}]} {
    %c0_i32 = arith.constant 0 : i32
    %0 = arith.cmpi eq, %arg2, %c0_i32 : i32
    %1 = arith.extui %0 : i1 to i32
    %c0_i32_0 = arith.constant 0 : i32
    %2 = arith.cmpi ne, %1, %c0_i32_0 : i32
    scf.if %2 {
      %cst_9 = arith.constant 0.000000e+00 : f32
      %12 = vector.broadcast %cst_9 : f32 to vector<32x256xf32>
      %c0_10 = arith.constant 0 : index
      %c0_11 = arith.constant 0 : index
      %13 = vector.load %arg7[%c0_10, %c0_11] : memref<32x256xf32, #tpu.memory_space<vmem>>, vector<32x256xf32>
      tpu.vector_store %arg7[%c0_10, %c0_11], %12 {strides = array<i32>} : memref<32x256xf32, #tpu.memory_space<vmem>>, vector<32x256xf32>,
    } else {
    }
    %c0 = arith.constant 0 : index
    %c0_1 = arith.constant 0 : index
    %3 = vector.load %arg7[%c0, %c0_1] : memref<32x256xf32, #tpu.memory_space<vmem>>, vector<32x256xf32>
    %c0_2 = arith.constant 0 : index
    %c0_3 = arith.constant 0 : index
    %4 = vector.load %arg3[%c0_2, %c0_3] : memref<32x384xbf16, #tpu.memory_space<vmem>>, vector<32x384xbf16>
    %c0_4 = arith.constant 0 : index
    %c0_5 = arith.constant 0 : index
    %5 = vector.load %arg4[%c0_4, %c0_5] : memref<384x256xbf16, #tpu.memory_space<vmem>>, vector<384x256xbf16>
    %cst = arith.constant dense<0.000000e+00> : vector<32x256xf32>
    %6 = tpu.matmul %4, %5, %cst {dimension_numbers = #tpu.dot_dimension_numbers<[1], [0], [0], [1], [0, 0, 1, 1], [], []>} : vector<32x384xbf16>, vector<384x256xbf16>, vector<32x256xf32> -> vector<32x256xf32>
    %7 = arith.addf %3, %6 : vector<32x256xf32>
    %c0_6 = arith.constant 0 : index
    %c0_7 = arith.constant 0 : index
    %8 = vector.load %arg7[%c0_6, %c0_7] : memref<32x256xf32, #tpu.memory_space<vmem>>, vector<32x256xf32>
    tpu.vector_store %arg7[%c0_6, %c0_7], %7 {strides = array<i32>} : memref<32x256xf32, #tpu.memory_space<vmem>>, vector<32x256xf32>,
    %c5_i32 = arith.constant 5 : i32
    %9 = arith.cmpi eq, %arg2, %c5_i32 : i32
    %10 = arith.extui %9 : i1 to i32
    %c0_i32_8 = arith.constant 0 : i32
    %11 = arith.cmpi ne, %10, %c0_i32_8 : i32
    scf.if %11 {
      %c0_9 = arith.constant 0 : index
      %c0_10 = arith.constant 0 : index
      %12 = vector.load %arg7[%c0_9, %c0_10] : memref<32x256xf32, #tpu.memory_space<vmem>>, vector<32x256xf32>
      %c0_11 = arith.constant 0 : index
      %c0_12 = arith.constant 0 : index
      %13 = vector.load %arg5[%c0_11, %c0_12] : memref<1x256xf32, #tpu.memory_space<vmem>>, vector<1x256xf32>
      %14 = vector.broadcast %13 : vector<1x256xf32> to vector<32x256xf32>
      %15 = arith.addf %12, %14 : vector<32x256xf32>
      %cst_13 = arith.constant 0.000000e+00 : f32
      %16 = vector.broadcast %cst_13 : f32 to vector<32x256xf32>
      %17 = arith.maximumf %15, %16 : vector<32x256xf32>
      %c0_14 = arith.constant 0 : index
      %c0_15 = arith.constant 0 : index
      %18 = vector.load %arg6[%c0_14, %c0_15] : memref<32x256xf32, #tpu.memory_space<vmem>>, vector<32x256xf32>
      tpu.vector_store %arg6[%c0_14, %c0_15], %17 {strides = array<i32>} : memref<32x256xf32, #tpu.memory_space<vmem>>, vector<32x256xf32>,
    } else {
    }
    return
  }
  func.func @transform_0(%arg0: i32, %arg1: i32, %arg2: i32) -> (i32, i32) {
    %c0_i32 = arith.constant 0 : i32
    return %arg0, %arg2 : i32, i32
  }
  func.func @transform_1(%arg0: i32, %arg1: i32, %arg2: i32) -> (i32, i32) {
    %c0_i32 = arith.constant 0 : i32
    return %arg2, %arg1 : i32, i32
  }
  func.func @transform_2(%arg0: i32, %arg1: i32, %arg2: i32) -> (i32, i32) {
    %c0_i32 = arith.constant 0 : i32
    %c0_i32_0 = arith.constant 0 : i32
    return %c0_i32, %arg1 : i32, i32
  }
  func.func @transform_3(%arg0: i32, %arg1: i32, %arg2: i32) -> (i32, i32) {
    %c0_i32 = arith.constant 0 : i32
    return %arg0, %arg1 : i32, i32
  }
}

module attributes {stable_mosaic.version = 11 : i64} {
  func.func @_dilated_kernel(%arg0: i32, %arg1: i32, %arg2: memref<1x40x512xbf16, #tpu.memory_space<vmem>>, %arg3: memref<2560x16xbf16, #tpu.memory_space<vmem>>, %arg4: memref<2560x8xbf16, #tpu.memory_space<vmem>>, %arg5: memref<2560x8xbf16, #tpu.memory_space<vmem>>, %arg6: memref<1x32xf32, #tpu.memory_space<vmem>>, %arg7: memref<1x160x16xbf16, #tpu.memory_space<vmem>>, %arg8: memref<1x160x8xbf16, #tpu.memory_space<vmem>>, %arg9: memref<1x160x8xbf16, #tpu.memory_space<vmem>>, %arg10: memref<1x1x32xf32, #tpu.memory_space<vmem>>, %arg11: memref<1x8x32xf32, #tpu.memory_space<vmem>>, %arg12: memref<40x32xf32, #tpu.memory_space<vmem>>) attributes {dimension_semantics = [#tpu.dimension_semantics<parallel>, #tpu.dimension_semantics<arbitrary>], iteration_bounds = array<i64: 2, 15>, scalar_prefetch = 0 : i64, scratch_operands = 1 : i64, tpu.core_type = #tpu.core_type<tc>, window_params = [{transform_indices = @transform_0, window_bounds = array<i64: 1, 40, 512>}, {pipeline_mode = #tpu.pipeline_mode<synchronous>, transform_indices = @transform_1, window_bounds = array<i64: 2560, 16>}, {pipeline_mode = #tpu.pipeline_mode<synchronous>, transform_indices = @transform_2, window_bounds = array<i64: 2560, 8>}, {pipeline_mode = #tpu.pipeline_mode<synchronous>, transform_indices = @transform_3, window_bounds = array<i64: 2560, 8>}, {pipeline_mode = #tpu.pipeline_mode<synchronous>, transform_indices = @transform_4, window_bounds = array<i64: 1, 32>}, {transform_indices = @transform_5, window_bounds = array<i64: 1, 160, 16>}, {transform_indices = @transform_6, window_bounds = array<i64: 1, 160, 8>}, {transform_indices = @transform_7, window_bounds = array<i64: 1, 160, 8>}, {transform_indices = @transform_8, window_bounds = array<i64: 1, 1, 32>}, {transform_indices = @transform_9, window_bounds = array<i64: 1, 8, 32>}]} {
    %c0_i32 = arith.constant 0 : i32
    %0 = arith.cmpi eq, %arg1, %c0_i32 : i32
    %1 = arith.extui %0 : i1 to i32
    %c0_i32_0 = arith.constant 0 : i32
    %2 = arith.cmpi ne, %1, %c0_i32_0 : i32
    scf.if %2 {
      %cst = arith.constant 0.000000e+00 : f32
      %9 = vector.broadcast %cst : f32 to vector<40x32xf32>
      %c0 = arith.constant 0 : index
      %c0_4 = arith.constant 0 : index
      %10 = vector.load %arg12[%c0, %c0_4] : memref<40x32xf32, #tpu.memory_space<vmem>>, vector<40x32xf32>
      tpu.vector_store %arg12[%c0, %c0_4], %9 {strides = array<i32>} : memref<40x32xf32, #tpu.memory_space<vmem>>, vector<40x32xf32>,
      %c0_5 = arith.constant 0 : index
      %c0_6 = arith.constant 0 : index
      %11 = vector.load %arg3[%c0_5, %c0_6] : memref<2560x16xbf16, #tpu.memory_space<vmem>>, vector<2560x16xbf16>
      %c0_7 = arith.constant 0 : index
      %c0_8 = arith.constant 0 : index
      %12 = vector.load %arg4[%c0_7, %c0_8] : memref<2560x8xbf16, #tpu.memory_space<vmem>>, vector<2560x8xbf16>
      %c0_9 = arith.constant 0 : index
      %c0_10 = arith.constant 0 : index
      %13 = vector.load %arg5[%c0_9, %c0_10] : memref<2560x8xbf16, #tpu.memory_space<vmem>>, vector<2560x8xbf16>
      %c0_11 = arith.constant 0 : index
      %c14 = arith.constant 14 : index
      %c0_12 = arith.constant 0 : index
      %14 = vector.load %arg2[%c0_11, %c14, %c0_12] : memref<1x40x512xbf16, #tpu.memory_space<vmem>>, vector<1x8x512xbf16>
      %15 = vector.shape_cast %14 : vector<1x8x512xbf16> to vector<8x512xbf16>
      %16 = vector.extract_strided_slice %11 {offsets = [0, 0], sizes = [512, 16], strides = [1, 1]} : vector<2560x16xbf16> to vector<512x16xbf16>
      %cst_13 = arith.constant dense<0.000000e+00> : vector<8x16xf32>
      %17 = tpu.matmul %15, %16, %cst_13 {dimension_numbers = #tpu.dot_dimension_numbers<[1], [0], [0], [1], [0, 0, 1, 1], [], []>} : vector<8x512xbf16>, vector<512x16xbf16>, vector<8x16xf32> -> vector<8x16xf32>
      %c0_14 = arith.constant 0 : index
      %c15 = arith.constant 15 : index
      %c0_15 = arith.constant 0 : index
      %18 = vector.load %arg2[%c0_14, %c15, %c0_15] : memref<1x40x512xbf16, #tpu.memory_space<vmem>>, vector<1x8x512xbf16>
      %19 = vector.shape_cast %18 : vector<1x8x512xbf16> to vector<8x512xbf16>
      %20 = vector.extract_strided_slice %11 {offsets = [512, 0], sizes = [512, 16], strides = [1, 1]} : vector<2560x16xbf16> to vector<512x16xbf16>
      %cst_16 = arith.constant dense<0.000000e+00> : vector<8x16xf32>
      %21 = tpu.matmul %19, %20, %cst_16 {dimension_numbers = #tpu.dot_dimension_numbers<[1], [0], [0], [1], [0, 0, 1, 1], [], []>} : vector<8x512xbf16>, vector<512x16xbf16>, vector<8x16xf32> -> vector<8x16xf32>
      %22 = arith.addf %17, %21 : vector<8x16xf32>
      %c0_17 = arith.constant 0 : index
      %c16 = arith.constant 16 : index
      %c0_18 = arith.constant 0 : index
      %23 = vector.load %arg2[%c0_17, %c16, %c0_18] : memref<1x40x512xbf16, #tpu.memory_space<vmem>>, vector<1x8x512xbf16>
      %24 = vector.shape_cast %23 : vector<1x8x512xbf16> to vector<8x512xbf16>
      %25 = vector.extract_strided_slice %11 {offsets = [1024, 0], sizes = [512, 16], strides = [1, 1]} : vector<2560x16xbf16> to vector<512x16xbf16>
      %cst_19 = arith.constant dense<0.000000e+00> : vector<8x16xf32>
      %26 = tpu.matmul %24, %25, %cst_19 {dimension_numbers = #tpu.dot_dimension_numbers<[1], [0], [0], [1], [0, 0, 1, 1], [], []>} : vector<8x512xbf16>, vector<512x16xbf16>, vector<8x16xf32> -> vector<8x16xf32>
      %27 = arith.addf %22, %26 : vector<8x16xf32>
      %c0_20 = arith.constant 0 : index
      %c17 = arith.constant 17 : index
      %c0_21 = arith.constant 0 : index
      %28 = vector.load %arg2[%c0_20, %c17, %c0_21] : memref<1x40x512xbf16, #tpu.memory_space<vmem>>, vector<1x8x512xbf16>
      %29 = vector.shape_cast %28 : vector<1x8x512xbf16> to vector<8x512xbf16>
      %30 = vector.extract_strided_slice %11 {offsets = [1536, 0], sizes = [512, 16], strides = [1, 1]} : vector<2560x16xbf16> to vector<512x16xbf16>
      %cst_22 = arith.constant dense<0.000000e+00> : vector<8x16xf32>
      %31 = tpu.matmul %29, %30, %cst_22 {dimension_numbers = #tpu.dot_dimension_numbers<[1], [0], [0], [1], [0, 0, 1, 1], [], []>} : vector<8x512xbf16>, vector<512x16xbf16>, vector<8x16xf32> -> vector<8x16xf32>
      %32 = arith.addf %27, %31 : vector<8x16xf32>
      %c0_23 = arith.constant 0 : index
      %c18 = arith.constant 18 : index
      %c0_24 = arith.constant 0 : index
      %33 = vector.load %arg2[%c0_23, %c18, %c0_24] : memref<1x40x512xbf16, #tpu.memory_space<vmem>>, vector<1x8x512xbf16>
      %34 = vector.shape_cast %33 : vector<1x8x512xbf16> to vector<8x512xbf16>
      %35 = vector.extract_strided_slice %11 {offsets = [2048, 0], sizes = [512, 16], strides = [1, 1]} : vector<2560x16xbf16> to vector<512x16xbf16>
      %cst_25 = arith.constant dense<0.000000e+00> : vector<8x16xf32>
      %36 = tpu.matmul %34, %35, %cst_25 {dimension_numbers = #tpu.dot_dimension_numbers<[1], [0], [0], [1], [0, 0, 1, 1], [], []>} : vector<8x512xbf16>, vector<512x16xbf16>, vector<8x16xf32> -> vector<8x16xf32>
      %37 = arith.addf %32, %36 : vector<8x16xf32>
      %c0_26 = arith.constant 0 : index
      %c8 = arith.constant 8 : index
      %c0_27 = arith.constant 0 : index
      %38 = vector.load %arg2[%c0_26, %c8, %c0_27] : memref<1x40x512xbf16, #tpu.memory_space<vmem>>, vector<1x8x512xbf16>
      %39 = vector.shape_cast %38 : vector<1x8x512xbf16> to vector<8x512xbf16>
      %40 = vector.extract_strided_slice %12 {offsets = [0, 0], sizes = [512, 8], strides = [1, 1]} : vector<2560x8xbf16> to vector<512x8xbf16>
      %cst_28 = arith.constant dense<0.000000e+00> : vector<8x8xf32>
      %41 = tpu.matmul %39, %40, %cst_28 {dimension_numbers = #tpu.dot_dimension_numbers<[1], [0], [0], [1], [0, 0, 1, 1], [], []>} : vector<8x512xbf16>, vector<512x8xbf16>, vector<8x8xf32> -> vector<8x8xf32>
      %c0_29 = arith.constant 0 : index
      %c12 = arith.constant 12 : index
      %c0_30 = arith.constant 0 : index
      %42 = vector.load %arg2[%c0_29, %c12, %c0_30] : memref<1x40x512xbf16, #tpu.memory_space<vmem>>, vector<1x8x512xbf16>
      %43 = vector.shape_cast %42 : vector<1x8x512xbf16> to vector<8x512xbf16>
      %44 = vector.extract_strided_slice %12 {offsets = [512, 0], sizes = [512, 8], strides = [1, 1]} : vector<2560x8xbf16> to vector<512x8xbf16>
      %cst_31 = arith.constant dense<0.000000e+00> : vector<8x8xf32>
      %45 = tpu.matmul %43, %44, %cst_31 {dimension_numbers = #tpu.dot_dimension_numbers<[1], [0], [0], [1], [0, 0, 1, 1], [], []>} : vector<8x512xbf16>, vector<512x8xbf16>, vector<8x8xf32> -> vector<8x8xf32>
      %46 = arith.addf %41, %45 : vector<8x8xf32>
      %c0_32 = arith.constant 0 : index
      %c16_33 = arith.constant 16 : index
      %c0_34 = arith.constant 0 : index
      %47 = vector.load %arg2[%c0_32, %c16_33, %c0_34] : memref<1x40x512xbf16, #tpu.memory_space<vmem>>, vector<1x8x512xbf16>
      %48 = vector.shape_cast %47 : vector<1x8x512xbf16> to vector<8x512xbf16>
      %49 = vector.extract_strided_slice %12 {offsets = [1024, 0], sizes = [512, 8], strides = [1, 1]} : vector<2560x8xbf16> to vector<512x8xbf16>
      %cst_35 = arith.constant dense<0.000000e+00> : vector<8x8xf32>
      %50 = tpu.matmul %48, %49, %cst_35 {dimension_numbers = #tpu.dot_dimension_numbers<[1], [0], [0], [1], [0, 0, 1, 1], [], []>} : vector<8x512xbf16>, vector<512x8xbf16>, vector<8x8xf32> -> vector<8x8xf32>
      %51 = arith.addf %46, %50 : vector<8x8xf32>
      %c0_36 = arith.constant 0 : index
      %c20 = arith.constant 20 : index
      %c0_37 = arith.constant 0 : index
      %52 = vector.load %arg2[%c0_36, %c20, %c0_37] : memref<1x40x512xbf16, #tpu.memory_space<vmem>>, vector<1x8x512xbf16>
      %53 = vector.shape_cast %52 : vector<1x8x512xbf16> to vector<8x512xbf16>
      %54 = vector.extract_strided_slice %12 {offsets = [1536, 0], sizes = [512, 8], strides = [1, 1]} : vector<2560x8xbf16> to vector<512x8xbf16>
      %cst_38 = arith.constant dense<0.000000e+00> : vector<8x8xf32>
      %55 = tpu.matmul %53, %54, %cst_38 {dimension_numbers = #tpu.dot_dimension_numbers<[1], [0], [0], [1], [0, 0, 1, 1], [], []>} : vector<8x512xbf16>, vector<512x8xbf16>, vector<8x8xf32> -> vector<8x8xf32>
      %56 = arith.addf %51, %55 : vector<8x8xf32>
      %c0_39 = arith.constant 0 : index
      %c24 = arith.constant 24 : index
      %c0_40 = arith.constant 0 : index
      %57 = vector.load %arg2[%c0_39, %c24, %c0_40] : memref<1x40x512xbf16, #tpu.memory_space<vmem>>, vector<1x8x512xbf16>
      %58 = vector.shape_cast %57 : vector<1x8x512xbf16> to vector<8x512xbf16>
      %59 = vector.extract_strided_slice %12 {offsets = [2048, 0], sizes = [512, 8], strides = [1, 1]} : vector<2560x8xbf16> to vector<512x8xbf16>
      %cst_41 = arith.constant dense<0.000000e+00> : vector<8x8xf32>
      %60 = tpu.matmul %58, %59, %cst_41 {dimension_numbers = #tpu.dot_dimension_numbers<[1], [0], [0], [1], [0, 0, 1, 1], [], []>} : vector<8x512xbf16>, vector<512x8xbf16>, vector<8x8xf32> -> vector<8x8xf32>
      %61 = arith.addf %56, %60 : vector<8x8xf32>
      %c0_42 = arith.constant 0 : index
      %c2 = arith.constant 2 : index
      %c0_43 = arith.constant 0 : index
      %62 = vector.load %arg2[%c0_42, %c2, %c0_43] : memref<1x40x512xbf16, #tpu.memory_space<vmem>>, vector<1x8x512xbf16>
      %63 = vector.shape_cast %62 : vector<1x8x512xbf16> to vector<8x512xbf16>
      %64 = vector.extract_strided_slice %13 {offsets = [0, 0], sizes = [512, 8], strides = [1, 1]} : vector<2560x8xbf16> to vector<512x8xbf16>
      %cst_44 = arith.constant dense<0.000000e+00> : vector<8x8xf32>
      %65 = tpu.matmul %63, %64, %cst_44 {dimension_numbers = #tpu.dot_dimension_numbers<[1], [0], [0], [1], [0, 0, 1, 1], [], []>} : vector<8x512xbf16>, vector<512x8xbf16>, vector<8x8xf32> -> vector<8x8xf32>
      %c0_45 = arith.constant 0 : index
      %c9 = arith.constant 9 : index
      %c0_46 = arith.constant 0 : index
      %66 = vector.load %arg2[%c0_45, %c9, %c0_46] : memref<1x40x512xbf16, #tpu.memory_space<vmem>>, vector<1x8x512xbf16>
      %67 = vector.shape_cast %66 : vector<1x8x512xbf16> to vector<8x512xbf16>
      %68 = vector.extract_strided_slice %13 {offsets = [512, 0], sizes = [512, 8], strides = [1, 1]} : vector<2560x8xbf16> to vector<512x8xbf16>
      %cst_47 = arith.constant dense<0.000000e+00> : vector<8x8xf32>
      %69 = tpu.matmul %67, %68, %cst_47 {dimension_numbers = #tpu.dot_dimension_numbers<[1], [0], [0], [1], [0, 0, 1, 1], [], []>} : vector<8x512xbf16>, vector<512x8xbf16>, vector<8x8xf32> -> vector<8x8xf32>
      %70 = arith.addf %65, %69 : vector<8x8xf32>
      %c0_48 = arith.constant 0 : index
      %c16_49 = arith.constant 16 : index
      %c0_50 = arith.constant 0 : index
      %71 = vector.load %arg2[%c0_48, %c16_49, %c0_50] : memref<1x40x512xbf16, #tpu.memory_space<vmem>>, vector<1x8x512xbf16>
      %72 = vector.shape_cast %71 : vector<1x8x512xbf16> to vector<8x512xbf16>
      %73 = vector.extract_strided_slice %13 {offsets = [1024, 0], sizes = [512, 8], strides = [1, 1]} : vector<2560x8xbf16> to vector<512x8xbf16>
      %cst_51 = arith.constant dense<0.000000e+00> : vector<8x8xf32>
      %74 = tpu.matmul %72, %73, %cst_51 {dimension_numbers = #tpu.dot_dimension_numbers<[1], [0], [0], [1], [0, 0, 1, 1], [], []>} : vector<8x512xbf16>, vector<512x8xbf16>, vector<8x8xf32> -> vector<8x8xf32>
      %75 = arith.addf %70, %74 : vector<8x8xf32>
      %c0_52 = arith.constant 0 : index
      %c23 = arith.constant 23 : index
      %c0_53 = arith.constant 0 : index
      %76 = vector.load %arg2[%c0_52, %c23, %c0_53] : memref<1x40x512xbf16, #tpu.memory_space<vmem>>, vector<1x8x512xbf16>
      %77 = vector.shape_cast %76 : vector<1x8x512xbf16> to vector<8x512xbf16>
      %78 = vector.extract_strided_slice %13 {offsets = [1536, 0], sizes = [512, 8], strides = [1, 1]} : vector<2560x8xbf16> to vector<512x8xbf16>
      %cst_54 = arith.constant dense<0.000000e+00> : vector<8x8xf32>
      %79 = tpu.matmul %77, %78, %cst_54 {dimension_numbers = #tpu.dot_dimension_numbers<[1], [0], [0], [1], [0, 0, 1, 1], [], []>} : vector<8x512xbf16>, vector<512x8xbf16>, vector<8x8xf32> -> vector<8x8xf32>
      %80 = arith.addf %75, %79 : vector<8x8xf32>
      %c0_55 = arith.constant 0 : index
      %c30 = arith.constant 30 : index
      %c0_56 = arith.constant 0 : index
      %81 = vector.load %arg2[%c0_55, %c30, %c0_56] : memref<1x40x512xbf16, #tpu.memory_space<vmem>>, vector<1x8x512xbf16>
      %82 = vector.shape_cast %81 : vector<1x8x512xbf16> to vector<8x512xbf16>
      %83 = vector.extract_strided_slice %13 {offsets = [2048, 0], sizes = [512, 8], strides = [1, 1]} : vector<2560x8xbf16> to vector<512x8xbf16>
      %cst_57 = arith.constant dense<0.000000e+00> : vector<8x8xf32>
      %84 = tpu.matmul %82, %83, %cst_57 {dimension_numbers = #tpu.dot_dimension_numbers<[1], [0], [0], [1], [0, 0, 1, 1], [], []>} : vector<8x512xbf16>, vector<512x8xbf16>, vector<8x8xf32> -> vector<8x8xf32>
      %85 = arith.addf %80, %84 : vector<8x8xf32>
      %86 = tpu.concatenate %37, %61, %85 in 1 : vector<8x16xf32>, vector<8x8xf32>, vector<8x8xf32> -> vector<8x32xf32>
      %c0_58 = arith.constant 0 : index
      %c0_59 = arith.constant 0 : index
      %87 = vector.load %arg6[%c0_58, %c0_59] : memref<1x32xf32, #tpu.memory_space<vmem>>, vector<1x32xf32>
      %88 = vector.broadcast %87 : vector<1x32xf32> to vector<8x32xf32>
      %89 = arith.addf %86, %88 : vector<8x32xf32>
      %cst_60 = arith.constant 0.000000e+00 : f32
      %90 = vector.broadcast %cst_60 : f32 to vector<8x32xf32>
      %91 = arith.maximumf %89, %90 : vector<8x32xf32>
      %c16_61 = arith.constant 16 : index
      %c0_62 = arith.constant 0 : index
      %92 = vector.load %arg12[%c16_61, %c0_62] : memref<40x32xf32, #tpu.memory_space<vmem>>, vector<8x32xf32>
      tpu.vector_store %arg12[%c16_61, %c0_62], %91 {strides = array<i32>} : memref<40x32xf32, #tpu.memory_space<vmem>>, vector<8x32xf32>,
    } else {
    }
    %c0_i32_1 = arith.constant 0 : i32
    %3 = arith.cmpi sgt, %arg1, %c0_i32_1 : i32
    %4 = arith.extui %3 : i1 to i32
    %c0_i32_2 = arith.constant 0 : i32
    %5 = arith.cmpi ne, %4, %c0_i32_2 : i32
    scf.if %5 {
      %c0 = arith.constant 0 : index
      %c0_4 = arith.constant 0 : index
      %c0_5 = arith.constant 0 : index
      %9 = vector.load %arg7[%c0, %c0_4, %c0_5] : memref<1x160x16xbf16, #tpu.memory_space<vmem>>, vector<1x160x16xbf16>
      %10 = vector.shape_cast %9 : vector<1x160x16xbf16> to vector<160x16xbf16>
      %c0_6 = arith.constant 0 : index
      %c0_7 = arith.constant 0 : index
      %c0_8 = arith.constant 0 : index
      %11 = vector.load %arg8[%c0_6, %c0_7, %c0_8] : memref<1x160x8xbf16, #tpu.memory_space<vmem>>, vector<1x160x8xbf16>
      %12 = vector.shape_cast %11 : vector<1x160x8xbf16> to vector<160x8xbf16>
      %c0_9 = arith.constant 0 : index
      %c0_10 = arith.constant 0 : index
      %c0_11 = arith.constant 0 : index
      %13 = vector.load %arg9[%c0_9, %c0_10, %c0_11] : memref<1x160x8xbf16, #tpu.memory_space<vmem>>, vector<1x160x8xbf16>
      %14 = vector.shape_cast %13 : vector<1x160x8xbf16> to vector<160x8xbf16>
      %c14 = arith.constant 14 : index
      %c0_12 = arith.constant 0 : index
      %15 = vector.load %arg12[%c14, %c0_12] : memref<40x32xf32, #tpu.memory_space<vmem>>, vector<8x32xf32>
      %16 = arith.truncf %15 : vector<8x32xf32> to vector<8x32xbf16>
      %17 = vector.extract_strided_slice %10 {offsets = [0, 0], sizes = [32, 16], strides = [1, 1]} : vector<160x16xbf16> to vector<32x16xbf16>
      %cst = arith.constant dense<0.000000e+00> : vector<8x16xf32>
      %18 = tpu.matmul %16, %17, %cst {dimension_numbers = #tpu.dot_dimension_numbers<[1], [0], [0], [1], [0, 0, 1, 1], [], []>} : vector<8x32xbf16>, vector<32x16xbf16>, vector<8x16xf32> -> vector<8x16xf32>
      %c15 = arith.constant 15 : index
      %c0_13 = arith.constant 0 : index
      %19 = vector.load %arg12[%c15, %c0_13] : memref<40x32xf32, #tpu.memory_space<vmem>>, vector<8x32xf32>
      %20 = arith.truncf %19 : vector<8x32xf32> to vector<8x32xbf16>
      %21 = vector.extract_strided_slice %10 {offsets = [32, 0], sizes = [32, 16], strides = [1, 1]} : vector<160x16xbf16> to vector<32x16xbf16>
      %cst_14 = arith.constant dense<0.000000e+00> : vector<8x16xf32>
      %22 = tpu.matmul %20, %21, %cst_14 {dimension_numbers = #tpu.dot_dimension_numbers<[1], [0], [0], [1], [0, 0, 1, 1], [], []>} : vector<8x32xbf16>, vector<32x16xbf16>, vector<8x16xf32> -> vector<8x16xf32>
      %23 = arith.addf %18, %22 : vector<8x16xf32>
      %c16 = arith.constant 16 : index
      %c0_15 = arith.constant 0 : index
      %24 = vector.load %arg12[%c16, %c0_15] : memref<40x32xf32, #tpu.memory_space<vmem>>, vector<8x32xf32>
      %25 = arith.truncf %24 : vector<8x32xf32> to vector<8x32xbf16>
      %26 = vector.extract_strided_slice %10 {offsets = [64, 0], sizes = [32, 16], strides = [1, 1]} : vector<160x16xbf16> to vector<32x16xbf16>
      %cst_16 = arith.constant dense<0.000000e+00> : vector<8x16xf32>
      %27 = tpu.matmul %25, %26, %cst_16 {dimension_numbers = #tpu.dot_dimension_numbers<[1], [0], [0], [1], [0, 0, 1, 1], [], []>} : vector<8x32xbf16>, vector<32x16xbf16>, vector<8x16xf32> -> vector<8x16xf32>
      %28 = arith.addf %23, %27 : vector<8x16xf32>
      %c17 = arith.constant 17 : index
      %c0_17 = arith.constant 0 : index
      %29 = vector.load %arg12[%c17, %c0_17] : memref<40x32xf32, #tpu.memory_space<vmem>>, vector<8x32xf32>
      %30 = arith.truncf %29 : vector<8x32xf32> to vector<8x32xbf16>
      %31 = vector.extract_strided_slice %10 {offsets = [96, 0], sizes = [32, 16], strides = [1, 1]} : vector<160x16xbf16> to vector<32x16xbf16>
      %cst_18 = arith.constant dense<0.000000e+00> : vector<8x16xf32>
      %32 = tpu.matmul %30, %31, %cst_18 {dimension_numbers = #tpu.dot_dimension_numbers<[1], [0], [0], [1], [0, 0, 1, 1], [], []>} : vector<8x32xbf16>, vector<32x16xbf16>, vector<8x16xf32> -> vector<8x16xf32>
      %33 = arith.addf %28, %32 : vector<8x16xf32>
      %c18 = arith.constant 18 : index
      %c0_19 = arith.constant 0 : index
      %34 = vector.load %arg12[%c18, %c0_19] : memref<40x32xf32, #tpu.memory_space<vmem>>, vector<8x32xf32>
      %35 = arith.truncf %34 : vector<8x32xf32> to vector<8x32xbf16>
      %36 = vector.extract_strided_slice %10 {offsets = [128, 0], sizes = [32, 16], strides = [1, 1]} : vector<160x16xbf16> to vector<32x16xbf16>
      %cst_20 = arith.constant dense<0.000000e+00> : vector<8x16xf32>
      %37 = tpu.matmul %35, %36, %cst_20 {dimension_numbers = #tpu.dot_dimension_numbers<[1], [0], [0], [1], [0, 0, 1, 1], [], []>} : vector<8x32xbf16>, vector<32x16xbf16>, vector<8x16xf32> -> vector<8x16xf32>
      %38 = arith.addf %33, %37 : vector<8x16xf32>
      %c8 = arith.constant 8 : index
      %c0_21 = arith.constant 0 : index
      %39 = vector.load %arg12[%c8, %c0_21] : memref<40x32xf32, #tpu.memory_space<vmem>>, vector<8x32xf32>
      %40 = arith.truncf %39 : vector<8x32xf32> to vector<8x32xbf16>
      %41 = vector.extract_strided_slice %12 {offsets = [0, 0], sizes = [32, 8], strides = [1, 1]} : vector<160x8xbf16> to vector<32x8xbf16>
      %cst_22 = arith.constant dense<0.000000e+00> : vector<8x8xf32>
      %42 = tpu.matmul %40, %41, %cst_22 {dimension_numbers = #tpu.dot_dimension_numbers<[1], [0], [0], [1], [0, 0, 1, 1], [], []>} : vector<8x32xbf16>, vector<32x8xbf16>, vector<8x8xf32> -> vector<8x8xf32>
      %c12 = arith.constant 12 : index
      %c0_23 = arith.constant 0 : index
      %43 = vector.load %arg12[%c12, %c0_23] : memref<40x32xf32, #tpu.memory_space<vmem>>, vector<8x32xf32>
      %44 = arith.truncf %43 : vector<8x32xf32> to vector<8x32xbf16>
      %45 = vector.extract_strided_slice %12 {offsets = [32, 0], sizes = [32, 8], strides = [1, 1]} : vector<160x8xbf16> to vector<32x8xbf16>
      %cst_24 = arith.constant dense<0.000000e+00> : vector<8x8xf32>
      %46 = tpu.matmul %44, %45, %cst_24 {dimension_numbers = #tpu.dot_dimension_numbers<[1], [0], [0], [1], [0, 0, 1, 1], [], []>} : vector<8x32xbf16>, vector<32x8xbf16>, vector<8x8xf32> -> vector<8x8xf32>
      %47 = arith.addf %42, %46 : vector<8x8xf32>
      %c16_25 = arith.constant 16 : index
      %c0_26 = arith.constant 0 : index
      %48 = vector.load %arg12[%c16_25, %c0_26] : memref<40x32xf32, #tpu.memory_space<vmem>>, vector<8x32xf32>
      %49 = arith.truncf %48 : vector<8x32xf32> to vector<8x32xbf16>
      %50 = vector.extract_strided_slice %12 {offsets = [64, 0], sizes = [32, 8], strides = [1, 1]} : vector<160x8xbf16> to vector<32x8xbf16>
      %cst_27 = arith.constant dense<0.000000e+00> : vector<8x8xf32>
      %51 = tpu.matmul %49, %50, %cst_27 {dimension_numbers = #tpu.dot_dimension_numbers<[1], [0], [0], [1], [0, 0, 1, 1], [], []>} : vector<8x32xbf16>, vector<32x8xbf16>, vector<8x8xf32> -> vector<8x8xf32>
      %52 = arith.addf %47, %51 : vector<8x8xf32>
      %c20 = arith.constant 20 : index
      %c0_28 = arith.constant 0 : index
      %53 = vector.load %arg12[%c20, %c0_28] : memref<40x32xf32, #tpu.memory_space<vmem>>, vector<8x32xf32>
      %54 = arith.truncf %53 : vector<8x32xf32> to vector<8x32xbf16>
      %55 = vector.extract_strided_slice %12 {offsets = [96, 0], sizes = [32, 8], strides = [1, 1]} : vector<160x8xbf16> to vector<32x8xbf16>
      %cst_29 = arith.constant dense<0.000000e+00> : vector<8x8xf32>
      %56 = tpu.matmul %54, %55, %cst_29 {dimension_numbers = #tpu.dot_dimension_numbers<[1], [0], [0], [1], [0, 0, 1, 1], [], []>} : vector<8x32xbf16>, vector<32x8xbf16>, vector<8x8xf32> -> vector<8x8xf32>
      %57 = arith.addf %52, %56 : vector<8x8xf32>
      %c24 = arith.constant 24 : index
      %c0_30 = arith.constant 0 : index
      %58 = vector.load %arg12[%c24, %c0_30] : memref<40x32xf32, #tpu.memory_space<vmem>>, vector<8x32xf32>
      %59 = arith.truncf %58 : vector<8x32xf32> to vector<8x32xbf16>
      %60 = vector.extract_strided_slice %12 {offsets = [128, 0], sizes = [32, 8], strides = [1, 1]} : vector<160x8xbf16> to vector<32x8xbf16>
      %cst_31 = arith.constant dense<0.000000e+00> : vector<8x8xf32>
      %61 = tpu.matmul %59, %60, %cst_31 {dimension_numbers = #tpu.dot_dimension_numbers<[1], [0], [0], [1], [0, 0, 1, 1], [], []>} : vector<8x32xbf16>, vector<32x8xbf16>, vector<8x8xf32> -> vector<8x8xf32>
      %62 = arith.addf %57, %61 : vector<8x8xf32>
      %c2 = arith.constant 2 : index
      %c0_32 = arith.constant 0 : index
      %63 = vector.load %arg12[%c2, %c0_32] : memref<40x32xf32, #tpu.memory_space<vmem>>, vector<8x32xf32>
      %64 = arith.truncf %63 : vector<8x32xf32> to vector<8x32xbf16>
      %65 = vector.extract_strided_slice %14 {offsets = [0, 0], sizes = [32, 8], strides = [1, 1]} : vector<160x8xbf16> to vector<32x8xbf16>
      %cst_33 = arith.constant dense<0.000000e+00> : vector<8x8xf32>
      %66 = tpu.matmul %64, %65, %cst_33 {dimension_numbers = #tpu.dot_dimension_numbers<[1], [0], [0], [1], [0, 0, 1, 1], [], []>} : vector<8x32xbf16>, vector<32x8xbf16>, vector<8x8xf32> -> vector<8x8xf32>
      %c9 = arith.constant 9 : index
      %c0_34 = arith.constant 0 : index
      %67 = vector.load %arg12[%c9, %c0_34] : memref<40x32xf32, #tpu.memory_space<vmem>>, vector<8x32xf32>
      %68 = arith.truncf %67 : vector<8x32xf32> to vector<8x32xbf16>
      %69 = vector.extract_strided_slice %14 {offsets = [32, 0], sizes = [32, 8], strides = [1, 1]} : vector<160x8xbf16> to vector<32x8xbf16>
      %cst_35 = arith.constant dense<0.000000e+00> : vector<8x8xf32>
      %70 = tpu.matmul %68, %69, %cst_35 {dimension_numbers = #tpu.dot_dimension_numbers<[1], [0], [0], [1], [0, 0, 1, 1], [], []>} : vector<8x32xbf16>, vector<32x8xbf16>, vector<8x8xf32> -> vector<8x8xf32>
      %71 = arith.addf %66, %70 : vector<8x8xf32>
      %c16_36 = arith.constant 16 : index
      %c0_37 = arith.constant 0 : index
      %72 = vector.load %arg12[%c16_36, %c0_37] : memref<40x32xf32, #tpu.memory_space<vmem>>, vector<8x32xf32>
      %73 = arith.truncf %72 : vector<8x32xf32> to vector<8x32xbf16>
      %74 = vector.extract_strided_slice %14 {offsets = [64, 0], sizes = [32, 8], strides = [1, 1]} : vector<160x8xbf16> to vector<32x8xbf16>
      %cst_38 = arith.constant dense<0.000000e+00> : vector<8x8xf32>
      %75 = tpu.matmul %73, %74, %cst_38 {dimension_numbers = #tpu.dot_dimension_numbers<[1], [0], [0], [1], [0, 0, 1, 1], [], []>} : vector<8x32xbf16>, vector<32x8xbf16>, vector<8x8xf32> -> vector<8x8xf32>
      %76 = arith.addf %71, %75 : vector<8x8xf32>
      %c23 = arith.constant 23 : index
      %c0_39 = arith.constant 0 : index
      %77 = vector.load %arg12[%c23, %c0_39] : memref<40x32xf32, #tpu.memory_space<vmem>>, vector<8x32xf32>
      %78 = arith.truncf %77 : vector<8x32xf32> to vector<8x32xbf16>
      %79 = vector.extract_strided_slice %14 {offsets = [96, 0], sizes = [32, 8], strides = [1, 1]} : vector<160x8xbf16> to vector<32x8xbf16>
      %cst_40 = arith.constant dense<0.000000e+00> : vector<8x8xf32>
      %80 = tpu.matmul %78, %79, %cst_40 {dimension_numbers = #tpu.dot_dimension_numbers<[1], [0], [0], [1], [0, 0, 1, 1], [], []>} : vector<8x32xbf16>, vector<32x8xbf16>, vector<8x8xf32> -> vector<8x8xf32>
      %81 = arith.addf %76, %80 : vector<8x8xf32>
      %c30 = arith.constant 30 : index
      %c0_41 = arith.constant 0 : index
      %82 = vector.load %arg12[%c30, %c0_41] : memref<40x32xf32, #tpu.memory_space<vmem>>, vector<8x32xf32>
      %83 = arith.truncf %82 : vector<8x32xf32> to vector<8x32xbf16>
      %84 = vector.extract_strided_slice %14 {offsets = [128, 0], sizes = [32, 8], strides = [1, 1]} : vector<160x8xbf16> to vector<32x8xbf16>
      %cst_42 = arith.constant dense<0.000000e+00> : vector<8x8xf32>
      %85 = tpu.matmul %83, %84, %cst_42 {dimension_numbers = #tpu.dot_dimension_numbers<[1], [0], [0], [1], [0, 0, 1, 1], [], []>} : vector<8x32xbf16>, vector<32x8xbf16>, vector<8x8xf32> -> vector<8x8xf32>
      %86 = arith.addf %81, %85 : vector<8x8xf32>
      %87 = tpu.concatenate %38, %62, %86 in 1 : vector<8x16xf32>, vector<8x8xf32>, vector<8x8xf32> -> vector<8x32xf32>
      %c16_43 = arith.constant 16 : index
      %c0_44 = arith.constant 0 : index
      %88 = vector.load %arg12[%c16_43, %c0_44] : memref<40x32xf32, #tpu.memory_space<vmem>>, vector<8x32xf32>
      %89 = arith.addf %88, %87 : vector<8x32xf32>
      %c0_45 = arith.constant 0 : index
      %c0_46 = arith.constant 0 : index
      %c0_47 = arith.constant 0 : index
      %90 = vector.load %arg10[%c0_45, %c0_46, %c0_47] : memref<1x1x32xf32, #tpu.memory_space<vmem>>, vector<1x1x32xf32>
      %91 = vector.shape_cast %90 : vector<1x1x32xf32> to vector<1x32xf32>
      %92 = vector.broadcast %91 : vector<1x32xf32> to vector<8x32xf32>
      %93 = arith.addf %89, %92 : vector<8x32xf32>
      %cst_48 = arith.constant 0.000000e+00 : f32
      %94 = vector.broadcast %cst_48 : f32 to vector<8x32xf32>
      %95 = arith.maximumf %93, %94 : vector<8x32xf32>
      %c16_49 = arith.constant 16 : index
      %c0_50 = arith.constant 0 : index
      %96 = vector.load %arg12[%c16_49, %c0_50] : memref<40x32xf32, #tpu.memory_space<vmem>>, vector<8x32xf32>
      tpu.vector_store %arg12[%c16_49, %c0_50], %95 {strides = array<i32>} : memref<40x32xf32, #tpu.memory_space<vmem>>, vector<8x32xf32>,
    } else {
    }
    %c14_i32 = arith.constant 14 : i32
    %6 = arith.cmpi eq, %arg1, %c14_i32 : i32
    %7 = arith.extui %6 : i1 to i32
    %c0_i32_3 = arith.constant 0 : i32
    %8 = arith.cmpi ne, %7, %c0_i32_3 : i32
    scf.if %8 {
      %c16 = arith.constant 16 : index
      %c0 = arith.constant 0 : index
      %9 = vector.load %arg12[%c16, %c0] : memref<40x32xf32, #tpu.memory_space<vmem>>, vector<8x32xf32>
      %c0_4 = arith.constant 0 : index
      %c0_5 = arith.constant 0 : index
      %c0_6 = arith.constant 0 : index
      %10 = vector.load %arg11[%c0_4, %c0_5, %c0_6] : memref<1x8x32xf32, #tpu.memory_space<vmem>>, vector<1x8x32xf32>
      %11 = vector.shape_cast %10 : vector<1x8x32xf32> to vector<8x32xf32>
      %12 = vector.shape_cast %9 : vector<8x32xf32> to vector<1x8x32xf32>
      tpu.vector_store %arg11[%c0_4, %c0_5, %c0_6], %12 {strides = array<i32>} : memref<1x8x32xf32, #tpu.memory_space<vmem>>, vector<1x8x32xf32>,
    } else {
    }
    return
  }
  func.func @transform_0(%arg0: i32, %arg1: i32) -> (i32, i32, i32) {
    %c0_i32 = arith.constant 0 : i32
    %c0_i32_0 = arith.constant 0 : i32
    %c0_i32_1 = arith.constant 0 : i32
    return %arg0, %c0_i32, %c0_i32_0 : i32, i32, i32
  }
  func.func @transform_1(%arg0: i32, %arg1: i32) -> (i32, i32) {
    %c0_i32 = arith.constant 0 : i32
    %c0_i32_0 = arith.constant 0 : i32
    %c0_i32_1 = arith.constant 0 : i32
    return %c0_i32, %c0_i32_0 : i32, i32
  }
  func.func @transform_2(%arg0: i32, %arg1: i32) -> (i32, i32) {
    %c0_i32 = arith.constant 0 : i32
    %c0_i32_0 = arith.constant 0 : i32
    %c0_i32_1 = arith.constant 0 : i32
    return %c0_i32, %c0_i32_0 : i32, i32
  }
  func.func @transform_3(%arg0: i32, %arg1: i32) -> (i32, i32) {
    %c0_i32 = arith.constant 0 : i32
    %c0_i32_0 = arith.constant 0 : i32
    %c0_i32_1 = arith.constant 0 : i32
    return %c0_i32, %c0_i32_0 : i32, i32
  }
  func.func @transform_4(%arg0: i32, %arg1: i32) -> (i32, i32) {
    %c0_i32 = arith.constant 0 : i32
    %c0_i32_0 = arith.constant 0 : i32
    %c0_i32_1 = arith.constant 0 : i32
    return %c0_i32, %c0_i32_0 : i32, i32
  }
  func.func @transform_5(%arg0: i32, %arg1: i32) -> (i32, i32, i32) {
    %c1_i32 = arith.constant 1 : i32
    %0 = arith.subi %arg1, %c1_i32 : i32
    %c0_i32 = arith.constant 0 : i32
    %1 = arith.maxsi %0, %c0_i32 : i32
    %c0_i32_0 = arith.constant 0 : i32
    %c0_i32_1 = arith.constant 0 : i32
    %c0_i32_2 = arith.constant 0 : i32
    return %1, %c0_i32_0, %c0_i32_1 : i32, i32, i32
  }
  func.func @transform_6(%arg0: i32, %arg1: i32) -> (i32, i32, i32) {
    %c1_i32 = arith.constant 1 : i32
    %0 = arith.subi %arg1, %c1_i32 : i32
    %c0_i32 = arith.constant 0 : i32
    %1 = arith.maxsi %0, %c0_i32 : i32
    %c0_i32_0 = arith.constant 0 : i32
    %c0_i32_1 = arith.constant 0 : i32
    %c0_i32_2 = arith.constant 0 : i32
    return %1, %c0_i32_0, %c0_i32_1 : i32, i32, i32
  }
  func.func @transform_7(%arg0: i32, %arg1: i32) -> (i32, i32, i32) {
    %c1_i32 = arith.constant 1 : i32
    %0 = arith.subi %arg1, %c1_i32 : i32
    %c0_i32 = arith.constant 0 : i32
    %1 = arith.maxsi %0, %c0_i32 : i32
    %c0_i32_0 = arith.constant 0 : i32
    %c0_i32_1 = arith.constant 0 : i32
    %c0_i32_2 = arith.constant 0 : i32
    return %1, %c0_i32_0, %c0_i32_1 : i32, i32, i32
  }
  func.func @transform_8(%arg0: i32, %arg1: i32) -> (i32, i32, i32) {
    %c1_i32 = arith.constant 1 : i32
    %0 = arith.subi %arg1, %c1_i32 : i32
    %c0_i32 = arith.constant 0 : i32
    %1 = arith.maxsi %0, %c0_i32 : i32
    %c0_i32_0 = arith.constant 0 : i32
    %c0_i32_1 = arith.constant 0 : i32
    %c0_i32_2 = arith.constant 0 : i32
    return %1, %c0_i32_0, %c0_i32_1 : i32, i32, i32
  }
  func.func @transform_9(%arg0: i32, %arg1: i32) -> (i32, i32, i32) {
    %c0_i32 = arith.constant 0 : i32
    %c0_i32_0 = arith.constant 0 : i32
    %c0_i32_1 = arith.constant 0 : i32
    return %arg0, %c0_i32, %c0_i32_0 : i32, i32, i32
  }
}

module attributes {stable_mosaic.version = 11 : i64} {
  func.func @_head_kernel(%arg0: i32, %arg1: memref<16x32xbf16, #tpu.memory_space<vmem>>, %arg2: memref<32x32xbf16, #tpu.memory_space<vmem>>, %arg3: memref<1x32xf32, #tpu.memory_space<vmem>>, %arg4: memref<32x32xbf16, #tpu.memory_space<vmem>>, %arg5: memref<1x32xf32, #tpu.memory_space<vmem>>, %arg6: memref<16x32xf32, #tpu.memory_space<vmem>>) attributes {dimension_semantics = [#tpu.dimension_semantics<parallel>], iteration_bounds = array<i64: 1>, scalar_prefetch = 0 : i64, scratch_operands = 0 : i64, tpu.core_type = #tpu.core_type<tc>, window_params = [{transform_indices = @transform_0, window_bounds = array<i64: 16, 32>}, {pipeline_mode = #tpu.pipeline_mode<synchronous>, transform_indices = @transform_1, window_bounds = array<i64: 32, 32>}, {pipeline_mode = #tpu.pipeline_mode<synchronous>, transform_indices = @transform_2, window_bounds = array<i64: 1, 32>}, {pipeline_mode = #tpu.pipeline_mode<synchronous>, transform_indices = @transform_3, window_bounds = array<i64: 32, 32>}, {pipeline_mode = #tpu.pipeline_mode<synchronous>, transform_indices = @transform_4, window_bounds = array<i64: 1, 32>}, {transform_indices = @transform_5, window_bounds = array<i64: 16, 32>}]} {
    %c0 = arith.constant 0 : index
    %c0_0 = arith.constant 0 : index
    %0 = vector.load %arg1[%c0, %c0_0] : memref<16x32xbf16, #tpu.memory_space<vmem>>, vector<16x32xbf16>
    %c0_1 = arith.constant 0 : index
    %c0_2 = arith.constant 0 : index
    %1 = vector.load %arg2[%c0_1, %c0_2] : memref<32x32xbf16, #tpu.memory_space<vmem>>, vector<32x32xbf16>
    %cst = arith.constant dense<0.000000e+00> : vector<16x32xf32>
    %2 = tpu.matmul %0, %1, %cst {dimension_numbers = #tpu.dot_dimension_numbers<[1], [0], [0], [1], [0, 0, 1, 1], [], []>} : vector<16x32xbf16>, vector<32x32xbf16>, vector<16x32xf32> -> vector<16x32xf32>
    %c0_3 = arith.constant 0 : index
    %c0_4 = arith.constant 0 : index
    %3 = vector.load %arg3[%c0_3, %c0_4] : memref<1x32xf32, #tpu.memory_space<vmem>>, vector<1x32xf32>
    %4 = vector.broadcast %3 : vector<1x32xf32> to vector<16x32xf32>
    %5 = arith.addf %2, %4 : vector<16x32xf32>
    %cst_5 = arith.constant 0.000000e+00 : f32
    %6 = vector.broadcast %cst_5 : f32 to vector<16x32xf32>
    %7 = arith.maximumf %5, %6 : vector<16x32xf32>
    %8 = arith.truncf %7 : vector<16x32xf32> to vector<16x32xbf16>
    %c0_6 = arith.constant 0 : index
    %c0_7 = arith.constant 0 : index
    %9 = vector.load %arg4[%c0_6, %c0_7] : memref<32x32xbf16, #tpu.memory_space<vmem>>, vector<32x32xbf16>
    %cst_8 = arith.constant dense<0.000000e+00> : vector<16x32xf32>
    %10 = tpu.matmul %8, %9, %cst_8 {dimension_numbers = #tpu.dot_dimension_numbers<[1], [0], [0], [1], [0, 0, 1, 1], [], []>} : vector<16x32xbf16>, vector<32x32xbf16>, vector<16x32xf32> -> vector<16x32xf32>
    %c0_9 = arith.constant 0 : index
    %c0_10 = arith.constant 0 : index
    %11 = vector.load %arg5[%c0_9, %c0_10] : memref<1x32xf32, #tpu.memory_space<vmem>>, vector<1x32xf32>
    %12 = vector.broadcast %11 : vector<1x32xf32> to vector<16x32xf32>
    %13 = arith.addf %10, %12 : vector<16x32xf32>
    %14 = math.tanh %13 : vector<16x32xf32>
    %c0_11 = arith.constant 0 : index
    %c0_12 = arith.constant 0 : index
    %15 = vector.load %arg6[%c0_11, %c0_12] : memref<16x32xf32, #tpu.memory_space<vmem>>, vector<16x32xf32>
    tpu.vector_store %arg6[%c0_11, %c0_12], %14 {strides = array<i32>} : memref<16x32xf32, #tpu.memory_space<vmem>>, vector<16x32xf32>,
    return
  }
  func.func @transform_0(%arg0: i32) -> (i32, i32) {
    %c0_i32 = arith.constant 0 : i32
    %c0_i32_0 = arith.constant 0 : i32
    return %arg0, %c0_i32 : i32, i32
  }
  func.func @transform_1(%arg0: i32) -> (i32, i32) {
    %c0_i32 = arith.constant 0 : i32
    %c0_i32_0 = arith.constant 0 : i32
    %c0_i32_1 = arith.constant 0 : i32
    return %c0_i32, %c0_i32_0 : i32, i32
  }
  func.func @transform_2(%arg0: i32) -> (i32, i32) {
    %c0_i32 = arith.constant 0 : i32
    %c0_i32_0 = arith.constant 0 : i32
    %c0_i32_1 = arith.constant 0 : i32
    return %c0_i32, %c0_i32_0 : i32, i32
  }
  func.func @transform_3(%arg0: i32) -> (i32, i32) {
    %c0_i32 = arith.constant 0 : i32
    %c0_i32_0 = arith.constant 0 : i32
    %c0_i32_1 = arith.constant 0 : i32
    return %c0_i32, %c0_i32_0 : i32, i32
  }
  func.func @transform_4(%arg0: i32) -> (i32, i32) {
    %c0_i32 = arith.constant 0 : i32
    %c0_i32_0 = arith.constant 0 : i32
    %c0_i32_1 = arith.constant 0 : i32
    return %c0_i32, %c0_i32_0 : i32, i32
  }
  func.func @transform_5(%arg0: i32) -> (i32, i32) {
    %c0_i32 = arith.constant 0 : i32
    %c0_i32_0 = arith.constant 0 : i32
    return %arg0, %c0_i32 : i32, i32
  }
}

</mosaic_0001>

<bundles_post_ra>
// kernel: encoder_forward.7
= control target key start
LH: loop header
LB: loop body
LE: loop exit
PB: predicated region body
PF: predicated region fallthrough
CT: control target
= control target key end

     0   :  { %8 = vsyncpa [#allocation4], 0  ;;  %s766_s12 = smov [#allocation3]   ;;  %s988_s0 = inlined_call_operand.vmem [shape: bf16[256,9], index: 0, kind: input, shape index: {}]   ;;  %s989_s1 = inlined_call_operand.vmem [shape: bf16[9,128], index: 1, kind: input, shape index: {}]   ;;  %s990_s2 = inlined_call_operand.hbm [shape: f32[1,128], index: 2, kind: input, shape index: {}]   ;;  %s991_s3 = inlined_call_operand.vmem [shape: f32[256,128], index: 3, kind: output, shape index: {}]  }
   0x1   :  { %s19_s13 = sshll.u32 %s766_s12, 4  ;;  %s20_s13 = int_to_ptr.vmem [resolvable:$true] %s19_s13 }
   0x2   :  { %s752_s14 = scalar_lea.vmem %s20_s13, 16  ;;  %s756_s15 = scalar_lea.vmem %s20_s13, 32 }
   0x3   :  { %p753_p0 = scmp.ne.s32.totalorder %s20_s13, %s752_s14  ;;  %p757_p1 = scmp.lt.s32.totalorder %s20_s13, %s20_s13 }
   0x4   :  { %p758_p2 = scmp.lt.s32.totalorder %s756_s15, %s752_s14 }
   0x6   :  { %p759_p3 = por %p758_p2, %p757_p1 }
   0x8   :  { %p760_p4 = pnand %p759_p3, %p753_p0 }
   0xa   :  { %763 = shalt.err (!%p760_p4)
}
   0xb   :  { %22 = dma.hbm_to_vmem [thread:$0]  %s990_s2, 16, %s20_s13, [#allocation4]  }
   0xc   :  { %764 = dma.done.wait [#allocation4], 16  }
   0xd   :  { %765 = vsyncadd [#allocation4], 4294967280  ;;  %vm263_vm0 = vcmask 1043456   ;;  %vm264_vm1 = vcmask 1044480   ;;  %v767_v0 = vmov 65535   ;;  %vm214_vm2 = vcmask 72704  }
   0xe   :  { %v265_v1 = vsel %vm263_vm0, 4294967295, %v767_v0  ;;  %v727_v3 = vld [vmem:[%s989_s1] sm:$0x1f]   ;;  %v730_v7 = vld [vmem:[%s988_s0 + $0x8] sm:$0xff]   ;;  %v732_v9 = vld [vmem:[%s988_s0 + $0x10] sm:$0xff]  }
   0xf   :  { %v266_v2 = vsel %vm264_vm1, %v265_v1, 0  ;;  %v728_v4 = vld [vmem:[%s988_s0] sm:$0xff]   ;;  %v731_v8 = vld [vmem:[%s988_s0 + $0x48] sm:$0xff]   ;;  %v733_v10 = vld [vmem:[%s988_s0 + $0x50] sm:$0xff]  }
  0x10   :  { %v268_v5 = vand.u32 %v727_v3, %v266_v2  ;;  %v729_v6 = vld [vmem:[%s988_s0 + $0x40] sm:$0xff]   ;;  %691 = vmatprep.mubr.msk.bf16.mxu0 %vm214_vm2, %v728_v4  ;;  %v734_v11 = vld [vmem:[%s988_s0 + $0x18] sm:$0xff]   ;;  %v738_v15 = vld [vmem:[%s988_s0 + $0x28] sm:$0xff]  }
  0x11   :  { %707 = vmatprep.mubr.msk.bf16.mxu1 %vm214_vm2, %v729_v6  ;;  %v735_v12 = vld [vmem:[%s988_s0 + $0x58] sm:$0xff]   ;;  %v736_v13 = vld [vmem:[%s988_s0 + $0x20] sm:$0xff]   ;;  %v739_v16 = vld [vmem:[%s988_s0 + $0x68] sm:$0xff]  }
  0x12   :  { %689 = vmatprep.subr.bf16.mxu0 %v268_v5  ;;  %723 = vmatprep.subr.bf16.mxu1 %v268_v5  ;;  %v737_v14 = vld [vmem:[%s988_s0 + $0x60] sm:$0xff]   ;;  %v740_v17 = vld [vmem:[%s988_s0 + $0x30] sm:$0xff]   ;;  %v742_v19 = vld [vmem:[%s988_s0 + $0x38] sm:$0xff]  }
  0x13   :  { %690 = vmatpush3.bf16.msra.mxu0 %v268_v5  ;;  %724 = vmatpush3.bf16.msra.mxu1 %v268_v5  ;;  %v741_v18 = vld [vmem:[%s988_s0 + $0x70] sm:$0xff]   ;;  %v743_v20 = vld [vmem:[%s988_s0 + $0x78] sm:$0xff]   ;;  %v858_v21 = vld [vmem:[#allocation3] ss:$0 sm:$0xff] }
  0x16   :  { %692 = vmatmul.mubr.msk.bf16.vlgmr.msra.gmra.mxu0 %vm214_vm2, %v730_v7  ;;  %708 = vmatmul.mubr.msk.bf16.vlgmr.msra.gmra.mxu1 %vm214_vm2, %v731_v8 }
  0x17   :  { %695 = vmatprep.mubr.msk.bf16.mxu0 %vm214_vm2, %v732_v9  ;;  %711 = vmatprep.mubr.msk.bf16.mxu1 %vm214_vm2, %v733_v10 }
  0x1e   :  { %696 = vmatmul.mubr.msk.bf16.gmra.mxu0 %vm214_vm2, %v734_v11  ;;  %712 = vmatmul.mubr.msk.bf16.gmra.mxu1 %vm214_vm2, %v735_v12 }
  0x1f   :  { %699 = vmatprep.mubr.msk.bf16.mxu0 %vm214_vm2, %v736_v13  ;;  %715 = vmatprep.mubr.msk.bf16.mxu1 %vm214_vm2, %v737_v14 }
  0x26   :  { %700 = vmatmul.mubr.msk.bf16.gmra.mxu0 %vm214_vm2, %v738_v15  ;;  %716 = vmatmul.mubr.msk.bf16.gmra.mxu1 %vm214_vm2, %v739_v16 }
  0x27   :  { %703 = vmatprep.mubr.msk.bf16.mxu0 %vm214_vm2, %v740_v17  ;;  %719 = vmatprep.mubr.msk.bf16.mxu1 %vm214_vm2, %v741_v18 }
  0x2e   :  { %704 = vmatmul.mubr.msk.bf16.gmra.mxu0 %vm214_vm2, %v742_v19  ;;  %720 = vmatmul.mubr.msk.bf16.gmra.mxu1 %vm214_vm2, %v743_v20 }
  0xd6   :  { %v693_v22 = vpop.f32.mrf.mxu0  ;;  %v709_v23 = vpop.f32.mrf.mxu1 }
  0xd7   :  { %v539_v24 = vadd.f32 %v693_v22, %v858_v21  ;;  %v555_v25 = vadd.f32 %v709_v23, %v858_v21 }
  0xd8   :  { %v304_v26 = vpop.f32.mrf.mxu0  ;;  %v368_v27 = vpop.f32.mrf.mxu1 }
  0xd9   :  { %v571_v28 = vmax.f32 %v539_v24, 0.0  ;;  %v587_v29 = vmax.f32 %v555_v25, 0.0  ;;  %v537_v30 = vadd.f32 %v858_v21, %v304_v26  ;;  %v553_v31 = vadd.f32 %v858_v21, %v368_v27 }
  0xda   :  { %v694_v32 = vpop.f32.mrf.mxu0  ;;  %v710_v33 = vpop.f32.mrf.mxu1 }
  0xdb   :  { %603 = vst [vmem:[%s991_s3 + $0x10] sm:$0xff] %v571_v28  ;;  %619 = vst [vmem:[%s991_s3 + $0x90] sm:$0xff] %v587_v29  ;;  %v569_v34 = vmax.f32 %v537_v30, 0.0  ;;  %v585_v35 = vmax.f32 %v553_v31, 0.0  ;;  %v540_v36 = vadd.f32 %v694_v32, %v858_v21  ;;  %v556_v37 = vadd.f32 %v710_v33, %v858_v21 }
  0xdc   :  { %v307_v38 = vpop.f32.mrf.mxu0  ;;  %v371_v39 = vpop.f32.mrf.mxu1 }
  0xdd   :  { %601 = vst [vmem:[%s991_s3] sm:$0xff] %v569_v34  ;;  %617 = vst [vmem:[%s991_s3 + $0x80] sm:$0xff] %v585_v35  ;;  %v572_v40 = vmax.f32 %v540_v36, 0.0  ;;  %v588_v41 = vmax.f32 %v556_v37, 0.0  ;;  %v538_v42 = vadd.f32 %v858_v21, %v307_v38  ;;  %v554_v43 = vadd.f32 %v858_v21, %v371_v39 }
  0xde   :  { %v697_v44 = vpop.f32.mrf.mxu0  ;;  %v713_v45 = vpop.f32.mrf.mxu1 }
  0xdf   :  { %604 = vst [vmem:[%s991_s3 + $0x18] sm:$0xff] %v572_v40  ;;  %620 = vst [vmem:[%s991_s3 + $0x98] sm:$0xff] %v588_v41  ;;  %v570_v46 = vmax.f32 %v538_v42, 0.0  ;;  %v586_v47 = vmax.f32 %v554_v43, 0.0  ;;  %v543_v48 = vadd.f32 %v697_v44, %v858_v21  ;;  %v559_v49 = vadd.f32 %v713_v45, %v858_v21 }
  0xe0   :  { %v320_v50 = vpop.f32.mrf.mxu0  ;;  %v384_v51 = vpop.f32.mrf.mxu1 }
  0xe1   :  { %602 = vst [vmem:[%s991_s3 + $0x8] sm:$0xff] %v570_v46  ;;  %618 = vst [vmem:[%s991_s3 + $0x88] sm:$0xff] %v586_v47  ;;  %v575_v52 = vmax.f32 %v543_v48, 0.0  ;;  %v591_v53 = vmax.f32 %v559_v49, 0.0  ;;  %v541_v54 = vadd.f32 %v858_v21, %v320_v50  ;;  %v557_v55 = vadd.f32 %v858_v21, %v384_v51 }
  0xe2   :  { %v698_v56 = vpop.f32.mrf.mxu0  ;;  %v714_v57 = vpop.f32.mrf.mxu1 }
  0xe3   :  { %607 = vst [vmem:[%s991_s3 + $0x30] sm:$0xff] %v575_v52  ;;  %623 = vst [vmem:[%s991_s3 + $0xb0] sm:$0xff] %v591_v53  ;;  %v573_v58 = vmax.f32 %v541_v54, 0.0  ;;  %v589_v59 = vmax.f32 %v557_v55, 0.0  ;;  %v544_v60 = vadd.f32 %v698_v56, %v858_v21  ;;  %v560_v61 = vadd.f32 %v714_v57, %v858_v21 }
  0xe4   :  { %v323_v62 = vpop.f32.mrf.mxu0  ;;  %v387_v63 = vpop.f32.mrf.mxu1 }
  0xe5   :  { %605 = vst [vmem:[%s991_s3 + $0x20] sm:$0xff] %v573_v58  ;;  %621 = vst [vmem:[%s991_s3 + $0xa0] sm:$0xff] %v589_v59  ;;  %v576_v0 = vmax.f32 %v544_v60, 0.0  ;;  %v592_v1 = vmax.f32 %v560_v61, 0.0  ;;  %v542_v2 = vadd.f32 %v858_v21, %v323_v62  ;;  %v558_v3 = vadd.f32 %v858_v21, %v387_v63 }
  0xe6   :  { %v701_v4 = vpop.f32.mrf.mxu0  ;;  %v717_v5 = vpop.f32.mrf.mxu1 }
  0xe7   :  { %608 = vst [vmem:[%s991_s3 + $0x38] sm:$0xff] %v576_v0  ;;  %624 = vst [vmem:[%s991_s3 + $0xb8] sm:$0xff] %v592_v1  ;;  %v574_v6 = vmax.f32 %v542_v2, 0.0  ;;  %v590_v7 = vmax.f32 %v558_v3, 0.0  ;;  %v547_v8 = vadd.f32 %v701_v4, %v858_v21  ;;  %v563_v9 = vadd.f32 %v717_v5, %v858_v21 }
  0xe8   :  { %v336_v10 = vpop.f32.mrf.mxu0  ;;  %v400_v11 = vpop.f32.mrf.mxu1 }
  0xe9   :  { %606 = vst [vmem:[%s991_s3 + $0x28] sm:$0xff] %v574_v6  ;;  %622 = vst [vmem:[%s991_s3 + $0xa8] sm:$0xff] %v590_v7  ;;  %v579_v12 = vmax.f32 %v547_v8, 0.0  ;;  %v595_v13 = vmax.f32 %v563_v9, 0.0  ;;  %v545_v14 = vadd.f32 %v858_v21, %v336_v10  ;;  %v561_v15 = vadd.f32 %v858_v21, %v400_v11 }
  0xea   :  { %v702_v16 = vpop.f32.mrf.mxu0  ;;  %v718_v17 = vpop.f32.mrf.mxu1 }
  0xeb   :  { %611 = vst [vmem:[%s991_s3 + $0x50] sm:$0xff] %v579_v12  ;;  %627 = vst [vmem:[%s991_s3 + $0xd0] sm:$0xff] %v595_v13  ;;  %v577_v18 = vmax.f32 %v545_v14, 0.0  ;;  %v593_v19 = vmax.f32 %v561_v15, 0.0  ;;  %v548_v20 = vadd.f32 %v702_v16, %v858_v21  ;;  %v564_v22 = vadd.f32 %v718_v17, %v858_v21 }
  0xec   :  { %v339_v23 = vpop.f32.mrf.mxu0  ;;  %v403_v24 = vpop.f32.mrf.mxu1 }
  0xed   :  { %609 = vst [vmem:[%s991_s3 + $0x40] sm:$0xff] %v577_v18  ;;  %625 = vst [vmem:[%s991_s3 + $0xc0] sm:$0xff] %v593_v19  ;;  %v580_v25 = vmax.f32 %v548_v20, 0.0  ;;  %v596_v26 = vmax.f32 %v564_v22, 0.0  ;;  %v546_v27 = vadd.f32 %v858_v21, %v339_v23  ;;  %v562_v28 = vadd.f32 %v858_v21, %v403_v24 }
  0xee   :  { %v705_v29 = vpop.f32.mrf.mxu0  ;;  %v721_v30 = vpop.f32.mrf.mxu1 }
  0xef   :  { %612 = vst [vmem:[%s991_s3 + $0x58] sm:$0xff] %v580_v25  ;;  %628 = vst [vmem:[%s991_s3 + $0xd8] sm:$0xff] %v596_v26  ;;  %v578_v31 = vmax.f32 %v546_v27, 0.0  ;;  %v594_v32 = vmax.f32 %v562_v28, 0.0  ;;  %v551_v33 = vadd.f32 %v705_v29, %v858_v21  ;;  %v567_v34 = vadd.f32 %v721_v30, %v858_v21 }
  0xf0   :  { %v352_v35 = vpop.f32.mrf.mxu0  ;;  %v416_v36 = vpop.f32.mrf.mxu1 }
  0xf1   :  { %610 = vst [vmem:[%s991_s3 + $0x48] sm:$0xff] %v578_v31  ;;  %626 = vst [vmem:[%s991_s3 + $0xc8] sm:$0xff] %v594_v32  ;;  %v583_v37 = vmax.f32 %v551_v33, 0.0  ;;  %v599_v38 = vmax.f32 %v567_v34, 0.0  ;;  %v549_v39 = vadd.f32 %v858_v21, %v352_v35  ;;  %v565_v40 = vadd.f32 %v858_v21, %v416_v36 }
  0xf2   :  { %v706_v41 = vpop.f32.mrf.mxu0  ;;  %v722_v42 = vpop.f32.mrf.mxu1 }
  0xf3   :  { %615 = vst [vmem:[%s991_s3 + $0x70] sm:$0xff] %v583_v37  ;;  %631 = vst [vmem:[%s991_s3 + $0xf0] sm:$0xff] %v599_v38  ;;  %v581_v43 = vmax.f32 %v549_v39, 0.0  ;;  %v597_v44 = vmax.f32 %v565_v40, 0.0  ;;  %v552_v45 = vadd.f32 %v706_v41, %v858_v21  ;;  %v568_v46 = vadd.f32 %v722_v42, %v858_v21 }
  0xf4   :  { %v355_v47 = vpop.f32.mrf.mxu0  ;;  %v419_v48 = vpop.f32.mrf.mxu1 }
  0xf5   :  { %613 = vst [vmem:[%s991_s3 + $0x60] sm:$0xff] %v581_v43  ;;  %629 = vst [vmem:[%s991_s3 + $0xe0] sm:$0xff] %v597_v44  ;;  %v584_v49 = vmax.f32 %v552_v45, 0.0  ;;  %v600_v50 = vmax.f32 %v568_v46, 0.0  ;;  %v550_v51 = vadd.f32 %v858_v21, %v355_v47  ;;  %v566_v52 = vadd.f32 %v858_v21, %v419_v48 }
  0xf7   :  { %616 = vst [vmem:[%s991_s3 + $0x78] sm:$0xff] %v584_v49  ;;  %632 = vst [vmem:[%s991_s3 + $0xf8] sm:$0xff] %v600_v50  ;;  %v582_v53 = vmax.f32 %v550_v51, 0.0  ;;  %v598_v54 = vmax.f32 %v566_v52, 0.0 }
  0xf9   :  { %614 = vst [vmem:[%s991_s3 + $0x68] sm:$0xff] %v582_v53  ;;  %630 = vst [vmem:[%s991_s3 + $0xe8] sm:$0xff] %v598_v54 }
  0xfa   :  { %637 = vsyncpa [#allocation4], 1 }

// kernel: encoder_forward.8
= control target key start
LH: loop header
LB: loop body
LE: loop exit
PB: predicated region body
PF: predicated region fallthrough
CT: control target
= control target key end

     0   :  { %s2499_s12 = smov 0   ;;  %s2501_s13 = smov 0   ;;  %s3270_s0 = inlined_call_operand.vmem [shape: bf16[256,1152], index: 0, kind: input, shape index: {}]   ;;  %s3271_s1 = inlined_call_operand.vmem [shape: bf16[1152,256], index: 1, kind: input, shape index: {}]   ;;  %s3272_s2 = inlined_call_operand.vmem [shape: f32[1,256], index: 2, kind: input, shape index: {}]   ;;  %s3273_s3 = inlined_call_operand.vmem [shape: f32[256,256], index: 3, kind: output, shape index: {}]  }
   0x1   :  { %s2503_s14 = smov 0   ;;  %s2505_s15 = smov 0  }
   0x2   :  { %s2507_s16 = smov 0  }
   0x3 LB: > { %s25_s17 = sadd.s32 1, %s2471_s15  ;;  %p48_p1 = scmp.ne.s32.totalorder %s2463_s13, %s2459_s12  ;;  %s2475_s16 = sphi %s2507_s16, %s13_s16   ;;  %s2471_s15 = sphi %s2505_s15, %s3277_s15   ;;  %s2467_s14 = sphi %s2503_s14, %s3276_s14   ;;  %s2463_s13 = sphi %s2501_s13, %s3275_s13   ;;  %s2459_s12 = sphi %s2499_s12, %s3274_s12  }
   0x4   : > { %p26_p0 = scmp.ge.s32.totalorder %s25_s17, 3  ;;  %p49_p2 = scmp.eq.s32.totalorder %s2475_s16, 0 }
   0x5   : > { %s41_s19 = sadd.s32 1, %s2463_s13  ;;  %p2084_p5 = scmp.ge.s32.totalorder %s2475_s16, 3 }
   0x6   : > { %s3279_s17 = smov (%p26_p0, %s25_s17), 0  ;;  %p50_p3 = por %p49_p2, %p48_p1 }
   0x7   : > { %s37_s18 = ssub.s32 %s2471_s15, %s3279_s17  ;;  %164 = sbr.rel (%p2084_p5) target bundleno = 54 (0x36), region = 20 }
   0x8   : > { %p39_p4 = scmp.eq.s32.totalorder %s37_s18, 0 }
   0xa   : > { %s2534_s20 = scalar_select %p39_p4, %s2463_s13, %s41_s19  }
   0xc   : > { %167 = sbr.rel (!%p50_p3) target bundleno = 54 (0x36), region = 24  ;;  %s169_s21 = sand.u32 (%p50_p3), 1, %s2463_s13  }
   0xd   : > { %s2255_s22 = smul.u32 (%p50_p3), 12, %s2471_s15 }
   0xe   : > { %s2257_s23 = smul.u32 (%p50_p3), 384, %s169_s21 }
   0xf   : > { %s2542_s26 = scalar_lea.vmem (%p50_p3), %s3270_s0, %s2255_s22 }
  0x10   : > { %v192_v0 = vld [vmem:[%s2542_s26] sm:$0xff] (%p50_p3)  ;;  %v196_v2 = vld [vmem:[%s2542_s26 + $0x48] sm:$0xff] (%p50_p3)  ;;  %s2547_s27 = scalar_lea.vmem (%p50_p3), [#allocation3], %s2257_s23  ;;  %v200_v4 = vld [vmem:[%s2542_s26 + $0x90] sm:$0xff] (%p50_p3) }
  0x11   : > { %v194_v1 = vld [vmem:[%s2542_s26 + $0x24] sm:$0xff]  ;;  %193 = vst [vmem:[%s2547_s27] sm:$0xff] %v192_v0  ;;  %197 = vst [vmem:[%s2547_s27 + $0x18] sm:$0xff] %v196_v2  ;;  %v198_v3 = vld [vmem:[%s2542_s26 + $0x6c] sm:$0xff] }
  0x12   : > { %195 = vst [vmem:[%s2547_s27 + $0xc] sm:$0xff] %v194_v1  ;;  %v202_v5 = vld [vmem:[%s2542_s26 + $0xb4] sm:$0xff]  ;;  %199 = vst [vmem:[%s2547_s27 + $0x24] sm:$0xff] %v198_v3  ;;  %v206_v7 = vld [vmem:[%s2542_s26 + $0xfc] sm:$0xff] }
  0x13   : > { %201 = vst [vmem:[%s2547_s27 + $0x30] sm:$0xff] %v200_v4  ;;  %203 = vst [vmem:[%s2547_s27 + $0x3c] sm:$0xff] %v202_v5  ;;  %v204_v6 = vld [vmem:[%s2542_s26 + $0xd8] sm:$0xff]  ;;  %v208_v8 = vld [vmem:[%s2542_s26 + $0x120] sm:$0xff] }
  0x14   : > { %205 = vst [vmem:[%s2547_s27 + $0x48] sm:$0xff] %v204_v6  ;;  %207 = vst [vmem:[%s2547_s27 + $0x54] sm:$0xff] %v206_v7  ;;  %v210_v9 = vld [vmem:[%s2542_s26 + $0x144] sm:$0xff]  ;;  %v214_v11 = vld [vmem:[%s2542_s26 + $0x18c] sm:$0xff] }
  0x15   : > { %209 = vst [vmem:[%s2547_s27 + $0x60] sm:$0xff] %v208_v8  ;;  %v212_v10 = vld [vmem:[%s2542_s26 + $0x168] sm:$0xff]  ;;  %211 = vst [vmem:[%s2547_s27 + $0x6c] sm:$0xff] %v210_v9  ;;  %v216_v12 = vld [vmem:[%s2542_s26 + $0x1b0] sm:$0xff] }
  0x16   : > { %213 = vst [vmem:[%s2547_s27 + $0x78] sm:$0xff] %v212_v10  ;;  %215 = vst [vmem:[%s2547_s27 + $0x84] sm:$0xff] %v214_v11  ;;  %v218_v13 = vld [vmem:[%s2542_s26 + $0x1d4] sm:$0xff]  ;;  %v222_v15 = vld [vmem:[%s2542_s26 + $0x21c] sm:$0xff] }
  0x17   : > { %v220_v14 = vld [vmem:[%s2542_s26 + $0x1f8] sm:$0xff]  ;;  %217 = vst [vmem:[%s2547_s27 + $0x90] sm:$0xff] %v216_v12  ;;  %219 = vst [vmem:[%s2547_s27 + $0x9c] sm:$0xff] %v218_v13  ;;  %v224_v16 = vld [vmem:[%s2542_s26 + $0x240] sm:$0xff] }
  0x18   : > { %221 = vst [vmem:[%s2547_s27 + $0xa8] sm:$0xff] %v220_v14  ;;  %v226_v17 = vld [vmem:[%s2542_s26 + $0x264] sm:$0xff]  ;;  %223 = vst [vmem:[%s2547_s27 + $0xb4] sm:$0xff] %v222_v15  ;;  %v230_v19 = vld [vmem:[%s2542_s26 + $0x2ac] sm:$0xff] }
  0x19   : > { %225 = vst [vmem:[%s2547_s27 + $0xc0] sm:$0xff] %v224_v16  ;;  %227 = vst [vmem:[%s2547_s27 + $0xcc] sm:$0xff] %v226_v17  ;;  %v228_v18 = vld [vmem:[%s2542_s26 + $0x288] sm:$0xff]  ;;  %v232_v20 = vld [vmem:[%s2542_s26 + $0x2d0] sm:$0xff] }
  0x1a   : > { %229 = vst [vmem:[%s2547_s27 + $0xd8] sm:$0xff] %v228_v18  ;;  %231 = vst [vmem:[%s2547_s27 + $0xe4] sm:$0xff] %v230_v19  ;;  %v234_v21 = vld [vmem:[%s2542_s26 + $0x2f4] sm:$0xff]  ;;  %v238_v23 = vld [vmem:[%s2542_s26 + $0x33c] sm:$0xff] }
  0x1b   : > { %233 = vst [vmem:[%s2547_s27 + $0xf0] sm:$0xff] %v232_v20  ;;  %v236_v22 = vld [vmem:[%s2542_s26 + $0x318] sm:$0xff]  ;;  %235 = vst [vmem:[%s2547_s27 + $0xfc] sm:$0xff] %v234_v21  ;;  %v240_v24 = vld [vmem:[%s2542_s26 + $0x360] sm:$0xff] }
  0x1c   : > { %237 = vst [vmem:[%s2547_s27 + $0x108] sm:$0xff] %v236_v22  ;;  %239 = vst [vmem:[%s2547_s27 + $0x114] sm:$0xff] %v238_v23  ;;  %v242_v25 = vld [vmem:[%s2542_s26 + $0x384] sm:$0xff]  ;;  %v246_v27 = vld [vmem:[%s2542_s26 + $0x3cc] sm:$0xff] }
  0x1d   : > { %v244_v26 = vld [vmem:[%s2542_s26 + $0x3a8] sm:$0xff]  ;;  %241 = vst [vmem:[%s2547_s27 + $0x120] sm:$0xff] %v240_v24  ;;  %243 = vst [vmem:[%s2547_s27 + $0x12c] sm:$0xff] %v242_v25  ;;  %v248_v28 = vld [vmem:[%s2542_s26 + $0x3f0] sm:$0xff] }
  0x1e   : > { %245 = vst [vmem:[%s2547_s27 + $0x138] sm:$0xff] %v244_v26  ;;  %v250_v29 = vld [vmem:[%s2542_s26 + $0x414] sm:$0xff]  ;;  %247 = vst [vmem:[%s2547_s27 + $0x144] sm:$0xff] %v246_v27  ;;  %v254_v31 = vld [vmem:[%s2542_s26 + $0x45c] sm:$0xff] }
  0x1f   : > { %249 = vst [vmem:[%s2547_s27 + $0x150] sm:$0xff] %v248_v28  ;;  %251 = vst [vmem:[%s2547_s27 + $0x15c] sm:$0xff] %v250_v29  ;;  %v252_v30 = vld [vmem:[%s2542_s26 + $0x438] sm:$0xff]  ;;  %v2086_v32 = vld [vmem:[%s2542_s26 + $0x8] sm:$0xf] }
  0x20   : > { %253 = vst [vmem:[%s2547_s27 + $0x168] sm:$0xff] %v252_v30  ;;  %255 = vst [vmem:[%s2547_s27 + $0x174] sm:$0xff] %v254_v31  ;;  %v2088_v33 = vld [vmem:[%s2542_s26 + $0x2c] sm:$0xf]  ;;  %v2090_v34 = vld [vmem:[%s2542_s26 + $0x50] sm:$0xf] }
  0x21   : > { %2087 = vst [vmem:[%s2547_s27 + $0x8] sm:$0xf] %v2086_v32  ;;  %v2092_v35 = vld [vmem:[%s2542_s26 + $0x74] sm:$0xf]  ;;  %2089 = vst [vmem:[%s2547_s27 + $0x14] sm:$0xf] %v2088_v33 }
  0x22   : > { %2091 = vst [vmem:[%s2547_s27 + $0x20] sm:$0xf] %v2090_v34  ;;  %2093 = vst [vmem:[%s2547_s27 + $0x2c] sm:$0xf] %v2092_v35  ;;  %v2094_v36 = vld [vmem:[%s2542_s26 + $0x98] sm:$0xf] }
  0x23   : > { %v2096_v37 = vld [vmem:[%s2542_s26 + $0xbc] sm:$0xf]  ;;  %v2098_v38 = vld [vmem:[%s2542_s26 + $0xe0] sm:$0xf]  ;;  %2095 = vst [vmem:[%s2547_s27 + $0x38] sm:$0xf] %v2094_v36 }
  0x24   : > { %2097 = vst [vmem:[%s2547_s27 + $0x44] sm:$0xf] %v2096_v37  ;;  %2099 = vst [vmem:[%s2547_s27 + $0x50] sm:$0xf] %v2098_v38  ;;  %v2100_v39 = vld [vmem:[%s2542_s26 + $0x104] sm:$0xf] }
  0x25   : > { %v2102_v40 = vld [vmem:[%s2542_s26 + $0x128] sm:$0xf]  ;;  %v2104_v41 = vld [vmem:[%s2542_s26 + $0x14c] sm:$0xf]  ;;  %2101 = vst [vmem:[%s2547_s27 + $0x5c] sm:$0xf] %v2100_v39 }
  0x26   : > { %2103 = vst [vmem:[%s2547_s27 + $0x68] sm:$0xf] %v2102_v40  ;;  %2105 = vst [vmem:[%s2547_s27 + $0x74] sm:$0xf] %v2104_v41  ;;  %v2106_v42 = vld [vmem:[%s2542_s26 + $0x170] sm:$0xf] }
  0x27   : > { %v2108_v43 = vld [vmem:[%s2542_s26 + $0x194] sm:$0xf]  ;;  %v2110_v44 = vld [vmem:[%s2542_s26 + $0x1b8] sm:$0xf]  ;;  %2107 = vst [vmem:[%s2547_s27 + $0x80] sm:$0xf] %v2106_v42 }
  0x28   : > { %2109 = vst [vmem:[%s2547_s27 + $0x8c] sm:$0xf] %v2108_v43  ;;  %2111 = vst [vmem:[%s2547_s27 + $0x98] sm:$0xf] %v2110_v44  ;;  %v2112_v45 = vld [vmem:[%s2542_s26 + $0x1dc] sm:$0xf] }
  0x29   : > { %v2114_v46 = vld [vmem:[%s2542_s26 + $0x200] sm:$0xf]  ;;  %v2116_v47 = vld [vmem:[%s2542_s26 + $0x224] sm:$0xf]  ;;  %2113 = vst [vmem:[%s2547_s27 + $0xa4] sm:$0xf] %v2112_v45 }
  0x2a   : > { %2115 = vst [vmem:[%s2547_s27 + $0xb0] sm:$0xf] %v2114_v46  ;;  %2117 = vst [vmem:[%s2547_s27 + $0xbc] sm:$0xf] %v2116_v47  ;;  %v2118_v48 = vld [vmem:[%s2542_s26 + $0x248] sm:$0xf] }
  0x2b   : > { %v2120_v49 = vld [vmem:[%s2542_s26 + $0x26c] sm:$0xf]  ;;  %v2122_v50 = vld [vmem:[%s2542_s26 + $0x290] sm:$0xf]  ;;  %2119 = vst [vmem:[%s2547_s27 + $0xc8] sm:$0xf] %v2118_v48 }
  0x2c   : > { %2121 = vst [vmem:[%s2547_s27 + $0xd4] sm:$0xf] %v2120_v49  ;;  %2123 = vst [vmem:[%s2547_s27 + $0xe0] sm:$0xf] %v2122_v50  ;;  %v2124_v51 = vld [vmem:[%s2542_s26 + $0x2b4] sm:$0xf] }
  0x2d   : > { %v2126_v52 = vld [vmem:[%s2542_s26 + $0x2d8] sm:$0xf]  ;;  %v2128_v53 = vld [vmem:[%s2542_s26 + $0x2fc] sm:$0xf]  ;;  %2125 = vst [vmem:[%s2547_s27 + $0xec] sm:$0xf] %v2124_v51 }
  0x2e   : > { %2127 = vst [vmem:[%s2547_s27 + $0xf8] sm:$0xf] %v2126_v52  ;;  %2129 = vst [vmem:[%s2547_s27 + $0x104] sm:$0xf] %v2128_v53  ;;  %v2130_v54 = vld [vmem:[%s2542_s26 + $0x320] sm:$0xf] }
  0x2f   : > { %v2132_v55 = vld [vmem:[%s2542_s26 + $0x344] sm:$0xf]  ;;  %v2134_v56 = vld [vmem:[%s2542_s26 + $0x368] sm:$0xf]  ;;  %2131 = vst [vmem:[%s2547_s27 + $0x110] sm:$0xf] %v2130_v54 }
  0x30   : > { %2133 = vst [vmem:[%s2547_s27 + $0x11c] sm:$0xf] %v2132_v55  ;;  %2135 = vst [vmem:[%s2547_s27 + $0x128] sm:$0xf] %v2134_v56  ;;  %v2136_v57 = vld [vmem:[%s2542_s26 + $0x38c] sm:$0xf] }
  0x31   : > { %v2138_v58 = vld [vmem:[%s2542_s26 + $0x3b0] sm:$0xf]  ;;  %v2140_v59 = vld [vmem:[%s2542_s26 + $0x3d4] sm:$0xf]  ;;  %2137 = vst [vmem:[%s2547_s27 + $0x134] sm:$0xf] %v2136_v57 }
  0x32   : > { %2139 = vst [vmem:[%s2547_s27 + $0x140] sm:$0xf] %v2138_v58  ;;  %2141 = vst [vmem:[%s2547_s27 + $0x14c] sm:$0xf] %v2140_v59  ;;  %v2142_v60 = vld [vmem:[%s2542_s26 + $0x3f8] sm:$0xf] }
  0x33   : > { %v2144_v61 = vld [vmem:[%s2542_s26 + $0x41c] sm:$0xf]  ;;  %v2146_v62 = vld [vmem:[%s2542_s26 + $0x440] sm:$0xf]  ;;  %2143 = vst [vmem:[%s2547_s27 + $0x158] sm:$0xf] %v2142_v60 }
  0x34   : > { %2145 = vst [vmem:[%s2547_s27 + $0x164] sm:$0xf] %v2144_v61  ;;  %2147 = vst [vmem:[%s2547_s27 + $0x170] sm:$0xf] %v2146_v62  ;;  %v2148_v63 = vld [vmem:[%s2542_s26 + $0x464] sm:$0xf] }
  0x35   : > { %2149 = vst [vmem:[%s2547_s27 + $0x17c] sm:$0xf] %v2148_v63 }
  0x36 PF: > { %p2150_p6 = scmp.ge.s32.totalorder %s2475_s16, 1  ;;  %p347_p7 = scmp.lt.s32.totalorder %s2475_s16, 4 }
  0x38   : > { %p348_p8 = pnand %p2150_p6, %p347_p7 }
  0x39   : > { %s354_s28 = sand.u32 (!%p348_p8), 1, %s2459_s12   ;;  %s398_s29 = smul.u32 (!%p348_p8), 48, %s2467_s14 }
  0x3a   : > { %351 = sbr.rel (%p348_p8) target bundleno = 535 (0x217), region = 54  ;;  %p2153_p10 = scmp.ne.s32.totalorder (!%p348_p8), %s2467_s14, 0 }
  0x3b   : > { %s2258_s30 = smul.u32 (!%p348_p8), 384, %s354_s28  ;;  %p400_p9 = scmp.lt.s32.totalorder (!%p348_p8), %s398_s29, 143 }
  0x3d   : > { %s2683_s8 = scalar_lea.vmem (!%p348_p8), [#allocation3], %s2258_s30 }
  0x3f   : > { %s3281_s29 = smov (!%p400_p9, %s398_s29), 143  ;;  %431 = sbr.rel (%p2153_p10) target bundleno = 101 (0x65), region = 62 }
  0x40   : > { %s2256_s4 = sshll.u32 %s3281_s29, 3 }
  0x41   : > { %s2681_s7 = scalar_lea.vmem %s3271_s1, %s2256_s4 }
  0x44   : > { %v2477_v0 = vmov 0.0  }
  0x45   : > { %432 = vst [vmem:[#allocation2 + $0xb0] sm:$0xff] %v2477_v0  ;;  %433 = vst [vmem:[#allocation2 + $0x1b0] sm:$0xff] %v2477_v0 }
  0x46   : > { %434 = vst [vmem:[#allocation2 + $0xd8] sm:$0xff] %v2477_v0  ;;  %435 = vst [vmem:[#allocation2 + $0x18] sm:$0xff] %v2477_v0 }
  0x47   : > { %436 = vst [vmem:[#allocation2 + $0x50] sm:$0xff] %v2477_v0  ;;  %437 = vst [vmem:[#allocation2 + $0x168] sm:$0xff] %v2477_v0 }
  0x48   : > { %438 = vst [vmem:[#allocation2 + $0x130] sm:$0xff] %v2477_v0  ;;  %439 = vst [vmem:[#allocation2 + $0x48] sm:$0xff] %v2477_v0 }
  0x49   : > { %440 = vst [vmem:[#allocation2 + $0x180] sm:$0xff] %v2477_v0  ;;  %441 = vst [vmem:[#allocation2 + $0x110] sm:$0xff] %v2477_v0 }
  0x4a   : > { %442 = vst [vmem:[#allocation2 + $0x118] sm:$0xff] %v2477_v0  ;;  %443 = vst [vmem:[#allocation2 + $0x98] sm:$0xff] %v2477_v0 }
  0x4b   : > { %444 = vst [vmem:[#allocation2 + $0x120] sm:$0xff] %v2477_v0  ;;  %445 = vst [vmem:[#allocation2 + $0x150] sm:$0xff] %v2477_v0 }
  0x4c   : > { %446 = vst [vmem:[#allocation2 + $0x108] sm:$0xff] %v2477_v0  ;;  %447 = vst [vmem:[#allocation2 + $0x60] sm:$0xff] %v2477_v0 }
  0x4d   : > { %448 = vst [vmem:[#allocation2 + $0xe0] sm:$0xff] %v2477_v0  ;;  %449 = vst [vmem:[#allocation2 + $0x188] sm:$0xff] %v2477_v0 }
  0x4e   : > { %450 = vst [vmem:[#allocation2 + $0x138] sm:$0xff] %v2477_v0  ;;  %451 = vst [vmem:[#allocation2 + $0x140] sm:$0xff] %v2477_v0 }
  0x4f   : > { %452 = vst [vmem:[#allocation2 + $0x80] sm:$0xff] %v2477_v0  ;;  %453 = vst [vmem:[#allocation2 + $0x1a8] sm:$0xff] %v2477_v0 }
  0x50   : > { %454 = vst [vmem:[#allocation2 + $0x1b8] sm:$0xff] %v2477_v0  ;;  %455 = vst [vmem:[#allocation2 + $0x28] sm:$0xff] %v2477_v0 }
  0x51   : > { %456 = vst [vmem:[#allocation2 + $0x1e8] sm:$0xff] %v2477_v0  ;;  %457 = vst [vmem:[#allocation2 + $0xf8] sm:$0xff] %v2477_v0 }
  0x52   : > { %458 = vst [vmem:[#allocation2 + $0x160] sm:$0xff] %v2477_v0  ;;  %459 = vst [vmem:[#allocation2 + $0x30] sm:$0xff] %v2477_v0 }
  0x53   : > { %460 = vst [vmem:[#allocation2 + $0x1e0] sm:$0xff] %v2477_v0  ;;  %461 = vst [vmem:[#allocation2] sm:$0xff] %v2477_v0 }
  0x54   : > { %462 = vst [vmem:[#allocation2 + $0xf0] sm:$0xff] %v2477_v0  ;;  %463 = vst [vmem:[#allocation2 + $0x8] sm:$0xff] %v2477_v0 }
  0x55   : > { %464 = vst [vmem:[#allocation2 + $0x148] sm:$0xff] %v2477_v0  ;;  %465 = vst [vmem:[#allocation2 + $0x1d0] sm:$0xff] %v2477_v0 }
  0x56   : > { %466 = vst [vmem:[#allocation2 + $0x100] sm:$0xff] %v2477_v0  ;;  %467 = vst [vmem:[#allocation2 + $0xc8] sm:$0xff] %v2477_v0 }
  0x57   : > { %468 = vst [vmem:[#allocation2 + $0x40] sm:$0xff] %v2477_v0  ;;  %469 = vst [vmem:[#allocation2 + $0x1f8] sm:$0xff] %v2477_v0 }
  0x58   : > { %470 = vst [vmem:[#allocation2 + $0x20] sm:$0xff] %v2477_v0  ;;  %471 = vst [vmem:[#allocation2 + $0x128] sm:$0xff] %v2477_v0 }
  0x59   : > { %472 = vst [vmem:[#allocation2 + $0x1a0] sm:$0xff] %v2477_v0  ;;  %473 = vst [vmem:[#allocation2 + $0x1f0] sm:$0xff] %v2477_v0 }
  0x5a   : > { %474 = vst [vmem:[#allocation2 + $0xe8] sm:$0xff] %v2477_v0  ;;  %475 = vst [vmem:[#allocation2 + $0x78] sm:$0xff] %v2477_v0 }
  0x5b   : > { %476 = vst [vmem:[#allocation2 + $0x70] sm:$0xff] %v2477_v0  ;;  %477 = vst [vmem:[#allocation2 + $0x90] sm:$0xff] %v2477_v0 }
  0x5c   : > { %478 = vst [vmem:[#allocation2 + $0x1d8] sm:$0xff] %v2477_v0  ;;  %479 = vst [vmem:[#allocation2 + $0xd0] sm:$0xff] %v2477_v0 }
  0x5d   : > { %480 = vst [vmem:[#allocation2 + $0xb8] sm:$0xff] %v2477_v0  ;;  %481 = vst [vmem:[#allocation2 + $0x88] sm:$0xff] %v2477_v0 }
  0x5e   : > { %482 = vst [vmem:[#allocation2 + $0xa8] sm:$0xff] %v2477_v0  ;;  %483 = vst [vmem:[#allocation2 + $0x1c8] sm:$0xff] %v2477_v0 }
  0x5f   : > { %484 = vst [vmem:[#allocation2 + $0x170] sm:$0xff] %v2477_v0  ;;  %485 = vst [vmem:[#allocation2 + $0x178] sm:$0xff] %v2477_v0 }
  0x60   : > { %486 = vst [vmem:[#allocation2 + $0x68] sm:$0xff] %v2477_v0  ;;  %487 = vst [vmem:[#allocation2 + $0x190] sm:$0xff] %v2477_v0 }
  0x61   : > { %488 = vst [vmem:[#allocation2 + $0x198] sm:$0xff] %v2477_v0  ;;  %489 = vst [vmem:[#allocation2 + $0x38] sm:$0xff] %v2477_v0 }
  0x62   : > { %490 = vst [vmem:[#allocation2 + $0xc0] sm:$0xff] %v2477_v0  ;;  %491 = vst [vmem:[#allocation2 + $0x1c0] sm:$0xff] %v2477_v0 }
  0x63   : > { %492 = vst [vmem:[#allocation2 + $0x158] sm:$0xff] %v2477_v0  ;;  %493 = vst [vmem:[#allocation2 + $0x10] sm:$0xff] %v2477_v0 }
  0x64   : > { %494 = vst [vmem:[#allocation2 + $0x58] sm:$0xff] %v2477_v0  ;;  %495 = vst [vmem:[#allocation2 + $0xa0] sm:$0xff] %v2477_v0 }
  0x65 PF: > { %v2301_v1 = vld [vmem:[%s2681_s7 + $0x74] ss:$8 sps:$4 sm:$0xff]   ;;  %v2303_v2 = vld [vmem:[%s2681_s7 + $0x70] ss:$8 sps:$4 sm:$0xff]   ;;  %v2478_v3 = vmov 0   ;;  %p2250_p11 = scmp.ne.s32.totalorder %s2467_s14, 2 }
  0x66   : > { %1393 = vmatprep.mubr.bf16.mxu1 %v2478_v3  ;;  %1168 = vmatprep.subr.bf16.mxu0 %v2301_v1  ;;  %v2304_v4 = vld [vmem:[%s2681_s7 + $0x64] ss:$8 sps:$4 sm:$0xff]   ;;  %v2306_v5 = vld [vmem:[%s2681_s7 + $0x60] ss:$8 sps:$4 sm:$0xff]   ;;  %v2307_v6 = vld [vmem:[%s2681_s7 + $0x54] ss:$8 sps:$4 sm:$0xff]  }
  0x67   : > { %1169 = vmatpush1.bf16.msra.mxu0 %v2303_v2  ;;  %v2309_v7 = vld [vmem:[%s2681_s7 + $0x50] ss:$8 sps:$4 sm:$0xff]   ;;  %v2310_v8 = vld [vmem:[%s2681_s7 + $0x44] ss:$8 sps:$4 sm:$0xff]   ;;  %v2322_v9 = vld [vmem:[%s2681_s7 + $0x174] ss:$8 sps:$4 sm:$0xff]  }
  0x68   : > { %1170 = vmatprep.subr.bf16.mxu0 %v2304_v4  ;;  %v2324_v10 = vld [vmem:[%s2681_s7 + $0x170] ss:$8 sps:$4 sm:$0xff]   ;;  %v2312_v11 = vld [vmem:[%s2681_s7 + $0x40] ss:$8 sps:$4 sm:$0xff]   ;;  %v2313_v12 = vld [vmem:[%s2681_s7 + $0x34] ss:$8 sps:$4 sm:$0xff]   ;;  %1361 = vmatprep.subr.bf16.mxu1 %v2322_v9 }
  0x69   : > { %v2328_v13 = vld [vmem:[%s2681_s7 + $0x164] ss:$8 sps:$4 sm:$0xff]   ;;  %1362 = vmatpush1.bf16.msra.mxu1 %v2324_v10  ;;  %v2330_v14 = vld [vmem:[%s2681_s7 + $0x160] ss:$8 sps:$4 sm:$0xff]   ;;  %v2315_v15 = vld [vmem:[%s2681_s7 + $0x30] ss:$8 sps:$4 sm:$0xff]  }
  0x6a   : > { %1363 = vmatprep.subr.bf16.mxu1 %v2328_v13  ;;  %v2334_v16 = vld [vmem:[%s2681_s7 + $0x154] ss:$8 sps:$4 sm:$0xff]   ;;  %v2316_v17 = vld [vmem:[%s2681_s7 + $0x24] ss:$8 sps:$4 sm:$0xff]   ;;  %v2336_v18 = vld [vmem:[%s2681_s7 + $0x150] ss:$8 sps:$4 sm:$0xff]  }
  0x6b   : > { %1171 = vmatpush1.bf16.msra.mxu0 %v2306_v5  ;;  %v2340_v19 = vld [vmem:[%s2681_s7 + $0x144] ss:$8 sps:$4 sm:$0xff]   ;;  %v2318_v20 = vld [vmem:[%s2681_s7 + $0x20] ss:$8 sps:$4 sm:$0xff]   ;;  %v2319_v21 = vld [vmem:[%s2681_s7 + $0x14] ss:$8 sps:$4 sm:$0xff]  }
  0x6c   : > { %1172 = vmatprep.subr.bf16.mxu0 %v2307_v6  ;;  %v2342_v22 = vld [vmem:[%s2681_s7 + $0x140] ss:$8 sps:$4 sm:$0xff]   ;;  %v2346_v23 = vld [vmem:[%s2681_s7 + $0x134] ss:$8 sps:$4 sm:$0xff]   ;;  %v2321_v24 = vld [vmem:[%s2681_s7 + $0x10] ss:$8 sps:$4 sm:$0xff]  }
  0x6d   : > { %1364 = vmatpush1.bf16.msra.mxu1 %v2330_v14  ;;  %v2325_v25 = vld [vmem:[%s2681_s7 + $0x4] ss:$8 sps:$4 sm:$0xff]   ;;  %v2348_v26 = vld [vmem:[%s2681_s7 + $0x130] ss:$8 sps:$4 sm:$0xff]   ;;  %v2327_v28 = vld [vmem:[%s2681_s7] ss:$8 sps:$4 sm:$0xff]  }
  0x6e   : > { %1365 = vmatprep.subr.bf16.mxu1 %v2334_v16  ;;  %v2352_v27 = vld [vmem:[%s2681_s7 + $0x124] ss:$8 sps:$4 sm:$0xff]   ;;  %v2331_v29 = vld [vmem:[%s2681_s7 + $0xf4] ss:$8 sps:$4 sm:$0xff]   ;;  %v2354_v30 = vld [vmem:[%s2681_s7 + $0x120] ss:$8 sps:$4 sm:$0xff]  }
  0x6f   : > { %1173 = vmatpush1.bf16.msra.mxu0 %v2309_v7  ;;  %v2358_v31 = vld [vmem:[%s2681_s7 + $0x114] ss:$8 sps:$4 sm:$0xff]   ;;  %v2333_v32 = vld [vmem:[%s2681_s7 + $0xf0] ss:$8 sps:$4 sm:$0xff]   ;;  %v2337_v33 = vld [vmem:[%s2681_s7 + $0xe4] ss:$8 sps:$4 sm:$0xff]  }
  0x70   : > { %1174 = vmatprep.subr.bf16.mxu0 %v2310_v8  ;;  %v2360_v34 = vld [vmem:[%s2681_s7 + $0x110] ss:$8 sps:$4 sm:$0xff]   ;;  %v2364_v35 = vld [vmem:[%s2681_s7 + $0x104] ss:$8 sps:$4 sm:$0xff]   ;;  %v2339_v37 = vld [vmem:[%s2681_s7 + $0xe0] ss:$8 sps:$4 sm:$0xff]  }
  0x71   : > { %1366 = vmatpush1.bf16.msra.mxu1 %v2336_v18  ;;  %v2376_v36 = vld [vmem:[%s2683_s8 + $0x4] ss:$12 sps:$4 sm:$0xff]   ;;  %v2343_v38 = vld [vmem:[%s2681_s7 + $0xd4] ss:$8 sps:$4 sm:$0xff]   ;;  %v2366_v39 = vld [vmem:[%s2681_s7 + $0x100] ss:$8 sps:$4 sm:$0xff]  }
  0x72   : > { %1367 = vmatprep.subr.bf16.mxu1 %v2340_v19  ;;  %1200 = vmatprep.mubr.bf16.mxu0 %v2376_v36  ;;  %v2345_v40 = vld [vmem:[%s2681_s7 + $0xd0] ss:$8 sps:$4 sm:$0xff]   ;;  %v2349_v41 = vld [vmem:[%s2681_s7 + $0xc4] ss:$8 sps:$4 sm:$0xff]   ;;  %v2370_v42 = vld [vmem:[%s2683_s8 + $0x8] ss:$12 sps:$4 sm:$0xff]  }
  0x73   : > { %1175 = vmatpush1.bf16.msra.mxu0 %v2312_v11  ;;  %v2351_v43 = vld [vmem:[%s2681_s7 + $0xc0] ss:$8 sps:$4 sm:$0xff]   ;;  %v2355_v44 = vld [vmem:[%s2681_s7 + $0xb4] ss:$8 sps:$4 sm:$0xff]   ;;  %v2357_v45 = vld [vmem:[%s2681_s7 + $0xb0] ss:$8 sps:$4 sm:$0xff]  }
  0x74   : > { %1176 = vmatprep.subr.bf16.mxu0 %v2313_v12  ;;  %v2361_v46 = vld [vmem:[%s2681_s7 + $0xa4] ss:$8 sps:$4 sm:$0xff]   ;;  %v2363_v48 = vld [vmem:[%s2681_s7 + $0xa0] ss:$8 sps:$4 sm:$0xff]   ;;  %v2367_v49 = vld [vmem:[%s2681_s7 + $0x94] ss:$8 sps:$4 sm:$0xff]  }
  0x75   : > { %1368 = vmatpush1.bf16.msra.mxu1 %v2342_v22  ;;  %v2377_v47 = vld [vmem:[%s2683_s8 + $0x20] ss:$12 sps:$4 sm:$0xff]   ;;  %v2369_v50 = vld [vmem:[%s2681_s7 + $0x90] ss:$8 sps:$4 sm:$0xff]   ;;  %v2378_v55 = vld [vmem:[%s2683_s8 + $0x1c] ss:$12 sps:$4 sm:$0xff]  }
  0x76   : > { %1369 = vmatprep.subr.bf16.mxu1 %v2346_v23  ;;  %v2371_v51 = vld [vmem:[%s2681_s7 + $0x84] ss:$8 sps:$4 sm:$0xff]   ;;  %v2373_v53 = vld [vmem:[%s2681_s7 + $0x80] ss:$8 sps:$4 sm:$0xff]   ;;  %v2385_v56 = vld [vmem:[%s2683_s8 + $0x50] ss:$12 sps:$4 sm:$0xff]  }
  0x77   : > { %1177 = vmatpush1.bf16.msra.mxu0 %v2315_v15  ;;  %v2381_v52 = vld [vmem:[%s2683_s8 + $0x38] ss:$12 sps:$4 sm:$0xff]   ;;  %v2374_v54 = vld [vmem:[%s2683_s8] ss:$12 sps:$4 sm:$0xff]   ;;  %v2389_v59 = vld [vmem:[%s2683_s8 + $0x68] ss:$12 sps:$4 sm:$0xff]  }
  0x78   : > { %1178 = vmatprep.subr.bf16.mxu0 %v2316_v17  ;;  %v2380_v57 = vld [vmem:[%s2683_s8 + $0x18] ss:$12 sps:$4 sm:$0xff]   ;;  %v2382_v58 = vld [vmem:[%s2683_s8 + $0x34] ss:$12 sps:$4 sm:$0xff]   ;;  %v2384_v60 = vld [vmem:[%s2683_s8 + $0x30] ss:$12 sps:$4 sm:$0xff]  }
  0x79   : > { %1370 = vmatpush1.bf16.msra.mxu1 %v2348_v26  ;;  %v2386_v61 = vld [vmem:[%s2683_s8 + $0x4c] ss:$12 sps:$4 sm:$0xff]   ;;  %v2388_v63 = vld [vmem:[%s2683_s8 + $0x48] ss:$12 sps:$4 sm:$0xff]   ;;  %v2390_v0 = vld [vmem:[%s2683_s8 + $0x64] ss:$12 sps:$4 sm:$0xff]  }
  0x7a   : > { %1371 = vmatprep.subr.bf16.mxu1 %v2352_v27  ;;  %v2393_v62 = vld [vmem:[%s2683_s8 + $0x80] ss:$12 sps:$4 sm:$0xff]   ;;  %v2397_v1 = vld [vmem:[%s2683_s8 + $0x98] ss:$12 sps:$4 sm:$0xff]   ;;  %v2394_v4 = vld [vmem:[%s2683_s8 + $0x7c] ss:$12 sps:$4 sm:$0xff]  }
  0x7b   : > { %1179 = vmatpush1.bf16.msra.mxu0 %v2318_v20  ;;  %v2392_v2 = vld [vmem:[%s2683_s8 + $0x60] ss:$12 sps:$4 sm:$0xff]   ;;  %v2401_v5 = vld [vmem:[%s2683_s8 + $0xb0] ss:$12 sps:$4 sm:$0xff]   ;;  %v2396_v6 = vld [vmem:[%s2683_s8 + $0x78] ss:$12 sps:$4 sm:$0xff]  }
  0x7c   : > { %1180 = vmatprep.subr.bf16.mxu0 %v2319_v21  ;;  %v2398_v7 = vld [vmem:[%s2683_s8 + $0x94] ss:$12 sps:$4 sm:$0xff]   ;;  %v2400_v9 = vld [vmem:[%s2683_s8 + $0x90] ss:$12 sps:$4 sm:$0xff]   ;;  %v2402_v10 = vld [vmem:[%s2683_s8 + $0xac] ss:$12 sps:$4 sm:$0xff]  }
  0x7d   : > { %1372 = vmatpush1.bf16.msra.mxu1 %v2354_v30  ;;  %v2405_v8 = vld [vmem:[%s2683_s8 + $0xc8] ss:$12 sps:$4 sm:$0xff]   ;;  %v2409_v11 = vld [vmem:[%s2683_s8 + $0xe0] ss:$12 sps:$4 sm:$0xff]   ;;  %v2406_v13 = vld [vmem:[%s2683_s8 + $0xc4] ss:$12 sps:$4 sm:$0xff]  }
  0x7e   : > { %1373 = vmatprep.subr.bf16.mxu1 %v2358_v31  ;;  %v2404_v12 = vld [vmem:[%s2683_s8 + $0xa8] ss:$12 sps:$4 sm:$0xff]   ;;  %v2413_v14 = vld [vmem:[%s2683_s8 + $0xf8] ss:$12 sps:$4 sm:$0xff]   ;;  %v2408_v15 = vld [vmem:[%s2683_s8 + $0xc0] ss:$12 sps:$4 sm:$0xff]  }
  0x7f   : > { %1181 = vmatpush1.bf16.msra.mxu0 %v2321_v24  ;;  %v2410_v16 = vld [vmem:[%s2683_s8 + $0xdc] ss:$12 sps:$4 sm:$0xff]   ;;  %v2412_v18 = vld [vmem:[%s2683_s8 + $0xd8] ss:$12 sps:$4 sm:$0xff]   ;;  %v2414_v19 = vld [vmem:[%s2683_s8 + $0xf4] ss:$12 sps:$4 sm:$0xff]  }
  0x80   : > { %1182 = vmatprep.subr.bf16.mxu0 %v2325_v25  ;;  %v2417_v17 = vld [vmem:[%s2683_s8 + $0x110] ss:$12 sps:$4 sm:$0xff]   ;;  %v2421_v20 = vld [vmem:[%s2683_s8 + $0x128] ss:$12 sps:$4 sm:$0xff]   ;;  %v2418_v22 = vld [vmem:[%s2683_s8 + $0x10c] ss:$12 sps:$4 sm:$0xff]  }
  0x81   : > { %1374 = vmatpush1.bf16.msra.mxu1 %v2360_v34  ;;  %v2416_v21 = vld [vmem:[%s2683_s8 + $0xf0] ss:$12 sps:$4 sm:$0xff]   ;;  %v2425_v23 = vld [vmem:[%s2683_s8 + $0x140] ss:$12 sps:$4 sm:$0xff]   ;;  %v2420_v24 = vld [vmem:[%s2683_s8 + $0x108] ss:$12 sps:$4 sm:$0xff]  }
  0x82   : > { %1375 = vmatprep.subr.bf16.mxu1 %v2364_v35  ;;  %v2422_v25 = vld [vmem:[%s2683_s8 + $0x124] ss:$12 sps:$4 sm:$0xff]   ;;  %v2424_v27 = vld [vmem:[%s2683_s8 + $0x120] ss:$12 sps:$4 sm:$0xff]   ;;  %v2436_v34 = vld [vmem:[%s2683_s8 + $0x168] ss:$12 sps:$4 sm:$0xff]  }
  0x83   : > { %1183 = vmatpush1.bf16.msra.mxu0 %v2327_v28  ;;  %v2429_v26 = vld [vmem:[%s2683_s8 + $0x158] ss:$12 sps:$4 sm:$0xff]   ;;  %v2426_v28 = vld [vmem:[%s2683_s8 + $0x13c] ss:$12 sps:$4 sm:$0xff]   ;;  %v2430_v31 = vld [vmem:[%s2683_s8 + $0x154] ss:$12 sps:$4 sm:$0xff]  }
  0x84   : > { %1184 = vmatprep.subr.bf16.mxu0 %v2331_v29  ;;  %v2433_v29 = vld [vmem:[%s2683_s8 + $0x170] ss:$12 sps:$4 sm:$0xff]   ;;  %v2428_v30 = vld [vmem:[%s2683_s8 + $0x138] ss:$12 sps:$4 sm:$0xff]  }
  0x85   : > { %1376 = vmatpush1.bf16.msra.mxu1 %v2366_v39 }
  0x87   : > { %1185 = vmatpush2.bf16.msra.mxu0 %v2333_v32  ;;  %v2432_v32 = vld [vmem:[%s2683_s8 + $0x150] ss:$12 sps:$4 sm:$0xff]  }
  0x88   : > { %1186 = vmatprep.subr.bf16.mxu0 %v2337_v33  ;;  %1394 = vmatmul.mubr.bf16.vlgmr.msra.gmra.mxu1 %v2370_v42  ;;  %v2434_v33 = vld [vmem:[%s2683_s8 + $0x16c] ss:$12 sps:$4 sm:$0xff]  }
  0x89   : > { %1403 = vmatprep.mubr.bf16.mxu1 %v2478_v3 }
  0x8b   : > { %1187 = vmatpush2.bf16.msra.mxu0 %v2339_v37 }
  0x8c   : > { %1188 = vmatprep.subr.bf16.mxu0 %v2343_v38 }
  0x8f   : > { %1189 = vmatpush2.bf16.msra.mxu0 %v2345_v40 }
  0x90   : > { %1190 = vmatprep.subr.bf16.mxu0 %v2349_v41  ;;  %1404 = vmatmul.mubr.bf16.gmra.mxu1 %v2377_v47 }
  0x91   : > { %1413 = vmatprep.mubr.bf16.mxu1 %v2478_v3 }
  0x93   : > { %1191 = vmatpush2.bf16.msra.mxu0 %v2351_v43 }
  0x94   : > { %1192 = vmatprep.subr.bf16.mxu0 %v2355_v44 }
  0x97   : > { %1193 = vmatpush2.bf16.msra.mxu0 %v2357_v45  ;;  %v496_v45 = vld [vmem:[#allocation2 + $0xb0] sm:$0xff] }
  0x98   : > { %1194 = vmatprep.subr.bf16.mxu0 %v2361_v46  ;;  %1414 = vmatmul.mubr.bf16.gmra.mxu1 %v2381_v52 }
  0x99   : > { %1423 = vmatprep.mubr.bf16.mxu1 %v2478_v3 }
  0x9b   : > { %1195 = vmatpush2.bf16.msra.mxu0 %v2363_v48 }
  0x9c   : > { %1196 = vmatprep.subr.bf16.mxu0 %v2367_v49  ;;  %v497_v49 = vld [vmem:[#allocation2 + $0x1b0] sm:$0xff] }
  0x9f   : > { %1197 = vmatpush2.bf16.msra.mxu0 %v2369_v50 }
  0xa0   : > { %1198 = vmatprep.subr.bf16.mxu0 %v2371_v51  ;;  %1424 = vmatmul.mubr.bf16.gmra.mxu1 %v2385_v56 }
  0xa1   : > { %1433 = vmatprep.mubr.bf16.mxu1 %v2478_v3 }
  0xa3   : > { %1199 = vmatpush2.bf16.msra.mxu0 %v2373_v53 }
  0xa6   : > { %1201 = vmatmul.mubr.bf16.vlgmr.msra.gmra.mxu0 %v2374_v54  ;;  %v498_v54 = vld [vmem:[#allocation2 + $0xd8] sm:$0xff] }
  0xa7   : > { %1210 = vmatprep.mubr.bf16.mxu0 %v2378_v55 }
  0xa8   : > { %1434 = vmatmul.mubr.bf16.gmra.mxu1 %v2389_v59  ;;  %v499_v59 = vld [vmem:[#allocation2 + $0x18] sm:$0xff] }
  0xa9   : > { %1443 = vmatprep.mubr.bf16.mxu1 %v2478_v3 }
  0xae   : > { %1211 = vmatmul.mubr.bf16.gmra.mxu0 %v2380_v57 }
  0xaf   : > { %1220 = vmatprep.mubr.bf16.mxu0 %v2382_v58 }
  0xb0   : > { %1444 = vmatmul.mubr.bf16.gmra.mxu1 %v2393_v62 }
  0xb1   : > { %1453 = vmatprep.mubr.bf16.mxu1 %v2478_v3 }
  0xb6   : > { %1221 = vmatmul.mubr.bf16.gmra.mxu0 %v2384_v60 }
  0xb7   : > { %1230 = vmatprep.mubr.bf16.mxu0 %v2386_v61 }
  0xb8   : > { %1454 = vmatmul.mubr.bf16.gmra.mxu1 %v2397_v1 }
  0xb9   : > { %1463 = vmatprep.mubr.bf16.mxu1 %v2478_v3 }
  0xbe   : > { %1231 = vmatmul.mubr.bf16.gmra.mxu0 %v2388_v63 }
  0xbf   : > { %1240 = vmatprep.mubr.bf16.mxu0 %v2390_v0  ;;  %v500_v0 = vld [vmem:[#allocation2 + $0x50] sm:$0xff] }
  0xc0   : > { %1464 = vmatmul.mubr.bf16.gmra.mxu1 %v2401_v5 }
  0xc1   : > { %1473 = vmatprep.mubr.bf16.mxu1 %v2478_v3 }
  0xc6   : > { %1241 = vmatmul.mubr.bf16.gmra.mxu0 %v2392_v2 }
  0xc7   : > { %1250 = vmatprep.mubr.bf16.mxu0 %v2394_v4 }
  0xc8   : > { %1474 = vmatmul.mubr.bf16.gmra.mxu1 %v2405_v8 }
  0xc9   : > { %1483 = vmatprep.mubr.bf16.mxu1 %v2478_v3 }
  0xce   : > { %1251 = vmatmul.mubr.bf16.gmra.mxu0 %v2396_v6  ;;  %v501_v6 = vld [vmem:[#allocation2 + $0x168] sm:$0xff] }
  0xcf   : > { %1260 = vmatprep.mubr.bf16.mxu0 %v2398_v7 }
  0xd0   : > { %1484 = vmatmul.mubr.bf16.gmra.mxu1 %v2409_v11  ;;  %v502_v11 = vld [vmem:[#allocation2 + $0x130] sm:$0xff] }
  0xd1   : > { %1493 = vmatprep.mubr.bf16.mxu1 %v2478_v3 }
  0xd6   : > { %1261 = vmatmul.mubr.bf16.gmra.mxu0 %v2400_v9 }
  0xd7   : > { %1270 = vmatprep.mubr.bf16.mxu0 %v2402_v10 }
  0xd8   : > { %1494 = vmatmul.mubr.bf16.gmra.mxu1 %v2413_v14 }
  0xd9   : > { %1503 = vmatprep.mubr.bf16.mxu1 %v2478_v3 }
  0xde   : > { %1271 = vmatmul.mubr.bf16.gmra.mxu0 %v2404_v12 }
  0xdf   : > { %1280 = vmatprep.mubr.bf16.mxu0 %v2406_v13 }
  0xe0   : > { %1504 = vmatmul.mubr.bf16.gmra.mxu1 %v2417_v17 }
  0xe1   : > { %1513 = vmatprep.mubr.bf16.mxu1 %v2478_v3 }
  0xe6   : > { %1281 = vmatmul.mubr.bf16.gmra.mxu0 %v2408_v15 }
  0xe7   : > { %1290 = vmatprep.mubr.bf16.mxu0 %v2410_v16  ;;  %v503_v16 = vld [vmem:[#allocation2 + $0x48] sm:$0xff] }
  0xe8   : > { %1514 = vmatmul.mubr.bf16.gmra.mxu1 %v2421_v20 }
  0xe9   : > { %1523 = vmatprep.mubr.bf16.mxu1 %v2478_v3 }
  0xee   : > { %1291 = vmatmul.mubr.bf16.gmra.mxu0 %v2412_v18 }
  0xef   : > { %1300 = vmatprep.mubr.bf16.mxu0 %v2414_v19 }
  0xf0   : > { %1524 = vmatmul.mubr.bf16.gmra.mxu1 %v2425_v23 }
  0xf1   : > { %1533 = vmatprep.mubr.bf16.mxu1 %v2478_v3 }
  0xf6   : > { %1301 = vmatmul.mubr.bf16.gmra.mxu0 %v2416_v21  ;;  %v504_v21 = vld [vmem:[#allocation2 + $0x180] sm:$0xff] }
  0xf7   : > { %1310 = vmatprep.mubr.bf16.mxu0 %v2418_v22 }
  0xf8   : > { %1534 = vmatmul.mubr.bf16.gmra.mxu1 %v2429_v26  ;;  %v505_v26 = vld [vmem:[#allocation2 + $0x110] sm:$0xff] }
  0xf9   : > { %1543 = vmatprep.mubr.bf16.mxu1 %v2478_v3 }
  0xfe   : > { %1311 = vmatmul.mubr.bf16.gmra.mxu0 %v2420_v24 }
  0xff   : > { %1320 = vmatprep.mubr.bf16.mxu0 %v2422_v25 }
 0x100   : > { %1544 = vmatmul.mubr.bf16.gmra.mxu1 %v2433_v29 }
 0x106   : > { %1321 = vmatmul.mubr.bf16.gmra.mxu0 %v2424_v27 }
 0x107   : > { %1330 = vmatprep.mubr.bf16.mxu0 %v2426_v28 }
 0x10e   : > { %1331 = vmatmul.mubr.bf16.gmra.mxu0 %v2428_v30 }
 0x10f   : > { %1340 = vmatprep.mubr.bf16.mxu0 %v2430_v31  ;;  %v506_v31 = vld [vmem:[#allocation2 + $0x118] sm:$0xff] }
 0x116   : > { %1341 = vmatmul.mubr.bf16.gmra.mxu0 %v2432_v32 }
 0x117   : > { %1350 = vmatprep.mubr.bf16.mxu0 %v2434_v33 }
 0x11e   : > { %1351 = vmatmul.mubr.bf16.gmra.mxu0 %v2436_v34 }
 0x148   : > { %v1395_v35 = vpop.f32.mrf.mxu1 }
 0x14a   : > { %v1397_v36 = vpop.f32.mrf.mxu1 }
 0x14c   : > { %v1399_v37 = vpop.f32.mrf.mxu1 }
 0x14e   : > { %v1401_v3 = vpop.f32.mrf.mxu1 }
 0x150   : > { %v1405_v38 = vpop.f32.mrf.mxu1 }
 0x152   : > { %v1407_v39 = vpop.f32.mrf.mxu1 }
 0x154   : > { %v1409_v40 = vpop.f32.mrf.mxu1 }
 0x156   : > { %v1411_v41 = vpop.f32.mrf.mxu1 }
 0x158   : > { %v1415_v42 = vpop.f32.mrf.mxu1 }
 0x15a   : > { %v1417_v43 = vpop.f32.mrf.mxu1 }
 0x15c   : > { %v2862_v44 = vpop.f32.mrf.mxu1 }
 0x15e   : > { %v2864_v47 = vpop.f32.mrf.mxu1 }
 0x160   : > { %v2866_v51 = vpop.f32.mrf.mxu1 }
 0x162   : > { %v2868_v56 = vpop.f32.mrf.mxu1 }
 0x164   : > { %v2870_v61 = vpop.f32.mrf.mxu1 }
 0x166   : > { %v1202_v46 = vpop.f32.mrf.mxu0  ;;  %v2872_v2 = vpop.f32.mrf.mxu1 }
 0x167   : > { %v1396_v48 = vadd.f32 %v1395_v35, %v1202_v46  ;;  %v509_v46 = vld [vmem:[#allocation2 + $0x150] sm:$0xff] }
 0x168   : > { %v1204_v50 = vpop.f32.mrf.mxu0  ;;  %v2874_v8 = vpop.f32.mrf.mxu1 }
 0x169   : > { %v1554_v52 = vadd.f32 %v1396_v48, %v496_v45  ;;  %v1398_v53 = vadd.f32 %v1397_v36, %v1204_v50  ;;  %v507_v36 = vld [vmem:[#allocation2 + $0x98] sm:$0xff] }
 0x16a   : > { %v1206_v55 = vpop.f32.mrf.mxu0  ;;  %v2876_v13 = vpop.f32.mrf.mxu1 }
 0x16b   : > { %1618 = vst [vmem:[#allocation2 + $0xb0] sm:$0xff] %v1554_v52  ;;  %v1555_v57 = vadd.f32 %v1398_v53, %v497_v49  ;;  %v1400_v58 = vadd.f32 %v1399_v37, %v1206_v55  ;;  %v510_v52 = vld [vmem:[#allocation2 + $0x108] sm:$0xff] }
 0x16c   : > { %v1208_v60 = vpop.f32.mrf.mxu0  ;;  %v2878_v18 = vpop.f32.mrf.mxu1 }
 0x16d   : > { %1619 = vst [vmem:[#allocation2 + $0x1b0] sm:$0xff] %v1555_v57  ;;  %v1556_v62 = vadd.f32 %v1400_v58, %v498_v54  ;;  %v1402_v63 = vadd.f32 %v1401_v3, %v1208_v60  ;;  %v511_v57 = vld [vmem:[#allocation2 + $0x60] sm:$0xff] }
 0x16e   : > { %v1212_v1 = vpop.f32.mrf.mxu0  ;;  %v2880_v23 = vpop.f32.mrf.mxu1 }
 0x16f   : > { %1620 = vst [vmem:[#allocation2 + $0xd8] sm:$0xff] %v1556_v62  ;;  %v1557_v4 = vadd.f32 %v1402_v63, %v499_v59  ;;  %v1406_v5 = vadd.f32 %v1405_v38, %v1212_v1  ;;  %v512_v62 = vld [vmem:[#allocation2 + $0xe0] sm:$0xff] }
 0x170   : > { %v1214_v7 = vpop.f32.mrf.mxu0  ;;  %v2882_v28 = vpop.f32.mrf.mxu1 }
 0x171   : > { %1621 = vst [vmem:[#allocation2 + $0x18] sm:$0xff] %v1557_v4  ;;  %v1558_v9 = vadd.f32 %v1406_v5, %v500_v0  ;;  %v1408_v10 = vadd.f32 %v1407_v39, %v1214_v7  ;;  %v513_v4 = vld [vmem:[#allocation2 + $0x188] sm:$0xff] }
 0x172   : > { %v1216_v12 = vpop.f32.mrf.mxu0  ;;  %v2884_v33 = vpop.f32.mrf.mxu1 }
 0x173   : > { %1622 = vst [vmem:[#allocation2 + $0x50] sm:$0xff] %v1558_v9  ;;  %v1559_v14 = vadd.f32 %v1408_v10, %v501_v6  ;;  %v1410_v15 = vadd.f32 %v1409_v40, %v1216_v12  ;;  %v508_v40 = vld [vmem:[#allocation2 + $0x120] sm:$0xff]  ;;  %v514_v9 = vld [vmem:[#allocation2 + $0x138] sm:$0xff] }
 0x174   : > { %v1218_v17 = vpop.f32.mrf.mxu0  ;;  %v2887_v3 = vpop.f32.mrf.mxu1 }
 0x175   : > { %1623 = vst [vmem:[#allocation2 + $0x168] sm:$0xff] %v1559_v14  ;;  %v1560_v19 = vadd.f32 %v1410_v15, %v502_v11  ;;  %v1412_v20 = vadd.f32 %v1411_v41, %v1218_v17  ;;  %v515_v14 = vld [vmem:[#allocation2 + $0x140] sm:$0xff] }
 0x176   : > { %v1222_v22 = vpop.f32.mrf.mxu0 }
 0x177   : > { %1624 = vst [vmem:[#allocation2 + $0x130] sm:$0xff] %v1560_v19  ;;  %v1561_v24 = vadd.f32 %v1412_v20, %v503_v16  ;;  %v1416_v25 = vadd.f32 %v1415_v42, %v1222_v22  ;;  %v2890_v42 = vpop.f32.mrf.mxu1  ;;  %v516_v19 = vld [vmem:[#allocation2 + $0x80] sm:$0xff] }
 0x178   : > { %v1224_v27 = vpop.f32.mrf.mxu0 }
 0x179   : > { %1625 = vst [vmem:[#allocation2 + $0x48] sm:$0xff] %v1561_v24  ;;  %v1562_v29 = vadd.f32 %v1416_v25, %v504_v21  ;;  %v1418_v30 = vadd.f32 %v1417_v43, %v1224_v27  ;;  %v2893_v49 = vpop.f32.mrf.mxu1  ;;  %v517_v24 = vld [vmem:[#allocation2 + $0x1a8] sm:$0xff] }
 0x17a   : > { %v1226_v32 = vpop.f32.mrf.mxu0 }
 0x17b   : > { %1626 = vst [vmem:[#allocation2 + $0x180] sm:$0xff] %v1562_v29  ;;  %v1563_v34 = vadd.f32 %v1418_v30, %v505_v26  ;;  %v1420_v35 = vadd.f32 %v2862_v44, %v1226_v32  ;;  %v2896_v54 = vpop.f32.mrf.mxu1  ;;  %v518_v29 = vld [vmem:[#allocation2 + $0x1b8] sm:$0xff] }
 0x17c   : > { %v1228_v37 = vpop.f32.mrf.mxu0 }
 0x17d   : > { %1627 = vst [vmem:[#allocation2 + $0x110] sm:$0xff] %v1563_v34  ;;  %v1564_v38 = vadd.f32 %v1420_v35, %v506_v31  ;;  %v1422_v39 = vadd.f32 %v2864_v47, %v1228_v37  ;;  %v2899_v59 = vpop.f32.mrf.mxu1  ;;  %v519_v34 = vld [vmem:[#allocation2 + $0x28] sm:$0xff] }
 0x17e   : > { %v1232_v41 = vpop.f32.mrf.mxu0 }
 0x17f   : > { %1628 = vst [vmem:[#allocation2 + $0x118] sm:$0xff] %v1564_v38  ;;  %v1565_v43 = vadd.f32 %v1422_v39, %v507_v36  ;;  %v1426_v45 = vadd.f32 %v2866_v51, %v1232_v41  ;;  %v2902_v0 = vpop.f32.mrf.mxu1  ;;  %v520_v38 = vld [vmem:[#allocation2 + $0x1e8] sm:$0xff] }
 0x180   : > { %v1234_v48 = vpop.f32.mrf.mxu0 }
 0x181   : > { %1629 = vst [vmem:[#allocation2 + $0x98] sm:$0xff] %v1565_v43  ;;  %v1566_v44 = vadd.f32 %v1426_v45, %v508_v40  ;;  %v1428_v50 = vadd.f32 %v2868_v56, %v1234_v48  ;;  %v2905_v6 = vpop.f32.mrf.mxu1  ;;  %v521_v43 = vld [vmem:[#allocation2 + $0xf8] sm:$0xff] }
 0x182   : > { %v1236_v53 = vpop.f32.mrf.mxu0 }
 0x183   : > { %1630 = vst [vmem:[#allocation2 + $0x120] sm:$0xff] %v1566_v44  ;;  %v1567_v47 = vadd.f32 %v1428_v50, %v509_v46  ;;  %v1430_v55 = vadd.f32 %v2870_v61, %v1236_v53  ;;  %v2908_v11 = vpop.f32.mrf.mxu1  ;;  %v522_v44 = vld [vmem:[#allocation2 + $0x160] sm:$0xff] }
 0x184   : > { %v1238_v58 = vpop.f32.mrf.mxu0 }
 0x185   : > { %1631 = vst [vmem:[#allocation2 + $0x150] sm:$0xff] %v1567_v47  ;;  %v1568_v51 = vadd.f32 %v1430_v55, %v510_v52  ;;  %v1432_v60 = vadd.f32 %v2872_v2, %v1238_v58  ;;  %v2911_v16 = vpop.f32.mrf.mxu1  ;;  %v523_v47 = vld [vmem:[#allocation2 + $0x30] sm:$0xff] }
 0x186   : > { %v1242_v63 = vpop.f32.mrf.mxu0 }
 0x187   : > { %1632 = vst [vmem:[#allocation2 + $0x108] sm:$0xff] %v1568_v51  ;;  %v1569_v56 = vadd.f32 %v1432_v60, %v511_v57  ;;  %v1436_v1 = vadd.f32 %v2874_v8, %v1242_v63  ;;  %v2914_v21 = vpop.f32.mrf.mxu1  ;;  %v524_v51 = vld [vmem:[#allocation2 + $0x1e0] sm:$0xff] }
 0x188   : > { %v1244_v5 = vpop.f32.mrf.mxu0 }
 0x189   : > { %1633 = vst [vmem:[#allocation2 + $0x60] sm:$0xff] %v1569_v56  ;;  %v1570_v61 = vadd.f32 %v1436_v1, %v512_v62  ;;  %v1438_v7 = vadd.f32 %v2876_v13, %v1244_v5  ;;  %v2917_v26 = vpop.f32.mrf.mxu1  ;;  %v525_v56 = vld [vmem:[#allocation2] sm:$0xff] }
 0x18a   : > { %v1246_v10 = vpop.f32.mrf.mxu0 }
 0x18b   : > { %1634 = vst [vmem:[#allocation2 + $0xe0] sm:$0xff] %v1570_v61  ;;  %v1571_v2 = vadd.f32 %v1438_v7, %v513_v4  ;;  %v1440_v12 = vadd.f32 %v2878_v18, %v1246_v10  ;;  %v2920_v31 = vpop.f32.mrf.mxu1  ;;  %v526_v61 = vld [vmem:[#allocation2 + $0xf0] sm:$0xff] }
 0x18c   : > { %v1248_v15 = vpop.f32.mrf.mxu0 }
 0x18d   : > { %1635 = vst [vmem:[#allocation2 + $0x188] sm:$0xff] %v1571_v2  ;;  %v1572_v8 = vadd.f32 %v1440_v12, %v514_v9  ;;  %v1442_v17 = vadd.f32 %v2880_v23, %v1248_v15  ;;  %v2923_v36 = vpop.f32.mrf.mxu1  ;;  %v527_v2 = vld [vmem:[#allocation2 + $0x8] sm:$0xff] }
 0x18e   : > { %v1252_v20 = vpop.f32.mrf.mxu0 }
 0x18f   : > { %1636 = vst [vmem:[#allocation2 + $0x138] sm:$0xff] %v1572_v8  ;;  %v1573_v13 = vadd.f32 %v1442_v17, %v515_v14  ;;  %v1446_v22 = vadd.f32 %v2882_v28, %v1252_v20  ;;  %v2926_v40 = vpop.f32.mrf.mxu1  ;;  %v528_v8 = vld [vmem:[#allocation2 + $0x148] sm:$0xff] }
 0x190   : > { %v1254_v25 = vpop.f32.mrf.mxu0 }
 0x191   : > { %1637 = vst [vmem:[#allocation2 + $0x140] sm:$0xff] %v1573_v13  ;;  %v1574_v18 = vadd.f32 %v1446_v22, %v516_v19  ;;  %v1448_v27 = vadd.f32 %v2884_v33, %v1254_v25  ;;  %v2929_v46 = vpop.f32.mrf.mxu1  ;;  %v529_v13 = vld [vmem:[#allocation2 + $0x1d0] sm:$0xff] }
 0x192   : > { %v1256_v30 = vpop.f32.mrf.mxu0 }
 0x193   : > { %1638 = vst [vmem:[#allocation2 + $0x80] sm:$0xff] %v1574_v18  ;;  %v1575_v23 = vadd.f32 %v1448_v27, %v517_v24  ;;  %v1450_v32 = vadd.f32 %v2887_v3, %v1256_v30  ;;  %v2932_v52 = vpop.f32.mrf.mxu1  ;;  %v530_v18 = vld [vmem:[#allocation2 + $0x100] sm:$0xff] }
 0x194   : > { %v1258_v35 = vpop.f32.mrf.mxu0 }
 0x195   : > { %1639 = vst [vmem:[#allocation2 + $0x1a8] sm:$0xff] %v1575_v23  ;;  %v1576_v28 = vadd.f32 %v1450_v32, %v518_v29  ;;  %v1452_v37 = vadd.f32 %v2890_v42, %v1258_v35  ;;  %v2935_v57 = vpop.f32.mrf.mxu1  ;;  %v531_v23 = vld [vmem:[#allocation2 + $0xc8] sm:$0xff] }
 0x196   : > { %v1262_v39 = vpop.f32.mrf.mxu0 }
 0x197   : > { %1640 = vst [vmem:[#allocation2 + $0x1b8] sm:$0xff] %v1576_v28  ;;  %v1577_v33 = vadd.f32 %v1452_v37, %v519_v34  ;;  %v1456_v41 = vadd.f32 %v2893_v49, %v1262_v39  ;;  %v2938_v62 = vpop.f32.mrf.mxu1  ;;  %v532_v28 = vld [vmem:[#allocation2 + $0x40] sm:$0xff] }
 0x198   : > { %v1264_v45 = vpop.f32.mrf.mxu0 }
 0x199   : > { %1641 = vst [vmem:[#allocation2 + $0x28] sm:$0xff] %v1577_v33  ;;  %v1578_v3 = vadd.f32 %v1456_v41, %v520_v38  ;;  %v1458_v48 = vadd.f32 %v2896_v54, %v1264_v45  ;;  %v2941_v4 = vpop.f32.mrf.mxu1  ;;  %v533_v33 = vld [vmem:[#allocation2 + $0x1f8] sm:$0xff] }
 0x19a   : > { %v1266_v50 = vpop.f32.mrf.mxu0 }
 0x19b   : > { %1642 = vst [vmem:[#allocation2 + $0x1e8] sm:$0xff] %v1578_v3  ;;  %v1579_v42 = vadd.f32 %v1458_v48, %v521_v43  ;;  %v1460_v53 = vadd.f32 %v2899_v59, %v1266_v50  ;;  %v2944_v9 = vpop.f32.mrf.mxu1  ;;  %v534_v3 = vld [vmem:[#allocation2 + $0x20] sm:$0xff] }
 0x19c   : > { %v1268_v55 = vpop.f32.mrf.mxu0 }
 0x19d   : > { %1643 = vst [vmem:[#allocation2 + $0xf8] sm:$0xff] %v1579_v42  ;;  %v1580_v49 = vadd.f32 %v1460_v53, %v522_v44  ;;  %v1462_v58 = vadd.f32 %v2902_v0, %v1268_v55  ;;  %v2947_v14 = vpop.f32.mrf.mxu1  ;;  %v535_v42 = vld [vmem:[#allocation2 + $0x128] sm:$0xff] }
 0x19e   : > { %v1272_v60 = vpop.f32.mrf.mxu0 }
 0x19f   : > { %1644 = vst [vmem:[#allocation2 + $0x160] sm:$0xff] %v1580_v49  ;;  %v1581_v54 = vadd.f32 %v1462_v58, %v523_v47  ;;  %v1466_v63 = vadd.f32 %v2905_v6, %v1272_v60  ;;  %v2950_v19 = vpop.f32.mrf.mxu1  ;;  %v536_v49 = vld [vmem:[#allocation2 + $0x1a0] sm:$0xff] }
 0x1a0   : > { %v1274_v1 = vpop.f32.mrf.mxu0 }
 0x1a1   : > { %1645 = vst [vmem:[#allocation2 + $0x30] sm:$0xff] %v1581_v54  ;;  %v1582_v59 = vadd.f32 %v1466_v63, %v524_v51  ;;  %v1468_v5 = vadd.f32 %v2908_v11, %v1274_v1  ;;  %v2953_v24 = vpop.f32.mrf.mxu1  ;;  %v537_v54 = vld [vmem:[#allocation2 + $0x1f0] sm:$0xff] }
 0x1a2   : > { %v1276_v7 = vpop.f32.mrf.mxu0 }
 0x1a3   : > { %1646 = vst [vmem:[#allocation2 + $0x1e0] sm:$0xff] %v1582_v59  ;;  %v1583_v0 = vadd.f32 %v1468_v5, %v525_v56  ;;  %v1470_v10 = vadd.f32 %v2911_v16, %v1276_v7  ;;  %v2956_v29 = vpop.f32.mrf.mxu1  ;;  %v538_v59 = vld [vmem:[#allocation2 + $0xe8] sm:$0xff]  ;;  %v539_v7 = vld [vmem:[#allocation2 + $0x78] sm:$0xff] }
 0x1a4   : > { %v1278_v12 = vpop.f32.mrf.mxu0 }
 0x1a5   : > { %1647 = vst [vmem:[#allocation2] sm:$0xff] %v1583_v0  ;;  %v1584_v6 = vadd.f32 %v1470_v10, %v526_v61  ;;  %v1472_v15 = vadd.f32 %v2914_v21, %v1278_v12  ;;  %v2959_v34 = vpop.f32.mrf.mxu1  ;;  %v540_v12 = vld [vmem:[#allocation2 + $0x70] sm:$0xff] }
 0x1a6   : > { %v1282_v17 = vpop.f32.mrf.mxu0 }
 0x1a7   : > { %1648 = vst [vmem:[#allocation2 + $0xf0] sm:$0xff] %v1584_v6  ;;  %v1585_v11 = vadd.f32 %v1472_v15, %v527_v2  ;;  %v1476_v20 = vadd.f32 %v2917_v26, %v1282_v17  ;;  %v2962_v38 = vpop.f32.mrf.mxu1 }
 0x1a8   : > { %v1284_v22 = vpop.f32.mrf.mxu0 }
 0x1a9   : > { %1649 = vst [vmem:[#allocation2 + $0x8] sm:$0xff] %v1585_v11  ;;  %v1586_v16 = vadd.f32 %v1476_v20, %v528_v8  ;;  %v1478_v25 = vadd.f32 %v2920_v31, %v1284_v22  ;;  %v2965_v43 = vpop.f32.mrf.mxu1 }
 0x1aa   : > { %v1286_v27 = vpop.f32.mrf.mxu0 }
 0x1ab   : > { %1650 = vst [vmem:[#allocation2 + $0x148] sm:$0xff] %v1586_v16  ;;  %v1587_v21 = vadd.f32 %v1478_v25, %v529_v13  ;;  %v1480_v30 = vadd.f32 %v2923_v36, %v1286_v27  ;;  %v2968_v44 = vpop.f32.mrf.mxu1  ;;  %v542_v13 = vld [vmem:[#allocation2 + $0x1d8] sm:$0xff] }
 0x1ac   : > { %v1288_v32 = vpop.f32.mrf.mxu0 }
 0x1ad   : > { %1651 = vst [vmem:[#allocation2 + $0x1d0] sm:$0xff] %v1587_v21  ;;  %v1588_v26 = vadd.f32 %v1480_v30, %v530_v18  ;;  %v1482_v35 = vadd.f32 %v2926_v40, %v1288_v32  ;;  %v2971_v47 = vpop.f32.mrf.mxu1  ;;  %v544_v30 = vld [vmem:[#allocation2 + $0xb8] sm:$0xff] }
 0x1ae   : > { %v1292_v37 = vpop.f32.mrf.mxu0 }
 0x1af   : > { %1652 = vst [vmem:[#allocation2 + $0x100] sm:$0xff] %v1588_v26  ;;  %v1589_v31 = vadd.f32 %v1482_v35, %v531_v23  ;;  %v1486_v39 = vadd.f32 %v2929_v46, %v1292_v37  ;;  %v2974_v51 = vpop.f32.mrf.mxu1 }
 0x1b0   : > { %v1294_v41 = vpop.f32.mrf.mxu0 }
 0x1b1   : > { %1653 = vst [vmem:[#allocation2 + $0xc8] sm:$0xff] %v1589_v31  ;;  %v1590_v36 = vadd.f32 %v1486_v39, %v532_v28  ;;  %v1488_v45 = vadd.f32 %v2932_v52, %v1294_v41  ;;  %v2977_v56 = vpop.f32.mrf.mxu1  ;;  %v546_v31 = vld [vmem:[#allocation2 + $0xa8] sm:$0xff] }
 0x1b2   : > { %v1296_v48 = vpop.f32.mrf.mxu0 }
 0x1b3   : > { %1654 = vst [vmem:[#allocation2 + $0x40] sm:$0xff] %v1590_v36  ;;  %v1591_v40 = vadd.f32 %v1488_v45, %v533_v33  ;;  %v1490_v50 = vadd.f32 %v2935_v57, %v1296_v48  ;;  %v1527_v10 = vpop.f32.mrf.mxu1  ;;  %v548_v48 = vld [vmem:[#allocation2 + $0x170] sm:$0xff] }
 0x1b4   : > { %v1298_v53 = vpop.f32.mrf.mxu0 }
 0x1b5   : > { %1655 = vst [vmem:[#allocation2 + $0x1f8] sm:$0xff] %v1591_v40  ;;  %v1592_v46 = vadd.f32 %v1490_v50, %v534_v3  ;;  %v1492_v55 = vadd.f32 %v2938_v62, %v1298_v53  ;;  %v1529_v11 = vpop.f32.mrf.mxu1 }
 0x1b6   : > { %v1302_v58 = vpop.f32.mrf.mxu0 }
 0x1b7   : > { %1656 = vst [vmem:[#allocation2 + $0x20] sm:$0xff] %v1592_v46  ;;  %v1593_v52 = vadd.f32 %v1492_v55, %v535_v42  ;;  %v1496_v60 = vadd.f32 %v2941_v4, %v1302_v58  ;;  %v1531_v27 = vpop.f32.mrf.mxu1 }
 0x1b8   : > { %v1304_v63 = vpop.f32.mrf.mxu0 }
 0x1b9   : > { %1657 = vst [vmem:[#allocation2 + $0x128] sm:$0xff] %v1593_v52  ;;  %v1594_v57 = vadd.f32 %v1496_v60, %v536_v49  ;;  %v1498_v1 = vadd.f32 %v2944_v9, %v1304_v63  ;;  %v541_v9 = vld [vmem:[#allocation2 + $0x90] sm:$0xff]  ;;  %v1535_v28 = vpop.f32.mrf.mxu1 }
 0x1ba   : > { %v1306_v5 = vpop.f32.mrf.mxu0 }
 0x1bb   : > { %1658 = vst [vmem:[#allocation2 + $0x1a0] sm:$0xff] %v1594_v57  ;;  %v1595_v62 = vadd.f32 %v1498_v1, %v537_v54  ;;  %v1500_v61 = vadd.f32 %v2947_v14, %v1306_v5  ;;  %v1537_v45 = vpop.f32.mrf.mxu1  ;;  %v551_v54 = vld [vmem:[#allocation2 + $0x190] sm:$0xff] }
 0x1bc   : > { %v1308_v0 = vpop.f32.mrf.mxu0 }
 0x1bd   : > { %1659 = vst [vmem:[#allocation2 + $0x1f0] sm:$0xff] %v1595_v62  ;;  %v1596_v2 = vadd.f32 %v1500_v61, %v538_v59  ;;  %v1502_v4 = vadd.f32 %v2950_v19, %v1308_v0  ;;  %v543_v19 = vld [vmem:[#allocation2 + $0xd0] sm:$0xff]  ;;  %v1539_v46 = vpop.f32.mrf.mxu1  ;;  %v552_v59 = vld [vmem:[#allocation2 + $0x198] sm:$0xff] }
 0x1be   : > { %v1312_v6 = vpop.f32.mrf.mxu0  ;;  %v553_v61 = vld [vmem:[#allocation2 + $0x38] sm:$0xff] }
 0x1bf   : > { %1660 = vst [vmem:[#allocation2 + $0xe8] sm:$0xff] %v1596_v2  ;;  %v1597_v15 = vadd.f32 %v1502_v4, %v539_v7  ;;  %v1506_v8 = vadd.f32 %v2953_v24, %v1312_v6  ;;  %v554_v4 = vld [vmem:[#allocation2 + $0xc0] sm:$0xff] }
 0x1c0   : > { %v1314_v17 = vpop.f32.mrf.mxu0 }
 0x1c1   : > { %1661 = vst [vmem:[#allocation2 + $0x78] sm:$0xff] %v1597_v15  ;;  %v1598_v20 = vadd.f32 %v1506_v8, %v540_v12  ;;  %v1508_v14 = vadd.f32 %v2956_v29, %v1314_v17  ;;  %v545_v29 = vld [vmem:[#allocation2 + $0x88] sm:$0xff] }
 0x1c2   : > { %v1316_v22 = vpop.f32.mrf.mxu0 }
 0x1c3   : > { %1662 = vst [vmem:[#allocation2 + $0x70] sm:$0xff] %v1598_v20  ;;  %v1599_v16 = vadd.f32 %v1508_v14, %v541_v9  ;;  %v1510_v25 = vadd.f32 %v2959_v34, %v1316_v22  ;;  %v555_v9 = vld [vmem:[#allocation2 + $0x1c0] sm:$0xff]  ;;  %v556_v14 = vld [vmem:[#allocation2 + $0x158] sm:$0xff] }
 0x1c4   : > { %v1318_v18 = vpop.f32.mrf.mxu0 }
 0x1c5   : > { %1663 = vst [vmem:[#allocation2 + $0x90] sm:$0xff] %v1599_v16  ;;  %v1600_v21 = vadd.f32 %v1510_v25, %v542_v13  ;;  %v1512_v24 = vadd.f32 %v2962_v38, %v1318_v18  ;;  %v547_v38 = vld [vmem:[#allocation2 + $0x1c8] sm:$0xff] }
 0x1c6   : > { %v1322_v23 = vpop.f32.mrf.mxu0 }
 0x1c7   : > { %1664 = vst [vmem:[#allocation2 + $0x1d8] sm:$0xff] %v1600_v21  ;;  %v1601_v32 = vadd.f32 %v1512_v24, %v543_v19  ;;  %v1516_v26 = vadd.f32 %v2965_v43, %v1322_v23  ;;  %v557_v19 = vld [vmem:[#allocation2 + $0x10] sm:$0xff]  ;;  %v558_v24 = vld [vmem:[#allocation2 + $0x58] sm:$0xff] }
 0x1c8   : > { %v1324_v35 = vpop.f32.mrf.mxu0 }
 0x1c9   : > { %1665 = vst [vmem:[#allocation2 + $0xd0] sm:$0xff] %v1601_v32  ;;  %v1602_v37 = vadd.f32 %v1516_v26, %v544_v30  ;;  %v1518_v34 = vadd.f32 %v2968_v44, %v1324_v35  ;;  %v549_v44 = vld [vmem:[#allocation2 + $0x178] sm:$0xff] }
 0x1ca   : > { %v1326_v39 = vpop.f32.mrf.mxu0 }
 0x1cb   : > { %1666 = vst [vmem:[#allocation2 + $0xb8] sm:$0xff] %v1602_v37  ;;  %v1603_v33 = vadd.f32 %v1518_v34, %v545_v29  ;;  %v1520_v41 = vadd.f32 %v2971_v47, %v1326_v39  ;;  %v550_v47 = vld [vmem:[#allocation2 + $0x68] sm:$0xff]  ;;  %v559_v29 = vld [vmem:[#allocation2 + $0xa0] sm:$0xff] }
 0x1cc   : > { %v1328_v36 = vpop.f32.mrf.mxu0 }
 0x1cd   : > { %1667 = vst [vmem:[#allocation2 + $0x88] sm:$0xff] %v1603_v33  ;;  %v1604_v3 = vadd.f32 %v1520_v41, %v546_v31  ;;  %v1522_v43 = vadd.f32 %v2974_v51, %v1328_v36  ;;  %v1541_v51 = vpop.f32.mrf.mxu1 }
 0x1ce   : > { %v1332_v40 = vpop.f32.mrf.mxu0 }
 0x1cf   : > { %1668 = vst [vmem:[#allocation2 + $0xa8] sm:$0xff] %v1604_v3  ;;  %v1605_v50 = vadd.f32 %v1522_v43, %v547_v38  ;;  %v1526_v42 = vadd.f32 %v2977_v56, %v1332_v40  ;;  %v1545_v0 = vpop.f32.mrf.mxu1 }
 0x1d0   : > { %v1334_v53 = vpop.f32.mrf.mxu0 }
 0x1d1   : > { %1669 = vst [vmem:[#allocation2 + $0x1c8] sm:$0xff] %v1605_v50  ;;  %v1606_v55 = vadd.f32 %v1526_v42, %v548_v48  ;;  %v1528_v49 = vadd.f32 %v1527_v10, %v1334_v53  ;;  %v1547_v8 = vpop.f32.mrf.mxu1 }
 0x1d2   : > { %v1336_v58 = vpop.f32.mrf.mxu0 }
 0x1d3   : > { %1670 = vst [vmem:[#allocation2 + $0x170] sm:$0xff] %v1606_v55  ;;  %v1607_v52 = vadd.f32 %v1528_v49, %v549_v44  ;;  %v1530_v60 = vadd.f32 %v1529_v11, %v1336_v58  ;;  %v1549_v25 = vpop.f32.mrf.mxu1 }
 0x1d4   : > { %v1338_v63 = vpop.f32.mrf.mxu0 }
 0x1d5   : > { %1671 = vst [vmem:[#allocation2 + $0x178] sm:$0xff] %v1607_v52  ;;  %v1608_v57 = vadd.f32 %v1530_v60, %v550_v47  ;;  %v1532_v1 = vadd.f32 %v1531_v27, %v1338_v63  ;;  %v1551_v26 = vpop.f32.mrf.mxu1 }
 0x1d6   : > { %v1342_v5 = vpop.f32.mrf.mxu0 }
 0x1d7   : > { %1672 = vst [vmem:[#allocation2 + $0x68] sm:$0xff] %v1608_v57  ;;  %v1609_v56 = vadd.f32 %v1532_v1, %v551_v54  ;;  %v1536_v62 = vadd.f32 %v1535_v28, %v1342_v5 }
 0x1d8   : > { %v1344_v7 = vpop.f32.mrf.mxu0 }
 0x1d9   : > { %1673 = vst [vmem:[#allocation2 + $0x190] sm:$0xff] %v1609_v56  ;;  %v1610_v10 = vadd.f32 %v1536_v62, %v552_v59  ;;  %v1538_v2 = vadd.f32 %v1537_v45, %v1344_v7 }
 0x1da   : > { %v1346_v12 = vpop.f32.mrf.mxu0 }
 0x1db   : > { %1674 = vst [vmem:[#allocation2 + $0x198] sm:$0xff] %v1610_v10  ;;  %v1611_v6 = vadd.f32 %v1538_v2, %v553_v61  ;;  %v1540_v15 = vadd.f32 %v1539_v46, %v1346_v12 }
 0x1dc   : > { %v1348_v17 = vpop.f32.mrf.mxu0 }
 0x1dd   : > { %1675 = vst [vmem:[#allocation2 + $0x38] sm:$0xff] %v1611_v6  ;;  %v1612_v11 = vadd.f32 %v1540_v15, %v554_v4  ;;  %v1542_v20 = vadd.f32 %v1541_v51, %v1348_v17 }
 0x1de   : > { %v1352_v13 = vpop.f32.mrf.mxu0 }
 0x1df   : > { %1676 = vst [vmem:[#allocation2 + $0xc0] sm:$0xff] %v1612_v11  ;;  %v1613_v22 = vadd.f32 %v1542_v20, %v555_v9  ;;  %v1546_v16 = vadd.f32 %v1545_v0, %v1352_v13 }
 0x1e0   : > { %v1354_v18 = vpop.f32.mrf.mxu0 }
 0x1e1   : > { %1677 = vst [vmem:[#allocation2 + $0x1c0] sm:$0xff] %v1613_v22  ;;  %v1614_v27 = vadd.f32 %v1546_v16, %v556_v14  ;;  %v1548_v21 = vadd.f32 %v1547_v8, %v1354_v18 }
 0x1e2   : > { %v1356_v30 = vpop.f32.mrf.mxu0 }
 0x1e3   : > { %1678 = vst [vmem:[#allocation2 + $0x158] sm:$0xff] %v1614_v27  ;;  %v1615_v23 = vadd.f32 %v1548_v21, %v557_v19  ;;  %v1550_v32 = vadd.f32 %v1549_v25, %v1356_v30 }
 0x1e4   : > { %v1358_v35 = vpop.f32.mrf.mxu0 }
 0x1e5   : > { %1679 = vst [vmem:[#allocation2 + $0x10] sm:$0xff] %v1615_v23  ;;  %v1616_v28 = vadd.f32 %v1550_v32, %v558_v24  ;;  %v1552_v37 = vadd.f32 %v1551_v26, %v1358_v35  ;;  %1685 = sbr.rel (%p2250_p11) target bundleno = 535 (0x217), region = 66 }
 0x1e7   : > { %1680 = vst [vmem:[#allocation2 + $0x58] sm:$0xff] %v1616_v28  ;;  %v1617_v34 = vadd.f32 %v1552_v37, %v559_v29 }
 0x1e9   : > { %1681 = vst [vmem:[#allocation2 + $0xa0] sm:$0xff] %v1617_v34 }
 0x1ea   : > { %v1752_v31 = vlaneseq  ;;  %v1750_v33 = vld [vmem:[%s3272_s2] sm:$0x3]  ;;  %v1686_v41 = vld [vmem:[#allocation2 + $0xb0] sm:$0xff]  ;;  %v1688_v3 = vld [vmem:[#allocation2 + $0xd8] sm:$0xff] }
 0x1eb   : > { %v1687_v36 = vld [vmem:[#allocation2 + $0x1b0] sm:$0xff]  ;;  %v1689_v43 = vld [vmem:[#allocation2 + $0x18] sm:$0xff]  ;;  %v1691_v42 = vld [vmem:[#allocation2 + $0x168] sm:$0xff] }
 0x1ec   : > { %v1753_v39 = vshrl.u32 %v1752_v31, 7  ;;  %v1690_v48 = vld [vmem:[#allocation2 + $0x50] sm:$0xff]  ;;  %v1693_v53 = vld [vmem:[#allocation2 + $0x48] sm:$0xff]  ;;  %v1694_v58 = vld [vmem:[#allocation2 + $0x180] sm:$0xff] }
 0x1ed   : > { %v1692_v44 = vld [vmem:[#allocation2 + $0x130] sm:$0xff]  ;;  %v1696_v60 = vld [vmem:[#allocation2 + $0x118] sm:$0xff]  ;;  %v1698_v59 = vld [vmem:[#allocation2 + $0x120] sm:$0xff] }
 0x1ee   : > { %v1754_v38 = vsub.s32 0, %v1753_v39  ;;  %v1758_v45 = vsub.s32 1, %v1753_v39  ;;  %v1695_v52 = vld [vmem:[#allocation2 + $0x110] sm:$0xff]  ;;  %v1697_v1 = vld [vmem:[#allocation2 + $0x98] sm:$0xff]  ;;  %v1700_v0 = vld [vmem:[#allocation2 + $0x108] sm:$0xff] }
 0x1ef   : > { %v1699_v5 = vld [vmem:[#allocation2 + $0x150] sm:$0xff]  ;;  %v1701_v10 = vld [vmem:[#allocation2 + $0x60] sm:$0xff]  ;;  %v1703_v20 = vld [vmem:[#allocation2 + $0x188] sm:$0xff] }
 0x1f0   : > { %v2995_v40 = vrot.slane %v1750_v33, %v1754_v38  ;;  %v2997_v50 = vrot.slane %v1750_v33, %v1758_v45  ;;  %v1702_v11 = vld [vmem:[#allocation2 + $0xe0] sm:$0xff]  ;;  %v1704_v14 = vld [vmem:[#allocation2 + $0x138] sm:$0xff]  ;;  %v1707_v27 = vld [vmem:[#allocation2 + $0x1a8] sm:$0xff] }
 0x1f1   : > { %v1705_v19 = vld [vmem:[#allocation2 + $0x140] sm:$0xff]  ;;  %v1708_v32 = vld [vmem:[#allocation2 + $0x1b8] sm:$0xff]  ;;  %v1709_v26 = vld [vmem:[#allocation2 + $0x28] sm:$0xff] }
 0x1f2   : > { %v1762_v46 = vadd.f32 %v2995_v40, %v1686_v41  ;;  %v1763_v55 = vadd.f32 %v2997_v50, %v1687_v36  ;;  %v1764_v49 = vadd.f32 %v2995_v40, %v1688_v3  ;;  %v1765_v47 = vadd.f32 %v2997_v50, %v1689_v43  ;;  %v1706_v18 = vld [vmem:[#allocation2 + $0x80] sm:$0xff]  ;;  %v1710_v41 = vld [vmem:[#allocation2 + $0x1e8] sm:$0xff]  ;;  %v1711_v38 = vld [vmem:[#allocation2 + $0xf8] sm:$0xff] }
 0x1f3   : > { %v1766_v54 = vadd.f32 %v2995_v40, %v1690_v48  ;;  %v1767_v63 = vadd.f32 %v2997_v50, %v1691_v42  ;;  %v1768_v51 = vadd.f32 %v2995_v40, %v1692_v44  ;;  %v1769_v57 = vadd.f32 %v2997_v50, %v1693_v53  ;;  %v1712_v36 = vld [vmem:[#allocation2 + $0x160] sm:$0xff]  ;;  %v1713_v42 = vld [vmem:[#allocation2 + $0x30] sm:$0xff] }
 0x1f4   : > { %v1826_v56 = vmax.f32 %v1762_v46, 0.0  ;;  %v1827_v62 = vmax.f32 %v1763_v55, 0.0  ;;  %v1828_v61 = vmax.f32 %v1764_v49, 0.0  ;;  %v1829_v7 = vmax.f32 %v1765_v47, 0.0  ;;  %v1714_v44 = vld [vmem:[#allocation2 + $0x1e0] sm:$0xff] }
 0x1f5   : > { %v1830_v2 = vmax.f32 %v1766_v54, 0.0  ;;  %v1831_v4 = vmax.f32 %v1767_v63, 0.0  ;;  %v1832_v12 = vmax.f32 %v1768_v51, 0.0  ;;  %v1833_v6 = vmax.f32 %v1769_v57, 0.0  ;;  %v1715_v53 = vld [vmem:[#allocation2] sm:$0xff] }
 0x1f6   : > { %1890 = vst [vmem:[%s3273_s3] sm:$0xff] %v1826_v56  ;;  %1891 = vst [vmem:[%s3273_s3 + $0x8] sm:$0xff] %v1827_v62  ;;  %v1770_v15 = vadd.f32 %v2995_v40, %v1694_v58  ;;  %v1771_v8 = vadd.f32 %v2997_v50, %v1695_v52  ;;  %v1772_v9 = vadd.f32 %v2995_v40, %v1696_v60  ;;  %v1716_v58 = vld [vmem:[#allocation2 + $0xf0] sm:$0xff]  ;;  %v1717_v52 = vld [vmem:[#allocation2 + $0x8] sm:$0xff] }
 0x1f7   : > { %1892 = vst [vmem:[%s3273_s3 + $0x10] sm:$0xff] %v1828_v61  ;;  %1893 = vst [vmem:[%s3273_s3 + $0x18] sm:$0xff] %v1829_v7  ;;  %v1773_v17 = vadd.f32 %v2997_v50, %v1697_v1  ;;  %v1774_v13 = vadd.f32 %v2995_v40, %v1698_v59  ;;  %v1775_v22 = vadd.f32 %v2997_v50, %v1699_v5  ;;  %v1718_v56 = vld [vmem:[#allocation2 + $0x148] sm:$0xff]  ;;  %v1719_v62 = vld [vmem:[#allocation2 + $0x1d0] sm:$0xff] }
 0x1f8   : > { %1894 = vst [vmem:[%s3273_s3 + $0x20] sm:$0xff] %v1830_v2  ;;  %1895 = vst [vmem:[%s3273_s3 + $0x28] sm:$0xff] %v1831_v4  ;;  %v1776_v16 = vadd.f32 %v2995_v40, %v1700_v0  ;;  %v1777_v25 = vadd.f32 %v2997_v50, %v1701_v10  ;;  %v1834_v21 = vmax.f32 %v1770_v15, 0.0  ;;  %v1835_v24 = vmax.f32 %v1771_v8, 0.0  ;;  %v1720_v61 = vld [vmem:[#allocation2 + $0x100] sm:$0xff]  ;;  %v1721_v4 = vld [vmem:[#allocation2 + $0xc8] sm:$0xff] }
 0x1f9   : > { %1896 = vst [vmem:[%s3273_s3 + $0x30] sm:$0xff] %v1832_v12  ;;  %1897 = vst [vmem:[%s3273_s3 + $0x38] sm:$0xff] %v1833_v6  ;;  %v1836_v30 = vmax.f32 %v1772_v9, 0.0  ;;  %v1837_v23 = vmax.f32 %v1773_v17, 0.0  ;;  %v1838_v29 = vmax.f32 %v1774_v13, 0.0  ;;  %v1839_v35 = vmax.f32 %v1775_v22, 0.0 }
 0x1fa   : > { %v1840_v28 = vmax.f32 %v1776_v16, 0.0  ;;  %v1841_v37 = vmax.f32 %v1777_v25, 0.0  ;;  %1898 = vst [vmem:[%s3273_s3 + $0x40] sm:$0xff] %v1834_v21  ;;  %1899 = vst [vmem:[%s3273_s3 + $0x48] sm:$0xff] %v1835_v24  ;;  %v1778_v34 = vadd.f32 %v2995_v40, %v1702_v11  ;;  %v1779_v31 = vadd.f32 %v2997_v50, %v1703_v20  ;;  %v1722_v12 = vld [vmem:[#allocation2 + $0x40] sm:$0xff]  ;;  %v1723_v6 = vld [vmem:[#allocation2 + $0x1f8] sm:$0xff] }
 0x1fb   : > { %1900 = vst [vmem:[%s3273_s3 + $0x50] sm:$0xff] %v1836_v30  ;;  %1901 = vst [vmem:[%s3273_s3 + $0x58] sm:$0xff] %v1837_v23  ;;  %v1780_v39 = vadd.f32 %v2995_v40, %v1704_v14  ;;  %v1781_v33 = vadd.f32 %v2997_v50, %v1705_v19  ;;  %v1782_v45 = vadd.f32 %v2995_v40, %v1706_v18  ;;  %v1724_v11 = vld [vmem:[#allocation2 + $0x20] sm:$0xff]  ;;  %v1725_v20 = vld [vmem:[#allocation2 + $0x128] sm:$0xff] }
 0x1fc   : > { %1902 = vst [vmem:[%s3273_s3 + $0x60] sm:$0xff] %v1838_v29  ;;  %1903 = vst [vmem:[%s3273_s3 + $0x68] sm:$0xff] %v1839_v35  ;;  %v1783_v3 = vadd.f32 %v2997_v50, %v1707_v27  ;;  %v1784_v43 = vadd.f32 %v2995_v40, %v1708_v32  ;;  %v1785_v48 = vadd.f32 %v2997_v50, %v1709_v26  ;;  %v1842_v46 = vmax.f32 %v1778_v34, 0.0  ;;  %v1726_v21 = vld [vmem:[#allocation2 + $0x1a0] sm:$0xff]  ;;  %v1727_v24 = vld [vmem:[#allocation2 + $0x1f0] sm:$0xff] }
 0x1fd   : > { %1904 = vst [vmem:[%s3273_s3 + $0x70] sm:$0xff] %v1840_v28  ;;  %1905 = vst [vmem:[%s3273_s3 + $0x78] sm:$0xff] %v1841_v37  ;;  %v1843_v55 = vmax.f32 %v1779_v31, 0.0  ;;  %v1844_v49 = vmax.f32 %v1780_v39, 0.0  ;;  %v1845_v47 = vmax.f32 %v1781_v33, 0.0  ;;  %v1846_v60 = vmax.f32 %v1782_v45, 0.0 }
 0x1fe   : > { %v1847_v54 = vmax.f32 %v1783_v3, 0.0  ;;  %v1848_v63 = vmax.f32 %v1784_v43, 0.0  ;;  %v1849_v51 = vmax.f32 %v1785_v48, 0.0  ;;  %1906 = vst [vmem:[%s3273_s3 + $0x80] sm:$0xff] %v1842_v46  ;;  %v1786_v57 = vadd.f32 %v2995_v40, %v1710_v41  ;;  %v1728_v30 = vld [vmem:[#allocation2 + $0xe8] sm:$0xff]  ;;  %v1729_v35 = vld [vmem:[#allocation2 + $0x78] sm:$0xff] }
 0x1ff   : > { %1907 = vst [vmem:[%s3273_s3 + $0x88] sm:$0xff] %v1843_v55  ;;  %1908 = vst [vmem:[%s3273_s3 + $0x90] sm:$0xff] %v1844_v49  ;;  %v1787_v1 = vadd.f32 %v2997_v50, %v1711_v38  ;;  %v1788_v59 = vadd.f32 %v2995_v40, %v1712_v36  ;;  %v1789_v5 = vadd.f32 %v2997_v50, %v1713_v42  ;;  %v1730_v28 = vld [vmem:[#allocation2 + $0x70] sm:$0xff]  ;;  %v1732_v41 = vld [vmem:[#allocation2 + $0x1d8] sm:$0xff] }
 0x200   : > { %1909 = vst [vmem:[%s3273_s3 + $0x98] sm:$0xff] %v1845_v47  ;;  %1910 = vst [vmem:[%s3273_s3 + $0xa0] sm:$0xff] %v1846_v60  ;;  %v1790_v7 = vadd.f32 %v2995_v40, %v1714_v44  ;;  %v1791_v0 = vadd.f32 %v2997_v50, %v1715_v53  ;;  %v1792_v10 = vadd.f32 %v2995_v40, %v1716_v58  ;;  %v1850_v15 = vmax.f32 %v1786_v57, 0.0  ;;  %v1731_v37 = vld [vmem:[#allocation2 + $0x90] sm:$0xff]  ;;  %v1734_v46 = vld [vmem:[#allocation2 + $0xb8] sm:$0xff] }
 0x201   : > { %1911 = vst [vmem:[%s3273_s3 + $0xa8] sm:$0xff] %v1847_v54  ;;  %1912 = vst [vmem:[%s3273_s3 + $0xb0] sm:$0xff] %v1848_v63  ;;  %v1793_v2 = vadd.f32 %v2997_v50, %v1717_v52  ;;  %v1851_v8 = vmax.f32 %v1787_v1, 0.0  ;;  %v1852_v9 = vmax.f32 %v1788_v59, 0.0  ;;  %v1853_v17 = vmax.f32 %v1789_v5, 0.0  ;;  %v1733_v38 = vld [vmem:[#allocation2 + $0xd0] sm:$0xff] }
 0x202   : > { %1913 = vst [vmem:[%s3273_s3 + $0xb8] sm:$0xff] %v1849_v51  ;;  %v1854_v14 = vmax.f32 %v1790_v7, 0.0  ;;  %v1855_v13 = vmax.f32 %v1791_v0, 0.0  ;;  %v1856_v22 = vmax.f32 %v1792_v10, 0.0  ;;  %1914 = vst [vmem:[%s3273_s3 + $0xc0] sm:$0xff] %v1850_v15  ;;  %v1794_v25 = vadd.f32 %v2995_v40, %v1718_v56  ;;  %v1735_v55 = vld [vmem:[#allocation2 + $0x88] sm:$0xff] }
 0x203   : > { %v1857_v16 = vmax.f32 %v1793_v2, 0.0  ;;  %1915 = vst [vmem:[%s3273_s3 + $0xc8] sm:$0xff] %v1851_v8  ;;  %1916 = vst [vmem:[%s3273_s3 + $0xd0] sm:$0xff] %v1852_v9  ;;  %v1795_v19 = vadd.f32 %v2997_v50, %v1719_v62  ;;  %v1796_v18 = vadd.f32 %v2995_v40, %v1720_v61  ;;  %v1797_v27 = vadd.f32 %v2997_v50, %v1721_v4  ;;  %v1736_v49 = vld [vmem:[#allocation2 + $0xa8] sm:$0xff]  ;;  %v1738_v63 = vld [vmem:[#allocation2 + $0x170] sm:$0xff] }
 0x204   : > { %1917 = vst [vmem:[%s3273_s3 + $0xd8] sm:$0xff] %v1853_v17  ;;  %1918 = vst [vmem:[%s3273_s3 + $0xe0] sm:$0xff] %v1854_v14  ;;  %v1798_v23 = vadd.f32 %v2995_v40, %v1722_v12  ;;  %v1799_v32 = vadd.f32 %v2997_v50, %v1723_v6  ;;  %v1800_v26 = vadd.f32 %v2995_v40, %v1724_v11  ;;  %v1858_v34 = vmax.f32 %v1794_v25, 0.0  ;;  %v1737_v54 = vld [vmem:[#allocation2 + $0x1c8] sm:$0xff]  ;;  %v1739_v51 = vld [vmem:[#allocation2 + $0x178] sm:$0xff] }
 0x205   : > { %1919 = vst [vmem:[%s3273_s3 + $0xe8] sm:$0xff] %v1855_v13  ;;  %1920 = vst [vmem:[%s3273_s3 + $0xf0] sm:$0xff] %v1856_v22  ;;  %v1801_v29 = vadd.f32 %v2997_v50, %v1725_v20  ;;  %v1859_v31 = vmax.f32 %v1795_v19, 0.0  ;;  %v1860_v39 = vmax.f32 %v1796_v18, 0.0  ;;  %v1861_v33 = vmax.f32 %v1797_v27, 0.0  ;;  %v1740_v56 = vld [vmem:[#allocation2 + $0x68] sm:$0xff] }
 0x206   : > { %1921 = vst [vmem:[%s3273_s3 + $0xf8] sm:$0xff] %v1857_v16  ;;  %v1862_v36 = vmax.f32 %v1798_v23, 0.0  ;;  %v1863_v45 = vmax.f32 %v1799_v32, 0.0  ;;  %v1864_v3 = vmax.f32 %v1800_v26, 0.0  ;;  %1922 = vst [vmem:[%s3273_s3 + $0x100] sm:$0xff] %v1858_v34  ;;  %v1802_v48 = vadd.f32 %v2995_v40, %v1726_v21  ;;  %v1741_v62 = vld [vmem:[#allocation2 + $0x190] sm:$0xff] }
 0x207   : > { %v1865_v43 = vmax.f32 %v1801_v29, 0.0  ;;  %1923 = vst [vmem:[%s3273_s3 + $0x108] sm:$0xff] %v1859_v31  ;;  %1924 = vst [vmem:[%s3273_s3 + $0x110] sm:$0xff] %v1860_v39  ;;  %v1803_v42 = vadd.f32 %v2997_v50, %v1727_v24  ;;  %v1804_v44 = vadd.f32 %v2995_v40, %v1728_v30  ;;  %v1805_v53 = vadd.f32 %v2997_v50, %v1729_v35  ;;  %v1742_v15 = vld [vmem:[#allocation2 + $0x198] sm:$0xff]  ;;  %v1744_v9 = vld [vmem:[#allocation2 + $0xc0] sm:$0xff] }
 0x208   : > { %1925 = vst [vmem:[%s3273_s3 + $0x118] sm:$0xff] %v1861_v33  ;;  %1926 = vst [vmem:[%s3273_s3 + $0x120] sm:$0xff] %v1862_v36  ;;  %v1806_v47 = vadd.f32 %v2995_v40, %v1730_v28  ;;  %v1807_v58 = vadd.f32 %v2997_v50, %v1731_v37  ;;  %v1808_v52 = vadd.f32 %v2995_v40, %v1732_v41  ;;  %v1866_v57 = vmax.f32 %v1802_v48, 0.0  ;;  %v1743_v8 = vld [vmem:[#allocation2 + $0x38] sm:$0xff]  ;;  %v1745_v13 = vld [vmem:[#allocation2 + $0x1c0] sm:$0xff] }
 0x209   : > { %1927 = vst [vmem:[%s3273_s3 + $0x128] sm:$0xff] %v1863_v45  ;;  %1928 = vst [vmem:[%s3273_s3 + $0x130] sm:$0xff] %v1864_v3  ;;  %v1809_v60 = vadd.f32 %v2997_v50, %v1733_v38  ;;  %v1867_v1 = vmax.f32 %v1803_v42, 0.0  ;;  %v1868_v59 = vmax.f32 %v1804_v44, 0.0  ;;  %v1869_v5 = vmax.f32 %v1805_v53, 0.0  ;;  %v1746_v22 = vld [vmem:[#allocation2 + $0x158] sm:$0xff] }
 0x20a   : > { %1929 = vst [vmem:[%s3273_s3 + $0x138] sm:$0xff] %v1865_v43  ;;  %v1870_v61 = vmax.f32 %v1806_v47, 0.0  ;;  %v1871_v7 = vmax.f32 %v1807_v58, 0.0  ;;  %v1872_v0 = vmax.f32 %v1808_v52, 0.0  ;;  %1930 = vst [vmem:[%s3273_s3 + $0x140] sm:$0xff] %v1866_v57  ;;  %v1810_v2 = vadd.f32 %v2995_v40, %v1734_v46  ;;  %v1747_v16 = vld [vmem:[#allocation2 + $0x10] sm:$0xff] }
 0x20b   : > { %v1873_v10 = vmax.f32 %v1809_v60, 0.0  ;;  %1931 = vst [vmem:[%s3273_s3 + $0x148] sm:$0xff] %v1867_v1  ;;  %1932 = vst [vmem:[%s3273_s3 + $0x150] sm:$0xff] %v1868_v59  ;;  %v1811_v4 = vadd.f32 %v2997_v50, %v1735_v55  ;;  %v1812_v12 = vadd.f32 %v2995_v40, %v1736_v49  ;;  %v1813_v6 = vadd.f32 %v2997_v50, %v1737_v54  ;;  %v1748_v21 = vld [vmem:[#allocation2 + $0x58] sm:$0xff]  ;;  %v1749_v24 = vld [vmem:[#allocation2 + $0xa0] sm:$0xff] }
 0x20c   : > { %1933 = vst [vmem:[%s3273_s3 + $0x158] sm:$0xff] %v1869_v5  ;;  %1934 = vst [vmem:[%s3273_s3 + $0x160] sm:$0xff] %v1870_v61  ;;  %v1814_v17 = vadd.f32 %v2995_v40, %v1738_v63  ;;  %v1815_v11 = vadd.f32 %v2997_v50, %v1739_v51  ;;  %v1816_v20 = vadd.f32 %v2995_v40, %v1740_v56  ;;  %v1874_v25 = vmax.f32 %v1810_v2, 0.0 }
 0x20d   : > { %1935 = vst [vmem:[%s3273_s3 + $0x168] sm:$0xff] %v1871_v7  ;;  %1936 = vst [vmem:[%s3273_s3 + $0x170] sm:$0xff] %v1872_v0  ;;  %v1817_v14 = vadd.f32 %v2997_v50, %v1741_v62  ;;  %v1875_v19 = vmax.f32 %v1811_v4, 0.0  ;;  %v1876_v18 = vmax.f32 %v1812_v12, 0.0  ;;  %v1877_v27 = vmax.f32 %v1813_v6, 0.0 }
 0x20e   : > { %1937 = vst [vmem:[%s3273_s3 + $0x178] sm:$0xff] %v1873_v10  ;;  %v1878_v30 = vmax.f32 %v1814_v17, 0.0  ;;  %v1879_v23 = vmax.f32 %v1815_v11, 0.0  ;;  %v1880_v32 = vmax.f32 %v1816_v20, 0.0  ;;  %1938 = vst [vmem:[%s3273_s3 + $0x180] sm:$0xff] %v1874_v25  ;;  %v1818_v29 = vadd.f32 %v2995_v40, %v1742_v15 }
 0x20f   : > { %v1881_v26 = vmax.f32 %v1817_v14, 0.0  ;;  %1939 = vst [vmem:[%s3273_s3 + $0x188] sm:$0xff] %v1875_v19  ;;  %1940 = vst [vmem:[%s3273_s3 + $0x190] sm:$0xff] %v1876_v18  ;;  %v1819_v35 = vadd.f32 %v2997_v50, %v1743_v8  ;;  %v1820_v28 = vadd.f32 %v2995_v40, %v1744_v9  ;;  %v1821_v37 = vadd.f32 %v2997_v50, %v1745_v13 }
 0x210   : > { %1941 = vst [vmem:[%s3273_s3 + $0x198] sm:$0xff] %v1877_v27  ;;  %1942 = vst [vmem:[%s3273_s3 + $0x1a0] sm:$0xff] %v1878_v30  ;;  %v1822_v34 = vadd.f32 %v2995_v40, %v1746_v22  ;;  %v1823_v31 = vadd.f32 %v2997_v50, %v1747_v16  ;;  %v1824_v39 = vadd.f32 %v2995_v40, %v1748_v21  ;;  %v1882_v41 = vmax.f32 %v1818_v29, 0.0 }
 0x211   : > { %1943 = vst [vmem:[%s3273_s3 + $0x1a8] sm:$0xff] %v1879_v23  ;;  %1944 = vst [vmem:[%s3273_s3 + $0x1b0] sm:$0xff] %v1880_v32  ;;  %v1825_v33 = vadd.f32 %v2997_v50, %v1749_v24  ;;  %v1883_v38 = vmax.f32 %v1819_v35, 0.0  ;;  %v1884_v36 = vmax.f32 %v1820_v28, 0.0  ;;  %v1885_v45 = vmax.f32 %v1821_v37, 0.0 }
 0x212   : > { %1945 = vst [vmem:[%s3273_s3 + $0x1b8] sm:$0xff] %v1881_v26  ;;  %v1886_v3 = vmax.f32 %v1822_v34, 0.0  ;;  %v1887_v43 = vmax.f32 %v1823_v31, 0.0  ;;  %v1888_v48 = vmax.f32 %v1824_v39, 0.0  ;;  %1946 = vst [vmem:[%s3273_s3 + $0x1c0] sm:$0xff] %v1882_v41 }
 0x213   : > { %v1889_v42 = vmax.f32 %v1825_v33, 0.0  ;;  %1947 = vst [vmem:[%s3273_s3 + $0x1c8] sm:$0xff] %v1883_v38  ;;  %1948 = vst [vmem:[%s3273_s3 + $0x1d0] sm:$0xff] %v1884_v36 }
 0x214   : > { %1949 = vst [vmem:[%s3273_s3 + $0x1d8] sm:$0xff] %v1885_v45  ;;  %1950 = vst [vmem:[%s3273_s3 + $0x1e0] sm:$0xff] %v1886_v3 }
 0x215   : > { %1951 = vst [vmem:[%s3273_s3 + $0x1e8] sm:$0xff] %v1887_v43  ;;  %1952 = vst [vmem:[%s3273_s3 + $0x1f0] sm:$0xff] %v1888_v48 }
 0x216   : > { %1953 = vst [vmem:[%s3273_s3 + $0x1f8] sm:$0xff] %v1889_v42 }
 0x217 PF: > { %s13_s16 = sadd.s32 1, %s2475_s16   ;;  %s3274_s12 = smov %s2463_s13 }
 0x218   : > { %p10_p12 = scmp.ge.s32.totalorder %s13_s16, 5   ;;  %s3275_s13 = smov %s2534_s20 }
 0x219   : > { %s3276_s14 = smov %s2471_s15  ;;  %s3277_s15 = smov %s3279_s17 }
 0x21a   :  { %12 = sbr.rel (!%p10_p12) target bundleno = 3 (0x3), region = 113 }

// kernel: encoder_forward.9
= control target key start
LH: loop header
LB: loop body
LE: loop exit
PB: predicated region body
PF: predicated region fallthrough
CT: control target
= control target key end

     0   :  { %s1771_s12 = smov 0   ;;  %s1773_s13 = smov 0   ;;  %s2155_s0 = inlined_call_operand.vmem [shape: bf16[128,2304], index: 0, kind: input, shape index: {}]   ;;  %s2156_s1 = inlined_call_operand.vmem [shape: bf16[2304,256], index: 1, kind: input, shape index: {}]   ;;  %s2157_s2 = inlined_call_operand.vmem [shape: f32[1,256], index: 2, kind: input, shape index: {}]   ;;  %s2158_s3 = inlined_call_operand.vmem [shape: f32[128,256], index: 3, kind: output, shape index: {}]  }
   0x1   :  { %s1775_s14 = smov 0   ;;  %s1777_s15 = smov 0  }
   0x2   :  { %s1779_s16 = smov 0  }
   0x3 LB: > { %s25_s17 = sadd.s32 1, %s1743_s15  ;;  %p48_p1 = scmp.ne.s32.totalorder %s1735_s13, %s1731_s12  ;;  %s1747_s16 = sphi %s1779_s16, %s13_s16   ;;  %s1743_s15 = sphi %s1777_s15, %s2162_s15   ;;  %s1739_s14 = sphi %s1775_s14, %s2161_s14   ;;  %s1735_s13 = sphi %s1773_s13, %s2160_s13   ;;  %s1731_s12 = sphi %s1771_s12, %s2159_s12  }
   0x4   : > { %p26_p0 = scmp.ge.s32.totalorder %s25_s17, 6  ;;  %p49_p2 = scmp.eq.s32.totalorder %s1747_s16, 0 }
   0x5   : > { %s41_s19 = sadd.s32 1, %s1735_s13  ;;  %p1444_p5 = scmp.ge.s32.totalorder %s1747_s16, 6 }
   0x6   : > { %s2164_s17 = smov (%p26_p0, %s25_s17), 0  ;;  %p50_p3 = por %p49_p2, %p48_p1 }
   0x7   : > { %s37_s18 = ssub.s32 %s1743_s15, %s2164_s17  ;;  %164 = sbr.rel (%p1444_p5) target bundleno = 35 (0x23), region = 20 }
   0x8   : > { %p39_p4 = scmp.eq.s32.totalorder %s37_s18, 0 }
   0xa   : > { %s1806_s20 = scalar_select %p39_p4, %s1735_s13, %s41_s19  }
   0xc   : > { %167 = sbr.rel (!%p50_p3) target bundleno = 35 (0x23), region = 24  ;;  %s169_s21 = sand.u32 (%p50_p3), 1, %s1735_s13  }
   0xd   : > { %s1559_s22 = smul.u32 (%p50_p3), 12, %s1743_s15 }
   0xe   : > { %s1561_s23 = smul.u32 (%p50_p3), 192, %s169_s21 }
   0xf   : > { %s1814_s26 = scalar_lea.vmem (%p50_p3), %s2155_s0, %s1559_s22 }
  0x10   : > { %v192_v0 = vld [vmem:[%s1814_s26] sm:$0xff] (%p50_p3)  ;;  %v194_v1 = vld [vmem:[%s1814_s26 + $0x48] sm:$0xff] (%p50_p3)  ;;  %v196_v2 = vld [vmem:[%s1814_s26 + $0x90] sm:$0xff] (%p50_p3)  ;;  %s1819_s27 = scalar_lea.vmem (%p50_p3), [#allocation3], %s1561_s23 }
  0x11   : > { %193 = vst [vmem:[%s1819_s27] sm:$0xff] %v192_v0  ;;  %195 = vst [vmem:[%s1819_s27 + $0xc] sm:$0xff] %v194_v1  ;;  %v198_v3 = vld [vmem:[%s1814_s26 + $0xd8] sm:$0xff]  ;;  %v200_v4 = vld [vmem:[%s1814_s26 + $0x120] sm:$0xff] }
  0x12   : > { %197 = vst [vmem:[%s1819_s27 + $0x18] sm:$0xff] %v196_v2  ;;  %v202_v5 = vld [vmem:[%s1814_s26 + $0x168] sm:$0xff]  ;;  %199 = vst [vmem:[%s1819_s27 + $0x24] sm:$0xff] %v198_v3  ;;  %v204_v6 = vld [vmem:[%s1814_s26 + $0x1b0] sm:$0xff] }
  0x13   : > { %201 = vst [vmem:[%s1819_s27 + $0x30] sm:$0xff] %v200_v4  ;;  %203 = vst [vmem:[%s1819_s27 + $0x3c] sm:$0xff] %v202_v5  ;;  %v206_v7 = vld [vmem:[%s1814_s26 + $0x1f8] sm:$0xff]  ;;  %v208_v8 = vld [vmem:[%s1814_s26 + $0x240] sm:$0xff] }
  0x14   : > { %205 = vst [vmem:[%s1819_s27 + $0x48] sm:$0xff] %v204_v6  ;;  %207 = vst [vmem:[%s1819_s27 + $0x54] sm:$0xff] %v206_v7  ;;  %v210_v9 = vld [vmem:[%s1814_s26 + $0x288] sm:$0xff]  ;;  %v212_v10 = vld [vmem:[%s1814_s26 + $0x2d0] sm:$0xff] }
  0x15   : > { %209 = vst [vmem:[%s1819_s27 + $0x60] sm:$0xff] %v208_v8  ;;  %v214_v11 = vld [vmem:[%s1814_s26 + $0x318] sm:$0xff]  ;;  %211 = vst [vmem:[%s1819_s27 + $0x6c] sm:$0xff] %v210_v9  ;;  %v216_v12 = vld [vmem:[%s1814_s26 + $0x360] sm:$0xff] }
  0x16   : > { %213 = vst [vmem:[%s1819_s27 + $0x78] sm:$0xff] %v212_v10  ;;  %215 = vst [vmem:[%s1819_s27 + $0x84] sm:$0xff] %v214_v11  ;;  %v218_v13 = vld [vmem:[%s1814_s26 + $0x3a8] sm:$0xff]  ;;  %v220_v14 = vld [vmem:[%s1814_s26 + $0x3f0] sm:$0xff] }
  0x17   : > { %217 = vst [vmem:[%s1819_s27 + $0x90] sm:$0xff] %v216_v12  ;;  %219 = vst [vmem:[%s1819_s27 + $0x9c] sm:$0xff] %v218_v13  ;;  %v222_v15 = vld [vmem:[%s1814_s26 + $0x438] sm:$0xff]  ;;  %v1446_v16 = vld [vmem:[%s1814_s26 + $0x8] sm:$0xf] }
  0x18   : > { %221 = vst [vmem:[%s1819_s27 + $0xa8] sm:$0xff] %v220_v14  ;;  %v1448_v17 = vld [vmem:[%s1814_s26 + $0x50] sm:$0xf]  ;;  %223 = vst [vmem:[%s1819_s27 + $0xb4] sm:$0xff] %v222_v15  ;;  %v1450_v18 = vld [vmem:[%s1814_s26 + $0x98] sm:$0xf] }
  0x19   : > { %1447 = vst [vmem:[%s1819_s27 + $0x8] sm:$0xf] %v1446_v16  ;;  %1449 = vst [vmem:[%s1819_s27 + $0x14] sm:$0xf] %v1448_v17  ;;  %v1452_v19 = vld [vmem:[%s1814_s26 + $0xe0] sm:$0xf] }
  0x1a   : > { %v1454_v20 = vld [vmem:[%s1814_s26 + $0x128] sm:$0xf]  ;;  %1451 = vst [vmem:[%s1819_s27 + $0x20] sm:$0xf] %v1450_v18  ;;  %1453 = vst [vmem:[%s1819_s27 + $0x2c] sm:$0xf] %v1452_v19 }
  0x1b   : > { %1455 = vst [vmem:[%s1819_s27 + $0x38] sm:$0xf] %v1454_v20  ;;  %v1456_v21 = vld [vmem:[%s1814_s26 + $0x170] sm:$0xf]  ;;  %v1458_v22 = vld [vmem:[%s1814_s26 + $0x1b8] sm:$0xf] }
  0x1c   : > { %v1460_v23 = vld [vmem:[%s1814_s26 + $0x200] sm:$0xf]  ;;  %1457 = vst [vmem:[%s1819_s27 + $0x44] sm:$0xf] %v1456_v21  ;;  %1459 = vst [vmem:[%s1819_s27 + $0x50] sm:$0xf] %v1458_v22 }
  0x1d   : > { %1461 = vst [vmem:[%s1819_s27 + $0x5c] sm:$0xf] %v1460_v23  ;;  %v1462_v24 = vld [vmem:[%s1814_s26 + $0x248] sm:$0xf]  ;;  %v1464_v25 = vld [vmem:[%s1814_s26 + $0x290] sm:$0xf] }
  0x1e   : > { %v1466_v26 = vld [vmem:[%s1814_s26 + $0x2d8] sm:$0xf]  ;;  %1463 = vst [vmem:[%s1819_s27 + $0x68] sm:$0xf] %v1462_v24  ;;  %1465 = vst [vmem:[%s1819_s27 + $0x74] sm:$0xf] %v1464_v25 }
  0x1f   : > { %1467 = vst [vmem:[%s1819_s27 + $0x80] sm:$0xf] %v1466_v26  ;;  %v1468_v27 = vld [vmem:[%s1814_s26 + $0x320] sm:$0xf]  ;;  %v1470_v28 = vld [vmem:[%s1814_s26 + $0x368] sm:$0xf] }
  0x20   : > { %v1472_v29 = vld [vmem:[%s1814_s26 + $0x3b0] sm:$0xf]  ;;  %1469 = vst [vmem:[%s1819_s27 + $0x8c] sm:$0xf] %v1468_v27  ;;  %1471 = vst [vmem:[%s1819_s27 + $0x98] sm:$0xf] %v1470_v28 }
  0x21   : > { %1473 = vst [vmem:[%s1819_s27 + $0xa4] sm:$0xf] %v1472_v29  ;;  %v1474_v30 = vld [vmem:[%s1814_s26 + $0x3f8] sm:$0xf]  ;;  %v1476_v31 = vld [vmem:[%s1814_s26 + $0x440] sm:$0xf] }
  0x22   : > { %1475 = vst [vmem:[%s1819_s27 + $0xb0] sm:$0xf] %v1474_v30  ;;  %1477 = vst [vmem:[%s1819_s27 + $0xbc] sm:$0xf] %v1476_v31 }
  0x23 PF: > { %p1478_p6 = scmp.ge.s32.totalorder %s1747_s16, 1  ;;  %p283_p7 = scmp.lt.s32.totalorder %s1747_s16, 7 }
  0x25   : > { %p284_p8 = pnand %p1478_p6, %p283_p7 }
  0x26   : > { %s290_s28 = sand.u32 (!%p284_p8), 1, %s1731_s12   ;;  %s334_s29 = smul.u32 (!%p284_p8), 48, %s1739_s14 }
  0x27   : > { %287 = sbr.rel (%p284_p8) target bundleno = 420 (0x1a4), region = 54  ;;  %p1481_p10 = scmp.ne.s32.totalorder (!%p284_p8), %s1739_s14, 0 }
  0x28   : > { %s1562_s30 = smul.u32 (!%p284_p8), 192, %s290_s28  ;;  %p336_p9 = scmp.lt.s32.totalorder (!%p284_p8), %s334_s29, 287 }
  0x2a   : > { %s1891_s8 = scalar_lea.vmem (!%p284_p8), [#allocation3], %s1562_s30 }
  0x2c   : > { %s2166_s29 = smov (!%p336_p9, %s334_s29), 287  ;;  %367 = sbr.rel (%p1481_p10) target bundleno = 66 (0x42), region = 62 }
  0x2d   : > { %s1560_s4 = sshll.u32 %s2166_s29, 3 }
  0x2e   : > { %s1889_s7 = scalar_lea.vmem %s2156_s1, %s1560_s4 }
  0x31   : > { %v1749_v32 = vmov 0.0  }
  0x32   : > { %368 = vst [vmem:[#allocation2 + $0xb0] sm:$0xff] %v1749_v32  ;;  %369 = vst [vmem:[#allocation2] sm:$0xff] %v1749_v32 }
  0x33   : > { %370 = vst [vmem:[#allocation2 + $0xd8] sm:$0xff] %v1749_v32  ;;  %371 = vst [vmem:[#allocation2 + $0x18] sm:$0xff] %v1749_v32 }
  0x34   : > { %372 = vst [vmem:[#allocation2 + $0x50] sm:$0xff] %v1749_v32  ;;  %373 = vst [vmem:[#allocation2 + $0x68] sm:$0xff] %v1749_v32 }
  0x35   : > { %374 = vst [vmem:[#allocation2 + $0x30] sm:$0xff] %v1749_v32  ;;  %375 = vst [vmem:[#allocation2 + $0x48] sm:$0xff] %v1749_v32 }
  0x36   : > { %376 = vst [vmem:[#allocation2 + $0x80] sm:$0xff] %v1749_v32  ;;  %377 = vst [vmem:[#allocation2 + $0x88] sm:$0xff] %v1749_v32 }
  0x37   : > { %378 = vst [vmem:[#allocation2 + $0xe8] sm:$0xff] %v1749_v32  ;;  %379 = vst [vmem:[#allocation2 + $0xb8] sm:$0xff] %v1749_v32 }
  0x38   : > { %380 = vst [vmem:[#allocation2 + $0x60] sm:$0xff] %v1749_v32  ;;  %381 = vst [vmem:[#allocation2 + $0xf0] sm:$0xff] %v1749_v32 }
  0x39   : > { %382 = vst [vmem:[#allocation2 + $0x8] sm:$0xff] %v1749_v32  ;;  %383 = vst [vmem:[#allocation2 + $0x78] sm:$0xff] %v1749_v32 }
  0x3a   : > { %384 = vst [vmem:[#allocation2 + $0x38] sm:$0xff] %v1749_v32  ;;  %385 = vst [vmem:[#allocation2 + $0x58] sm:$0xff] %v1749_v32 }
  0x3b   : > { %386 = vst [vmem:[#allocation2 + $0x40] sm:$0xff] %v1749_v32  ;;  %387 = vst [vmem:[#allocation2 + $0xc8] sm:$0xff] %v1749_v32 }
  0x3c   : > { %388 = vst [vmem:[#allocation2 + $0xe0] sm:$0xff] %v1749_v32  ;;  %389 = vst [vmem:[#allocation2 + $0x90] sm:$0xff] %v1749_v32 }
  0x3d   : > { %390 = vst [vmem:[#allocation2 + $0x70] sm:$0xff] %v1749_v32  ;;  %391 = vst [vmem:[#allocation2 + $0xc0] sm:$0xff] %v1749_v32 }
  0x3e   : > { %392 = vst [vmem:[#allocation2 + $0xa8] sm:$0xff] %v1749_v32  ;;  %393 = vst [vmem:[#allocation2 + $0xd0] sm:$0xff] %v1749_v32 }
  0x3f   : > { %394 = vst [vmem:[#allocation2 + $0x10] sm:$0xff] %v1749_v32  ;;  %395 = vst [vmem:[#allocation2 + $0x28] sm:$0xff] %v1749_v32 }
  0x40   : > { %396 = vst [vmem:[#allocation2 + $0xa0] sm:$0xff] %v1749_v32  ;;  %397 = vst [vmem:[#allocation2 + $0xf8] sm:$0xff] %v1749_v32 }
  0x41   : > { %398 = vst [vmem:[#allocation2 + $0x20] sm:$0xff] %v1749_v32  ;;  %399 = vst [vmem:[#allocation2 + $0x98] sm:$0xff] %v1749_v32 }
  0x42 PF: > { %v1605_v33 = vld [vmem:[%s1889_s7 + $0x74] ss:$8 sps:$4 sm:$0xff]   ;;  %v1607_v34 = vld [vmem:[%s1889_s7 + $0x70] ss:$8 sps:$4 sm:$0xff]   ;;  %v1750_v35 = vmov 0   ;;  %p1554_p11 = scmp.ne.s32.totalorder %s1739_s14, 5 }
  0x43   : > { %1025 = vmatprep.mubr.bf16.mxu1 %v1750_v35  ;;  %880 = vmatprep.subr.bf16.mxu0 %v1605_v33  ;;  %v1608_v36 = vld [vmem:[%s1889_s7 + $0x64] ss:$8 sps:$4 sm:$0xff]   ;;  %v1610_v37 = vld [vmem:[%s1889_s7 + $0x60] ss:$8 sps:$4 sm:$0xff]   ;;  %v1611_v38 = vld [vmem:[%s1889_s7 + $0x54] ss:$8 sps:$4 sm:$0xff]  }
  0x44   : > { %881 = vmatpush1.bf16.msra.mxu0 %v1607_v34  ;;  %v1613_v39 = vld [vmem:[%s1889_s7 + $0x50] ss:$8 sps:$4 sm:$0xff]   ;;  %v1614_v40 = vld [vmem:[%s1889_s7 + $0x44] ss:$8 sps:$4 sm:$0xff]   ;;  %v1626_v41 = vld [vmem:[%s1889_s7 + $0x174] ss:$8 sps:$4 sm:$0xff]  }
  0x45   : > { %882 = vmatprep.subr.bf16.mxu0 %v1608_v36  ;;  %v1628_v42 = vld [vmem:[%s1889_s7 + $0x170] ss:$8 sps:$4 sm:$0xff]   ;;  %v1616_v43 = vld [vmem:[%s1889_s7 + $0x40] ss:$8 sps:$4 sm:$0xff]   ;;  %v1617_v44 = vld [vmem:[%s1889_s7 + $0x34] ss:$8 sps:$4 sm:$0xff]   ;;  %993 = vmatprep.subr.bf16.mxu1 %v1626_v41 }
  0x46   : > { %v1632_v45 = vld [vmem:[%s1889_s7 + $0x164] ss:$8 sps:$4 sm:$0xff]   ;;  %994 = vmatpush1.bf16.msra.mxu1 %v1628_v42  ;;  %v1634_v46 = vld [vmem:[%s1889_s7 + $0x160] ss:$8 sps:$4 sm:$0xff]   ;;  %v1619_v47 = vld [vmem:[%s1889_s7 + $0x30] ss:$8 sps:$4 sm:$0xff]  }
  0x47   : > { %995 = vmatprep.subr.bf16.mxu1 %v1632_v45  ;;  %v1638_v48 = vld [vmem:[%s1889_s7 + $0x154] ss:$8 sps:$4 sm:$0xff]   ;;  %v1620_v49 = vld [vmem:[%s1889_s7 + $0x24] ss:$8 sps:$4 sm:$0xff]   ;;  %v1640_v50 = vld [vmem:[%s1889_s7 + $0x150] ss:$8 sps:$4 sm:$0xff]  }
  0x48   : > { %883 = vmatpush1.bf16.msra.mxu0 %v1610_v37  ;;  %v1644_v51 = vld [vmem:[%s1889_s7 + $0x144] ss:$8 sps:$4 sm:$0xff]   ;;  %v1622_v52 = vld [vmem:[%s1889_s7 + $0x20] ss:$8 sps:$4 sm:$0xff]   ;;  %v1623_v53 = vld [vmem:[%s1889_s7 + $0x14] ss:$8 sps:$4 sm:$0xff]  }
  0x49   : > { %884 = vmatprep.subr.bf16.mxu0 %v1611_v38  ;;  %v1646_v54 = vld [vmem:[%s1889_s7 + $0x140] ss:$8 sps:$4 sm:$0xff]   ;;  %v1650_v55 = vld [vmem:[%s1889_s7 + $0x134] ss:$8 sps:$4 sm:$0xff]   ;;  %v1625_v56 = vld [vmem:[%s1889_s7 + $0x10] ss:$8 sps:$4 sm:$0xff]  }
  0x4a   : > { %996 = vmatpush1.bf16.msra.mxu1 %v1634_v46  ;;  %v1629_v57 = vld [vmem:[%s1889_s7 + $0x4] ss:$8 sps:$4 sm:$0xff]   ;;  %v1652_v58 = vld [vmem:[%s1889_s7 + $0x130] ss:$8 sps:$4 sm:$0xff]   ;;  %v1631_v60 = vld [vmem:[%s1889_s7] ss:$8 sps:$4 sm:$0xff]  }
  0x4b   : > { %997 = vmatprep.subr.bf16.mxu1 %v1638_v48  ;;  %v1656_v59 = vld [vmem:[%s1889_s7 + $0x124] ss:$8 sps:$4 sm:$0xff]   ;;  %v1635_v61 = vld [vmem:[%s1889_s7 + $0xf4] ss:$8 sps:$4 sm:$0xff]   ;;  %v1658_v62 = vld [vmem:[%s1889_s7 + $0x120] ss:$8 sps:$4 sm:$0xff]  }
  0x4c   : > { %885 = vmatpush1.bf16.msra.mxu0 %v1613_v39  ;;  %v1662_v63 = vld [vmem:[%s1889_s7 + $0x114] ss:$8 sps:$4 sm:$0xff]   ;;  %v1637_v0 = vld [vmem:[%s1889_s7 + $0xf0] ss:$8 sps:$4 sm:$0xff]   ;;  %v1641_v1 = vld [vmem:[%s1889_s7 + $0xe4] ss:$8 sps:$4 sm:$0xff]  }
  0x4d   : > { %886 = vmatprep.subr.bf16.mxu0 %v1614_v40  ;;  %v1664_v2 = vld [vmem:[%s1889_s7 + $0x110] ss:$8 sps:$4 sm:$0xff]   ;;  %v1668_v3 = vld [vmem:[%s1889_s7 + $0x104] ss:$8 sps:$4 sm:$0xff]   ;;  %v1643_v5 = vld [vmem:[%s1889_s7 + $0xe0] ss:$8 sps:$4 sm:$0xff]  }
  0x4e   : > { %998 = vmatpush1.bf16.msra.mxu1 %v1640_v50  ;;  %v1680_v4 = vld [vmem:[%s1891_s8 + $0x4] ss:$12 sps:$4 sm:$0xff]   ;;  %v1647_v6 = vld [vmem:[%s1889_s7 + $0xd4] ss:$8 sps:$4 sm:$0xff]   ;;  %v1670_v7 = vld [vmem:[%s1889_s7 + $0x100] ss:$8 sps:$4 sm:$0xff]  }
  0x4f   : > { %999 = vmatprep.subr.bf16.mxu1 %v1644_v51  ;;  %912 = vmatprep.mubr.bf16.mxu0 %v1680_v4  ;;  %v1649_v8 = vld [vmem:[%s1889_s7 + $0xd0] ss:$8 sps:$4 sm:$0xff]   ;;  %v1653_v9 = vld [vmem:[%s1889_s7 + $0xc4] ss:$8 sps:$4 sm:$0xff]   ;;  %v1674_v10 = vld [vmem:[%s1891_s8 + $0x8] ss:$12 sps:$4 sm:$0xff]  }
  0x50   : > { %887 = vmatpush1.bf16.msra.mxu0 %v1616_v43  ;;  %v1655_v11 = vld [vmem:[%s1889_s7 + $0xc0] ss:$8 sps:$4 sm:$0xff]   ;;  %v1659_v12 = vld [vmem:[%s1889_s7 + $0xb4] ss:$8 sps:$4 sm:$0xff]   ;;  %v1661_v13 = vld [vmem:[%s1889_s7 + $0xb0] ss:$8 sps:$4 sm:$0xff]  }
  0x51   : > { %888 = vmatprep.subr.bf16.mxu0 %v1617_v44  ;;  %v1665_v14 = vld [vmem:[%s1889_s7 + $0xa4] ss:$8 sps:$4 sm:$0xff]   ;;  %v1667_v16 = vld [vmem:[%s1889_s7 + $0xa0] ss:$8 sps:$4 sm:$0xff]   ;;  %v1671_v17 = vld [vmem:[%s1889_s7 + $0x94] ss:$8 sps:$4 sm:$0xff]  }
  0x52   : > { %1000 = vmatpush1.bf16.msra.mxu1 %v1646_v54  ;;  %v1681_v15 = vld [vmem:[%s1891_s8 + $0x20] ss:$12 sps:$4 sm:$0xff]   ;;  %v1673_v18 = vld [vmem:[%s1889_s7 + $0x90] ss:$8 sps:$4 sm:$0xff]   ;;  %v1682_v23 = vld [vmem:[%s1891_s8 + $0x1c] ss:$12 sps:$4 sm:$0xff]  }
  0x53   : > { %1001 = vmatprep.subr.bf16.mxu1 %v1650_v55  ;;  %v1675_v19 = vld [vmem:[%s1889_s7 + $0x84] ss:$8 sps:$4 sm:$0xff]   ;;  %v1677_v21 = vld [vmem:[%s1889_s7 + $0x80] ss:$8 sps:$4 sm:$0xff]   ;;  %v1689_v24 = vld [vmem:[%s1891_s8 + $0x50] ss:$12 sps:$4 sm:$0xff]  }
  0x54   : > { %889 = vmatpush1.bf16.msra.mxu0 %v1619_v47  ;;  %v1685_v20 = vld [vmem:[%s1891_s8 + $0x38] ss:$12 sps:$4 sm:$0xff]   ;;  %v1678_v22 = vld [vmem:[%s1891_s8] ss:$12 sps:$4 sm:$0xff]   ;;  %v1693_v27 = vld [vmem:[%s1891_s8 + $0x68] ss:$12 sps:$4 sm:$0xff]  }
  0x55   : > { %890 = vmatprep.subr.bf16.mxu0 %v1620_v49  ;;  %v1684_v25 = vld [vmem:[%s1891_s8 + $0x18] ss:$12 sps:$4 sm:$0xff]   ;;  %v1686_v26 = vld [vmem:[%s1891_s8 + $0x34] ss:$12 sps:$4 sm:$0xff]   ;;  %v1688_v28 = vld [vmem:[%s1891_s8 + $0x30] ss:$12 sps:$4 sm:$0xff]  }
  0x56   : > { %1002 = vmatpush1.bf16.msra.mxu1 %v1652_v58  ;;  %v1690_v29 = vld [vmem:[%s1891_s8 + $0x4c] ss:$12 sps:$4 sm:$0xff]   ;;  %v1692_v31 = vld [vmem:[%s1891_s8 + $0x48] ss:$12 sps:$4 sm:$0xff]   ;;  %v1694_v32 = vld [vmem:[%s1891_s8 + $0x64] ss:$12 sps:$4 sm:$0xff]  }
  0x57   : > { %1003 = vmatprep.subr.bf16.mxu1 %v1656_v59  ;;  %v1697_v30 = vld [vmem:[%s1891_s8 + $0x80] ss:$12 sps:$4 sm:$0xff]   ;;  %v1701_v33 = vld [vmem:[%s1891_s8 + $0x98] ss:$12 sps:$4 sm:$0xff]   ;;  %v1698_v36 = vld [vmem:[%s1891_s8 + $0x7c] ss:$12 sps:$4 sm:$0xff]  }
  0x58   : > { %891 = vmatpush1.bf16.msra.mxu0 %v1622_v52  ;;  %v1696_v34 = vld [vmem:[%s1891_s8 + $0x60] ss:$12 sps:$4 sm:$0xff]   ;;  %v1705_v37 = vld [vmem:[%s1891_s8 + $0xb0] ss:$12 sps:$4 sm:$0xff]   ;;  %v1700_v38 = vld [vmem:[%s1891_s8 + $0x78] ss:$12 sps:$4 sm:$0xff]  }
  0x59   : > { %892 = vmatprep.subr.bf16.mxu0 %v1623_v53  ;;  %v1702_v39 = vld [vmem:[%s1891_s8 + $0x94] ss:$12 sps:$4 sm:$0xff]   ;;  %v1704_v40 = vld [vmem:[%s1891_s8 + $0x90] ss:$12 sps:$4 sm:$0xff]   ;;  %v1706_v41 = vld [vmem:[%s1891_s8 + $0xac] ss:$12 sps:$4 sm:$0xff]  }
  0x5a   : > { %1004 = vmatpush1.bf16.msra.mxu1 %v1658_v62  ;;  %v1708_v42 = vld [vmem:[%s1891_s8 + $0xa8] ss:$12 sps:$4 sm:$0xff]   ;;  %v402_v62 = vld [vmem:[#allocation2 + $0xd8] sm:$0xff] }
  0x5b   : > { %1005 = vmatprep.subr.bf16.mxu1 %v1662_v63  ;;  %v400_v53 = vld [vmem:[#allocation2 + $0xb0] sm:$0xff] }
  0x5c   : > { %893 = vmatpush1.bf16.msra.mxu0 %v1625_v56 }
  0x5d   : > { %894 = vmatprep.subr.bf16.mxu0 %v1629_v57  ;;  %v401_v57 = vld [vmem:[#allocation2] sm:$0xff] }
  0x5e   : > { %1006 = vmatpush1.bf16.msra.mxu1 %v1664_v2 }
  0x5f   : > { %1007 = vmatprep.subr.bf16.mxu1 %v1668_v3  ;;  %v403_v3 = vld [vmem:[#allocation2 + $0x18] sm:$0xff] }
  0x60   : > { %895 = vmatpush1.bf16.msra.mxu0 %v1631_v60 }
  0x61   : > { %896 = vmatprep.subr.bf16.mxu0 %v1635_v61 }
  0x62   : > { %1008 = vmatpush1.bf16.msra.mxu1 %v1670_v7 }
  0x64   : > { %897 = vmatpush2.bf16.msra.mxu0 %v1637_v0 }
  0x65   : > { %898 = vmatprep.subr.bf16.mxu0 %v1641_v1  ;;  %1026 = vmatmul.mubr.bf16.vlgmr.msra.gmra.mxu1 %v1674_v10 }
  0x66   : > { %1035 = vmatprep.mubr.bf16.mxu1 %v1750_v35 }
  0x68   : > { %899 = vmatpush2.bf16.msra.mxu0 %v1643_v5 }
  0x69   : > { %900 = vmatprep.subr.bf16.mxu0 %v1647_v6 }
  0x6c   : > { %901 = vmatpush2.bf16.msra.mxu0 %v1649_v8  ;;  %v404_v8 = vld [vmem:[#allocation2 + $0x50] sm:$0xff] }
  0x6d   : > { %902 = vmatprep.subr.bf16.mxu0 %v1653_v9  ;;  %1036 = vmatmul.mubr.bf16.gmra.mxu1 %v1681_v15 }
  0x6e   : > { %1045 = vmatprep.mubr.bf16.mxu1 %v1750_v35 }
  0x70   : > { %903 = vmatpush2.bf16.msra.mxu0 %v1655_v11 }
  0x71   : > { %904 = vmatprep.subr.bf16.mxu0 %v1659_v12 }
  0x74   : > { %905 = vmatpush2.bf16.msra.mxu0 %v1661_v13  ;;  %v405_v13 = vld [vmem:[#allocation2 + $0x68] sm:$0xff] }
  0x75   : > { %906 = vmatprep.subr.bf16.mxu0 %v1665_v14  ;;  %1046 = vmatmul.mubr.bf16.gmra.mxu1 %v1685_v20 }
  0x76   : > { %1055 = vmatprep.mubr.bf16.mxu1 %v1750_v35 }
  0x78   : > { %907 = vmatpush2.bf16.msra.mxu0 %v1667_v16 }
  0x79   : > { %908 = vmatprep.subr.bf16.mxu0 %v1671_v17 }
  0x7c   : > { %909 = vmatpush2.bf16.msra.mxu0 %v1673_v18  ;;  %v406_v18 = vld [vmem:[#allocation2 + $0x30] sm:$0xff] }
  0x7d   : > { %910 = vmatprep.subr.bf16.mxu0 %v1675_v19  ;;  %1056 = vmatmul.mubr.bf16.gmra.mxu1 %v1689_v24 }
  0x7e   : > { %1065 = vmatprep.mubr.bf16.mxu1 %v1750_v35 }
  0x80   : > { %911 = vmatpush2.bf16.msra.mxu0 %v1677_v21 }
  0x83   : > { %913 = vmatmul.mubr.bf16.vlgmr.msra.gmra.mxu0 %v1678_v22 }
  0x84   : > { %922 = vmatprep.mubr.bf16.mxu0 %v1682_v23  ;;  %v407_v23 = vld [vmem:[#allocation2 + $0x48] sm:$0xff] }
  0x85   : > { %1066 = vmatmul.mubr.bf16.gmra.mxu1 %v1693_v27 }
  0x86   : > { %1075 = vmatprep.mubr.bf16.mxu1 %v1750_v35 }
  0x8b   : > { %923 = vmatmul.mubr.bf16.gmra.mxu0 %v1684_v25 }
  0x8c   : > { %932 = vmatprep.mubr.bf16.mxu0 %v1686_v26 }
  0x8d   : > { %1076 = vmatmul.mubr.bf16.gmra.mxu1 %v1697_v30 }
  0x8e   : > { %1085 = vmatprep.mubr.bf16.mxu1 %v1750_v35 }
  0x93   : > { %933 = vmatmul.mubr.bf16.gmra.mxu0 %v1688_v28  ;;  %v408_v28 = vld [vmem:[#allocation2 + $0x80] sm:$0xff] }
  0x94   : > { %942 = vmatprep.mubr.bf16.mxu0 %v1690_v29 }
  0x95   : > { %1086 = vmatmul.mubr.bf16.gmra.mxu1 %v1701_v33  ;;  %v409_v33 = vld [vmem:[#allocation2 + $0x88] sm:$0xff] }
  0x96   : > { %1095 = vmatprep.mubr.bf16.mxu1 %v1750_v35 }
  0x9b   : > { %943 = vmatmul.mubr.bf16.gmra.mxu0 %v1692_v31 }
  0x9c   : > { %952 = vmatprep.mubr.bf16.mxu0 %v1694_v32 }
  0x9d   : > { %1096 = vmatmul.mubr.bf16.gmra.mxu1 %v1705_v37 }
  0xa3   : > { %953 = vmatmul.mubr.bf16.gmra.mxu0 %v1696_v34 }
  0xa4   : > { %962 = vmatprep.mubr.bf16.mxu0 %v1698_v36 }
  0xab   : > { %963 = vmatmul.mubr.bf16.gmra.mxu0 %v1700_v38 }
  0xac   : > { %972 = vmatprep.mubr.bf16.mxu0 %v1702_v39  ;;  %v410_v39 = vld [vmem:[#allocation2 + $0xe8] sm:$0xff] }
  0xb3   : > { %973 = vmatmul.mubr.bf16.gmra.mxu0 %v1704_v40 }
  0xb4   : > { %982 = vmatprep.mubr.bf16.mxu0 %v1706_v41 }
  0xbb   : > { %983 = vmatmul.mubr.bf16.gmra.mxu0 %v1708_v42 }
 0x125   : > { %v1027_v43 = vpop.f32.mrf.mxu1 }
 0x127   : > { %v1029_v44 = vpop.f32.mrf.mxu1 }
 0x129   : > { %v1031_v45 = vpop.f32.mrf.mxu1 }
 0x12b   : > { %v1033_v35 = vpop.f32.mrf.mxu1 }
 0x12d   : > { %v1037_v46 = vpop.f32.mrf.mxu1 }
 0x12f   : > { %v1039_v47 = vpop.f32.mrf.mxu1 }
 0x131   : > { %v1041_v48 = vpop.f32.mrf.mxu1 }
 0x133   : > { %v1043_v49 = vpop.f32.mrf.mxu1 }
 0x135   : > { %v1047_v50 = vpop.f32.mrf.mxu1 }
 0x137   : > { %v1049_v51 = vpop.f32.mrf.mxu1 }
 0x139   : > { %v1051_v52 = vpop.f32.mrf.mxu1 }
 0x13b   : > { %v1974_v55 = vpop.f32.mrf.mxu1 }
 0x13d   : > { %v1976_v59 = vpop.f32.mrf.mxu1 }
 0x13f   : > { %v1978_v0 = vpop.f32.mrf.mxu1 }
 0x141   : > { %v1980_v5 = vpop.f32.mrf.mxu1 }
 0x143   : > { %v914_v54 = vpop.f32.mrf.mxu0  ;;  %v1982_v10 = vpop.f32.mrf.mxu1 }
 0x144   : > { %v1028_v56 = vadd.f32 %v1027_v43, %v914_v54  ;;  %v411_v43 = vld [vmem:[#allocation2 + $0xb8] sm:$0xff] }
 0x145   : > { %v916_v58 = vpop.f32.mrf.mxu0  ;;  %v1984_v15 = vpop.f32.mrf.mxu1 }
 0x146   : > { %v1106_v60 = vadd.f32 %v1028_v56, %v400_v53  ;;  %v1030_v61 = vadd.f32 %v1029_v44, %v916_v58  ;;  %v413_v53 = vld [vmem:[#allocation2 + $0xf0] sm:$0xff] }
 0x147   : > { %v918_v63 = vpop.f32.mrf.mxu0  ;;  %v1986_v20 = vpop.f32.mrf.mxu1 }
 0x148   : > { %1138 = vst [vmem:[#allocation2 + $0xb0] sm:$0xff] %v1106_v60  ;;  %v1107_v1 = vadd.f32 %v1030_v61, %v401_v57  ;;  %v1032_v2 = vadd.f32 %v1031_v45, %v918_v63  ;;  %v414_v57 = vld [vmem:[#allocation2 + $0x8] sm:$0xff] }
 0x149   : > { %v920_v4 = vpop.f32.mrf.mxu0  ;;  %v1988_v25 = vpop.f32.mrf.mxu1 }
 0x14a   : > { %1139 = vst [vmem:[#allocation2] sm:$0xff] %v1107_v1  ;;  %v1108_v6 = vadd.f32 %v1032_v2, %v402_v62  ;;  %v1034_v7 = vadd.f32 %v1033_v35, %v920_v4  ;;  %v416_v2 = vld [vmem:[#allocation2 + $0x38] sm:$0xff] }
 0x14b   : > { %v924_v9 = vpop.f32.mrf.mxu0  ;;  %v1990_v30 = vpop.f32.mrf.mxu1 }
 0x14c   : > { %1140 = vst [vmem:[#allocation2 + $0xd8] sm:$0xff] %v1108_v6  ;;  %v1109_v11 = vadd.f32 %v1034_v7, %v403_v3  ;;  %v1038_v12 = vadd.f32 %v1037_v46, %v924_v9 }
 0x14d   : > { %v926_v14 = vpop.f32.mrf.mxu0  ;;  %v1992_v36 = vpop.f32.mrf.mxu1 }
 0x14e   : > { %1141 = vst [vmem:[#allocation2 + $0x18] sm:$0xff] %v1109_v11  ;;  %v1110_v16 = vadd.f32 %v1038_v12, %v404_v8  ;;  %v1040_v17 = vadd.f32 %v1039_v47, %v926_v14  ;;  %v412_v47 = vld [vmem:[#allocation2 + $0x60] sm:$0xff] }
 0x14f   : > { %v928_v19 = vpop.f32.mrf.mxu0  ;;  %v1079_v45 = vpop.f32.mrf.mxu1  ;;  %v418_v11 = vld [vmem:[#allocation2 + $0x40] sm:$0xff] }
 0x150   : > { %1142 = vst [vmem:[#allocation2 + $0x50] sm:$0xff] %v1110_v16  ;;  %v1111_v21 = vadd.f32 %v1040_v17, %v405_v13  ;;  %v1042_v22 = vadd.f32 %v1041_v48, %v928_v19  ;;  %v420_v19 = vld [vmem:[#allocation2 + $0xe0] sm:$0xff] }
 0x151   : > { %v930_v24 = vpop.f32.mrf.mxu0  ;;  %v1081_v54 = vpop.f32.mrf.mxu1 }
 0x152   : > { %1143 = vst [vmem:[#allocation2 + $0x68] sm:$0xff] %v1111_v21  ;;  %v1112_v26 = vadd.f32 %v1042_v22, %v406_v18  ;;  %v1044_v27 = vadd.f32 %v1043_v49, %v930_v24 }
 0x153   : > { %v934_v29 = vpop.f32.mrf.mxu0  ;;  %v1083_v63 = vpop.f32.mrf.mxu1 }
 0x154   : > { %1144 = vst [vmem:[#allocation2 + $0x30] sm:$0xff] %v1112_v26  ;;  %v1113_v31 = vadd.f32 %v1044_v27, %v407_v23  ;;  %v1048_v32 = vadd.f32 %v1047_v50, %v934_v29 }
 0x155   : > { %v936_v34 = vpop.f32.mrf.mxu0  ;;  %v1087_v8 = vpop.f32.mrf.mxu1 }
 0x156   : > { %1145 = vst [vmem:[#allocation2 + $0x48] sm:$0xff] %v1113_v31  ;;  %v1114_v37 = vadd.f32 %v1048_v32, %v408_v28  ;;  %v1050_v38 = vadd.f32 %v1049_v51, %v936_v34 }
 0x157   : > { %v938_v40 = vpop.f32.mrf.mxu0  ;;  %v1089_v17 = vpop.f32.mrf.mxu1 }
 0x158   : > { %1146 = vst [vmem:[#allocation2 + $0x80] sm:$0xff] %v1114_v37  ;;  %v1115_v41 = vadd.f32 %v1050_v38, %v409_v33  ;;  %v1052_v42 = vadd.f32 %v1051_v52, %v938_v40  ;;  %v423_v33 = vld [vmem:[#allocation2 + $0xc0] sm:$0xff] }
 0x159   : > { %v940_v44 = vpop.f32.mrf.mxu0  ;;  %v1091_v26 = vpop.f32.mrf.mxu1 }
 0x15a   : > { %1147 = vst [vmem:[#allocation2 + $0x88] sm:$0xff] %v1115_v41  ;;  %v1116_v35 = vadd.f32 %v1052_v42, %v410_v39  ;;  %v1054_v46 = vadd.f32 %v1974_v55, %v940_v44  ;;  %v415_v55 = vld [vmem:[#allocation2 + $0x78] sm:$0xff]  ;;  %v424_v39 = vld [vmem:[#allocation2 + $0xa8] sm:$0xff]  ;;  %v425_v42 = vld [vmem:[#allocation2 + $0xd0] sm:$0xff] }
 0x15b   : > { %v944_v48 = vpop.f32.mrf.mxu0 }
 0x15c   : > { %1148 = vst [vmem:[#allocation2 + $0xe8] sm:$0xff] %v1116_v35  ;;  %v1117_v49 = vadd.f32 %v1054_v46, %v411_v43  ;;  %v1058_v50 = vadd.f32 %v1976_v59, %v944_v48  ;;  %v426_v46 = vld [vmem:[#allocation2 + $0x10] sm:$0xff] }
 0x15d   : > { %v946_v51 = vpop.f32.mrf.mxu0 }
 0x15e   : > { %1149 = vst [vmem:[#allocation2 + $0xb8] sm:$0xff] %v1117_v49  ;;  %v1118_v56 = vadd.f32 %v1058_v50, %v412_v47  ;;  %v1060_v52 = vadd.f32 %v1978_v0, %v946_v51  ;;  %v417_v0 = vld [vmem:[#allocation2 + $0x58] sm:$0xff] }
 0x15f   : > { %v948_v58 = vpop.f32.mrf.mxu0 }
 0x160   : > { %1150 = vst [vmem:[#allocation2 + $0x60] sm:$0xff] %v1118_v56  ;;  %v1119_v60 = vadd.f32 %v1060_v52, %v413_v53  ;;  %v1062_v61 = vadd.f32 %v1980_v5, %v948_v58  ;;  %v427_v53 = vld [vmem:[#allocation2 + $0x28] sm:$0xff]  ;;  %v428_v52 = vld [vmem:[#allocation2 + $0xa0] sm:$0xff] }
 0x161   : > { %v950_v62 = vpop.f32.mrf.mxu0 }
 0x162   : > { %1151 = vst [vmem:[#allocation2 + $0xf0] sm:$0xff] %v1119_v60  ;;  %v1120_v1 = vadd.f32 %v1062_v61, %v414_v57  ;;  %v1064_v59 = vadd.f32 %v1982_v10, %v950_v62  ;;  %v419_v10 = vld [vmem:[#allocation2 + $0xc8] sm:$0xff] }
 0x163   : > { %v954_v3 = vpop.f32.mrf.mxu0 }
 0x164   : > { %1152 = vst [vmem:[#allocation2 + $0x8] sm:$0xff] %v1120_v1  ;;  %v1121_v4 = vadd.f32 %v1064_v59, %v415_v55  ;;  %v1068_v6 = vadd.f32 %v1984_v15, %v954_v3  ;;  %v429_v55 = vld [vmem:[#allocation2 + $0xf8] sm:$0xff]  ;;  %v430_v59 = vld [vmem:[#allocation2 + $0x20] sm:$0xff] }
 0x165   : > { %v956_v7 = vpop.f32.mrf.mxu0 }
 0x166   : > { %1153 = vst [vmem:[#allocation2 + $0x78] sm:$0xff] %v1121_v4  ;;  %v1122_v9 = vadd.f32 %v1068_v6, %v416_v2  ;;  %v1070_v5 = vadd.f32 %v1986_v20, %v956_v7  ;;  %v421_v20 = vld [vmem:[#allocation2 + $0x90] sm:$0xff] }
 0x167   : > { %v958_v12 = vpop.f32.mrf.mxu0 }
 0x168   : > { %1154 = vst [vmem:[#allocation2 + $0x38] sm:$0xff] %v1122_v9  ;;  %v1123_v13 = vadd.f32 %v1070_v5, %v417_v0  ;;  %v1072_v14 = vadd.f32 %v1988_v25, %v958_v12  ;;  %v422_v25 = vld [vmem:[#allocation2 + $0x70] sm:$0xff]  ;;  %v431_v0 = vld [vmem:[#allocation2 + $0x98] sm:$0xff] }
 0x169   : > { %v960_v16 = vpop.f32.mrf.mxu0 }
 0x16a   : > { %1155 = vst [vmem:[#allocation2 + $0x58] sm:$0xff] %v1123_v13  ;;  %v1124_v18 = vadd.f32 %v1072_v14, %v418_v11  ;;  %v1074_v15 = vadd.f32 %v1990_v30, %v960_v16  ;;  %v1093_v30 = vpop.f32.mrf.mxu1 }
 0x16b   : > { %v964_v21 = vpop.f32.mrf.mxu0 }
 0x16c   : > { %1156 = vst [vmem:[#allocation2 + $0x40] sm:$0xff] %v1124_v18  ;;  %v1125_v22 = vadd.f32 %v1074_v15, %v419_v10  ;;  %v1078_v23 = vadd.f32 %v1992_v36, %v964_v21  ;;  %v1097_v44 = vpop.f32.mrf.mxu1 }
 0x16d   : > { %v966_v24 = vpop.f32.mrf.mxu0 }
 0x16e   : > { %1157 = vst [vmem:[#allocation2 + $0xc8] sm:$0xff] %v1125_v22  ;;  %v1126_v27 = vadd.f32 %v1078_v23, %v420_v19  ;;  %v1080_v28 = vadd.f32 %v1079_v45, %v966_v24  ;;  %v1099_v50 = vpop.f32.mrf.mxu1 }
 0x16f   : > { %v968_v29 = vpop.f32.mrf.mxu0 }
 0x170   : > { %1158 = vst [vmem:[#allocation2 + $0xe0] sm:$0xff] %v1126_v27  ;;  %v1127_v31 = vadd.f32 %v1080_v28, %v421_v20  ;;  %v1082_v32 = vadd.f32 %v1081_v54, %v968_v29  ;;  %v1101_v61 = vpop.f32.mrf.mxu1 }
 0x171   : > { %v970_v34 = vpop.f32.mrf.mxu0 }
 0x172   : > { %1159 = vst [vmem:[#allocation2 + $0x90] sm:$0xff] %v1127_v31  ;;  %v1128_v37 = vadd.f32 %v1082_v32, %v422_v25  ;;  %v1084_v38 = vadd.f32 %v1083_v63, %v970_v34  ;;  %v1103_v6 = vpop.f32.mrf.mxu1 }
 0x173   : > { %v974_v40 = vpop.f32.mrf.mxu0 }
 0x174   : > { %1160 = vst [vmem:[#allocation2 + $0x70] sm:$0xff] %v1128_v37  ;;  %v1129_v36 = vadd.f32 %v1084_v38, %v423_v33  ;;  %v1088_v41 = vadd.f32 %v1087_v8, %v974_v40 }
 0x175   : > { %v976_v43 = vpop.f32.mrf.mxu0 }
 0x176   : > { %1161 = vst [vmem:[#allocation2 + $0xc0] sm:$0xff] %v1129_v36  ;;  %v1130_v45 = vadd.f32 %v1088_v41, %v424_v39  ;;  %v1090_v35 = vadd.f32 %v1089_v17, %v976_v43 }
 0x177   : > { %v978_v47 = vpop.f32.mrf.mxu0 }
 0x178   : > { %1162 = vst [vmem:[#allocation2 + $0xa8] sm:$0xff] %v1130_v45  ;;  %v1131_v48 = vadd.f32 %v1090_v35, %v425_v42  ;;  %v1092_v49 = vadd.f32 %v1091_v26, %v978_v47 }
 0x179   : > { %v980_v51 = vpop.f32.mrf.mxu0 }
 0x17a   : > { %1163 = vst [vmem:[#allocation2 + $0xd0] sm:$0xff] %v1131_v48  ;;  %v1132_v54 = vadd.f32 %v1092_v49, %v426_v46  ;;  %v1094_v56 = vadd.f32 %v1093_v30, %v980_v51 }
 0x17b   : > { %v984_v57 = vpop.f32.mrf.mxu0 }
 0x17c   : > { %1164 = vst [vmem:[#allocation2 + $0x10] sm:$0xff] %v1132_v54  ;;  %v1133_v58 = vadd.f32 %v1094_v56, %v427_v53  ;;  %v1098_v60 = vadd.f32 %v1097_v44, %v984_v57 }
 0x17d   : > { %v986_v62 = vpop.f32.mrf.mxu0 }
 0x17e   : > { %1165 = vst [vmem:[#allocation2 + $0x28] sm:$0xff] %v1133_v58  ;;  %v1134_v63 = vadd.f32 %v1098_v60, %v428_v52  ;;  %v1100_v1 = vadd.f32 %v1099_v50, %v986_v62 }
 0x17f   : > { %v988_v2 = vpop.f32.mrf.mxu0 }
 0x180   : > { %1166 = vst [vmem:[#allocation2 + $0xa0] sm:$0xff] %v1134_v63  ;;  %v1135_v3 = vadd.f32 %v1100_v1, %v429_v55  ;;  %v1102_v4 = vadd.f32 %v1101_v61, %v988_v2 }
 0x181   : > { %v990_v7 = vpop.f32.mrf.mxu0 }
 0x182   : > { %1167 = vst [vmem:[#allocation2 + $0xf8] sm:$0xff] %v1135_v3  ;;  %v1136_v8 = vadd.f32 %v1102_v4, %v430_v59  ;;  %v1104_v9 = vadd.f32 %v1103_v6, %v990_v7  ;;  %1173 = sbr.rel (%p1554_p11) target bundleno = 420 (0x1a4), region = 66 }
 0x184   : > { %1168 = vst [vmem:[#allocation2 + $0x20] sm:$0xff] %v1136_v8  ;;  %v1137_v5 = vadd.f32 %v1104_v9, %v431_v0 }
 0x186   : > { %1169 = vst [vmem:[#allocation2 + $0x98] sm:$0xff] %v1137_v5 }
 0x187   : > { %v1208_v11 = vlaneseq  ;;  %v1206_v13 = vld [vmem:[%s2157_s2] sm:$0x3]  ;;  %v1174_v14 = vld [vmem:[#allocation2 + $0xb0] sm:$0xff]  ;;  %v1176_v18 = vld [vmem:[#allocation2 + $0xd8] sm:$0xff] }
 0x188   : > { %v1175_v16 = vld [vmem:[#allocation2] sm:$0xff]  ;;  %v1177_v15 = vld [vmem:[#allocation2 + $0x18] sm:$0xff]  ;;  %v1178_v19 = vld [vmem:[#allocation2 + $0x50] sm:$0xff] }
 0x189   : > { %v1209_v12 = vshrl.u32 %v1208_v11, 7  ;;  %v1179_v23 = vld [vmem:[#allocation2 + $0x68] sm:$0xff]  ;;  %v1180_v20 = vld [vmem:[#allocation2 + $0x30] sm:$0xff]  ;;  %v1182_v29 = vld [vmem:[#allocation2 + $0x80] sm:$0xff] }
 0x18a   : > { %v1181_v24 = vld [vmem:[#allocation2 + $0x48] sm:$0xff]  ;;  %v1185_v38 = vld [vmem:[#allocation2 + $0xb8] sm:$0xff]  ;;  %v1186_v39 = vld [vmem:[#allocation2 + $0x60] sm:$0xff] }
 0x18b   : > { %v1210_v10 = vsub.s32 0, %v1209_v12  ;;  %v1214_v17 = vsub.s32 1, %v1209_v12  ;;  %v1183_v31 = vld [vmem:[#allocation2 + $0x88] sm:$0xff]  ;;  %v1187_v40 = vld [vmem:[#allocation2 + $0xf0] sm:$0xff]  ;;  %v1189_v45 = vld [vmem:[#allocation2 + $0x78] sm:$0xff] }
 0x18c   : > { %v1184_v32 = vld [vmem:[#allocation2 + $0xe8] sm:$0xff]  ;;  %v1190_v54 = vld [vmem:[#allocation2 + $0x38] sm:$0xff]  ;;  %v1192_v52 = vld [vmem:[#allocation2 + $0x40] sm:$0xff] }
 0x18d   : > { %v2008_v21 = vrot.slane %v1206_v13, %v1210_v10  ;;  %v2010_v22 = vrot.slane %v1206_v13, %v1214_v17  ;;  %v1188_v44 = vld [vmem:[#allocation2 + $0x8] sm:$0xff]  ;;  %v1191_v56 = vld [vmem:[#allocation2 + $0x58] sm:$0xff]  ;;  %v1194_v62 = vld [vmem:[#allocation2 + $0xe0] sm:$0xff] }
 0x18e   : > { %v1193_v55 = vld [vmem:[#allocation2 + $0xc8] sm:$0xff]  ;;  %v1195_v63 = vld [vmem:[#allocation2 + $0x90] sm:$0xff]  ;;  %v1197_v6 = vld [vmem:[#allocation2 + $0xc0] sm:$0xff] }
 0x18f   : > { %v1218_v26 = vadd.f32 %v2008_v21, %v1174_v14  ;;  %v1219_v27 = vadd.f32 %v2010_v22, %v1175_v16  ;;  %v1220_v28 = vadd.f32 %v2008_v21, %v1176_v18  ;;  %v1221_v25 = vadd.f32 %v2010_v22, %v1177_v15  ;;  %v1196_v4 = vld [vmem:[#allocation2 + $0x70] sm:$0xff]  ;;  %v1198_v14 = vld [vmem:[#allocation2 + $0xa8] sm:$0xff] }
 0x190   : > { %v1222_v33 = vadd.f32 %v2008_v21, %v1178_v19  ;;  %v1223_v34 = vadd.f32 %v2010_v22, %v1179_v23  ;;  %v1224_v30 = vadd.f32 %v2008_v21, %v1180_v20  ;;  %v1225_v37 = vadd.f32 %v2010_v22, %v1181_v24  ;;  %v1199_v10 = vld [vmem:[#allocation2 + $0xd0] sm:$0xff]  ;;  %v1201_v23 = vld [vmem:[#allocation2 + $0x28] sm:$0xff]  ;;  %v1202_v20 = vld [vmem:[#allocation2 + $0xa0] sm:$0xff] }
 0x191   : > { %v1250_v36 = vmax.f32 %v1218_v26, 0.0  ;;  %v1251_v41 = vmax.f32 %v1219_v27, 0.0  ;;  %v1252_v42 = vmax.f32 %v1220_v28, 0.0  ;;  %v1253_v43 = vmax.f32 %v1221_v25, 0.0  ;;  %v1200_v16 = vld [vmem:[#allocation2 + $0x10] sm:$0xff]  ;;  %v1203_v24 = vld [vmem:[#allocation2 + $0xf8] sm:$0xff] }
 0x192   : > { %v1254_v35 = vmax.f32 %v1222_v33, 0.0  ;;  %v1255_v46 = vmax.f32 %v1223_v34, 0.0  ;;  %v1256_v47 = vmax.f32 %v1224_v30, 0.0  ;;  %v1257_v48 = vmax.f32 %v1225_v37, 0.0 }
 0x193   : > { %1282 = vst [vmem:[%s2158_s3] sm:$0xff] %v1250_v36  ;;  %1283 = vst [vmem:[%s2158_s3 + $0x8] sm:$0xff] %v1251_v41  ;;  %v1226_v49 = vadd.f32 %v2008_v21, %v1182_v29  ;;  %v1227_v50 = vadd.f32 %v2010_v22, %v1183_v31  ;;  %v1228_v53 = vadd.f32 %v2008_v21, %v1184_v32  ;;  %v1204_v29 = vld [vmem:[#allocation2 + $0x20] sm:$0xff]  ;;  %v1205_v31 = vld [vmem:[#allocation2 + $0x98] sm:$0xff] }
 0x194   : > { %1284 = vst [vmem:[%s2158_s3 + $0x10] sm:$0xff] %v1252_v42  ;;  %1285 = vst [vmem:[%s2158_s3 + $0x18] sm:$0xff] %v1253_v43  ;;  %v1229_v51 = vadd.f32 %v2010_v22, %v1185_v38  ;;  %v1230_v57 = vadd.f32 %v2008_v21, %v1186_v39  ;;  %v1231_v58 = vadd.f32 %v2010_v22, %v1187_v40 }
 0x195   : > { %1286 = vst [vmem:[%s2158_s3 + $0x20] sm:$0xff] %v1254_v35  ;;  %1287 = vst [vmem:[%s2158_s3 + $0x28] sm:$0xff] %v1255_v46  ;;  %v1232_v60 = vadd.f32 %v2008_v21, %v1188_v44  ;;  %v1233_v61 = vadd.f32 %v2010_v22, %v1189_v45  ;;  %v1258_v1 = vmax.f32 %v1226_v49, 0.0  ;;  %v1259_v59 = vmax.f32 %v1227_v50, 0.0 }
 0x196   : > { %1288 = vst [vmem:[%s2158_s3 + $0x30] sm:$0xff] %v1256_v47  ;;  %1289 = vst [vmem:[%s2158_s3 + $0x38] sm:$0xff] %v1257_v48  ;;  %v1260_v2 = vmax.f32 %v1228_v53, 0.0  ;;  %v1261_v3 = vmax.f32 %v1229_v51, 0.0  ;;  %v1262_v0 = vmax.f32 %v1230_v57, 0.0  ;;  %v1263_v7 = vmax.f32 %v1231_v58, 0.0 }
 0x197   : > { %v1264_v8 = vmax.f32 %v1232_v60, 0.0  ;;  %v1265_v9 = vmax.f32 %v1233_v61, 0.0  ;;  %1290 = vst [vmem:[%s2158_s3 + $0x40] sm:$0xff] %v1258_v1  ;;  %1291 = vst [vmem:[%s2158_s3 + $0x48] sm:$0xff] %v1259_v59  ;;  %v1234_v5 = vadd.f32 %v2008_v21, %v1190_v54  ;;  %v1235_v11 = vadd.f32 %v2010_v22, %v1191_v56 }
 0x198   : > { %1292 = vst [vmem:[%s2158_s3 + $0x50] sm:$0xff] %v1260_v2  ;;  %1293 = vst [vmem:[%s2158_s3 + $0x58] sm:$0xff] %v1261_v3  ;;  %v1236_v12 = vadd.f32 %v2008_v21, %v1192_v52  ;;  %v1237_v13 = vadd.f32 %v2010_v22, %v1193_v55  ;;  %v1238_v17 = vadd.f32 %v2008_v21, %v1194_v62 }
 0x199   : > { %1294 = vst [vmem:[%s2158_s3 + $0x60] sm:$0xff] %v1262_v0  ;;  %1295 = vst [vmem:[%s2158_s3 + $0x68] sm:$0xff] %v1263_v7  ;;  %v1239_v18 = vadd.f32 %v2010_v22, %v1195_v63  ;;  %v1240_v15 = vadd.f32 %v2008_v21, %v1196_v4  ;;  %v1241_v19 = vadd.f32 %v2010_v22, %v1197_v6  ;;  %v1266_v26 = vmax.f32 %v1234_v5, 0.0 }
 0x19a   : > { %1296 = vst [vmem:[%s2158_s3 + $0x70] sm:$0xff] %v1264_v8  ;;  %1297 = vst [vmem:[%s2158_s3 + $0x78] sm:$0xff] %v1265_v9  ;;  %v1267_v27 = vmax.f32 %v1235_v11, 0.0  ;;  %v1268_v28 = vmax.f32 %v1236_v12, 0.0  ;;  %v1269_v25 = vmax.f32 %v1237_v13, 0.0  ;;  %v1270_v32 = vmax.f32 %v1238_v17, 0.0 }
 0x19b   : > { %v1271_v33 = vmax.f32 %v1239_v18, 0.0  ;;  %v1272_v34 = vmax.f32 %v1240_v15, 0.0  ;;  %v1273_v30 = vmax.f32 %v1241_v19, 0.0  ;;  %1298 = vst [vmem:[%s2158_s3 + $0x80] sm:$0xff] %v1266_v26  ;;  %v1242_v37 = vadd.f32 %v2008_v21, %v1198_v14 }
 0x19c   : > { %1299 = vst [vmem:[%s2158_s3 + $0x88] sm:$0xff] %v1267_v27  ;;  %1300 = vst [vmem:[%s2158_s3 + $0x90] sm:$0xff] %v1268_v28  ;;  %v1243_v38 = vadd.f32 %v2010_v22, %v1199_v10  ;;  %v1244_v39 = vadd.f32 %v2008_v21, %v1200_v16  ;;  %v1245_v40 = vadd.f32 %v2010_v22, %v1201_v23 }
 0x19d   : > { %1301 = vst [vmem:[%s2158_s3 + $0x98] sm:$0xff] %v1269_v25  ;;  %1302 = vst [vmem:[%s2158_s3 + $0xa0] sm:$0xff] %v1270_v32  ;;  %v1246_v36 = vadd.f32 %v2008_v21, %v1202_v20  ;;  %v1247_v41 = vadd.f32 %v2010_v22, %v1203_v24  ;;  %v1248_v42 = vadd.f32 %v2008_v21, %v1204_v29  ;;  %v1274_v44 = vmax.f32 %v1242_v37, 0.0 }
 0x19e   : > { %1303 = vst [vmem:[%s2158_s3 + $0xa8] sm:$0xff] %v1271_v33  ;;  %1304 = vst [vmem:[%s2158_s3 + $0xb0] sm:$0xff] %v1272_v34  ;;  %v1249_v43 = vadd.f32 %v2010_v22, %v1205_v31  ;;  %v1275_v45 = vmax.f32 %v1243_v38, 0.0  ;;  %v1276_v35 = vmax.f32 %v1244_v39, 0.0  ;;  %v1277_v46 = vmax.f32 %v1245_v40, 0.0 }
 0x19f   : > { %1305 = vst [vmem:[%s2158_s3 + $0xb8] sm:$0xff] %v1273_v30  ;;  %v1278_v47 = vmax.f32 %v1246_v36, 0.0  ;;  %v1279_v48 = vmax.f32 %v1247_v41, 0.0  ;;  %v1280_v49 = vmax.f32 %v1248_v42, 0.0  ;;  %1306 = vst [vmem:[%s2158_s3 + $0xc0] sm:$0xff] %v1274_v44 }
 0x1a0   : > { %v1281_v50 = vmax.f32 %v1249_v43, 0.0  ;;  %1307 = vst [vmem:[%s2158_s3 + $0xc8] sm:$0xff] %v1275_v45  ;;  %1308 = vst [vmem:[%s2158_s3 + $0xd0] sm:$0xff] %v1276_v35 }
 0x1a1   : > { %1309 = vst [vmem:[%s2158_s3 + $0xd8] sm:$0xff] %v1277_v46  ;;  %1310 = vst [vmem:[%s2158_s3 + $0xe0] sm:$0xff] %v1278_v47 }
 0x1a2   : > { %1311 = vst [vmem:[%s2158_s3 + $0xe8] sm:$0xff] %v1279_v48  ;;  %1312 = vst [vmem:[%s2158_s3 + $0xf0] sm:$0xff] %v1280_v49 }
 0x1a3   : > { %1313 = vst [vmem:[%s2158_s3 + $0xf8] sm:$0xff] %v1281_v50 }
 0x1a4 PF: > { %s13_s16 = sadd.s32 1, %s1747_s16   ;;  %s2159_s12 = smov %s1735_s13 }
 0x1a5   : > { %p10_p12 = scmp.ge.s32.totalorder %s13_s16, 8   ;;  %s2160_s13 = smov %s1806_s20 }
 0x1a6   : > { %s2161_s14 = smov %s1743_s15  ;;  %s2162_s15 = smov %s2164_s17 }
 0x1a7   :  { %12 = sbr.rel (!%p10_p12) target bundleno = 3 (0x3), region = 113 }

// kernel: encoder_forward.10
= control target key start
LH: loop header
LB: loop body
LE: loop exit
PB: predicated region body
PF: predicated region fallthrough
CT: control target
= control target key end

     0   :  { %s1407_s12 = smov 0   ;;  %s1409_s13 = smov 0   ;;  %s1611_s0 = inlined_call_operand.vmem [shape: bf16[64,2304], index: 0, kind: input, shape index: {}]   ;;  %s1612_s1 = inlined_call_operand.vmem [shape: bf16[2304,256], index: 1, kind: input, shape index: {}]   ;;  %s1613_s2 = inlined_call_operand.vmem [shape: f32[1,256], index: 2, kind: input, shape index: {}]   ;;  %s1614_s3 = inlined_call_operand.vmem [shape: f32[64,256], index: 3, kind: output, shape index: {}]  }
   0x1   :  { %s1411_s14 = smov 0   ;;  %s1413_s15 = smov 0  }
   0x2   :  { %s1415_s16 = smov 0  }
   0x3 LB: > { %s25_s17 = sadd.s32 1, %s1379_s15  ;;  %p48_p1 = scmp.ne.s32.totalorder %s1371_s13, %s1367_s12  ;;  %s1383_s16 = sphi %s1415_s16, %s13_s16   ;;  %s1379_s15 = sphi %s1413_s15, %s1618_s15   ;;  %s1375_s14 = sphi %s1411_s14, %s1617_s14   ;;  %s1371_s13 = sphi %s1409_s13, %s1616_s13   ;;  %s1367_s12 = sphi %s1407_s12, %s1615_s12  }
   0x4   : > { %p26_p0 = scmp.ge.s32.totalorder %s25_s17, 6  ;;  %p49_p2 = scmp.eq.s32.totalorder %s1383_s16, 0 }
   0x5   : > { %s41_s19 = sadd.s32 1, %s1371_s13  ;;  %p1124_p5 = scmp.ge.s32.totalorder %s1383_s16, 6 }
   0x6   : > { %s1620_s17 = smov (%p26_p0, %s25_s17), 0  ;;  %p50_p3 = por %p49_p2, %p48_p1 }
   0x7   : > { %s37_s18 = ssub.s32 %s1379_s15, %s1620_s17  ;;  %164 = sbr.rel (%p1124_p5) target bundleno = 26 (0x1a), region = 20 }
   0x8   : > { %p39_p4 = scmp.eq.s32.totalorder %s37_s18, 0 }
   0xa   : > { %s1442_s20 = scalar_select %p39_p4, %s1371_s13, %s41_s19  }
   0xc   : > { %167 = sbr.rel (!%p50_p3) target bundleno = 26 (0x1a), region = 24  ;;  %s169_s21 = sand.u32 (%p50_p3), 1, %s1371_s13  }
   0xd   : > { %s1211_s22 = smul.u32 (%p50_p3), 12, %s1379_s15 }
   0xe   : > { %s1213_s23 = smul.u32 (%p50_p3), 96, %s169_s21 }
   0xf   : > { %s1450_s26 = scalar_lea.vmem (%p50_p3), %s1611_s0, %s1211_s22 }
  0x10   : > { %v192_v0 = vld [vmem:[%s1450_s26] sm:$0xff] (%p50_p3)  ;;  %v194_v1 = vld [vmem:[%s1450_s26 + $0x48] sm:$0xff] (%p50_p3)  ;;  %v196_v2 = vld [vmem:[%s1450_s26 + $0x90] sm:$0xff] (%p50_p3)  ;;  %s171_s27 = scalar_lea.vmem (%p50_p3), [#allocation3], %s1213_s23 }
  0x11   : > { %193 = vst [vmem:[%s171_s27] sm:$0xff] %v192_v0  ;;  %195 = vst [vmem:[%s171_s27 + $0xc] sm:$0xff] %v194_v1  ;;  %v198_v3 = vld [vmem:[%s1450_s26 + $0xd8] sm:$0xff]  ;;  %v200_v4 = vld [vmem:[%s1450_s26 + $0x120] sm:$0xff] }
  0x12   : > { %197 = vst [vmem:[%s171_s27 + $0x18] sm:$0xff] %v196_v2  ;;  %v202_v5 = vld [vmem:[%s1450_s26 + $0x168] sm:$0xff]  ;;  %199 = vst [vmem:[%s171_s27 + $0x24] sm:$0xff] %v198_v3  ;;  %v204_v6 = vld [vmem:[%s1450_s26 + $0x1b0] sm:$0xff] }
  0x13   : > { %201 = vst [vmem:[%s171_s27 + $0x30] sm:$0xff] %v200_v4  ;;  %203 = vst [vmem:[%s171_s27 + $0x3c] sm:$0xff] %v202_v5  ;;  %v206_v7 = vld [vmem:[%s1450_s26 + $0x1f8] sm:$0xff]  ;;  %v1126_v8 = vld [vmem:[%s1450_s26 + $0x8] sm:$0xf] }
  0x14   : > { %205 = vst [vmem:[%s171_s27 + $0x48] sm:$0xff] %v204_v6  ;;  %207 = vst [vmem:[%s171_s27 + $0x54] sm:$0xff] %v206_v7  ;;  %v1128_v9 = vld [vmem:[%s1450_s26 + $0x50] sm:$0xf]  ;;  %v1130_v10 = vld [vmem:[%s1450_s26 + $0x98] sm:$0xf] }
  0x15   : > { %1127 = vst [vmem:[%s171_s27 + $0x8] sm:$0xf] %v1126_v8  ;;  %v1132_v11 = vld [vmem:[%s1450_s26 + $0xe0] sm:$0xf]  ;;  %1129 = vst [vmem:[%s171_s27 + $0x14] sm:$0xf] %v1128_v9 }
  0x16   : > { %1131 = vst [vmem:[%s171_s27 + $0x20] sm:$0xf] %v1130_v10  ;;  %1133 = vst [vmem:[%s171_s27 + $0x2c] sm:$0xf] %v1132_v11  ;;  %v1134_v12 = vld [vmem:[%s1450_s26 + $0x128] sm:$0xf] }
  0x17   : > { %v1136_v13 = vld [vmem:[%s1450_s26 + $0x170] sm:$0xf]  ;;  %v1138_v14 = vld [vmem:[%s1450_s26 + $0x1b8] sm:$0xf]  ;;  %1135 = vst [vmem:[%s171_s27 + $0x38] sm:$0xf] %v1134_v12 }
  0x18   : > { %1137 = vst [vmem:[%s171_s27 + $0x44] sm:$0xf] %v1136_v13  ;;  %1139 = vst [vmem:[%s171_s27 + $0x50] sm:$0xf] %v1138_v14  ;;  %v1140_v15 = vld [vmem:[%s1450_s26 + $0x200] sm:$0xf] }
  0x19   : > { %1141 = vst [vmem:[%s171_s27 + $0x5c] sm:$0xf] %v1140_v15 }
  0x1a PF: > { %p1142_p6 = scmp.ge.s32.totalorder %s1383_s16, 1  ;;  %p251_p7 = scmp.lt.s32.totalorder %s1383_s16, 7 }
  0x1c   : > { %p252_p8 = pnand %p1142_p6, %p251_p7 }
  0x1d   : > { %s258_s28 = sand.u32 (!%p252_p8), 1, %s1367_s12   ;;  %s302_s29 = smul.u32 (!%p252_p8), 48, %s1375_s14 }
  0x1e   : > { %255 = sbr.rel (%p252_p8) target bundleno = 362 (0x16a), region = 54  ;;  %p1145_p10 = scmp.ne.s32.totalorder (!%p252_p8), %s1375_s14, 0 }
  0x1f   : > { %s1214_s30 = smul.u32 (!%p252_p8), 96, %s258_s28  ;;  %p304_p9 = scmp.lt.s32.totalorder (!%p252_p8), %s302_s29, 287 }
  0x21   : > { %s1477_s8 = scalar_lea.vmem (!%p252_p8), [#allocation3], %s1214_s30 }
  0x23   : > { %s1622_s29 = smov (!%p304_p9, %s302_s29), 287  ;;  %335 = sbr.rel (%p1145_p10) target bundleno = 49 (0x31), region = 62 }
  0x24   : > { %s1212_s4 = sshll.u32 %s1622_s29, 3 }
  0x25   : > { %s1475_s7 = scalar_lea.vmem %s1612_s1, %s1212_s4 }
  0x28   : > { %v1385_v16 = vmov 0.0  }
  0x29   : > { %336 = vst [vmem:[#allocation2 + $0x30] sm:$0xff] %v1385_v16  ;;  %337 = vst [vmem:[#allocation2] sm:$0xff] %v1385_v16 }
  0x2a   : > { %338 = vst [vmem:[#allocation2 + $0x58] sm:$0xff] %v1385_v16  ;;  %339 = vst [vmem:[#allocation2 + $0x18] sm:$0xff] %v1385_v16 }
  0x2b   : > { %340 = vst [vmem:[#allocation2 + $0x50] sm:$0xff] %v1385_v16  ;;  %341 = vst [vmem:[#allocation2 + $0x68] sm:$0xff] %v1385_v16 }
  0x2c   : > { %342 = vst [vmem:[#allocation2 + $0x8] sm:$0xff] %v1385_v16  ;;  %343 = vst [vmem:[#allocation2 + $0x48] sm:$0xff] %v1385_v16 }
  0x2d   : > { %344 = vst [vmem:[#allocation2 + $0x40] sm:$0xff] %v1385_v16  ;;  %345 = vst [vmem:[#allocation2 + $0x20] sm:$0xff] %v1385_v16 }
  0x2e   : > { %346 = vst [vmem:[#allocation2 + $0x10] sm:$0xff] %v1385_v16  ;;  %347 = vst [vmem:[#allocation2 + $0x38] sm:$0xff] %v1385_v16 }
  0x2f   : > { %348 = vst [vmem:[#allocation2 + $0x60] sm:$0xff] %v1385_v16  ;;  %349 = vst [vmem:[#allocation2 + $0x70] sm:$0xff] %v1385_v16 }
  0x30   : > { %350 = vst [vmem:[#allocation2 + $0x78] sm:$0xff] %v1385_v16  ;;  %351 = vst [vmem:[#allocation2 + $0x28] sm:$0xff] %v1385_v16 }
  0x31 PF: > { %v1257_v17 = vld [vmem:[%s1475_s7 + $0x74] ss:$8 sps:$4 sm:$0xff]   ;;  %v1259_v18 = vld [vmem:[%s1475_s7 + $0x70] ss:$8 sps:$4 sm:$0xff]   ;;  %v1386_v19 = vmov 0   ;;  %p1206_p11 = scmp.ne.s32.totalorder %s1375_s14, 5 }
  0x32   : > { %841 = vmatprep.mubr.bf16.mxu1 %v1386_v19  ;;  %736 = vmatprep.subr.bf16.mxu0 %v1257_v17  ;;  %v1260_v20 = vld [vmem:[%s1475_s7 + $0x64] ss:$8 sps:$4 sm:$0xff]   ;;  %v1262_v21 = vld [vmem:[%s1475_s7 + $0x60] ss:$8 sps:$4 sm:$0xff]   ;;  %v1263_v22 = vld [vmem:[%s1475_s7 + $0x54] ss:$8 sps:$4 sm:$0xff]  }
  0x33   : > { %737 = vmatpush1.bf16.msra.mxu0 %v1259_v18  ;;  %v1265_v23 = vld [vmem:[%s1475_s7 + $0x50] ss:$8 sps:$4 sm:$0xff]   ;;  %v1266_v24 = vld [vmem:[%s1475_s7 + $0x44] ss:$8 sps:$4 sm:$0xff]   ;;  %v1278_v25 = vld [vmem:[%s1475_s7 + $0x174] ss:$8 sps:$4 sm:$0xff]  }
  0x34   : > { %738 = vmatprep.subr.bf16.mxu0 %v1260_v20  ;;  %v1280_v26 = vld [vmem:[%s1475_s7 + $0x170] ss:$8 sps:$4 sm:$0xff]   ;;  %v1268_v27 = vld [vmem:[%s1475_s7 + $0x40] ss:$8 sps:$4 sm:$0xff]   ;;  %v1269_v28 = vld [vmem:[%s1475_s7 + $0x34] ss:$8 sps:$4 sm:$0xff]   ;;  %809 = vmatprep.subr.bf16.mxu1 %v1278_v25 }
  0x35   : > { %v1284_v29 = vld [vmem:[%s1475_s7 + $0x164] ss:$8 sps:$4 sm:$0xff]   ;;  %810 = vmatpush1.bf16.msra.mxu1 %v1280_v26  ;;  %v1286_v30 = vld [vmem:[%s1475_s7 + $0x160] ss:$8 sps:$4 sm:$0xff]   ;;  %v1271_v31 = vld [vmem:[%s1475_s7 + $0x30] ss:$8 sps:$4 sm:$0xff]  }
  0x36   : > { %811 = vmatprep.subr.bf16.mxu1 %v1284_v29  ;;  %v1290_v32 = vld [vmem:[%s1475_s7 + $0x154] ss:$8 sps:$4 sm:$0xff]   ;;  %v1272_v33 = vld [vmem:[%s1475_s7 + $0x24] ss:$8 sps:$4 sm:$0xff]   ;;  %v1292_v34 = vld [vmem:[%s1475_s7 + $0x150] ss:$8 sps:$4 sm:$0xff]  }
  0x37   : > { %739 = vmatpush1.bf16.msra.mxu0 %v1262_v21  ;;  %v1296_v35 = vld [vmem:[%s1475_s7 + $0x144] ss:$8 sps:$4 sm:$0xff]   ;;  %v1274_v36 = vld [vmem:[%s1475_s7 + $0x20] ss:$8 sps:$4 sm:$0xff]   ;;  %v1275_v37 = vld [vmem:[%s1475_s7 + $0x14] ss:$8 sps:$4 sm:$0xff]  }
  0x38   : > { %740 = vmatprep.subr.bf16.mxu0 %v1263_v22  ;;  %v1298_v38 = vld [vmem:[%s1475_s7 + $0x140] ss:$8 sps:$4 sm:$0xff]   ;;  %v1302_v39 = vld [vmem:[%s1475_s7 + $0x134] ss:$8 sps:$4 sm:$0xff]   ;;  %v1277_v40 = vld [vmem:[%s1475_s7 + $0x10] ss:$8 sps:$4 sm:$0xff]  }
  0x39   : > { %812 = vmatpush1.bf16.msra.mxu1 %v1286_v30  ;;  %v1281_v41 = vld [vmem:[%s1475_s7 + $0x4] ss:$8 sps:$4 sm:$0xff]   ;;  %v1304_v42 = vld [vmem:[%s1475_s7 + $0x130] ss:$8 sps:$4 sm:$0xff]   ;;  %v1283_v44 = vld [vmem:[%s1475_s7] ss:$8 sps:$4 sm:$0xff]  }
  0x3a   : > { %813 = vmatprep.subr.bf16.mxu1 %v1290_v32  ;;  %v1308_v43 = vld [vmem:[%s1475_s7 + $0x124] ss:$8 sps:$4 sm:$0xff]   ;;  %v1287_v45 = vld [vmem:[%s1475_s7 + $0xf4] ss:$8 sps:$4 sm:$0xff]   ;;  %v1310_v46 = vld [vmem:[%s1475_s7 + $0x120] ss:$8 sps:$4 sm:$0xff]  }
  0x3b   : > { %741 = vmatpush1.bf16.msra.mxu0 %v1265_v23  ;;  %v1314_v47 = vld [vmem:[%s1475_s7 + $0x114] ss:$8 sps:$4 sm:$0xff]   ;;  %v1289_v48 = vld [vmem:[%s1475_s7 + $0xf0] ss:$8 sps:$4 sm:$0xff]   ;;  %v1293_v49 = vld [vmem:[%s1475_s7 + $0xe4] ss:$8 sps:$4 sm:$0xff]  }
  0x3c   : > { %742 = vmatprep.subr.bf16.mxu0 %v1266_v24  ;;  %v1316_v50 = vld [vmem:[%s1475_s7 + $0x110] ss:$8 sps:$4 sm:$0xff]   ;;  %v1320_v51 = vld [vmem:[%s1475_s7 + $0x104] ss:$8 sps:$4 sm:$0xff]   ;;  %v1295_v53 = vld [vmem:[%s1475_s7 + $0xe0] ss:$8 sps:$4 sm:$0xff]  }
  0x3d   : > { %814 = vmatpush1.bf16.msra.mxu1 %v1292_v34  ;;  %v1332_v52 = vld [vmem:[%s1477_s8 + $0x4] ss:$12 sps:$4 sm:$0xff]   ;;  %v1299_v54 = vld [vmem:[%s1475_s7 + $0xd4] ss:$8 sps:$4 sm:$0xff]   ;;  %v1322_v55 = vld [vmem:[%s1475_s7 + $0x100] ss:$8 sps:$4 sm:$0xff]  }
  0x3e   : > { %815 = vmatprep.subr.bf16.mxu1 %v1296_v35  ;;  %768 = vmatprep.mubr.bf16.mxu0 %v1332_v52  ;;  %v1301_v56 = vld [vmem:[%s1475_s7 + $0xd0] ss:$8 sps:$4 sm:$0xff]   ;;  %v1305_v57 = vld [vmem:[%s1475_s7 + $0xc4] ss:$8 sps:$4 sm:$0xff]   ;;  %v1326_v58 = vld [vmem:[%s1477_s8 + $0x8] ss:$12 sps:$4 sm:$0xff]  }
  0x3f   : > { %743 = vmatpush1.bf16.msra.mxu0 %v1268_v27  ;;  %v1307_v59 = vld [vmem:[%s1475_s7 + $0xc0] ss:$8 sps:$4 sm:$0xff]   ;;  %v1311_v60 = vld [vmem:[%s1475_s7 + $0xb4] ss:$8 sps:$4 sm:$0xff]   ;;  %v1313_v61 = vld [vmem:[%s1475_s7 + $0xb0] ss:$8 sps:$4 sm:$0xff]  }
  0x40   : > { %744 = vmatprep.subr.bf16.mxu0 %v1269_v28  ;;  %v1317_v62 = vld [vmem:[%s1475_s7 + $0xa4] ss:$8 sps:$4 sm:$0xff]   ;;  %v1319_v0 = vld [vmem:[%s1475_s7 + $0xa0] ss:$8 sps:$4 sm:$0xff]   ;;  %v1323_v1 = vld [vmem:[%s1475_s7 + $0x94] ss:$8 sps:$4 sm:$0xff]  }
  0x41   : > { %816 = vmatpush1.bf16.msra.mxu1 %v1298_v38  ;;  %v1333_v63 = vld [vmem:[%s1477_s8 + $0x20] ss:$12 sps:$4 sm:$0xff]   ;;  %v1325_v2 = vld [vmem:[%s1475_s7 + $0x90] ss:$8 sps:$4 sm:$0xff]   ;;  %v1334_v7 = vld [vmem:[%s1477_s8 + $0x1c] ss:$12 sps:$4 sm:$0xff]  }
  0x42   : > { %817 = vmatprep.subr.bf16.mxu1 %v1302_v39  ;;  %v1327_v3 = vld [vmem:[%s1475_s7 + $0x84] ss:$8 sps:$4 sm:$0xff]   ;;  %v1329_v5 = vld [vmem:[%s1475_s7 + $0x80] ss:$8 sps:$4 sm:$0xff]   ;;  %v1341_v8 = vld [vmem:[%s1477_s8 + $0x50] ss:$12 sps:$4 sm:$0xff]  }
  0x43   : > { %745 = vmatpush1.bf16.msra.mxu0 %v1271_v31  ;;  %v1337_v4 = vld [vmem:[%s1477_s8 + $0x38] ss:$12 sps:$4 sm:$0xff]   ;;  %v1330_v6 = vld [vmem:[%s1477_s8] ss:$12 sps:$4 sm:$0xff]   ;;  %v1340_v11 = vld [vmem:[%s1477_s8 + $0x30] ss:$12 sps:$4 sm:$0xff]  }
  0x44   : > { %746 = vmatprep.subr.bf16.mxu0 %v1272_v33  ;;  %v1336_v9 = vld [vmem:[%s1477_s8 + $0x18] ss:$12 sps:$4 sm:$0xff]   ;;  %v1338_v10 = vld [vmem:[%s1477_s8 + $0x34] ss:$12 sps:$4 sm:$0xff]   ;;  %v359_v52 = vld [vmem:[#allocation2 + $0x48] sm:$0xff] }
  0x45   : > { %818 = vmatpush1.bf16.msra.mxu1 %v1304_v42  ;;  %v1342_v12 = vld [vmem:[%s1477_s8 + $0x4c] ss:$12 sps:$4 sm:$0xff]   ;;  %v1344_v13 = vld [vmem:[%s1477_s8 + $0x48] ss:$12 sps:$4 sm:$0xff]   ;;  %v353_v25 = vld [vmem:[#allocation2] sm:$0xff] }
  0x46   : > { %819 = vmatprep.subr.bf16.mxu1 %v1308_v43  ;;  %v352_v22 = vld [vmem:[#allocation2 + $0x30] sm:$0xff]  ;;  %v354_v30 = vld [vmem:[#allocation2 + $0x58] sm:$0xff]  ;;  %v357_v43 = vld [vmem:[#allocation2 + $0x68] sm:$0xff] }
  0x47   : > { %747 = vmatpush1.bf16.msra.mxu0 %v1274_v36  ;;  %v355_v34 = vld [vmem:[#allocation2 + $0x18] sm:$0xff]  ;;  %v356_v39 = vld [vmem:[#allocation2 + $0x50] sm:$0xff] }
  0x48   : > { %748 = vmatprep.subr.bf16.mxu0 %v1275_v37 }
  0x49   : > { %820 = vmatpush1.bf16.msra.mxu1 %v1310_v46 }
  0x4a   : > { %821 = vmatprep.subr.bf16.mxu1 %v1314_v47 }
  0x4b   : > { %749 = vmatpush1.bf16.msra.mxu0 %v1277_v40 }
  0x4c   : > { %750 = vmatprep.subr.bf16.mxu0 %v1281_v41 }
  0x4d   : > { %822 = vmatpush1.bf16.msra.mxu1 %v1316_v50 }
  0x4e   : > { %823 = vmatprep.subr.bf16.mxu1 %v1320_v51 }
  0x4f   : > { %751 = vmatpush1.bf16.msra.mxu0 %v1283_v44 }
  0x50   : > { %752 = vmatprep.subr.bf16.mxu0 %v1287_v45 }
  0x51   : > { %824 = vmatpush1.bf16.msra.mxu1 %v1322_v55 }
  0x53   : > { %753 = vmatpush2.bf16.msra.mxu0 %v1289_v48  ;;  %v358_v48 = vld [vmem:[#allocation2 + $0x8] sm:$0xff] }
  0x54   : > { %754 = vmatprep.subr.bf16.mxu0 %v1293_v49  ;;  %842 = vmatmul.mubr.bf16.vlgmr.msra.gmra.mxu1 %v1326_v58 }
  0x55   : > { %851 = vmatprep.mubr.bf16.mxu1 %v1386_v19 }
  0x57   : > { %755 = vmatpush2.bf16.msra.mxu0 %v1295_v53 }
  0x58   : > { %756 = vmatprep.subr.bf16.mxu0 %v1299_v54 }
  0x5b   : > { %757 = vmatpush2.bf16.msra.mxu0 %v1301_v56 }
  0x5c   : > { %758 = vmatprep.subr.bf16.mxu0 %v1305_v57  ;;  %852 = vmatmul.mubr.bf16.gmra.mxu1 %v1333_v63  ;;  %v360_v57 = vld [vmem:[#allocation2 + $0x40] sm:$0xff] }
  0x5d   : > { %861 = vmatprep.mubr.bf16.mxu1 %v1386_v19 }
  0x5f   : > { %759 = vmatpush2.bf16.msra.mxu0 %v1307_v59 }
  0x60   : > { %760 = vmatprep.subr.bf16.mxu0 %v1311_v60 }
  0x63   : > { %761 = vmatpush2.bf16.msra.mxu0 %v1313_v61  ;;  %v361_v61 = vld [vmem:[#allocation2 + $0x20] sm:$0xff] }
  0x64   : > { %762 = vmatprep.subr.bf16.mxu0 %v1317_v62  ;;  %862 = vmatmul.mubr.bf16.gmra.mxu1 %v1337_v4 }
  0x65   : > { %871 = vmatprep.mubr.bf16.mxu1 %v1386_v19 }
  0x67   : > { %763 = vmatpush2.bf16.msra.mxu0 %v1319_v0 }
  0x68   : > { %764 = vmatprep.subr.bf16.mxu0 %v1323_v1 }
  0x6b   : > { %765 = vmatpush2.bf16.msra.mxu0 %v1325_v2  ;;  %v362_v2 = vld [vmem:[#allocation2 + $0x10] sm:$0xff] }
  0x6c   : > { %766 = vmatprep.subr.bf16.mxu0 %v1327_v3  ;;  %872 = vmatmul.mubr.bf16.gmra.mxu1 %v1341_v8 }
  0x6f   : > { %767 = vmatpush2.bf16.msra.mxu0 %v1329_v5 }
  0x72   : > { %769 = vmatmul.mubr.bf16.vlgmr.msra.gmra.mxu0 %v1330_v6 }
  0x73   : > { %778 = vmatprep.mubr.bf16.mxu0 %v1334_v7  ;;  %v363_v7 = vld [vmem:[#allocation2 + $0x38] sm:$0xff] }
  0x7a   : > { %779 = vmatmul.mubr.bf16.gmra.mxu0 %v1336_v9 }
  0x7b   : > { %788 = vmatprep.mubr.bf16.mxu0 %v1338_v10 }
  0x82   : > { %789 = vmatmul.mubr.bf16.gmra.mxu0 %v1340_v11  ;;  %v364_v11 = vld [vmem:[#allocation2 + $0x60] sm:$0xff] }
  0x83   : > { %798 = vmatprep.mubr.bf16.mxu0 %v1342_v12 }
  0x8a   : > { %799 = vmatmul.mubr.bf16.gmra.mxu0 %v1344_v13 }
 0x114   : > { %v843_v14 = vpop.f32.mrf.mxu1 }
 0x116   : > { %v845_v15 = vpop.f32.mrf.mxu1 }
 0x118   : > { %v847_v16 = vpop.f32.mrf.mxu1 }
 0x11a   : > { %v849_v17 = vpop.f32.mrf.mxu1 }
 0x11c   : > { %v853_v18 = vpop.f32.mrf.mxu1 }
 0x11e   : > { %v855_v19 = vpop.f32.mrf.mxu1 }
 0x120   : > { %v857_v20 = vpop.f32.mrf.mxu1 }
 0x122   : > { %v859_v21 = vpop.f32.mrf.mxu1 }
 0x124   : > { %v863_v27 = vpop.f32.mrf.mxu1 }
 0x126   : > { %v865_v36 = vpop.f32.mrf.mxu1 }
 0x128   : > { %v867_v45 = vpop.f32.mrf.mxu1 }
 0x12a   : > { %v869_v54 = vpop.f32.mrf.mxu1 }
 0x12c   : > { %v873_v63 = vpop.f32.mrf.mxu1 }
 0x12e   : > { %v875_v6 = vpop.f32.mrf.mxu1 }
 0x132   : > { %v770_v23 = vpop.f32.mrf.mxu0 }
 0x133   : > { %v844_v24 = vadd.f32 %v843_v14, %v770_v23 }
 0x134   : > { %v772_v26 = vpop.f32.mrf.mxu0 }
 0x135   : > { %v882_v28 = vadd.f32 %v844_v24, %v352_v22  ;;  %v846_v29 = vadd.f32 %v845_v15, %v772_v26  ;;  %v877_v15 = vpop.f32.mrf.mxu1 }
 0x136   : > { %v774_v31 = vpop.f32.mrf.mxu0 }
 0x137   : > { %898 = vst [vmem:[#allocation2 + $0x30] sm:$0xff] %v882_v28  ;;  %v883_v32 = vadd.f32 %v846_v29, %v353_v25  ;;  %v848_v33 = vadd.f32 %v847_v16, %v774_v31  ;;  %v365_v16 = vld [vmem:[#allocation2 + $0x70] sm:$0xff]  ;;  %v879_v24 = vpop.f32.mrf.mxu1  ;;  %v367_v25 = vld [vmem:[#allocation2 + $0x28] sm:$0xff] }
 0x138   : > { %v776_v35 = vpop.f32.mrf.mxu0 }
 0x139   : > { %899 = vst [vmem:[#allocation2] sm:$0xff] %v883_v32  ;;  %v884_v37 = vadd.f32 %v848_v33, %v354_v30  ;;  %v850_v38 = vadd.f32 %v849_v17, %v776_v35 }
 0x13a   : > { %v780_v40 = vpop.f32.mrf.mxu0 }
 0x13b   : > { %900 = vst [vmem:[#allocation2 + $0x58] sm:$0xff] %v884_v37  ;;  %v885_v41 = vadd.f32 %v850_v38, %v355_v34  ;;  %v854_v42 = vadd.f32 %v853_v18, %v780_v40 }
 0x13c   : > { %v782_v44 = vpop.f32.mrf.mxu0 }
 0x13d   : > { %901 = vst [vmem:[#allocation2 + $0x18] sm:$0xff] %v885_v41  ;;  %v886_v46 = vadd.f32 %v854_v42, %v356_v39  ;;  %v856_v47 = vadd.f32 %v855_v19, %v782_v44 }
 0x13e   : > { %v784_v49 = vpop.f32.mrf.mxu0 }
 0x13f   : > { %902 = vst [vmem:[#allocation2 + $0x50] sm:$0xff] %v886_v46  ;;  %v887_v50 = vadd.f32 %v856_v47, %v357_v43  ;;  %v858_v51 = vadd.f32 %v857_v20, %v784_v49  ;;  %v366_v20 = vld [vmem:[#allocation2 + $0x78] sm:$0xff] }
 0x140   : > { %v786_v53 = vpop.f32.mrf.mxu0 }
 0x141   : > { %903 = vst [vmem:[#allocation2 + $0x68] sm:$0xff] %v887_v50  ;;  %v888_v55 = vadd.f32 %v858_v51, %v358_v48  ;;  %v860_v56 = vadd.f32 %v859_v21, %v786_v53 }
 0x142   : > { %v790_v58 = vpop.f32.mrf.mxu0 }
 0x143   : > { %904 = vst [vmem:[#allocation2 + $0x8] sm:$0xff] %v888_v55  ;;  %v889_v59 = vadd.f32 %v860_v56, %v359_v52  ;;  %v864_v60 = vadd.f32 %v863_v27, %v790_v58 }
 0x144   : > { %v792_v62 = vpop.f32.mrf.mxu0 }
 0x145   : > { %905 = vst [vmem:[#allocation2 + $0x48] sm:$0xff] %v889_v59  ;;  %v890_v0 = vadd.f32 %v864_v60, %v360_v57  ;;  %v866_v1 = vadd.f32 %v865_v36, %v792_v62 }
 0x146   : > { %v794_v3 = vpop.f32.mrf.mxu0 }
 0x147   : > { %906 = vst [vmem:[#allocation2 + $0x40] sm:$0xff] %v890_v0  ;;  %v891_v4 = vadd.f32 %v866_v1, %v361_v61  ;;  %v868_v5 = vadd.f32 %v867_v45, %v794_v3 }
 0x148   : > { %v796_v8 = vpop.f32.mrf.mxu0 }
 0x149   : > { %907 = vst [vmem:[#allocation2 + $0x20] sm:$0xff] %v891_v4  ;;  %v892_v9 = vadd.f32 %v868_v5, %v362_v2  ;;  %v870_v10 = vadd.f32 %v869_v54, %v796_v8 }
 0x14a   : > { %v800_v12 = vpop.f32.mrf.mxu0 }
 0x14b   : > { %908 = vst [vmem:[#allocation2 + $0x10] sm:$0xff] %v892_v9  ;;  %v893_v13 = vadd.f32 %v870_v10, %v363_v7  ;;  %v874_v14 = vadd.f32 %v873_v63, %v800_v12 }
 0x14c   : > { %v802_v17 = vpop.f32.mrf.mxu0 }
 0x14d   : > { %909 = vst [vmem:[#allocation2 + $0x38] sm:$0xff] %v893_v13  ;;  %v894_v18 = vadd.f32 %v874_v14, %v364_v11  ;;  %v876_v19 = vadd.f32 %v875_v6, %v802_v17 }
 0x14e   : > { %v804_v21 = vpop.f32.mrf.mxu0 }
 0x14f   : > { %910 = vst [vmem:[#allocation2 + $0x60] sm:$0xff] %v894_v18  ;;  %v895_v22 = vadd.f32 %v876_v19, %v365_v16  ;;  %v878_v23 = vadd.f32 %v877_v15, %v804_v21 }
 0x150   : > { %v806_v26 = vpop.f32.mrf.mxu0 }
 0x151   : > { %911 = vst [vmem:[#allocation2 + $0x70] sm:$0xff] %v895_v22  ;;  %v896_v27 = vadd.f32 %v878_v23, %v366_v20  ;;  %v880_v28 = vadd.f32 %v879_v24, %v806_v26  ;;  %917 = sbr.rel (%p1206_p11) target bundleno = 362 (0x16a), region = 66 }
 0x153   : > { %912 = vst [vmem:[#allocation2 + $0x78] sm:$0xff] %v896_v27  ;;  %v897_v29 = vadd.f32 %v880_v28, %v367_v25 }
 0x155   : > { %913 = vst [vmem:[#allocation2 + $0x28] sm:$0xff] %v897_v29 }
 0x156   : > { %v936_v30 = vlaneseq  ;;  %v934_v32 = vld [vmem:[%s1613_s2] sm:$0x3]  ;;  %v918_v33 = vld [vmem:[#allocation2 + $0x30] sm:$0xff]  ;;  %v920_v37 = vld [vmem:[#allocation2 + $0x58] sm:$0xff] }
 0x157   : > { %v919_v35 = vld [vmem:[#allocation2] sm:$0xff]  ;;  %v921_v38 = vld [vmem:[#allocation2 + $0x18] sm:$0xff]  ;;  %v922_v39 = vld [vmem:[#allocation2 + $0x50] sm:$0xff] }
 0x158   : > { %v937_v31 = vshrl.u32 %v936_v30, 7  ;;  %v923_v42 = vld [vmem:[#allocation2 + $0x68] sm:$0xff]  ;;  %v926_v49 = vld [vmem:[#allocation2 + $0x40] sm:$0xff]  ;;  %v928_v51 = vld [vmem:[#allocation2 + $0x10] sm:$0xff] }
 0x159   : > { %v924_v43 = vld [vmem:[#allocation2 + $0x8] sm:$0xff]  ;;  %v927_v50 = vld [vmem:[#allocation2 + $0x20] sm:$0xff]  ;;  %v929_v56 = vld [vmem:[#allocation2 + $0x38] sm:$0xff] }
 0x15a   : > { %v938_v34 = vsub.s32 0, %v937_v31  ;;  %v942_v36 = vsub.s32 1, %v937_v31  ;;  %v925_v44 = vld [vmem:[#allocation2 + $0x48] sm:$0xff]  ;;  %v930_v57 = vld [vmem:[#allocation2 + $0x60] sm:$0xff]  ;;  %v931_v58 = vld [vmem:[#allocation2 + $0x70] sm:$0xff] }
 0x15b   : > { %v932_v63 = vld [vmem:[#allocation2 + $0x78] sm:$0xff] }
 0x15c   : > { %v939_v40 = vrot.slane %v934_v32, %v938_v34  ;;  %v943_v41 = vrot.slane %v934_v32, %v942_v36  ;;  %v933_v0 = vld [vmem:[#allocation2 + $0x28] sm:$0xff] }
 0x15e   : > { %v946_v45 = vadd.f32 %v939_v40, %v918_v33  ;;  %v947_v46 = vadd.f32 %v943_v41, %v919_v35  ;;  %v948_v47 = vadd.f32 %v939_v40, %v920_v37  ;;  %v949_v48 = vadd.f32 %v943_v41, %v921_v38 }
 0x15f   : > { %v950_v52 = vadd.f32 %v939_v40, %v922_v39  ;;  %v951_v53 = vadd.f32 %v943_v41, %v923_v42  ;;  %v952_v54 = vadd.f32 %v939_v40, %v924_v43  ;;  %v953_v55 = vadd.f32 %v943_v41, %v925_v44 }
 0x160   : > { %v962_v59 = vmax.f32 %v946_v45, 0.0  ;;  %v963_v60 = vmax.f32 %v947_v46, 0.0  ;;  %v964_v61 = vmax.f32 %v948_v47, 0.0  ;;  %v965_v62 = vmax.f32 %v949_v48, 0.0 }
 0x161   : > { %v966_v1 = vmax.f32 %v950_v52, 0.0  ;;  %v967_v2 = vmax.f32 %v951_v53, 0.0  ;;  %v968_v3 = vmax.f32 %v952_v54, 0.0  ;;  %v969_v4 = vmax.f32 %v953_v55, 0.0 }
 0x162   : > { %978 = vst [vmem:[%s1614_s3] sm:$0xff] %v962_v59  ;;  %979 = vst [vmem:[%s1614_s3 + $0x8] sm:$0xff] %v963_v60  ;;  %v954_v5 = vadd.f32 %v939_v40, %v926_v49  ;;  %v955_v6 = vadd.f32 %v943_v41, %v927_v50  ;;  %v956_v7 = vadd.f32 %v939_v40, %v928_v51 }
 0x163   : > { %980 = vst [vmem:[%s1614_s3 + $0x10] sm:$0xff] %v964_v61  ;;  %981 = vst [vmem:[%s1614_s3 + $0x18] sm:$0xff] %v965_v62  ;;  %v957_v8 = vadd.f32 %v943_v41, %v929_v56  ;;  %v958_v9 = vadd.f32 %v939_v40, %v930_v57  ;;  %v959_v10 = vadd.f32 %v943_v41, %v931_v58 }
 0x164   : > { %982 = vst [vmem:[%s1614_s3 + $0x20] sm:$0xff] %v966_v1  ;;  %983 = vst [vmem:[%s1614_s3 + $0x28] sm:$0xff] %v967_v2  ;;  %v960_v11 = vadd.f32 %v939_v40, %v932_v63  ;;  %v961_v12 = vadd.f32 %v943_v41, %v933_v0  ;;  %v970_v13 = vmax.f32 %v954_v5, 0.0  ;;  %v971_v14 = vmax.f32 %v955_v6, 0.0 }
 0x165   : > { %984 = vst [vmem:[%s1614_s3 + $0x30] sm:$0xff] %v968_v3  ;;  %985 = vst [vmem:[%s1614_s3 + $0x38] sm:$0xff] %v969_v4  ;;  %v972_v15 = vmax.f32 %v956_v7, 0.0  ;;  %v973_v16 = vmax.f32 %v957_v8, 0.0  ;;  %v974_v17 = vmax.f32 %v958_v9, 0.0  ;;  %v975_v18 = vmax.f32 %v959_v10, 0.0 }
 0x166   : > { %v976_v19 = vmax.f32 %v960_v11, 0.0  ;;  %v977_v20 = vmax.f32 %v961_v12, 0.0  ;;  %986 = vst [vmem:[%s1614_s3 + $0x40] sm:$0xff] %v970_v13  ;;  %987 = vst [vmem:[%s1614_s3 + $0x48] sm:$0xff] %v971_v14 }
 0x167   : > { %988 = vst [vmem:[%s1614_s3 + $0x50] sm:$0xff] %v972_v15  ;;  %989 = vst [vmem:[%s1614_s3 + $0x58] sm:$0xff] %v973_v16 }
 0x168   : > { %990 = vst [vmem:[%s1614_s3 + $0x60] sm:$0xff] %v974_v17  ;;  %991 = vst [vmem:[%s1614_s3 + $0x68] sm:$0xff] %v975_v18 }
 0x169   : > { %992 = vst [vmem:[%s1614_s3 + $0x70] sm:$0xff] %v976_v19  ;;  %993 = vst [vmem:[%s1614_s3 + $0x78] sm:$0xff] %v977_v20 }
 0x16a PF: > { %s13_s16 = sadd.s32 1, %s1383_s16   ;;  %s1615_s12 = smov %s1371_s13 }
 0x16b   : > { %p10_p12 = scmp.ge.s32.totalorder %s13_s16, 8   ;;  %s1616_s13 = smov %s1442_s20 }
 0x16c   : > { %s1617_s14 = smov %s1379_s15  ;;  %s1618_s15 = smov %s1620_s17 }
 0x16d   :  { %12 = sbr.rel (!%p10_p12) target bundleno = 3 (0x3), region = 113 }

// kernel: encoder_forward.11
= control target key start
LH: loop header
LB: loop body
LE: loop exit
PB: predicated region body
PF: predicated region fallthrough
CT: control target
= control target key end

     0   :  { %s1225_s12 = smov 0   ;;  %s1227_s13 = smov 0   ;;  %s1379_s0 = inlined_call_operand.vmem [shape: bf16[32,2304], index: 0, kind: input, shape index: {}]   ;;  %s1380_s1 = inlined_call_operand.vmem [shape: bf16[2304,256], index: 1, kind: input, shape index: {}]   ;;  %s1381_s2 = inlined_call_operand.vmem [shape: f32[1,256], index: 2, kind: input, shape index: {}]   ;;  %s1382_s3 = inlined_call_operand.vmem [shape: f32[32,256], index: 3, kind: output, shape index: {}]  }
   0x1   :  { %s1229_s14 = smov 0   ;;  %s1231_s15 = smov 0  }
   0x2   :  { %s1233_s16 = smov 0  }
   0x3 LB: > { %s25_s17 = sadd.s32 1, %s1197_s15  ;;  %p48_p1 = scmp.ne.s32.totalorder %s1189_s13, %s1185_s12  ;;  %s1201_s16 = sphi %s1233_s16, %s13_s16   ;;  %s1197_s15 = sphi %s1231_s15, %s1386_s15   ;;  %s1193_s14 = sphi %s1229_s14, %s1385_s14   ;;  %s1189_s13 = sphi %s1227_s13, %s1384_s13   ;;  %s1185_s12 = sphi %s1225_s12, %s1383_s12  }
   0x4   : > { %p26_p0 = scmp.ge.s32.totalorder %s25_s17, 6  ;;  %p49_p2 = scmp.eq.s32.totalorder %s1201_s16, 0 }
   0x5   : > { %s41_s19 = sadd.s32 1, %s1189_s13  ;;  %p964_p5 = scmp.ge.s32.totalorder %s1201_s16, 6 }
   0x6   : > { %s1388_s17 = smov (%p26_p0, %s25_s17), 0  ;;  %p50_p3 = por %p49_p2, %p48_p1 }
   0x7   : > { %s37_s18 = ssub.s32 %s1197_s15, %s1388_s17  ;;  %164 = sbr.rel (%p964_p5) target bundleno = 21 (0x15), region = 20 }
   0x8   : > { %p39_p4 = scmp.eq.s32.totalorder %s37_s18, 0 }
   0xa   : > { %s1260_s20 = scalar_select %p39_p4, %s1189_s13, %s41_s19  }
   0xc   : > { %167 = sbr.rel (!%p50_p3) target bundleno = 21 (0x15), region = 24  ;;  %s169_s21 = sand.u32 (%p50_p3), 1, %s1189_s13  }
   0xd   : > { %s1037_s22 = smul.u32 (%p50_p3), 12, %s1197_s15 }
   0xe   : > { %s1039_s23 = smul.u32 (%p50_p3), 48, %s169_s21 }
   0xf   : > { %s177_s26 = scalar_lea.vmem (%p50_p3), %s1379_s0, %s1037_s22 }
  0x10   : > { %v192_v0 = vld [vmem:[%s177_s26] sm:$0xff] (%p50_p3)  ;;  %v194_v1 = vld [vmem:[%s177_s26 + $0x48] sm:$0xff] (%p50_p3)  ;;  %v196_v2 = vld [vmem:[%s177_s26 + $0x90] sm:$0xff] (%p50_p3)  ;;  %s171_s27 = scalar_lea.vmem (%p50_p3), [#allocation3], %s1039_s23 }
  0x11   : > { %193 = vst [vmem:[%s171_s27] sm:$0xff] %v192_v0  ;;  %195 = vst [vmem:[%s171_s27 + $0xc] sm:$0xff] %v194_v1  ;;  %v198_v3 = vld [vmem:[%s177_s26 + $0xd8] sm:$0xff]  ;;  %v966_v4 = vld [vmem:[%s177_s26 + $0x8] sm:$0xf] }
  0x12   : > { %197 = vst [vmem:[%s171_s27 + $0x18] sm:$0xff] %v196_v2  ;;  %v968_v5 = vld [vmem:[%s177_s26 + $0x50] sm:$0xf]  ;;  %199 = vst [vmem:[%s171_s27 + $0x24] sm:$0xff] %v198_v3  ;;  %v970_v6 = vld [vmem:[%s177_s26 + $0x98] sm:$0xf] }
  0x13   : > { %967 = vst [vmem:[%s171_s27 + $0x8] sm:$0xf] %v966_v4  ;;  %969 = vst [vmem:[%s171_s27 + $0x14] sm:$0xf] %v968_v5  ;;  %v972_v7 = vld [vmem:[%s177_s26 + $0xe0] sm:$0xf] }
  0x14   : > { %971 = vst [vmem:[%s171_s27 + $0x20] sm:$0xf] %v970_v6  ;;  %973 = vst [vmem:[%s171_s27 + $0x2c] sm:$0xf] %v972_v7 }
  0x15 PF: > { %p974_p6 = scmp.ge.s32.totalorder %s1201_s16, 1  ;;  %p235_p7 = scmp.lt.s32.totalorder %s1201_s16, 7 }
  0x17   : > { %p236_p8 = pnand %p974_p6, %p235_p7 }
  0x18   : > { %s242_s28 = sand.u32 (!%p236_p8), 1, %s1185_s12   ;;  %s286_s29 = smul.u32 (!%p236_p8), 48, %s1193_s14 }
  0x19   : > { %239 = sbr.rel (%p236_p8) target bundleno = 333 (0x14d), region = 54  ;;  %p977_p10 = scmp.ne.s32.totalorder (!%p236_p8), %s1193_s14, 0 }
  0x1a   : > { %s1040_s30 = smul.u32 (!%p236_p8), 48, %s242_s28  ;;  %p288_p9 = scmp.lt.s32.totalorder (!%p236_p8), %s286_s29, 287 }
  0x1c   : > { %s1277_s8 = scalar_lea.vmem (!%p236_p8), [#allocation3], %s1040_s30 }
  0x1e   : > { %s1390_s29 = smov (!%p288_p9, %s286_s29), 287  ;;  %319 = sbr.rel (%p977_p10) target bundleno = 40 (0x28), region = 62 }
  0x1f   : > { %s1038_s4 = sshll.u32 %s1390_s29, 3 }
  0x20   : > { %s1275_s7 = scalar_lea.vmem %s1380_s1, %s1038_s4 }
  0x23   : > { %v1203_v8 = vmov 0.0  }
  0x24   : > { %320 = vst [vmem:[#allocation2 + $0x30] sm:$0xff] %v1203_v8  ;;  %321 = vst [vmem:[#allocation2] sm:$0xff] %v1203_v8 }
  0x25   : > { %322 = vst [vmem:[#allocation2 + $0x18] sm:$0xff] %v1203_v8  ;;  %323 = vst [vmem:[#allocation2 + $0x10] sm:$0xff] %v1203_v8 }
  0x26   : > { %324 = vst [vmem:[#allocation2 + $0x8] sm:$0xff] %v1203_v8  ;;  %325 = vst [vmem:[#allocation2 + $0x20] sm:$0xff] %v1203_v8 }
  0x27   : > { %326 = vst [vmem:[#allocation2 + $0x28] sm:$0xff] %v1203_v8  ;;  %327 = vst [vmem:[#allocation2 + $0x38] sm:$0xff] %v1203_v8 }
  0x28 PF: > { %v1083_v9 = vld [vmem:[%s1275_s7 + $0x74] ss:$8 sps:$4 sm:$0xff]   ;;  %v1085_v10 = vld [vmem:[%s1275_s7 + $0x70] ss:$8 sps:$4 sm:$0xff]   ;;  %v1204_v11 = vmov 0   ;;  %p1032_p11 = scmp.ne.s32.totalorder %s1193_s14, 5 }
  0x29   : > { %749 = vmatprep.mubr.bf16.mxu1 %v1204_v11  ;;  %664 = vmatprep.subr.bf16.mxu0 %v1083_v9  ;;  %v1086_v12 = vld [vmem:[%s1275_s7 + $0x64] ss:$8 sps:$4 sm:$0xff]   ;;  %v1088_v13 = vld [vmem:[%s1275_s7 + $0x60] ss:$8 sps:$4 sm:$0xff]   ;;  %v1089_v14 = vld [vmem:[%s1275_s7 + $0x54] ss:$8 sps:$4 sm:$0xff]  }
  0x2a   : > { %665 = vmatpush1.bf16.msra.mxu0 %v1085_v10  ;;  %v1091_v15 = vld [vmem:[%s1275_s7 + $0x50] ss:$8 sps:$4 sm:$0xff]   ;;  %v1092_v16 = vld [vmem:[%s1275_s7 + $0x44] ss:$8 sps:$4 sm:$0xff]   ;;  %v1104_v17 = vld [vmem:[%s1275_s7 + $0x174] ss:$8 sps:$4 sm:$0xff]  }
  0x2b   : > { %666 = vmatprep.subr.bf16.mxu0 %v1086_v12  ;;  %v1106_v18 = vld [vmem:[%s1275_s7 + $0x170] ss:$8 sps:$4 sm:$0xff]   ;;  %v1094_v19 = vld [vmem:[%s1275_s7 + $0x40] ss:$8 sps:$4 sm:$0xff]   ;;  %v1095_v20 = vld [vmem:[%s1275_s7 + $0x34] ss:$8 sps:$4 sm:$0xff]   ;;  %717 = vmatprep.subr.bf16.mxu1 %v1104_v17 }
  0x2c   : > { %v1110_v21 = vld [vmem:[%s1275_s7 + $0x164] ss:$8 sps:$4 sm:$0xff]   ;;  %718 = vmatpush1.bf16.msra.mxu1 %v1106_v18  ;;  %v1112_v22 = vld [vmem:[%s1275_s7 + $0x160] ss:$8 sps:$4 sm:$0xff]   ;;  %v1097_v23 = vld [vmem:[%s1275_s7 + $0x30] ss:$8 sps:$4 sm:$0xff]  }
  0x2d   : > { %719 = vmatprep.subr.bf16.mxu1 %v1110_v21  ;;  %v1116_v24 = vld [vmem:[%s1275_s7 + $0x154] ss:$8 sps:$4 sm:$0xff]   ;;  %v1098_v25 = vld [vmem:[%s1275_s7 + $0x24] ss:$8 sps:$4 sm:$0xff]   ;;  %v1118_v26 = vld [vmem:[%s1275_s7 + $0x150] ss:$8 sps:$4 sm:$0xff]  }
  0x2e   : > { %667 = vmatpush1.bf16.msra.mxu0 %v1088_v13  ;;  %v1122_v27 = vld [vmem:[%s1275_s7 + $0x144] ss:$8 sps:$4 sm:$0xff]   ;;  %v1100_v28 = vld [vmem:[%s1275_s7 + $0x20] ss:$8 sps:$4 sm:$0xff]   ;;  %v1101_v29 = vld [vmem:[%s1275_s7 + $0x14] ss:$8 sps:$4 sm:$0xff]  }
  0x2f   : > { %668 = vmatprep.subr.bf16.mxu0 %v1089_v14  ;;  %v1124_v30 = vld [vmem:[%s1275_s7 + $0x140] ss:$8 sps:$4 sm:$0xff]   ;;  %v1128_v31 = vld [vmem:[%s1275_s7 + $0x134] ss:$8 sps:$4 sm:$0xff]   ;;  %v1103_v32 = vld [vmem:[%s1275_s7 + $0x10] ss:$8 sps:$4 sm:$0xff]  }
  0x30   : > { %720 = vmatpush1.bf16.msra.mxu1 %v1112_v22  ;;  %v1107_v33 = vld [vmem:[%s1275_s7 + $0x4] ss:$8 sps:$4 sm:$0xff]   ;;  %v1130_v34 = vld [vmem:[%s1275_s7 + $0x130] ss:$8 sps:$4 sm:$0xff]   ;;  %v1109_v36 = vld [vmem:[%s1275_s7] ss:$8 sps:$4 sm:$0xff]  }
  0x31   : > { %721 = vmatprep.subr.bf16.mxu1 %v1116_v24  ;;  %v1134_v35 = vld [vmem:[%s1275_s7 + $0x124] ss:$8 sps:$4 sm:$0xff]   ;;  %v1113_v37 = vld [vmem:[%s1275_s7 + $0xf4] ss:$8 sps:$4 sm:$0xff]   ;;  %v1136_v38 = vld [vmem:[%s1275_s7 + $0x120] ss:$8 sps:$4 sm:$0xff]  }
  0x32   : > { %669 = vmatpush1.bf16.msra.mxu0 %v1091_v15  ;;  %v1140_v39 = vld [vmem:[%s1275_s7 + $0x114] ss:$8 sps:$4 sm:$0xff]   ;;  %v1115_v40 = vld [vmem:[%s1275_s7 + $0xf0] ss:$8 sps:$4 sm:$0xff]   ;;  %v1119_v41 = vld [vmem:[%s1275_s7 + $0xe4] ss:$8 sps:$4 sm:$0xff]  }
  0x33   : > { %670 = vmatprep.subr.bf16.mxu0 %v1092_v16  ;;  %v1142_v42 = vld [vmem:[%s1275_s7 + $0x110] ss:$8 sps:$4 sm:$0xff]   ;;  %v1146_v43 = vld [vmem:[%s1275_s7 + $0x104] ss:$8 sps:$4 sm:$0xff]   ;;  %v1121_v45 = vld [vmem:[%s1275_s7 + $0xe0] ss:$8 sps:$4 sm:$0xff]  }
  0x34   : > { %722 = vmatpush1.bf16.msra.mxu1 %v1118_v26  ;;  %v1158_v44 = vld [vmem:[%s1277_s8 + $0x4] ss:$12 sps:$4 sm:$0xff]   ;;  %v1152_v50 = vld [vmem:[%s1277_s8 + $0x8] ss:$12 sps:$4 sm:$0xff]   ;;  %v1159_v55 = vld [vmem:[%s1277_s8 + $0x20] ss:$12 sps:$4 sm:$0xff]  }
  0x35   : > { %723 = vmatprep.subr.bf16.mxu1 %v1122_v27  ;;  %v1125_v46 = vld [vmem:[%s1275_s7 + $0xd4] ss:$8 sps:$4 sm:$0xff]   ;;  %696 = vmatprep.mubr.bf16.mxu0 %v1158_v44  ;;  %v1148_v47 = vld [vmem:[%s1275_s7 + $0x100] ss:$8 sps:$4 sm:$0xff]   ;;  %v1127_v48 = vld [vmem:[%s1275_s7 + $0xd0] ss:$8 sps:$4 sm:$0xff]  }
  0x36   : > { %671 = vmatpush1.bf16.msra.mxu0 %v1094_v19  ;;  %v1131_v49 = vld [vmem:[%s1275_s7 + $0xc4] ss:$8 sps:$4 sm:$0xff]   ;;  %v1133_v51 = vld [vmem:[%s1275_s7 + $0xc0] ss:$8 sps:$4 sm:$0xff]   ;;  %v1137_v52 = vld [vmem:[%s1275_s7 + $0xb4] ss:$8 sps:$4 sm:$0xff]  }
  0x37   : > { %672 = vmatprep.subr.bf16.mxu0 %v1095_v20  ;;  %v1139_v53 = vld [vmem:[%s1275_s7 + $0xb0] ss:$8 sps:$4 sm:$0xff]   ;;  %v1143_v54 = vld [vmem:[%s1275_s7 + $0xa4] ss:$8 sps:$4 sm:$0xff]   ;;  %v1145_v56 = vld [vmem:[%s1275_s7 + $0xa0] ss:$8 sps:$4 sm:$0xff]  }
  0x38   : > { %724 = vmatpush1.bf16.msra.mxu1 %v1124_v30  ;;  %v1149_v57 = vld [vmem:[%s1275_s7 + $0x94] ss:$8 sps:$4 sm:$0xff]   ;;  %v1151_v58 = vld [vmem:[%s1275_s7 + $0x90] ss:$8 sps:$4 sm:$0xff]   ;;  %v1153_v59 = vld [vmem:[%s1275_s7 + $0x84] ss:$8 sps:$4 sm:$0xff]  }
  0x39   : > { %725 = vmatprep.subr.bf16.mxu1 %v1128_v31  ;;  %v1155_v60 = vld [vmem:[%s1275_s7 + $0x80] ss:$8 sps:$4 sm:$0xff]   ;;  %v328_v4 = vld [vmem:[#allocation2 + $0x30] sm:$0xff]  ;;  %v330_v12 = vld [vmem:[#allocation2 + $0x18] sm:$0xff] }
  0x3a   : > { %673 = vmatpush1.bf16.msra.mxu0 %v1097_v23  ;;  %v1156_v61 = vld [vmem:[%s1277_s8] ss:$12 sps:$4 sm:$0xff]   ;;  %v1160_v62 = vld [vmem:[%s1277_s8 + $0x1c] ss:$12 sps:$4 sm:$0xff]   ;;  %v1162_v63 = vld [vmem:[%s1277_s8 + $0x18] ss:$12 sps:$4 sm:$0xff]  }
  0x3b   : > { %674 = vmatprep.subr.bf16.mxu0 %v1098_v25  ;;  %v329_v7 = vld [vmem:[#allocation2] sm:$0xff]  ;;  %v331_v17 = vld [vmem:[#allocation2 + $0x10] sm:$0xff]  ;;  %v332_v21 = vld [vmem:[#allocation2 + $0x8] sm:$0xff] }
  0x3c   : > { %726 = vmatpush1.bf16.msra.mxu1 %v1130_v34  ;;  %v333_v26 = vld [vmem:[#allocation2 + $0x20] sm:$0xff]  ;;  %v334_v30 = vld [vmem:[#allocation2 + $0x28] sm:$0xff] }
  0x3d   : > { %727 = vmatprep.subr.bf16.mxu1 %v1134_v35  ;;  %v335_v35 = vld [vmem:[#allocation2 + $0x38] sm:$0xff] }
  0x3e   : > { %675 = vmatpush1.bf16.msra.mxu0 %v1100_v28 }
  0x3f   : > { %676 = vmatprep.subr.bf16.mxu0 %v1101_v29 }
  0x40   : > { %728 = vmatpush1.bf16.msra.mxu1 %v1136_v38 }
  0x41   : > { %729 = vmatprep.subr.bf16.mxu1 %v1140_v39 }
  0x42   : > { %677 = vmatpush1.bf16.msra.mxu0 %v1103_v32 }
  0x43   : > { %678 = vmatprep.subr.bf16.mxu0 %v1107_v33 }
  0x44   : > { %730 = vmatpush1.bf16.msra.mxu1 %v1142_v42 }
  0x45   : > { %731 = vmatprep.subr.bf16.mxu1 %v1146_v43 }
  0x46   : > { %679 = vmatpush1.bf16.msra.mxu0 %v1109_v36 }
  0x47   : > { %680 = vmatprep.subr.bf16.mxu0 %v1113_v37 }
  0x48   : > { %732 = vmatpush1.bf16.msra.mxu1 %v1148_v47 }
  0x4a   : > { %681 = vmatpush2.bf16.msra.mxu0 %v1115_v40 }
  0x4b   : > { %682 = vmatprep.subr.bf16.mxu0 %v1119_v41  ;;  %750 = vmatmul.mubr.bf16.vlgmr.msra.gmra.mxu1 %v1152_v50 }
  0x4c   : > { %759 = vmatprep.mubr.bf16.mxu1 %v1204_v11 }
  0x4e   : > { %683 = vmatpush2.bf16.msra.mxu0 %v1121_v45 }
  0x4f   : > { %684 = vmatprep.subr.bf16.mxu0 %v1125_v46 }
  0x52   : > { %685 = vmatpush2.bf16.msra.mxu0 %v1127_v48 }
  0x53   : > { %686 = vmatprep.subr.bf16.mxu0 %v1131_v49  ;;  %760 = vmatmul.mubr.bf16.gmra.mxu1 %v1159_v55 }
  0x56   : > { %687 = vmatpush2.bf16.msra.mxu0 %v1133_v51 }
  0x57   : > { %688 = vmatprep.subr.bf16.mxu0 %v1137_v52 }
  0x5a   : > { %689 = vmatpush2.bf16.msra.mxu0 %v1139_v53 }
  0x5b   : > { %690 = vmatprep.subr.bf16.mxu0 %v1143_v54 }
  0x5e   : > { %691 = vmatpush2.bf16.msra.mxu0 %v1145_v56 }
  0x5f   : > { %692 = vmatprep.subr.bf16.mxu0 %v1149_v57 }
  0x62   : > { %693 = vmatpush2.bf16.msra.mxu0 %v1151_v58 }
  0x63   : > { %694 = vmatprep.subr.bf16.mxu0 %v1153_v59 }
  0x66   : > { %695 = vmatpush2.bf16.msra.mxu0 %v1155_v60 }
  0x69   : > { %697 = vmatmul.mubr.bf16.vlgmr.msra.gmra.mxu0 %v1156_v61 }
  0x6a   : > { %706 = vmatprep.mubr.bf16.mxu0 %v1160_v62 }
  0x71   : > { %707 = vmatmul.mubr.bf16.gmra.mxu0 %v1162_v63 }
 0x10b   : > { %v751_v0 = vpop.f32.mrf.mxu1 }
 0x10d   : > { %v753_v1 = vpop.f32.mrf.mxu1 }
 0x10f   : > { %v755_v2 = vpop.f32.mrf.mxu1 }
 0x111   : > { %v757_v3 = vpop.f32.mrf.mxu1 }
 0x113   : > { %v761_v9 = vpop.f32.mrf.mxu1 }
 0x115   : > { %v763_v16 = vpop.f32.mrf.mxu1 }
 0x117   : > { %v765_v25 = vpop.f32.mrf.mxu1 }
 0x119   : > { %v767_v34 = vpop.f32.mrf.mxu1 }
 0x129   : > { %v698_v5 = vpop.f32.mrf.mxu0 }
 0x12a   : > { %v752_v6 = vadd.f32 %v751_v0, %v698_v5 }
 0x12b   : > { %v700_v8 = vpop.f32.mrf.mxu0 }
 0x12c   : > { %v770_v10 = vadd.f32 %v752_v6, %v328_v4  ;;  %v754_v11 = vadd.f32 %v753_v1, %v700_v8 }
 0x12d   : > { %v702_v13 = vpop.f32.mrf.mxu0 }
 0x12e   : > { %778 = vst [vmem:[#allocation2 + $0x30] sm:$0xff] %v770_v10  ;;  %v771_v14 = vadd.f32 %v754_v11, %v329_v7  ;;  %v756_v15 = vadd.f32 %v755_v2, %v702_v13 }
 0x12f   : > { %v704_v18 = vpop.f32.mrf.mxu0 }
 0x130   : > { %779 = vst [vmem:[#allocation2] sm:$0xff] %v771_v14  ;;  %v772_v19 = vadd.f32 %v756_v15, %v330_v12  ;;  %v758_v20 = vadd.f32 %v757_v3, %v704_v18 }
 0x131   : > { %v708_v22 = vpop.f32.mrf.mxu0 }
 0x132   : > { %780 = vst [vmem:[#allocation2 + $0x18] sm:$0xff] %v772_v19  ;;  %v773_v23 = vadd.f32 %v758_v20, %v331_v17  ;;  %v762_v24 = vadd.f32 %v761_v9, %v708_v22 }
 0x133   : > { %v710_v27 = vpop.f32.mrf.mxu0 }
 0x134   : > { %781 = vst [vmem:[#allocation2 + $0x10] sm:$0xff] %v773_v23  ;;  %v774_v28 = vadd.f32 %v762_v24, %v332_v21  ;;  %v764_v29 = vadd.f32 %v763_v16, %v710_v27 }
 0x135   : > { %v712_v31 = vpop.f32.mrf.mxu0 }
 0x136   : > { %782 = vst [vmem:[#allocation2 + $0x8] sm:$0xff] %v774_v28  ;;  %v775_v32 = vadd.f32 %v764_v29, %v333_v26  ;;  %v766_v33 = vadd.f32 %v765_v25, %v712_v31 }
 0x137   : > { %v714_v36 = vpop.f32.mrf.mxu0 }
 0x138   : > { %783 = vst [vmem:[#allocation2 + $0x20] sm:$0xff] %v775_v32  ;;  %v776_v37 = vadd.f32 %v766_v33, %v334_v30  ;;  %v768_v38 = vadd.f32 %v767_v34, %v714_v36  ;;  %789 = sbr.rel (%p1032_p11) target bundleno = 333 (0x14d), region = 66 }
 0x13a   : > { %784 = vst [vmem:[#allocation2 + $0x28] sm:$0xff] %v776_v37  ;;  %v777_v39 = vadd.f32 %v768_v38, %v335_v35 }
 0x13c   : > { %785 = vst [vmem:[#allocation2 + $0x38] sm:$0xff] %v777_v39 }
 0x13d   : > { %v800_v40 = vlaneseq  ;;  %v798_v42 = vld [vmem:[%s1381_s2] sm:$0x3]  ;;  %v790_v43 = vld [vmem:[#allocation2 + $0x30] sm:$0xff]  ;;  %v792_v47 = vld [vmem:[#allocation2 + $0x18] sm:$0xff] }
 0x13e   : > { %v791_v45 = vld [vmem:[#allocation2] sm:$0xff]  ;;  %v793_v48 = vld [vmem:[#allocation2 + $0x10] sm:$0xff]  ;;  %v794_v49 = vld [vmem:[#allocation2 + $0x8] sm:$0xff] }
 0x13f   : > { %v801_v41 = vshrl.u32 %v800_v40, 7  ;;  %v795_v52 = vld [vmem:[#allocation2 + $0x20] sm:$0xff] }
 0x141   : > { %v802_v44 = vsub.s32 0, %v801_v41  ;;  %v806_v46 = vsub.s32 1, %v801_v41  ;;  %v796_v53 = vld [vmem:[#allocation2 + $0x28] sm:$0xff] }
 0x143   : > { %v803_v50 = vrot.slane %v798_v42, %v802_v44  ;;  %v807_v51 = vrot.slane %v798_v42, %v806_v46  ;;  %v797_v54 = vld [vmem:[#allocation2 + $0x38] sm:$0xff] }
 0x145   : > { %v810_v55 = vadd.f32 %v803_v50, %v790_v43  ;;  %v811_v56 = vadd.f32 %v807_v51, %v791_v45  ;;  %v812_v57 = vadd.f32 %v803_v50, %v792_v47  ;;  %v813_v58 = vadd.f32 %v807_v51, %v793_v48 }
 0x146   : > { %v814_v59 = vadd.f32 %v803_v50, %v794_v49  ;;  %v815_v60 = vadd.f32 %v807_v51, %v795_v52  ;;  %v816_v61 = vadd.f32 %v803_v50, %v796_v53  ;;  %v817_v62 = vadd.f32 %v807_v51, %v797_v54 }
 0x147   : > { %v818_v63 = vmax.f32 %v810_v55, 0.0  ;;  %v819_v0 = vmax.f32 %v811_v56, 0.0  ;;  %v820_v1 = vmax.f32 %v812_v57, 0.0  ;;  %v821_v2 = vmax.f32 %v813_v58, 0.0 }
 0x148   : > { %v822_v3 = vmax.f32 %v814_v59, 0.0  ;;  %v823_v4 = vmax.f32 %v815_v60, 0.0  ;;  %v824_v5 = vmax.f32 %v816_v61, 0.0  ;;  %v825_v6 = vmax.f32 %v817_v62, 0.0 }
 0x149   : > { %826 = vst [vmem:[%s1382_s3] sm:$0xff] %v818_v63  ;;  %827 = vst [vmem:[%s1382_s3 + $0x8] sm:$0xff] %v819_v0 }
 0x14a   : > { %828 = vst [vmem:[%s1382_s3 + $0x10] sm:$0xff] %v820_v1  ;;  %829 = vst [vmem:[%s1382_s3 + $0x18] sm:$0xff] %v821_v2 }
 0x14b   : > { %830 = vst [vmem:[%s1382_s3 + $0x20] sm:$0xff] %v822_v3  ;;  %831 = vst [vmem:[%s1382_s3 + $0x28] sm:$0xff] %v823_v4 }
 0x14c   : > { %832 = vst [vmem:[%s1382_s3 + $0x30] sm:$0xff] %v824_v5  ;;  %833 = vst [vmem:[%s1382_s3 + $0x38] sm:$0xff] %v825_v6 }
 0x14d PF: > { %s13_s16 = sadd.s32 1, %s1201_s16   ;;  %s1383_s12 = smov %s1189_s13 }
 0x14e   : > { %p10_p12 = scmp.ge.s32.totalorder %s13_s16, 8   ;;  %s1384_s13 = smov %s1260_s20 }
 0x14f   : > { %s1385_s14 = smov %s1197_s15  ;;  %s1386_s15 = smov %s1388_s17 }
 0x150   :  { %12 = sbr.rel (!%p10_p12) target bundleno = 3 (0x3), region = 113 }

// kernel: encoder_forward.13
= control target key start
LH: loop header
LB: loop body
LE: loop exit
PB: predicated region body
PF: predicated region fallthrough
CT: control target
= control target key end

     0   :  { %v254_v1 = vmov 0.0   ;;  %vm255_vm0 = vmmov 0   ;;  %s317_s0 = inlined_call_operand.vmem [shape: bf16[16,32], index: 0, kind: input, shape index: {}]   ;;  %s318_s1 = inlined_call_operand.vmem [shape: bf16[32,32], index: 1, kind: input, shape index: {}]   ;;  %s319_s2 = inlined_call_operand.vmem [shape: f32[1,32], index: 2, kind: input, shape index: {}]   ;;  %s320_s3 = inlined_call_operand.vmem [shape: bf16[32,32], index: 3, kind: input, shape index: {}]   ;;  %s321_s4 = inlined_call_operand.vmem [shape: f32[1,32], index: 4, kind: input, shape index: {}]   ;;  %s322_s5 = inlined_call_operand.hbm [shape: f32[16,32], index: 5, kind: output, shape index: {}]  }
   0x1   :  { %v223_v0 = vld [vmem:[%s318_s1 + $0x8] sm:$0xff]   ;;  %202 = vmatprep.subr.bf16.mxu0 %v254_v1  ;;  %210 = vmatprep.subr.bf16.mxu1 %v254_v1  ;;  %v224_v2 = vld [vmem:[%s318_s1] sm:$0xff]  }
   0x2   :  { %203 = vmatpush3.bf16.msra.mxu0 %v223_v0  ;;  %206 = vmatprep.mubr.msk.bf16.mxu0 %vm255_vm0, %v254_v1 }
   0x3   :  { %204 = vmatprep.subr.bf16.mxu0 %v254_v1  ;;  %214 = vmatprep.mubr.msk.bf16.mxu1 %vm255_vm0, %v254_v1 }
   0x4   :  { %10 = vsyncpa [#allocation3], 0  ;;  %v225_v3 = vld [vmem:[%s317_s0] sm:$0xff]   ;;  %vm52_vm1 = vcmask 261120   ;;  %v226_v4 = vld [vmem:[%s320_s3 + $0x8] sm:$0xff]  }
   0x5   :  { %211 = vmatpush3.bf16.msra.mxu1 %v226_v4  ;;  %v227_v5 = vld [vmem:[%s320_s3] sm:$0xff]  }
   0x6   :  { %205 = vmatpush3.bf16.msra.mxu0 %v224_v2  ;;  %212 = vmatprep.subr.bf16.mxu1 %v254_v1  ;;  %v187_v6 = vld [vmem:[%s319_s2] ss:$0 sm:$0xff]  ;;  %s256_s2 = smov [#allocation2]  }
   0x7   :  { %v192_v16 = vld [vmem:[%s321_s4] ss:$0 sm:$0xff]  ;;  %s176_s3 = sshll.u32 %s256_s2, 4  ;;  %s177_s3 = int_to_ptr.vmem [resolvable:$true] %s176_s3 }
   0x8   :  { %s232_s30 = scalar_lea.vmem %s177_s3, 256  ;;  %p237_p1 = scmp.lt.s32.totalorder %s177_s3, %s177_s3 }
   0x9   :  { %207 = vmatmul.mubr.msk.bf16.vlgmr.msra.gmra.mxu0 %vm52_vm1, %v225_v3  ;;  %213 = vmatpush3.bf16.msra.mxu1 %v227_v5  ;;  %p233_p0 = scmp.ne.s32.totalorder %s177_s3, %s232_s30  ;;  %p238_p2 = scmp.lt.s32.totalorder %s232_s30, %s232_s30 }
   0xb   :  { %p239_p3 = por %p238_p2, %p237_p1 }
   0xd   :  { %p240_p4 = pnand %p239_p3, %p233_p0 }
  0xc9   :  { %v90_v7 = vpop.f32.mrf.mxu0 }
  0xca   :  { %v91_v9 = vadd.f32 %v187_v6, %v90_v7 }
  0xcb   :  { %v208_v8 = vpop.f32.mrf.mxu0 }
  0xcc   :  { %v97_v13 = vmax.f32 %v91_v9, 0.0 }
  0xcd   :  { %v93_v10 = vpop.f32.mrf.mxu0 }
  0xce   :  { %v94_v11 = vadd.f32 %v187_v6, %v93_v10 }
  0xcf   :  { %v209_v12 = vpop.f32.mrf.mxu0 }
  0xd0   :  { %v98_v14 = vmax.f32 %v94_v11, 0.0 }
  0xd2   :  { %v99_v15 = vpack.c.bf16 %v98_v14, %v97_v13 }
  0xd4   :  { %215 = vmatmul.mubr.msk.bf16.vlgmr.msra.gmra.mxu1 %vm52_vm1, %v99_v15 }
 0x194   :  { %v160_v17 = vpop.f32.mrf.mxu1 }
 0x195   :  { %v161_v18 = vadd.f32 %v192_v16, %v160_v17 }
 0x196   :  { %v216_v19 = vpop.f32.mrf.mxu1 }
 0x197   :  { %228 = vtanh.f32 %v161_v18 }
 0x198   :  { %v163_v20 = vpop.f32.mrf.mxu1 }
 0x199   :  { %v164_v21 = vadd.f32 %v192_v16, %v163_v20 }
 0x19a   :  { %v217_v22 = vpop.f32.mrf.mxu1 }
 0x19b   :  { %230 = vtanh.f32 %v164_v21 }
 0x1a4   :  { %v229_v23 = vpop.eup %228 }
 0x1a5   :  { %169 = vst.msk [vmem:[#allocation2] sm:$0xff] %vm52_vm1, %v229_v23 }
 0x1a8   :  { %v231_v24 = vpop.eup %230 }
 0x1a9   :  { %170 = vst.msk [vmem:[#allocation2 + $0x8] sm:$0xff] %vm52_vm1, %v231_v24 }
 0x1aa   :  { %243 = shalt.err (!%p240_p4)
}
 0x1ab   :  { %s257_s4 = smov 128   ;;  %s258_s6 = smov 8  }
 0x1ac   :  { %182 = dma.vmem_to_hbm [thread:$0]  %s177_s3, 256, %s322_s5, [#allocation3], %s257_s4, %s257_s4, %s258_s6  }
 0x1ad   :  { %252 = dma.done.wait [#allocation3], 256  }
 0x1ae   :  { %253 = vsyncadd [#allocation3], 4294967040 }
 0x1af   :  { %186 = vsyncpa [#allocation3], 1 }

// kernel: encoder_forward.12
= control target key start
LH: loop header
LB: loop body
LE: loop exit
PB: predicated region body
PF: predicated region fallthrough
CT: control target
= control target key end

     0   :  { %s9220_s30 = smov 0   ;;  %s9222_s10 = smov 0   ;;  %s11000_s0 = inlined_call_operand.vmem [shape: bf16[2,40,512], index: 0, kind: input, shape index: {}]   ;;  %s11001_s1 = inlined_call_operand.vmem [shape: bf16[2560,16], index: 1, kind: input, shape index: {}]   ;;  %s11002_s2 = inlined_call_operand.vmem [shape: bf16[2560,8], index: 2, kind: input, shape index: {}]   ;;  %s11003_s3 = inlined_call_operand.vmem [shape: bf16[2560,8], index: 3, kind: input, shape index: {}]   ;;  %s11004_s4 = inlined_call_operand.vmem [shape: f32[1,32], index: 4, kind: input, shape index: {}]   ;;  %s11005_s5 = inlined_call_operand.vmem [shape: bf16[14,160,16], index: 5, kind: input, shape index: {}]   ;;  %s11006_s6 = inlined_call_operand.vmem [shape: bf16[14,160,8], index: 6, kind: input, shape index: {}]   ;;  %s11007_s7 = inlined_call_operand.vmem [shape: bf16[14,160,8], index: 7, kind: input, shape index: {}]   ;;  %s11008_s8 = inlined_call_operand.vmem [shape: f32[14,1,32], index: 8, kind: input, shape index: {}]   ;;  %s11009_s9 = inlined_call_operand.vmem [shape: f32[2,8,32], index: 9, kind: output, shape index: {}]  }
   0x1   :  { %11010 = sst [smem:[#allocation5_spill]] %s11000_s0  ;;  %s9224_s11 = smov 0  }
   0x2   :  { %s9226_s12 = smov 0   ;;  %s9228_s13 = smov 0  }
   0x3 LB: > { %s28_s14 = sadd.s32 1, %s9153_s11  ;;  %s31_s15 = sadd.s32 1, %s9157_s12  ;;  %s9161_s13 = sphi %s9228_s13, %s19_s13   ;;  %s9157_s12 = sphi %s9226_s12, %s11019_s12   ;;  %s9153_s11 = sphi %s9224_s11, %s11018_s11   ;;  %s9149_s10 = sphi %s9222_s10, %s11017_s10   ;;  %s9145_s30 = sphi %s9220_s30, %s11016_s30  }
   0x4   : > { %p29_p0 = scmp.ge.s32.totalorder %s28_s14, 15  ;;  %p7053_p1 = scmp.ge.s32.totalorder %s9161_s13, 1 }
   0x5   : > { %p385_p2 = scmp.lt.s32.totalorder %s9161_s13, 31 }
   0x6   : > { %s11021_s14 = smov (%p29_p0, %s28_s14), 0  ;;  %s11023_s15 = smov (!%p29_p0, %s31_s15), %s9157_s12 }
   0x7   : > { %11011 = sst [smem:[#allocation3_spill]] %s11021_s14  ;;  %p386_p3 = pnand %p7053_p1, %p385_p2 }
   0x8   : > { %p33_p4 = scmp.ge.s32.totalorder %s11023_s15, 2  ;;  %p450_p5 = scmp.lt.s32.totalorder (!%p386_p3), %s9149_s10, 1 }
   0x9   : > { %389 = sbr.rel (%p386_p3) target bundleno = 1240 (0x4d8), region = 56  ;;  %s7055_s16 = sadd.s32 (!%p386_p3), 4294967295, %s9145_s30 }
   0xa   : > { %s11025_s15 = smov (%p33_p4, %s11023_s15), 0  ;;  %p456_p6 = scmp.gt.s32.totalorder (!%p386_p3), %s7055_s16, 0 }
   0xb   : > { %11012 = sst [smem:[#allocation4_spill]] %s11025_s15  ;;  %p7056_p7 = scmp.lt.s32.totalorder (!%p386_p3), %s7055_s16, 13 }
   0xc   : > { %s11013_s0 = sld [smem:[#allocation5_spill]] (!%p386_p3)  ;;  %p7083_p8 = scmp.ne.s32.totalorder (!%p386_p3), %s9145_s30, 0 }
   0xe   : > { %s11027_s10 = smov (!%p450_p5, %s9149_s10), 1  ;;  %s11029_s16 = smov (!%p456_p6, %s7055_s16), 0 }
   0xf   : > { %s8500_s17 = smul.u32 80, %s11027_s10  ;;  %s7082_s18 = sshll.u32 %s11027_s10, 3 }
  0x10   : > { %s11031_s16 = smov (!%p7056_p7, %s11029_s16), 13  ;;  %s9263_s24 = scalar_lea.vmem %s11009_s9, %s7082_s18 }
  0x11   : > { %s8501_s25 = smul.u32 80, %s11031_s16  ;;  %s493_s28 = scalar_lea.vmem %s11008_s8, %s11031_s16 }
  0x12   : > { %s9258_s21 = scalar_lea.vmem %s11013_s0, %s8500_s17  ;;  %505 = sbr.rel (%p7083_p8) target bundleno = 841 (0x349), region = 60 }
  0x13   : > { %s9273_s15 = scalar_lea.vmem %s11005_s5, %s8501_s25  ;;  %s9278_s17 = scalar_lea.vmem %s11006_s6, %s8501_s25 }
  0x14   : > { %s9283_s18 = scalar_lea.vmem %s11007_s7, %s8501_s25  ;;  %s9165_s27 = smov (!%p7083_p8), 24  }
  0x17   : > { %v8549_v0 = vld [vmem:[%s11001_s1 + $0x178] sm:$0xff]   ;;  %v8553_v4 = vld [vmem:[%s11001_s1 + $0x170] sm:$0xff]   ;;  %v8557_v8 = vld [vmem:[%s11001_s1 + $0x168] sm:$0xff]   ;;  %vm506_vm0 = vcmask 261120   ;;  %vm5969_vm1 = vcmask 130048   ;;  %vm5971_vm2 = vcmask 195584  }
  0x18   : > { %v8550_v1 = vld [vmem:[%s11001_s1 + $0x1f8] sm:$0xff]   ;;  %7675 = vmatprep.subr.bf16.mxu0 %v8549_v0  ;;  %v8554_v5 = vld [vmem:[%s11001_s1 + $0x1f0] sm:$0xff]   ;;  %v8558_v9 = vld [vmem:[%s11001_s1 + $0x1e8] sm:$0xff]  }
  0x19   : > { %v8551_v2 = vld [vmem:[%s11001_s1 + $0x138] sm:$0xff]   ;;  %7697 = vmatprep.subr.bf16.mxu1 %v8550_v1  ;;  %v8555_v6 = vld [vmem:[%s11001_s1 + $0x130] sm:$0xff]   ;;  %v8559_v10 = vld [vmem:[%s11001_s1 + $0x128] sm:$0xff]  }
  0x1a   : > { %v8552_v3 = vld [vmem:[%s11001_s1 + $0x1b8] sm:$0xff]   ;;  %7676 = vmatpush3.bf16.msra.mxu0 %v8551_v2  ;;  %v8556_v7 = vld [vmem:[%s11001_s1 + $0x1b0] sm:$0xff]   ;;  %v8560_v11 = vld [vmem:[%s11001_s1 + $0x1a8] sm:$0xff]  }
  0x1b   : > { %7698 = vmatpush3.bf16.msra.mxu1 %v8552_v3  ;;  %7677 = vmatprep.subr.bf16.mxu0 %v8553_v4  ;;  %v8561_v12 = vld [vmem:[%s11001_s1 + $0x160] sm:$0xff]   ;;  %v8565_v16 = vld [vmem:[%s11001_s1 + $0x158] sm:$0xff]   ;;  %v8569_v20 = vld [vmem:[%s11001_s1 + $0x150] sm:$0xff]  }
  0x1c   : > { %7699 = vmatprep.subr.bf16.mxu1 %v8554_v5  ;;  %v8562_v13 = vld [vmem:[%s11001_s1 + $0x1e0] sm:$0xff]   ;;  %v8566_v17 = vld [vmem:[%s11001_s1 + $0x1d8] sm:$0xff]   ;;  %v8570_v21 = vld [vmem:[%s11001_s1 + $0x1d0] sm:$0xff]  }
  0x1d   : > { %v8563_v14 = vld [vmem:[%s11001_s1 + $0x120] sm:$0xff]   ;;  %v8567_v18 = vld [vmem:[%s11001_s1 + $0x118] sm:$0xff]   ;;  %v8571_v22 = vld [vmem:[%s11001_s1 + $0x110] sm:$0xff]  }
  0x1e   : > { %7678 = vmatpush3.bf16.msra.mxu0 %v8555_v6  ;;  %v8564_v15 = vld [vmem:[%s11001_s1 + $0x1a0] sm:$0xff]   ;;  %v8568_v19 = vld [vmem:[%s11001_s1 + $0x198] sm:$0xff]   ;;  %v8572_v23 = vld [vmem:[%s11001_s1 + $0x190] sm:$0xff]  }
  0x1f   : > { %7700 = vmatpush3.bf16.msra.mxu1 %v8556_v7  ;;  %7679 = vmatprep.subr.bf16.mxu0 %v8557_v8  ;;  %v8573_v24 = vld [vmem:[%s11001_s1 + $0x148] sm:$0xff]   ;;  %v8577_v28 = vld [vmem:[%s11001_s1 + $0x140] sm:$0xff]   ;;  %v9383_v32 = vld [vmem:[%s9258_s21 + $0x10] sm:$0x88] }
  0x20   : > { %7701 = vmatprep.subr.bf16.mxu1 %v8558_v9  ;;  %v8574_v25 = vld [vmem:[%s11001_s1 + $0x1c8] sm:$0xff]   ;;  %v8578_v29 = vld [vmem:[%s11001_s1 + $0x1c0] sm:$0xff]   ;;  %v9389_v34 = vld [vmem:[%s9258_s21 + $0x18] sm:$0x88] }
  0x21   : > { %v8575_v26 = vld [vmem:[%s11001_s1 + $0x108] sm:$0xff]   ;;  %v8579_v30 = vld [vmem:[%s11001_s1 + $0x100] sm:$0xff]   ;;  %v8585_v40 = vld [vmem:[%s11001_s1 + $0x78] sm:$0xff]  }
  0x22   : > { %7680 = vmatpush3.bf16.msra.mxu0 %v8559_v10  ;;  %v8576_v27 = vld [vmem:[%s11001_s1 + $0x188] sm:$0xff]   ;;  %v8580_v31 = vld [vmem:[%s11001_s1 + $0x180] sm:$0xff]   ;;  %v8586_v45 = vld [vmem:[%s11001_s1 + $0xf8] sm:$0xff]  }
  0x23   : > { %7702 = vmatpush3.bf16.msra.mxu1 %v8560_v11  ;;  %7681 = vmatprep.subr.bf16.mxu0 %v8561_v12  ;;  %v9386_v33 = vld [vmem:[%s9258_s21 + $0x20] sm:$0xff]  ;;  %v9394_v36 = vld [vmem:[%s9258_s21 + $0x28] sm:$0xff]  ;;  %v8587_v54 = vld [vmem:[%s11001_s1 + $0x38] sm:$0xff]  }
  0x24   : > { %7703 = vmatprep.subr.bf16.mxu1 %v8562_v13  ;;  %v7085_v35 = vcombine.high %v9383_v32, %v9386_v33  ;;  %v7084_v37 = vcombine.low %v9383_v32, %v9386_v33  ;;  %v7087_v38 = vcombine.high %v9389_v34, %v9394_v36  ;;  %v7086_v39 = vcombine.low %v9389_v34, %v9394_v36  ;;  %v8588_v61 = vld [vmem:[%s11001_s1 + $0xb8] sm:$0xff]   ;;  %v8589_v0 = vld [vmem:[%s11001_s1 + $0x70] sm:$0xff]   ;;  %v8593_v4 = vld [vmem:[%s11001_s1 + $0x68] sm:$0xff]  }
  0x25   : > { %v8590_v1 = vld [vmem:[%s11001_s1 + $0xf0] sm:$0xff]   ;;  %v8594_v5 = vld [vmem:[%s11001_s1 + $0xe8] sm:$0xff]   ;;  %v8597_v8 = vld [vmem:[%s11001_s1 + $0x60] sm:$0xff]  }
  0x26   : > { %7682 = vmatpush3.bf16.msra.mxu0 %v8563_v14  ;;  %v1503_v41 = vshrl.u32 %v7085_v35, 16  ;;  %v1506_v42 = vshll.u32 %v7085_v35, 16  ;;  %v1495_v43 = vshrl.u32 %v7084_v37, 16  ;;  %v1498_v44 = vshll.u32 %v7084_v37, 16  ;;  %v8591_v2 = vld [vmem:[%s11001_s1 + $0x30] sm:$0xff]   ;;  %v8595_v6 = vld [vmem:[%s11001_s1 + $0x28] sm:$0xff]  }
  0x27   : > { %7704 = vmatpush3.bf16.msra.mxu1 %v8564_v15  ;;  %7683 = vmatprep.subr.bf16.mxu0 %v8565_v16  ;;  %v1519_v46 = vshrl.u32 %v7087_v38, 16  ;;  %v1522_v47 = vshll.u32 %v7087_v38, 16  ;;  %v1511_v48 = vshrl.u32 %v7086_v39, 16  ;;  %v1514_v49 = vshll.u32 %v7086_v39, 16  ;;  %v8592_v3 = vld [vmem:[%s11001_s1 + $0xb0] sm:$0xff]   ;;  %v8596_v7 = vld [vmem:[%s11001_s1 + $0xa8] sm:$0xff]  }
  0x28   : > { %7705 = vmatprep.subr.bf16.mxu1 %v8566_v17  ;;  %v1505_v50 = vrot.slane %v1503_v41, 3  ;;  %v1508_v51 = vrot.slane %v1506_v42, 4  ;;  %v1497_v52 = vrot.slane %v1495_v43, 3  ;;  %v1500_v53 = vrot.slane %v1498_v44, 4  ;;  %v8598_v9 = vld [vmem:[%s11001_s1 + $0xe0] sm:$0xff]   ;;  %v8601_v12 = vld [vmem:[%s11001_s1 + $0x58] sm:$0xff]  }
  0x29   : > { %v1521_v55 = vrot.slane %v1519_v46, 3  ;;  %v1524_v56 = vrot.slane %v1522_v47, 4  ;;  %v1513_v57 = vrot.slane %v1511_v48, 3  ;;  %v1516_v58 = vrot.slane %v1514_v49, 4  ;;  %v8599_v10 = vld [vmem:[%s11001_s1 + $0x20] sm:$0xff]   ;;  %v8602_v13 = vld [vmem:[%s11001_s1 + $0xd8] sm:$0xff]  }
  0x2a   : > { %7684 = vmatpush3.bf16.msra.mxu0 %v8567_v18  ;;  %v1509_v59 = vor.u32 %v1508_v51, %v1505_v50  ;;  %v1501_v60 = vor.u32 %v1500_v53, %v1497_v52  ;;  %v8600_v11 = vld [vmem:[%s11001_s1 + $0xa0] sm:$0xff]   ;;  %v8603_v14 = vld [vmem:[%s11001_s1 + $0x18] sm:$0xff]   ;;  %v8605_v16 = vld [vmem:[%s11001_s1 + $0x50] sm:$0xff]   ;;  %v9528_v47 = vcombine.high %v9394_v36, %v9394_v36 }
  0x2b   : > { %7706 = vmatpush3.bf16.msra.mxu1 %v8568_v19  ;;  %7685 = vmatprep.subr.bf16.mxu0 %v8569_v20  ;;  %v1525_v62 = vor.u32 %v1524_v56, %v1521_v55  ;;  %v1517_v63 = vor.u32 %v1516_v58, %v1513_v57  ;;  %v8604_v15 = vld [vmem:[%s11001_s1 + $0x98] sm:$0xff]   ;;  %v8606_v17 = vld [vmem:[%s11001_s1 + $0xd0] sm:$0xff]   ;;  %v8609_v20 = vld [vmem:[%s11001_s1 + $0x48] sm:$0xff]  }
  0x2c   : > { %7707 = vmatprep.subr.bf16.mxu1 %v8570_v21  ;;  %1754 = vmatprep.mubr.bf16.mxu0 %v1509_v59  ;;  %v8607_v18 = vld [vmem:[%s11001_s1 + $0x10] sm:$0xff]   ;;  %v8610_v21 = vld [vmem:[%s11001_s1 + $0xc8] sm:$0xff]   ;;  %v8621_v38 = vld [vmem:[%s11001_s1 + $0x278] sm:$0xff]  }
  0x2d   : > { %1794 = vmatprep.mubr.bf16.mxu1 %v1525_v62  ;;  %v8608_v19 = vld [vmem:[%s11001_s1 + $0x90] sm:$0xff]   ;;  %v8622_v41 = vld [vmem:[%s11001_s1 + $0x2f8] sm:$0xff]   ;;  %v8629_v50 = vld [vmem:[%s11001_s1 + $0x268] sm:$0xff]  }
  0x2e   : > { %7686 = vmatpush3.bf16.msra.mxu0 %v8571_v22  ;;  %v8611_v22 = vld [vmem:[%s11001_s1 + $0x8] sm:$0xff]   ;;  %v8625_v44 = vld [vmem:[%s11001_s1 + $0x270] sm:$0xff]   ;;  %v8634_v55 = vld [vmem:[%s11001_s1 + $0x2e0] sm:$0xff]  }
  0x2f   : > { %7708 = vmatpush3.bf16.msra.mxu1 %v8572_v23  ;;  %7687 = vmatprep.subr.bf16.mxu0 %v8573_v24  ;;  %v8612_v23 = vld [vmem:[%s11001_s1 + $0x88] sm:$0xff]   ;;  %v8613_v24 = vld [vmem:[%s11001_s1 + $0x40] sm:$0xff]   ;;  %v8626_v46 = vld [vmem:[%s11001_s1 + $0x2f0] sm:$0xff]  }
  0x30   : > { %7709 = vmatprep.subr.bf16.mxu1 %v8574_v25  ;;  %v8614_v25 = vld [vmem:[%s11001_s1 + $0xc0] sm:$0xff]   ;;  %v8627_v48 = vld [vmem:[%s11001_s1 + $0x230] sm:$0xff]   ;;  %v8630_v51 = vld [vmem:[%s11001_s1 + $0x2e8] sm:$0xff]  }
  0x31   : > { %v8628_v49 = vld [vmem:[%s11001_s1 + $0x2b0] sm:$0xff]   ;;  %v8631_v52 = vld [vmem:[%s11001_s1 + $0x228] sm:$0xff]   ;;  %v8635_v56 = vld [vmem:[%s11001_s1 + $0x220] sm:$0xff]  }
  0x32   : > { %7688 = vmatpush3.bf16.msra.mxu0 %v8575_v26  ;;  %v8615_v26 = vld [vmem:[%s11001_s1] sm:$0xff]   ;;  %v8632_v53 = vld [vmem:[%s11001_s1 + $0x2a8] sm:$0xff]   ;;  %v8637_v58 = vld [vmem:[%s11001_s1 + $0x258] sm:$0xff]  }
  0x33   : > { %7710 = vmatpush3.bf16.msra.mxu1 %v8576_v27  ;;  %7689 = vmatprep.subr.bf16.mxu0 %v8577_v28  ;;  %v8616_v27 = vld [vmem:[%s11001_s1 + $0x80] sm:$0xff]   ;;  %v8638_v59 = vld [vmem:[%s11001_s1 + $0x2d8] sm:$0xff]   ;;  %v8641_v62 = vld [vmem:[%s11001_s1 + $0x250] sm:$0xff]  }
  0x34   : > { %7711 = vmatprep.subr.bf16.mxu1 %v8578_v29  ;;  %v1474_v28 = vld [vmem:[%s9258_s21 + $0x20] sm:$0x77] }
  0x35   : > { %v7120_v29 = vcombine.low %v9383_v32, %v1474_v28  ;;  %v8636_v57 = vld [vmem:[%s11001_s1 + $0x2a0] sm:$0xff]  }
  0x36   : > { %7690 = vmatpush3.bf16.msra.mxu0 %v8579_v30  ;;  %v7121_v30 = vcombine.high %v9383_v32, %v1474_v28  ;;  %v8623_v32 = vld [vmem:[%s11001_s1 + $0x238] sm:$0xff]  }
  0x37   : > { %7712 = vmatpush3.bf16.msra.mxu1 %v8580_v31  ;;  %7719 = vmatprep.subr.bf16.mxu0 %v8585_v40  ;;  %v1475_v31 = vld [vmem:[%s9258_s21 + $0x28] sm:$0x77]  ;;  %v1812_v39 = vrot.slane %v7120_v29, 3  ;;  %v8673_v28 = vld [vmem:[%s11001_s1 + $0x358] sm:$0xff]  }
  0x38   : > { %7741 = vmatprep.subr.bf16.mxu1 %v8586_v45  ;;  %v7122_v35 = vcombine.low %v9389_v34, %v1475_v31  ;;  %v7123_v37 = vcombine.high %v9389_v34, %v1475_v31  ;;  %v1813_v40 = vrot.slane %v7121_v30, 3  ;;  %v8624_v34 = vld [vmem:[%s11001_s1 + $0x2b8] sm:$0xff]   ;;  %v9521_v45 = vcombine.high %v9386_v33, %v9386_v33 }
  0x39   : > { %1755 = vmatmul.mubr.bf16.vlgmr.msra.gmra.mxu0 %v1501_v60  ;;  %v8639_v60 = vld [vmem:[%s11001_s1 + $0x218] sm:$0xff]  }
  0x3a   : > { %1795 = vmatmul.mubr.bf16.vlgmr.msra.gmra.mxu1 %v1517_v63  ;;  %7720 = vmatpush3.bf16.msra.mxu0 %v8587_v54  ;;  %v1814_v42 = vrot.slane %v7122_v35, 3  ;;  %v1815_v43 = vrot.slane %v7123_v37, 3  ;;  %v8633_v54 = vld [vmem:[%s11001_s1 + $0x260] sm:$0xff]   ;;  %v8642_v63 = vld [vmem:[%s11001_s1 + $0x2d0] sm:$0xff]   ;;  %v8674_v29 = vld [vmem:[%s11001_s1 + $0x3d8] sm:$0xff]  }
  0x3b   : > { %7742 = vmatpush3.bf16.msra.mxu1 %v8588_v61  ;;  %7721 = vmatprep.subr.bf16.mxu0 %v8589_v0  ;;  %v8640_v61 = vld [vmem:[%s11001_s1 + $0x298] sm:$0xff]   ;;  %v8643_v0 = vld [vmem:[%s11001_s1 + $0x210] sm:$0xff]  }
  0x3c   : > { %7743 = vmatprep.subr.bf16.mxu1 %v8590_v1  ;;  %2044 = vmatprep.mubr.bf16.mxu0 %v1813_v40  ;;  %v8644_v1 = vld [vmem:[%s11001_s1 + $0x290] sm:$0xff]   ;;  %v8675_v30 = vld [vmem:[%s11001_s1 + $0x318] sm:$0xff]   ;;  %v8681_v40 = vld [vmem:[%s11001_s1 + $0x348] sm:$0xff]  }
  0x3d   : > { %2084 = vmatprep.mubr.bf16.mxu1 %v1815_v43  ;;  %v8676_v31 = vld [vmem:[%s11001_s1 + $0x398] sm:$0xff]   ;;  %v8677_v35 = vld [vmem:[%s11001_s1 + $0x350] sm:$0xff]   ;;  %v8685_v43 = vld [vmem:[%s11001_s1 + $0x340] sm:$0xff]  }
  0x3e   : > { %7722 = vmatpush3.bf16.msra.mxu0 %v8591_v2  ;;  %v8645_v2 = vld [vmem:[%s11001_s1 + $0x248] sm:$0xff]   ;;  %v8678_v37 = vld [vmem:[%s11001_s1 + $0x3d0] sm:$0xff]  }
  0x3f   : > { %7744 = vmatpush3.bf16.msra.mxu1 %v8592_v3  ;;  %7723 = vmatprep.subr.bf16.mxu0 %v8593_v4  ;;  %v8646_v3 = vld [vmem:[%s11001_s1 + $0x2c8] sm:$0xff]  }
  0x40   : > { %7745 = vmatprep.subr.bf16.mxu1 %v8594_v5  ;;  %v8647_v4 = vld [vmem:[%s11001_s1 + $0x208] sm:$0xff]  }
  0x41   : > { %v8648_v5 = vld [vmem:[%s11001_s1 + $0x288] sm:$0xff]  }
  0x42   : > { %7724 = vmatpush3.bf16.msra.mxu0 %v8595_v6  ;;  %v8649_v6 = vld [vmem:[%s11001_s1 + $0x240] sm:$0xff]  }
  0x43   : > { %7746 = vmatpush3.bf16.msra.mxu1 %v8596_v7  ;;  %7725 = vmatprep.subr.bf16.mxu0 %v8597_v8  ;;  %v8650_v7 = vld [vmem:[%s11001_s1 + $0x2c0] sm:$0xff]  }
  0x44   : > { %7747 = vmatprep.subr.bf16.mxu1 %v8598_v9  ;;  %v8651_v8 = vld [vmem:[%s11001_s1 + $0x200] sm:$0xff]  }
  0x45   : > { %v8652_v9 = vld [vmem:[%s11001_s1 + $0x280] sm:$0xff]  }
  0x46   : > { %7726 = vmatpush3.bf16.msra.mxu0 %v8599_v10  ;;  %v8657_v10 = vld [vmem:[%s11001_s1 + $0x378] sm:$0xff]  }
  0x47   : > { %7748 = vmatpush3.bf16.msra.mxu1 %v8600_v11  ;;  %7727 = vmatprep.subr.bf16.mxu0 %v8601_v12  ;;  %v9615_v11 = vcombine.low %v9386_v33, %v9386_v33  ;;  %v8658_v12 = vld [vmem:[%s11001_s1 + $0x3f8] sm:$0xff]  }
  0x48   : > { %7749 = vmatprep.subr.bf16.mxu1 %v8602_v13  ;;  %v9622_v13 = vcombine.low %v9394_v36, %v9394_v36 }
  0x4a   : > { %7728 = vmatpush3.bf16.msra.mxu0 %v8603_v14  ;;  %v8659_v14 = vld [vmem:[%s11001_s1 + $0x338] sm:$0xff]  }
  0x4b   : > { %7750 = vmatpush3.bf16.msra.mxu1 %v8604_v15  ;;  %7729 = vmatprep.subr.bf16.mxu0 %v8605_v16  ;;  %v8660_v15 = vld [vmem:[%s11001_s1 + $0x3b8] sm:$0xff]   ;;  %v8661_v16 = vld [vmem:[%s11001_s1 + $0x370] sm:$0xff]  }
  0x4c   : > { %7751 = vmatprep.subr.bf16.mxu1 %v8606_v17  ;;  %v8662_v17 = vld [vmem:[%s11001_s1 + $0x3f0] sm:$0xff]  }
  0x4e   : > { %7730 = vmatpush3.bf16.msra.mxu0 %v8607_v18  ;;  %v8663_v18 = vld [vmem:[%s11001_s1 + $0x330] sm:$0xff]  }
  0x4f   : > { %7752 = vmatpush3.bf16.msra.mxu1 %v8608_v19  ;;  %7731 = vmatprep.subr.bf16.mxu0 %v8609_v20  ;;  %v8664_v19 = vld [vmem:[%s11001_s1 + $0x3b0] sm:$0xff]   ;;  %v8665_v20 = vld [vmem:[%s11001_s1 + $0x368] sm:$0xff]  }
  0x50   : > { %7753 = vmatprep.subr.bf16.mxu1 %v8610_v21  ;;  %v8666_v21 = vld [vmem:[%s11001_s1 + $0x3e8] sm:$0xff]  }
  0x52   : > { %7732 = vmatpush3.bf16.msra.mxu0 %v8611_v22  ;;  %v8667_v22 = vld [vmem:[%s11001_s1 + $0x328] sm:$0xff]  }
  0x53   : > { %7754 = vmatpush3.bf16.msra.mxu1 %v8612_v23  ;;  %7733 = vmatprep.subr.bf16.mxu0 %v8613_v24  ;;  %v8668_v23 = vld [vmem:[%s11001_s1 + $0x3a8] sm:$0xff]   ;;  %v8669_v24 = vld [vmem:[%s11001_s1 + $0x360] sm:$0xff]  }
  0x54   : > { %7755 = vmatprep.subr.bf16.mxu1 %v8614_v25  ;;  %v8670_v25 = vld [vmem:[%s11001_s1 + $0x3e0] sm:$0xff]  }
  0x56   : > { %7734 = vmatpush3.bf16.msra.mxu0 %v8615_v26  ;;  %v8671_v26 = vld [vmem:[%s11001_s1 + $0x320] sm:$0xff]  }
  0x57   : > { %7756 = vmatpush3.bf16.msra.mxu1 %v8616_v27  ;;  %7763 = vmatprep.subr.bf16.mxu0 %v8621_v38  ;;  %v8672_v27 = vld [vmem:[%s11001_s1 + $0x3a0] sm:$0xff]   ;;  %v8679_v38 = vld [vmem:[%s11001_s1 + $0x310] sm:$0xff]  }
  0x58   : > { %7785 = vmatprep.subr.bf16.mxu1 %v8622_v41  ;;  %v8682_v41 = vld [vmem:[%s11001_s1 + $0x3c8] sm:$0xff]  }
  0x59   : > { %2045 = vmatmul.mubr.bf16.vlgmr.msra.gmra.mxu0 %v1812_v39  ;;  %v8680_v39 = vld [vmem:[%s11001_s1 + $0x390] sm:$0xff]  }
  0x5a   : > { %2085 = vmatmul.mubr.bf16.vlgmr.msra.gmra.mxu1 %v1814_v42  ;;  %7764 = vmatpush3.bf16.msra.mxu0 %v8623_v32  ;;  %v8683_v32 = vld [vmem:[%s11001_s1 + $0x308] sm:$0xff]  }
  0x5b   : > { %7786 = vmatpush3.bf16.msra.mxu1 %v8624_v34  ;;  %7765 = vmatprep.subr.bf16.mxu0 %v8625_v44  ;;  %v8684_v42 = vld [vmem:[%s11001_s1 + $0x388] sm:$0xff]   ;;  %v8686_v34 = vld [vmem:[%s11001_s1 + $0x3c0] sm:$0xff]  }
  0x5c   : > { %7787 = vmatprep.subr.bf16.mxu1 %v8626_v46  ;;  %2324 = vmatprep.mubr.bf16.mxu0 %v9521_v45  ;;  %v8687_v44 = vld [vmem:[%s11001_s1 + $0x300] sm:$0xff]  }
  0x5d   : > { %2364 = vmatprep.mubr.bf16.mxu1 %v9528_v47  ;;  %v8688_v46 = vld [vmem:[%s11001_s1 + $0x380] sm:$0xff]  }
  0x5e   : > { %7766 = vmatpush3.bf16.msra.mxu0 %v8627_v48  ;;  %v9717_v48 = vld [vmem:[%s9258_s21 + $0x30] sm:$0x11] }
  0x5f   : > { %7788 = vmatpush3.bf16.msra.mxu1 %v8628_v49  ;;  %7767 = vmatprep.subr.bf16.mxu0 %v8629_v50  ;;  %v7192_v49 = vcombine.low %v9386_v33, %v9717_v48  ;;  %v7193_v50 = vcombine.high %v9386_v33, %v9717_v48  ;;  %v8694_v33 = vld [vmem:[%s11001_s1 + $0x4f8] sm:$0xff]  }
  0x60   : > { %7789 = vmatprep.subr.bf16.mxu1 %v8630_v51  ;;  %v9724_v51 = vld [vmem:[%s9258_s21 + $0x38] sm:$0x11] }
  0x62   : > { %7768 = vmatpush3.bf16.msra.mxu0 %v8631_v52  ;;  %v7194_v52 = vcombine.low %v9394_v36, %v9724_v51 }
  0x63   : > { %7790 = vmatpush3.bf16.msra.mxu1 %v8632_v53  ;;  %7769 = vmatprep.subr.bf16.mxu0 %v8633_v54  ;;  %v7195_v53 = vcombine.high %v9394_v36, %v9724_v51  ;;  %v8693_v54 = vld [vmem:[%s11001_s1 + $0x478] sm:$0xff]  }
  0x64   : > { %7791 = vmatprep.subr.bf16.mxu1 %v8634_v55  ;;  %v2401_v55 = vshrl.u32 %v7193_v50, 16 }
  0x66   : > { %7770 = vmatpush3.bf16.msra.mxu0 %v8635_v56  ;;  %v2403_v56 = vshll.u32 %v7193_v50, 16 }
  0x67   : > { %7792 = vmatpush3.bf16.msra.mxu1 %v8636_v57  ;;  %7771 = vmatprep.subr.bf16.mxu0 %v8637_v58  ;;  %v2394_v57 = vshrl.u32 %v7192_v49, 16  ;;  %v2396_v58 = vshll.u32 %v7192_v49, 16 }
  0x68   : > { %7793 = vmatprep.subr.bf16.mxu1 %v8638_v59  ;;  %v2415_v59 = vshrl.u32 %v7195_v53, 16  ;;  %v2405_v36 = vrot.slane %v2403_v56, 1  ;;  %v8733_v56 = vld [vmem:[%s11002_s2 + $0x170] sm:$0xff]  }
  0x6a   : > { %7772 = vmatpush3.bf16.msra.mxu0 %v8639_v60  ;;  %v2417_v60 = vshll.u32 %v7195_v53, 16 }
  0x6b   : > { %7794 = vmatpush3.bf16.msra.mxu1 %v8640_v61  ;;  %7773 = vmatprep.subr.bf16.mxu0 %v8641_v62  ;;  %v2408_v61 = vshrl.u32 %v7194_v52, 16  ;;  %v2410_v62 = vshll.u32 %v7194_v52, 16  ;;  %v8729_v52 = vld [vmem:[%s11002_s2 + $0x178] sm:$0xff]  }
  0x6c   : > { %7795 = vmatprep.subr.bf16.mxu1 %v8642_v63  ;;  %v2398_v63 = vrot.slane %v2396_v58, 1  ;;  %v8735_v58 = vld [vmem:[%s11002_s2 + $0x130] sm:$0xff]  }
  0x6e   : > { %7774 = vmatpush3.bf16.msra.mxu0 %v8643_v0  ;;  %v2419_v0 = vrot.slane %v2417_v60, 1  ;;  %v8738_v60 = vld [vmem:[%s11002_s2 + $0x1e8] sm:$0xff]  }
  0x6f   : > { %7796 = vmatpush3.bf16.msra.mxu1 %v8644_v1  ;;  %7775 = vmatprep.subr.bf16.mxu0 %v8645_v2  ;;  %v2412_v1 = vrot.slane %v2410_v62, 1  ;;  %v8695_v2 = vld [vmem:[%s11001_s1 + $0x438] sm:$0xff]   ;;  %v8740_v62 = vld [vmem:[%s11002_s2 + $0x1a8] sm:$0xff]  }
  0x70   : > { %7797 = vmatprep.subr.bf16.mxu1 %v8646_v3  ;;  %v8696_v3 = vld [vmem:[%s11001_s1 + $0x4b8] sm:$0xff]  }
  0x72   : > { %7776 = vmatpush3.bf16.msra.mxu0 %v8647_v4  ;;  %v2406_v4 = vor.u32 %v2405_v36, %v2401_v55  ;;  %v8741_v36 = vld [vmem:[%s11002_s2 + $0x160] sm:$0xff]  }
  0x73   : > { %7798 = vmatpush3.bf16.msra.mxu1 %v8648_v5  ;;  %7777 = vmatprep.subr.bf16.mxu0 %v8649_v6  ;;  %v2399_v5 = vor.u32 %v2398_v63, %v2394_v57  ;;  %v2420_v6 = vor.u32 %v2419_v0, %v2415_v59  ;;  %v8734_v57 = vld [vmem:[%s11002_s2 + $0x1f0] sm:$0xff]   ;;  %v8737_v59 = vld [vmem:[%s11002_s2 + $0x168] sm:$0xff]   ;;  %v8742_v63 = vld [vmem:[%s11002_s2 + $0x1e0] sm:$0xff]  }
  0x74   : > { %7799 = vmatprep.subr.bf16.mxu1 %v8650_v7  ;;  %v2413_v7 = vor.u32 %v2412_v1, %v2408_v61  ;;  %v8739_v61 = vld [vmem:[%s11002_s2 + $0x128] sm:$0xff]   ;;  %v8743_v0 = vld [vmem:[%s11002_s2 + $0x120] sm:$0xff]  }
  0x75   : > { %v8744_v1 = vld [vmem:[%s11002_s2 + $0x1a0] sm:$0xff]  }
  0x76   : > { %7778 = vmatpush3.bf16.msra.mxu0 %v8651_v8  ;;  %v8697_v8 = vld [vmem:[%s11001_s1 + $0x470] sm:$0xff]  }
  0x77   : > { %7800 = vmatpush3.bf16.msra.mxu1 %v8652_v9  ;;  %7807 = vmatprep.subr.bf16.mxu0 %v8657_v10  ;;  %v8698_v9 = vld [vmem:[%s11001_s1 + $0x4f0] sm:$0xff]  }
  0x78   : > { %7829 = vmatprep.subr.bf16.mxu1 %v8658_v12  ;;  %v8699_v10 = vld [vmem:[%s11001_s1 + $0x430] sm:$0xff]  }
  0x79   : > { %2325 = vmatmul.mubr.bf16.vlgmr.msra.gmra.mxu0 %v9615_v11  ;;  %v8700_v12 = vld [vmem:[%s11001_s1 + $0x4b0] sm:$0xff]  }
  0x7a   : > { %2365 = vmatmul.mubr.bf16.vlgmr.msra.gmra.mxu1 %v9622_v13  ;;  %7808 = vmatpush3.bf16.msra.mxu0 %v8659_v14  ;;  %v8701_v14 = vld [vmem:[%s11001_s1 + $0x468] sm:$0xff]  }
  0x7b   : > { %7830 = vmatpush3.bf16.msra.mxu1 %v8660_v15  ;;  %7809 = vmatprep.subr.bf16.mxu0 %v8661_v16  ;;  %v8702_v15 = vld [vmem:[%s11001_s1 + $0x4e8] sm:$0xff]  }
  0x7c   : > { %7831 = vmatprep.subr.bf16.mxu1 %v8662_v17  ;;  %2649 = vmatprep.mubr.bf16.mxu0 %v2406_v4  ;;  %v8703_v16 = vld [vmem:[%s11001_s1 + $0x428] sm:$0xff]   ;;  %v8747_v4 = vld [vmem:[%s11002_s2 + $0x118] sm:$0xff]  }
  0x7d   : > { %2689 = vmatprep.mubr.bf16.mxu1 %v2420_v6  ;;  %v8704_v17 = vld [vmem:[%s11001_s1 + $0x4a8] sm:$0xff]   ;;  %v8749_v6 = vld [vmem:[%s11002_s2 + $0x150] sm:$0xff]  }
  0x7e   : > { %7810 = vmatpush3.bf16.msra.mxu0 %v8663_v18  ;;  %v8705_v18 = vld [vmem:[%s11001_s1 + $0x460] sm:$0xff]  }
  0x7f   : > { %7832 = vmatpush3.bf16.msra.mxu1 %v8664_v19  ;;  %7811 = vmatprep.subr.bf16.mxu0 %v8665_v20  ;;  %v8706_v19 = vld [vmem:[%s11001_s1 + $0x4e0] sm:$0xff]  }
  0x80   : > { %7833 = vmatprep.subr.bf16.mxu1 %v8666_v21  ;;  %v8707_v20 = vld [vmem:[%s11001_s1 + $0x420] sm:$0xff]  }
  0x81   : > { %v8708_v21 = vld [vmem:[%s11001_s1 + $0x4a0] sm:$0xff]  }
  0x82   : > { %7812 = vmatpush3.bf16.msra.mxu0 %v8667_v22  ;;  %v8709_v22 = vld [vmem:[%s11001_s1 + $0x458] sm:$0xff]  }
  0x83   : > { %7834 = vmatpush3.bf16.msra.mxu1 %v8668_v23  ;;  %7813 = vmatprep.subr.bf16.mxu0 %v8669_v24  ;;  %v8710_v23 = vld [vmem:[%s11001_s1 + $0x4d8] sm:$0xff]  }
  0x84   : > { %7835 = vmatprep.subr.bf16.mxu1 %v8670_v25  ;;  %v8711_v24 = vld [vmem:[%s11001_s1 + $0x418] sm:$0xff]  }
  0x85   : > { %v8712_v25 = vld [vmem:[%s11001_s1 + $0x498] sm:$0xff]  }
  0x86   : > { %7814 = vmatpush3.bf16.msra.mxu0 %v8671_v26  ;;  %v8713_v26 = vld [vmem:[%s11001_s1 + $0x450] sm:$0xff]  }
  0x87   : > { %7836 = vmatpush3.bf16.msra.mxu1 %v8672_v27  ;;  %7815 = vmatprep.subr.bf16.mxu0 %v8673_v28  ;;  %v8714_v27 = vld [vmem:[%s11001_s1 + $0x4d0] sm:$0xff]  }
  0x88   : > { %7837 = vmatprep.subr.bf16.mxu1 %v8674_v29  ;;  %v8715_v28 = vld [vmem:[%s11001_s1 + $0x410] sm:$0xff]  }
  0x89   : > { %v8716_v29 = vld [vmem:[%s11001_s1 + $0x490] sm:$0xff]  }
  0x8a   : > { %7816 = vmatpush3.bf16.msra.mxu0 %v8675_v30  ;;  %v8717_v30 = vld [vmem:[%s11001_s1 + $0x448] sm:$0xff]  }
  0x8b   : > { %7838 = vmatpush3.bf16.msra.mxu1 %v8676_v31  ;;  %7817 = vmatprep.subr.bf16.mxu0 %v8677_v35  ;;  %v8718_v31 = vld [vmem:[%s11001_s1 + $0x4c8] sm:$0xff]  }
  0x8c   : > { %7839 = vmatprep.subr.bf16.mxu1 %v8678_v37  ;;  %v8719_v35 = vld [vmem:[%s11001_s1 + $0x408] sm:$0xff]  }
  0x8d   : > { %v8720_v37 = vld [vmem:[%s11001_s1 + $0x488] sm:$0xff]  }
  0x8e   : > { %7818 = vmatpush3.bf16.msra.mxu0 %v8679_v38  ;;  %v8721_v38 = vld [vmem:[%s11001_s1 + $0x440] sm:$0xff]  }
  0x8f   : > { %7840 = vmatpush3.bf16.msra.mxu1 %v8680_v39  ;;  %7819 = vmatprep.subr.bf16.mxu0 %v8681_v40  ;;  %v8722_v39 = vld [vmem:[%s11001_s1 + $0x4c0] sm:$0xff]  }
  0x90   : > { %7841 = vmatprep.subr.bf16.mxu1 %v8682_v41  ;;  %v8723_v40 = vld [vmem:[%s11001_s1 + $0x400] sm:$0xff]  }
  0x91   : > { %v2698_v41 = vld [vmem:[%s9258_s21 + $0x20] sm:$0xee] }
  0x92   : > { %7820 = vmatpush3.bf16.msra.mxu0 %v8683_v32  ;;  %v7228_v32 = vcombine.low %v2698_v41, %v9717_v48 }
  0x93   : > { %7842 = vmatpush3.bf16.msra.mxu1 %v8684_v42  ;;  %7821 = vmatprep.subr.bf16.mxu0 %v8685_v43  ;;  %v7229_v42 = vcombine.high %v2698_v41, %v9717_v48  ;;  %v2699_v43 = vld [vmem:[%s9258_s21 + $0x28] sm:$0xee]  ;;  %v8730_v48 = vld [vmem:[%s11002_s2 + $0x1f8] sm:$0xff]  }
  0x94   : > { %7843 = vmatprep.subr.bf16.mxu1 %v8686_v34  ;;  %v8724_v34 = vld [vmem:[%s11001_s1 + $0x480] sm:$0xff]   ;;  %v2710_v49 = vrot.slane %v7228_v32, 1  ;;  %v8776_v41 = vld [vmem:[%s11002_s2 + $0xe8] sm:$0xff]  }
  0x95   : > { %v2711_v50 = vrot.slane %v7229_v42, 1  ;;  %v8777_v32 = vld [vmem:[%s11002_s2 + $0x28] sm:$0xff]  }
  0x96   : > { %7822 = vmatpush3.bf16.msra.mxu0 %v8687_v44  ;;  %v7230_v44 = vcombine.low %v2699_v43, %v9724_v51  ;;  %v8778_v42 = vld [vmem:[%s11002_s2 + $0xa8] sm:$0xff]  }
  0x97   : > { %7844 = vmatpush3.bf16.msra.mxu1 %v8688_v46  ;;  %7851 = vmatprep.subr.bf16.mxu0 %v8693_v54  ;;  %v7231_v46 = vcombine.high %v2699_v43, %v9724_v51  ;;  %v8731_v54 = vld [vmem:[%s11002_s2 + $0x138] sm:$0xff]   ;;  %v8779_v43 = vld [vmem:[%s11002_s2 + $0x60] sm:$0xff]  }
  0x98   : > { %7873 = vmatprep.subr.bf16.mxu1 %v8694_v33  ;;  %v2712_v55 = vrot.slane %v7230_v44, 1  ;;  %v8732_v51 = vld [vmem:[%s11002_s2 + $0x1b8] sm:$0xff]   ;;  %v8736_v33 = vld [vmem:[%s11002_s2 + $0x1b0] sm:$0xff]   ;;  %v8781_v44 = vld [vmem:[%s11002_s2 + $0x20] sm:$0xff]  }
  0x99   : > { %2650 = vmatmul.mubr.bf16.vlgmr.msra.gmra.mxu0 %v2399_v5  ;;  %v2713_v53 = vrot.slane %v7231_v46, 1  ;;  %v8748_v5 = vld [vmem:[%s11002_s2 + $0x198] sm:$0xff]   ;;  %v8782_v46 = vld [vmem:[%s11002_s2 + $0xa0] sm:$0xff]  }
  0x9a   : > { %2690 = vmatmul.mubr.bf16.vlgmr.msra.gmra.mxu1 %v2413_v7  ;;  %7852 = vmatpush3.bf16.msra.mxu0 %v8695_v2  ;;  %v8745_v2 = vld [vmem:[%s11002_s2 + $0x158] sm:$0xff]   ;;  %v8750_v7 = vld [vmem:[%s11002_s2 + $0x1d0] sm:$0xff]  }
  0x9b   : > { %7874 = vmatpush3.bf16.msra.mxu1 %v8696_v3  ;;  %7853 = vmatprep.subr.bf16.mxu0 %v8697_v8  ;;  %v8746_v3 = vld [vmem:[%s11002_s2 + $0x1d8] sm:$0xff]   ;;  %v8751_v8 = vld [vmem:[%s11002_s2 + $0x110] sm:$0xff]  }
  0x9c   : > { %7875 = vmatprep.subr.bf16.mxu1 %v8698_v9  ;;  %2942 = vmatprep.mubr.bf16.mxu0 %v2711_v50  ;;  %v8752_v9 = vld [vmem:[%s11002_s2 + $0x190] sm:$0xff]   ;;  %v8784_v50 = vld [vmem:[%s11002_s2 + $0xd8] sm:$0xff]  }
  0x9d   : > { %2982 = vmatprep.mubr.bf16.mxu1 %v2713_v53  ;;  %v8787_v53 = vld [vmem:[%s11002_s2 + $0x50] sm:$0xff]  }
  0x9e   : > { %7854 = vmatpush3.bf16.msra.mxu0 %v8699_v10  ;;  %v8753_v10 = vld [vmem:[%s11002_s2 + $0x148] sm:$0xff]  }
  0x9f   : > { %7876 = vmatpush3.bf16.msra.mxu1 %v8700_v12  ;;  %7855 = vmatprep.subr.bf16.mxu0 %v8701_v14  ;;  %v8754_v12 = vld [vmem:[%s11002_s2 + $0x1c8] sm:$0xff]  }
  0xa0   : > { %7877 = vmatprep.subr.bf16.mxu1 %v8702_v15  ;;  %v8755_v14 = vld [vmem:[%s11002_s2 + $0x108] sm:$0xff]  }
  0xa1   : > { %v8756_v15 = vld [vmem:[%s11002_s2 + $0x188] sm:$0xff]  }
  0xa2   : > { %7856 = vmatpush3.bf16.msra.mxu0 %v8703_v16  ;;  %v8757_v16 = vld [vmem:[%s11002_s2 + $0x140] sm:$0xff]  }
  0xa3   : > { %7878 = vmatpush3.bf16.msra.mxu1 %v8704_v17  ;;  %7857 = vmatprep.subr.bf16.mxu0 %v8705_v18  ;;  %v8758_v17 = vld [vmem:[%s11002_s2 + $0x1c0] sm:$0xff]  }
  0xa4   : > { %7879 = vmatprep.subr.bf16.mxu1 %v8706_v19  ;;  %v8759_v18 = vld [vmem:[%s11002_s2 + $0x100] sm:$0xff]  }
  0xa5   : > { %v8760_v19 = vld [vmem:[%s11002_s2 + $0x180] sm:$0xff]  }
  0xa6   : > { %7858 = vmatpush3.bf16.msra.mxu0 %v8707_v20  ;;  %v8761_v20 = vld [vmem:[%s9258_s21 + $0x10] ss:$16 sps:$4 sm:$0x3c]  }
  0xa7   : > { %7880 = vmatpush3.bf16.msra.mxu1 %v8708_v21  ;;  %7859 = vmatprep.subr.bf16.mxu0 %v8709_v22  ;;  %v8767_v21 = vld [vmem:[%s11002_s2 + $0x78] sm:$0xff]   ;;  %v8763_v22 = vld [vmem:[%s9258_s21 + $0x14] ss:$16 sps:$4 sm:$0x3c]  }
  0xa8   : > { %7881 = vmatprep.subr.bf16.mxu1 %v8710_v23  ;;  %v8768_v23 = vld [vmem:[%s11002_s2 + $0xf8] sm:$0xff]  }
  0xaa   : > { %7860 = vmatpush3.bf16.msra.mxu0 %v8711_v24  ;;  %v3013_v24 = vrot.slane %v8761_v20, 2 }
  0xab   : > { %7882 = vmatpush3.bf16.msra.mxu1 %v8712_v25  ;;  %7861 = vmatprep.subr.bf16.mxu0 %v8713_v26  ;;  %v8764_v25 = vld [vmem:[%s9258_s21 + $0x18] ss:$16 sps:$4 sm:$0x3c]   ;;  %v3014_v26 = vrot.slane %v8763_v22, 2 }
  0xac   : > { %7883 = vmatprep.subr.bf16.mxu1 %v8714_v27  ;;  %v8766_v27 = vld [vmem:[%s9258_s21 + $0x1c] ss:$16 sps:$4 sm:$0x3c]  }
  0xae   : > { %7862 = vmatpush3.bf16.msra.mxu0 %v8715_v28  ;;  %v3015_v28 = vrot.slane %v8764_v25, 2  ;;  %v8811_v25 = vld [vmem:[%s11002_s2 + $0x268] sm:$0xff]  }
  0xaf   : > { %7884 = vmatpush3.bf16.msra.mxu1 %v8716_v29  ;;  %7863 = vmatprep.subr.bf16.mxu0 %v8717_v30  ;;  %v8769_v29 = vld [vmem:[%s11002_s2 + $0x38] sm:$0xff]   ;;  %v3016_v30 = vrot.slane %v8766_v27, 2  ;;  %v8813_v27 = vld [vmem:[%s11002_s2 + $0x228] sm:$0xff]  }
  0xb0   : > { %7885 = vmatprep.subr.bf16.mxu1 %v8718_v31  ;;  %v8770_v31 = vld [vmem:[%s11002_s2 + $0xb8] sm:$0xff]  }
  0xb2   : > { %7864 = vmatpush3.bf16.msra.mxu0 %v8719_v35  ;;  %v8771_v35 = vld [vmem:[%s11002_s2 + $0x70] sm:$0xff]  }
  0xb3   : > { %7886 = vmatpush3.bf16.msra.mxu1 %v8720_v37  ;;  %7865 = vmatprep.subr.bf16.mxu0 %v8721_v38  ;;  %v8772_v37 = vld [vmem:[%s11002_s2 + $0xf0] sm:$0xff]  }
  0xb4   : > { %7887 = vmatprep.subr.bf16.mxu1 %v8722_v39  ;;  %v8773_v38 = vld [vmem:[%s11002_s2 + $0x30] sm:$0xff]  }
  0xb5   : > { %v8774_v39 = vld [vmem:[%s11002_s2 + $0xb0] sm:$0xff]  }
  0xb6   : > { %7866 = vmatpush3.bf16.msra.mxu0 %v8723_v40  ;;  %v8775_v40 = vld [vmem:[%s11002_s2 + $0x68] sm:$0xff]  }
  0xb7   : > { %7888 = vmatpush3.bf16.msra.mxu1 %v8724_v34  ;;  %7895 = vmatprep.subr.bf16.mxu0 %v8729_v52  ;;  %v8780_v34 = vld [vmem:[%s11002_s2 + $0xe0] sm:$0xff]   ;;  %v8785_v52 = vld [vmem:[%s11002_s2 + $0x18] sm:$0xff]  }
  0xb8   : > { %7917 = vmatprep.subr.bf16.mxu1 %v8730_v48  ;;  %v8786_v48 = vld [vmem:[%s11002_s2 + $0x98] sm:$0xff]  }
  0xb9   : > { %2943 = vmatmul.mubr.bf16.vlgmr.msra.gmra.mxu0 %v2710_v49  ;;  %v8783_v49 = vld [vmem:[%s11002_s2 + $0x58] sm:$0xff]  }
  0xba   : > { %2983 = vmatmul.mubr.bf16.vlgmr.msra.gmra.mxu1 %v2712_v55  ;;  %7896 = vmatpush3.bf16.msra.mxu0 %v8731_v54  ;;  %v8788_v54 = vld [vmem:[%s11002_s2 + $0xd0] sm:$0xff]  }
  0xbb   : > { %7918 = vmatpush3.bf16.msra.mxu1 %v8732_v51  ;;  %7897 = vmatprep.subr.bf16.mxu0 %v8733_v56  ;;  %v8789_v55 = vld [vmem:[%s11002_s2 + $0x10] sm:$0xff]   ;;  %v8791_v56 = vld [vmem:[%s11002_s2 + $0x48] sm:$0xff]  }
  0xbc   : > { %7919 = vmatprep.subr.bf16.mxu1 %v8734_v57  ;;  %3245 = vmatprep.mubr.bf16.mxu0 %v3014_v26  ;;  %v8790_v51 = vld [vmem:[%s11002_s2 + $0x90] sm:$0xff]   ;;  %v8792_v57 = vld [vmem:[%s11002_s2 + $0xc8] sm:$0xff]  }
  0xbd   : > { %3285 = vmatprep.mubr.bf16.mxu1 %v3016_v30  ;;  %v8812_v26 = vld [vmem:[%s11002_s2 + $0x2e8] sm:$0xff]   ;;  %v8816_v30 = vld [vmem:[%s11002_s2 + $0x2e0] sm:$0xff]  }
  0xbe   : > { %7898 = vmatpush3.bf16.msra.mxu0 %v8735_v58  ;;  %v8793_v58 = vld [vmem:[%s11002_s2 + $0x8] sm:$0xff]  }
  0xbf   : > { %7920 = vmatpush3.bf16.msra.mxu1 %v8736_v33  ;;  %7899 = vmatprep.subr.bf16.mxu0 %v8737_v59  ;;  %v8794_v33 = vld [vmem:[%s11002_s2 + $0x88] sm:$0xff]   ;;  %v8795_v59 = vld [vmem:[%s11002_s2 + $0x40] sm:$0xff]  }
  0xc0   : > { %7921 = vmatprep.subr.bf16.mxu1 %v8738_v60  ;;  %v8796_v60 = vld [vmem:[%s11002_s2 + $0xc0] sm:$0xff]  }
  0xc2   : > { %7900 = vmatpush3.bf16.msra.mxu0 %v8739_v61  ;;  %v8797_v61 = vld [vmem:[%s11002_s2] sm:$0xff]  }
  0xc3   : > { %7922 = vmatpush3.bf16.msra.mxu1 %v8740_v62  ;;  %7901 = vmatprep.subr.bf16.mxu0 %v8741_v36  ;;  %v8798_v62 = vld [vmem:[%s11002_s2 + $0x80] sm:$0xff]  }
  0xc4   : > { %7923 = vmatprep.subr.bf16.mxu1 %v8742_v63  ;;  %v2991_v63 = vld [vmem:[%s9258_s21 + $0x10] sm:$0xff] }
  0xc6   : > { %7902 = vmatpush3.bf16.msra.mxu0 %v8743_v0  ;;  %v2992_v0 = vld [vmem:[%s9258_s21 + $0x18] sm:$0xff] }
  0xc7   : > { %7924 = vmatpush3.bf16.msra.mxu1 %v8744_v1  ;;  %7903 = vmatprep.subr.bf16.mxu0 %v8745_v2  ;;  %v7300_v2 = vcombine.low %v2991_v63, %v2991_v63 }
  0xc8   : > { %7925 = vmatprep.subr.bf16.mxu1 %v8746_v3  ;;  %v7301_v3 = vcombine.high %v2991_v63, %v2991_v63 }
  0xca   : > { %7904 = vmatpush3.bf16.msra.mxu0 %v8747_v4  ;;  %v7302_v4 = vcombine.low %v2992_v0, %v2992_v0 }
  0xcb   : > { %7926 = vmatpush3.bf16.msra.mxu1 %v8748_v5  ;;  %7905 = vmatprep.subr.bf16.mxu0 %v8749_v6  ;;  %v7303_v5 = vcombine.high %v2992_v0, %v2992_v0  ;;  %v8803_v6 = vld [vmem:[%s11002_s2 + $0x278] sm:$0xff]   ;;  %v8839_v0 = vld [vmem:[%s11002_s2 + $0x370] sm:$0xff]  }
  0xcc   : > { %7927 = vmatprep.subr.bf16.mxu1 %v8750_v7 }
  0xce   : > { %7906 = vmatpush3.bf16.msra.mxu0 %v8751_v8  ;;  %v8804_v8 = vld [vmem:[%s11002_s2 + $0x2f8] sm:$0xff]  }
  0xcf   : > { %7928 = vmatpush3.bf16.msra.mxu1 %v8752_v9  ;;  %7907 = vmatprep.subr.bf16.mxu0 %v8753_v10 }
  0xd0   : > { %7929 = vmatprep.subr.bf16.mxu1 %v8754_v12  ;;  %v8805_v12 = vld [vmem:[%s11002_s2 + $0x238] sm:$0xff]  }
  0xd2   : > { %7908 = vmatpush3.bf16.msra.mxu0 %v8755_v14 }
  0xd3   : > { %7930 = vmatpush3.bf16.msra.mxu1 %v8756_v15  ;;  %7909 = vmatprep.subr.bf16.mxu0 %v8757_v16  ;;  %v8806_v16 = vld [vmem:[%s11002_s2 + $0x2b8] sm:$0xff]  }
  0xd4   : > { %7931 = vmatprep.subr.bf16.mxu1 %v8758_v17 }
  0xd6   : > { %7910 = vmatpush3.bf16.msra.mxu0 %v8759_v18 }
  0xd7   : > { %7932 = vmatpush3.bf16.msra.mxu1 %v8760_v19  ;;  %7939 = vmatprep.subr.bf16.mxu0 %v8767_v21  ;;  %v8807_v19 = vld [vmem:[%s11002_s2 + $0x270] sm:$0xff]  }
  0xd8   : > { %7961 = vmatprep.subr.bf16.mxu1 %v8768_v23  ;;  %v8808_v21 = vld [vmem:[%s11002_s2 + $0x2f0] sm:$0xff]  }
  0xd9   : > { %3246 = vmatmul.mubr.bf16.vlgmr.msra.gmra.mxu0 %v3013_v24  ;;  %v8809_v23 = vld [vmem:[%s11002_s2 + $0x230] sm:$0xff]  }
  0xda   : > { %7940 = vmatpush3.bf16.msra.mxu0 %v8769_v29  ;;  %3286 = vmatmul.mubr.bf16.vlgmr.msra.gmra.mxu1 %v3015_v28  ;;  %v8810_v24 = vld [vmem:[%s11002_s2 + $0x2b0] sm:$0xff]   ;;  %v8814_v28 = vld [vmem:[%s11002_s2 + $0x2a8] sm:$0xff]   ;;  %v8815_v29 = vld [vmem:[%s11002_s2 + $0x260] sm:$0xff]  }
  0xdb   : > { %7962 = vmatpush3.bf16.msra.mxu1 %v8770_v31  ;;  %7941 = vmatprep.subr.bf16.mxu0 %v8771_v35  ;;  %v8817_v31 = vld [vmem:[%s11002_s2 + $0x220] sm:$0xff]  }
  0xdc   : > { %7963 = vmatprep.subr.bf16.mxu1 %v8772_v37  ;;  %3531 = vmatprep.mubr.bf16.mxu0 %v7301_v3  ;;  %v8818_v35 = vld [vmem:[%s11002_s2 + $0x2a0] sm:$0xff]   ;;  %v8819_v37 = vld [vmem:[%s11002_s2 + $0x258] sm:$0xff]   ;;  %v8840_v3 = vld [vmem:[%s11002_s2 + $0x3f0] sm:$0xff]  }
  0xdd   : > { %3571 = vmatprep.mubr.bf16.mxu1 %v7303_v5  ;;  %v8841_v5 = vld [vmem:[%s11002_s2 + $0x330] sm:$0xff]  }
  0xde   : > { %7942 = vmatpush3.bf16.msra.mxu0 %v8773_v38  ;;  %v8820_v38 = vld [vmem:[%s11002_s2 + $0x2d8] sm:$0xff]  }
  0xdf   : > { %7964 = vmatpush3.bf16.msra.mxu1 %v8774_v39  ;;  %7943 = vmatprep.subr.bf16.mxu0 %v8775_v40  ;;  %v8821_v39 = vld [vmem:[%s11002_s2 + $0x218] sm:$0xff]  }
  0xe0   : > { %7965 = vmatprep.subr.bf16.mxu1 %v8776_v41  ;;  %v8822_v40 = vld [vmem:[%s11002_s2 + $0x298] sm:$0xff]   ;;  %v8823_v41 = vld [vmem:[%s11002_s2 + $0x250] sm:$0xff]  }
  0xe2   : > { %7944 = vmatpush3.bf16.msra.mxu0 %v8777_v32  ;;  %v8824_v32 = vld [vmem:[%s11002_s2 + $0x2d0] sm:$0xff]  }
  0xe3   : > { %7966 = vmatpush3.bf16.msra.mxu1 %v8778_v42  ;;  %7945 = vmatprep.subr.bf16.mxu0 %v8779_v43  ;;  %v8825_v42 = vld [vmem:[%s11002_s2 + $0x210] sm:$0xff]  }
  0xe4   : > { %7967 = vmatprep.subr.bf16.mxu1 %v8780_v34  ;;  %v8826_v43 = vld [vmem:[%s11002_s2 + $0x290] sm:$0xff]   ;;  %v8827_v34 = vld [vmem:[%s11002_s2 + $0x248] sm:$0xff]  }
  0xe6   : > { %7946 = vmatpush3.bf16.msra.mxu0 %v8781_v44  ;;  %v8828_v44 = vld [vmem:[%s11002_s2 + $0x2c8] sm:$0xff]  }
  0xe7   : > { %7968 = vmatpush3.bf16.msra.mxu1 %v8782_v46  ;;  %7947 = vmatprep.subr.bf16.mxu0 %v8783_v49  ;;  %v8829_v46 = vld [vmem:[%s11002_s2 + $0x208] sm:$0xff]  }
  0xe8   : > { %7969 = vmatprep.subr.bf16.mxu1 %v8784_v50  ;;  %v8830_v49 = vld [vmem:[%s11002_s2 + $0x288] sm:$0xff]   ;;  %v8831_v50 = vld [vmem:[%s11002_s2 + $0x240] sm:$0xff]  }
  0xea   : > { %7948 = vmatpush3.bf16.msra.mxu0 %v8785_v52  ;;  %v8832_v52 = vld [vmem:[%s11002_s2 + $0x2c0] sm:$0xff]  }
  0xeb   : > { %7970 = vmatpush3.bf16.msra.mxu1 %v8786_v48  ;;  %7949 = vmatprep.subr.bf16.mxu0 %v8787_v53  ;;  %v8833_v48 = vld [vmem:[%s11002_s2 + $0x200] sm:$0xff]  }
  0xec   : > { %7971 = vmatprep.subr.bf16.mxu1 %v8788_v54  ;;  %v8834_v54 = vld [vmem:[%s11002_s2 + $0x280] sm:$0xff]  }
  0xee   : > { %7950 = vmatpush3.bf16.msra.mxu0 %v8789_v55 }
  0xef   : > { %7972 = vmatpush3.bf16.msra.mxu1 %v8790_v51  ;;  %7951 = vmatprep.subr.bf16.mxu0 %v8791_v56  ;;  %v8835_v51 = vld [vmem:[%s11002_s2 + $0x378] sm:$0xff]  }
  0xf0   : > { %7973 = vmatprep.subr.bf16.mxu1 %v8792_v57  ;;  %v8836_v57 = vld [vmem:[%s11002_s2 + $0x3f8] sm:$0xff]  }
  0xf2   : > { %7952 = vmatpush3.bf16.msra.mxu0 %v8793_v58 }
  0xf3   : > { %7974 = vmatpush3.bf16.msra.mxu1 %v8794_v33  ;;  %7953 = vmatprep.subr.bf16.mxu0 %v8795_v59  ;;  %v8837_v59 = vld [vmem:[%s11002_s2 + $0x338] sm:$0xff]  }
  0xf4   : > { %7975 = vmatprep.subr.bf16.mxu1 %v8796_v60 }
  0xf6   : > { %7954 = vmatpush3.bf16.msra.mxu0 %v8797_v61 }
  0xf7   : > { %7976 = vmatpush3.bf16.msra.mxu1 %v8798_v62  ;;  %7983 = vmatprep.subr.bf16.mxu0 %v8803_v6  ;;  %v8838_v62 = vld [vmem:[%s11002_s2 + $0x3b8] sm:$0xff]   ;;  %v8842_v6 = vld [vmem:[%s11002_s2 + $0x3b0] sm:$0xff]  }
  0xf8   : > { %8005 = vmatprep.subr.bf16.mxu1 %v8804_v8  ;;  %v8844_v8 = vld [vmem:[%s11002_s2 + $0x3e8] sm:$0xff]  }
  0xf9   : > { %v7691_v36 = vpop.f32.mrf.mxu0  ;;  %3532 = vmatmul.mubr.bf16.vlgmr.msra.gmra.mxu0 %v7300_v2 }
  0xfa   : > { %v7713_v1 = vpop.f32.mrf.mxu1  ;;  %3572 = vmatmul.mubr.bf16.vlgmr.msra.gmra.mxu1 %v7302_v4  ;;  %7984 = vmatpush3.bf16.msra.mxu0 %v8805_v12  ;;  %v8847_v12 = vld [vmem:[%s11002_s2 + $0x360] sm:$0xff]  }
  0xfb   : > { %v7692_v7 = vpop.f32.mrf.mxu0  ;;  %8006 = vmatpush3.bf16.msra.mxu1 %v8806_v16  ;;  %7985 = vmatprep.subr.bf16.mxu0 %v8807_v19  ;;  %v8850_v16 = vld [vmem:[%s11002_s2 + $0x3a0] sm:$0xff]   ;;  %v8853_v19 = vld [vmem:[%s11002_s2 + $0x318] sm:$0xff]  }
  0xfc   : > { %v7693_v9 = vadd.f32 %v7692_v7, %v7691_v36  ;;  %v7714_v10 = vpop.f32.mrf.mxu1  ;;  %3803 = vmatprep.mubr.bf16.mxu0 %v9521_v45  ;;  %8007 = vmatprep.subr.bf16.mxu1 %v8808_v21  ;;  %v8843_v7 = vld [vmem:[%s11002_s2 + $0x368] sm:$0xff]   ;;  %v8855_v21 = vld [vmem:[%s11002_s2 + $0x350] sm:$0xff]  }
  0xfd   : > { %v7715_v14 = vadd.f32 %v7714_v10, %v7713_v1  ;;  %v7694_v15 = vpop.f32.mrf.mxu0  ;;  %3843 = vmatprep.mubr.bf16.mxu1 %v9528_v47  ;;  %v8846_v10 = vld [vmem:[%s11002_s2 + $0x3a8] sm:$0xff]  }
  0xfe   : > { %v7716_v17 = vpop.f32.mrf.mxu1  ;;  %7986 = vmatpush3.bf16.msra.mxu0 %v8809_v23  ;;  %v8849_v15 = vld [vmem:[%s11002_s2 + $0x320] sm:$0xff]   ;;  %v8857_v23 = vld [vmem:[%s11002_s2 + $0x310] sm:$0xff]  }
  0xff   : > { %v10042_v18 = vadd.f32 %v7715_v14, %v7693_v9  ;;  %v7695_v20 = vpop.f32.mrf.mxu0  ;;  %8008 = vmatpush3.bf16.msra.mxu1 %v8810_v24  ;;  %7987 = vmatprep.subr.bf16.mxu0 %v8811_v25  ;;  %v8845_v9 = vld [vmem:[%s11002_s2 + $0x328] sm:$0xff]   ;;  %v8848_v14 = vld [vmem:[%s11002_s2 + $0x3e0] sm:$0xff]   ;;  %v8851_v17 = vld [vmem:[%s11002_s2 + $0x358] sm:$0xff]  }
 0x100   : > { %v7717_v22 = vpop.f32.mrf.mxu1  ;;  %8009 = vmatprep.subr.bf16.mxu1 %v8812_v26  ;;  %v8854_v20 = vld [vmem:[%s11002_s2 + $0x398] sm:$0xff]   ;;  %v8858_v24 = vld [vmem:[%s11002_s2 + $0x390] sm:$0xff]   ;;  %v8859_v25 = vld [vmem:[%s11002_s2 + $0x348] sm:$0xff]  }
 0x101   : > { %v8856_v22 = vld [vmem:[%s11002_s2 + $0x3d0] sm:$0xff]   ;;  %v8860_v26 = vld [vmem:[%s11002_s2 + $0x3c8] sm:$0xff]  }
 0x102   : > { %7988 = vmatpush3.bf16.msra.mxu0 %v8813_v27  ;;  %v8861_v27 = vld [vmem:[%s11002_s2 + $0x308] sm:$0xff]  }
 0x103   : > { %8010 = vmatpush3.bf16.msra.mxu1 %v8814_v28  ;;  %7989 = vmatprep.subr.bf16.mxu0 %v8815_v29  ;;  %v8862_v28 = vld [vmem:[%s11002_s2 + $0x388] sm:$0xff]   ;;  %v8863_v29 = vld [vmem:[%s11002_s2 + $0x340] sm:$0xff]  }
 0x104   : > { %8011 = vmatprep.subr.bf16.mxu1 %v8816_v30  ;;  %v8864_v30 = vld [vmem:[%s11002_s2 + $0x3c0] sm:$0xff]  }
 0x106   : > { %7990 = vmatpush3.bf16.msra.mxu0 %v8817_v31  ;;  %v8865_v31 = vld [vmem:[%s11002_s2 + $0x300] sm:$0xff]  }
 0x107   : > { %8012 = vmatpush3.bf16.msra.mxu1 %v8818_v35  ;;  %7991 = vmatprep.subr.bf16.mxu0 %v8819_v37  ;;  %v8866_v37 = vld [vmem:[%s11002_s2 + $0x380] sm:$0xff]  }
 0x108   : > { %8013 = vmatprep.subr.bf16.mxu1 %v8820_v38 }
 0x10a   : > { %7992 = vmatpush3.bf16.msra.mxu0 %v8821_v39  ;;  %v8867_v39 = vld [vmem:[%s9258_s21 + $0x20] ss:$16 sps:$4 sm:$0x3c]  }
 0x10b   : > { %8014 = vmatpush3.bf16.msra.mxu1 %v8822_v40  ;;  %7993 = vmatprep.subr.bf16.mxu0 %v8823_v41  ;;  %v8873_v40 = vld [vmem:[%s11002_s2 + $0x478] sm:$0xff]  }
 0x10c   : > { %8015 = vmatprep.subr.bf16.mxu1 %v8824_v32  ;;  %v8869_v32 = vld [vmem:[%s9258_s21 + $0x24] ss:$16 sps:$4 sm:$0x3c]  }
 0x10e   : > { %7994 = vmatpush3.bf16.msra.mxu0 %v8825_v42  ;;  %v8874_v42 = vld [vmem:[%s11002_s2 + $0x4f8] sm:$0xff]  }
 0x10f   : > { %8016 = vmatpush3.bf16.msra.mxu1 %v8826_v43  ;;  %7995 = vmatprep.subr.bf16.mxu0 %v8827_v34 }
 0x110   : > { %8017 = vmatprep.subr.bf16.mxu1 %v8828_v44  ;;  %v3872_v44 = vrot.slane %v8867_v39, 2  ;;  %v8910_v39 = vld [vmem:[%s11003_s3 + $0x1f8] sm:$0xff]  }
 0x112   : > { %7996 = vmatpush3.bf16.msra.mxu0 %v8829_v46  ;;  %v8870_v46 = vld [vmem:[%s9258_s21 + $0x28] ss:$16 sps:$4 sm:$0x3c]  }
 0x113   : > { %8018 = vmatpush3.bf16.msra.mxu1 %v8830_v49  ;;  %7997 = vmatprep.subr.bf16.mxu0 %v8831_v50 }
 0x114   : > { %8019 = vmatprep.subr.bf16.mxu1 %v8832_v52  ;;  %v3873_v52 = vrot.slane %v8869_v32, 2  ;;  %v8911_v32 = vld [vmem:[%s11003_s3 + $0x138] sm:$0xff]  }
 0x116   : > { %7998 = vmatpush3.bf16.msra.mxu0 %v8833_v48  ;;  %v8872_v48 = vld [vmem:[%s9258_s21 + $0x2c] ss:$16 sps:$4 sm:$0x3c]  }
 0x117   : > { %8020 = vmatpush3.bf16.msra.mxu1 %v8834_v54  ;;  %8027 = vmatprep.subr.bf16.mxu0 %v8835_v51  ;;  %v3874_v54 = vrot.slane %v8870_v46, 2 }
 0x118   : > { %8049 = vmatprep.subr.bf16.mxu1 %v8836_v57  ;;  %v3875_v57 = vrot.slane %v8872_v48, 2 }
 0x119   : > { %v7735_v53 = vpop.f32.mrf.mxu0  ;;  %3804 = vmatmul.mubr.bf16.vlgmr.msra.gmra.mxu0 %v9615_v11 }
 0x11a   : > { %v7757_v55 = vpop.f32.mrf.mxu1  ;;  %3844 = vmatmul.mubr.bf16.vlgmr.msra.gmra.mxu1 %v9622_v13  ;;  %8028 = vmatpush3.bf16.msra.mxu0 %v8837_v59 }
 0x11b   : > { %v7736_v56 = vpop.f32.mrf.mxu0  ;;  %8050 = vmatpush3.bf16.msra.mxu1 %v8838_v62  ;;  %8029 = vmatprep.subr.bf16.mxu0 %v8839_v0  ;;  %v8879_v62 = vld [vmem:[%s11002_s2 + $0x430] sm:$0xff]   ;;  %v8882_v0 = vld [vmem:[%s11002_s2 + $0x4e8] sm:$0xff]  }
 0x11c   : > { %v7737_v58 = vadd.f32 %v7736_v56, %v7735_v53  ;;  %v7758_v33 = vpop.f32.mrf.mxu1  ;;  %8051 = vmatprep.subr.bf16.mxu1 %v8840_v3  ;;  %4104 = vmatprep.mubr.bf16.mxu0 %v3873_v52  ;;  %v8885_v3 = vld [vmem:[%s11002_s2 + $0x460] sm:$0xff]   ;;  %v8914_v52 = vld [vmem:[%s11003_s3 + $0x1f0] sm:$0xff]  }
 0x11d   : > { %v7759_v60 = vadd.f32 %v7758_v33, %v7757_v55  ;;  %v7738_v61 = vpop.f32.mrf.mxu0  ;;  %v8875_v55 = vld [vmem:[%s11002_s2 + $0x438] sm:$0xff]   ;;  %4144 = vmatprep.mubr.bf16.mxu1 %v3875_v57  ;;  %v8919_v57 = vld [vmem:[%s11003_s3 + $0x128] sm:$0xff]  }
 0x11e   : > { %v2047_v36 = vadd.f32 %v7737_v58, %v10042_v18  ;;  %v7760_v63 = vpop.f32.mrf.mxu1  ;;  %8030 = vmatpush3.bf16.msra.mxu0 %v8841_v5  ;;  %v8852_v18 = vld [vmem:[%s11002_s2 + $0x3d8] sm:$0xff]   ;;  %v8878_v61 = vld [vmem:[%s11002_s2 + $0x4f0] sm:$0xff]   ;;  %v8887_v5 = vld [vmem:[%s11002_s2 + $0x420] sm:$0xff]  }
 0x11f   : > { %v7739_v1 = vpop.f32.mrf.mxu0  ;;  %8052 = vmatpush3.bf16.msra.mxu1 %v8842_v6  ;;  %8031 = vmatprep.subr.bf16.mxu0 %v8843_v7  ;;  %v8876_v58 = vld [vmem:[%s11002_s2 + $0x4b8] sm:$0xff]   ;;  %v8881_v63 = vld [vmem:[%s11002_s2 + $0x468] sm:$0xff]   ;;  %v8888_v6 = vld [vmem:[%s11002_s2 + $0x4a0] sm:$0xff]  }
 0x120   : > { %v10148_v2 = vadd.f32 %v7759_v60, %v2047_v36  ;;  %v7761_v4 = vpop.f32.mrf.mxu1  ;;  %8053 = vmatprep.subr.bf16.mxu1 %v8844_v8  ;;  %v8877_v60 = vld [vmem:[%s11002_s2 + $0x470] sm:$0xff]   ;;  %v8883_v1 = vld [vmem:[%s11002_s2 + $0x428] sm:$0xff]   ;;  %v8889_v7 = vld [vmem:[%s11002_s2 + $0x458] sm:$0xff]  }
 0x121   : > { %v8880_v36 = vld [vmem:[%s11002_s2 + $0x4b0] sm:$0xff]   ;;  %v8886_v4 = vld [vmem:[%s11002_s2 + $0x4e0] sm:$0xff]   ;;  %v8890_v8 = vld [vmem:[%s11002_s2 + $0x4d8] sm:$0xff]  }
 0x122   : > { %8032 = vmatpush3.bf16.msra.mxu0 %v8845_v9  ;;  %v8891_v9 = vld [vmem:[%s11002_s2 + $0x418] sm:$0xff]  }
 0x123   : > { %8054 = vmatpush3.bf16.msra.mxu1 %v8846_v10  ;;  %8033 = vmatprep.subr.bf16.mxu0 %v8847_v12  ;;  %v8892_v10 = vld [vmem:[%s11002_s2 + $0x498] sm:$0xff]   ;;  %v8893_v12 = vld [vmem:[%s11002_s2 + $0x450] sm:$0xff]  }
 0x124   : > { %8055 = vmatprep.subr.bf16.mxu1 %v8848_v14  ;;  %v8894_v14 = vld [vmem:[%s11002_s2 + $0x4d0] sm:$0xff]  }
 0x126   : > { %8034 = vmatpush3.bf16.msra.mxu0 %v8849_v15  ;;  %v8895_v15 = vld [vmem:[%s11002_s2 + $0x410] sm:$0xff]  }
 0x127   : > { %8056 = vmatpush3.bf16.msra.mxu1 %v8850_v16  ;;  %8035 = vmatprep.subr.bf16.mxu0 %v8851_v17  ;;  %v8896_v16 = vld [vmem:[%s11002_s2 + $0x490] sm:$0xff]   ;;  %v8897_v17 = vld [vmem:[%s11002_s2 + $0x448] sm:$0xff]  }
 0x128   : > { %8057 = vmatprep.subr.bf16.mxu1 %v8852_v18  ;;  %v8898_v18 = vld [vmem:[%s11002_s2 + $0x4c8] sm:$0xff]  }
 0x12a   : > { %8036 = vmatpush3.bf16.msra.mxu0 %v8853_v19  ;;  %v8899_v19 = vld [vmem:[%s11002_s2 + $0x408] sm:$0xff]  }
 0x12b   : > { %8058 = vmatpush3.bf16.msra.mxu1 %v8854_v20  ;;  %8037 = vmatprep.subr.bf16.mxu0 %v8855_v21  ;;  %v8900_v20 = vld [vmem:[%s11002_s2 + $0x488] sm:$0xff]   ;;  %v8901_v21 = vld [vmem:[%s11002_s2 + $0x440] sm:$0xff]  }
 0x12c   : > { %8059 = vmatprep.subr.bf16.mxu1 %v8856_v22  ;;  %v8902_v22 = vld [vmem:[%s11002_s2 + $0x4c0] sm:$0xff]  }
 0x12e   : > { %8038 = vmatpush3.bf16.msra.mxu0 %v8857_v23  ;;  %v8903_v23 = vld [vmem:[%s11002_s2 + $0x400] sm:$0xff]  }
 0x12f   : > { %8060 = vmatpush3.bf16.msra.mxu1 %v8858_v24  ;;  %8039 = vmatprep.subr.bf16.mxu0 %v8859_v25  ;;  %v8904_v24 = vld [vmem:[%s11002_s2 + $0x480] sm:$0xff]  }
 0x130   : > { %8061 = vmatprep.subr.bf16.mxu1 %v8860_v26  ;;  %v4153_v26 = vld [vmem:[%s9258_s21 + $0x30] sm:$0xff] }
 0x132   : > { %8040 = vmatpush3.bf16.msra.mxu0 %v8861_v27  ;;  %v4154_v27 = vld [vmem:[%s9258_s21 + $0x38] sm:$0xff] }
 0x133   : > { %8062 = vmatpush3.bf16.msra.mxu1 %v8862_v28  ;;  %8041 = vmatprep.subr.bf16.mxu0 %v8863_v29  ;;  %v7405_v29 = vcombine.high %v4153_v26, %v4153_v26 }
 0x134   : > { %8063 = vmatprep.subr.bf16.mxu1 %v8864_v30  ;;  %v7407_v30 = vcombine.high %v4154_v27, %v4154_v27 }
 0x136   : > { %8042 = vmatpush3.bf16.msra.mxu0 %v8865_v31  ;;  %v7404_v31 = vcombine.low %v4153_v26, %v4153_v26 }
 0x137   : > { %8064 = vmatpush3.bf16.msra.mxu1 %v8866_v37  ;;  %8071 = vmatprep.subr.bf16.mxu0 %v8873_v40  ;;  %v8909_v37 = vld [vmem:[%s11003_s3 + $0x178] sm:$0xff]  }
 0x138   : > { %8093 = vmatprep.subr.bf16.mxu1 %v8874_v42 }
 0x139   : > { %v7779_v35 = vpop.f32.mrf.mxu0  ;;  %4105 = vmatmul.mubr.bf16.vlgmr.msra.gmra.mxu0 %v3872_v44 }
 0x13a   : > { %v7801_v38 = vpop.f32.mrf.mxu1  ;;  %8072 = vmatpush3.bf16.msra.mxu0 %v8875_v55  ;;  %4145 = vmatmul.mubr.bf16.vlgmr.msra.gmra.mxu1 %v3874_v54  ;;  %v8915_v54 = vld [vmem:[%s11003_s3 + $0x130] sm:$0xff]  }
 0x13b   : > { %v7780_v41 = vpop.f32.mrf.mxu0  ;;  %8094 = vmatpush3.bf16.msra.mxu1 %v8876_v58  ;;  %8073 = vmatprep.subr.bf16.mxu0 %v8877_v60  ;;  %v8916_v55 = vld [vmem:[%s11003_s3 + $0x1b0] sm:$0xff]   ;;  %v8920_v58 = vld [vmem:[%s11003_s3 + $0x1a8] sm:$0xff]   ;;  %v8923_v60 = vld [vmem:[%s11003_s3 + $0x120] sm:$0xff]  }
 0x13c   : > { %v7781_v43 = vadd.f32 %v7780_v41, %v7779_v35  ;;  %v7802_v34 = vpop.f32.mrf.mxu1  ;;  %8095 = vmatprep.subr.bf16.mxu1 %v8878_v61  ;;  %v7406_v35 = vcombine.low %v4154_v27, %v4154_v27  ;;  %4393 = vmatprep.mubr.bf16.mxu0 %v7405_v29  ;;  %v8924_v61 = vld [vmem:[%s11003_s3 + $0x1a0] sm:$0xff]  }
 0x13d   : > { %v7803_v49 = vadd.f32 %v7802_v34, %v7801_v38  ;;  %v7782_v50 = vpop.f32.mrf.mxu0  ;;  %4433 = vmatprep.mubr.bf16.mxu1 %v7407_v30  ;;  %v8912_v34 = vld [vmem:[%s11003_s3 + $0x1b8] sm:$0xff]  }
 0x13e   : > { %v7804_v53 = vpop.f32.mrf.mxu1  ;;  %8074 = vmatpush3.bf16.msra.mxu0 %v8879_v62  ;;  %v8925_v62 = vld [vmem:[%s11003_s3 + $0x158] sm:$0xff]  }
 0x13f   : > { %v2367_v51 = vadd.f32 %v7803_v49, %v7781_v43  ;;  %v7783_v56 = vpop.f32.mrf.mxu0  ;;  %8096 = vmatpush3.bf16.msra.mxu1 %v8880_v36  ;;  %8075 = vmatprep.subr.bf16.mxu0 %v8881_v63  ;;  %v8913_v49 = vld [vmem:[%s11003_s3 + $0x170] sm:$0xff]   ;;  %v8926_v36 = vld [vmem:[%s11003_s3 + $0x1d8] sm:$0xff]  }
 0x140   : > { %v7805_v33 = vpop.f32.mrf.mxu1  ;;  %8097 = vmatprep.subr.bf16.mxu1 %v8882_v0  ;;  %v8918_v56 = vld [vmem:[%s11003_s3 + $0x1e8] sm:$0xff]   ;;  %v8927_v63 = vld [vmem:[%s11003_s3 + $0x118] sm:$0xff]  }
 0x141   : > { %v10248_v59 = vadd.f32 %v2367_v51, %v10148_v2  ;;  %v8884_v2 = vld [vmem:[%s11002_s2 + $0x4a8] sm:$0xff]   ;;  %v8921_v33 = vld [vmem:[%s11003_s3 + $0x160] sm:$0xff]   ;;  %v8928_v0 = vld [vmem:[%s11003_s3 + $0x198] sm:$0xff]  }
 0x142   : > { %8076 = vmatpush3.bf16.msra.mxu0 %v8883_v1  ;;  %v8917_v51 = vld [vmem:[%s11003_s3 + $0x168] sm:$0xff]   ;;  %v8929_v1 = vld [vmem:[%s11003_s3 + $0x150] sm:$0xff]  }
 0x143   : > { %8098 = vmatpush3.bf16.msra.mxu1 %v8884_v2  ;;  %8077 = vmatprep.subr.bf16.mxu0 %v8885_v3  ;;  %v8930_v2 = vld [vmem:[%s11003_s3 + $0x1d0] sm:$0xff]  }
 0x144   : > { %8099 = vmatprep.subr.bf16.mxu1 %v8886_v4  ;;  %v8931_v3 = vld [vmem:[%s11003_s3 + $0x110] sm:$0xff]  }
 0x145   : > { %v8932_v4 = vld [vmem:[%s11003_s3 + $0x190] sm:$0xff]  }
 0x146   : > { %8078 = vmatpush3.bf16.msra.mxu0 %v8887_v5  ;;  %v8933_v5 = vld [vmem:[%s11003_s3 + $0x148] sm:$0xff]  }
 0x147   : > { %8100 = vmatpush3.bf16.msra.mxu1 %v8888_v6  ;;  %8079 = vmatprep.subr.bf16.mxu0 %v8889_v7  ;;  %v8934_v6 = vld [vmem:[%s11003_s3 + $0x1c8] sm:$0xff]  }
 0x148   : > { %8101 = vmatprep.subr.bf16.mxu1 %v8890_v8  ;;  %v8935_v7 = vld [vmem:[%s11003_s3 + $0x108] sm:$0xff]  }
 0x149   : > { %v8936_v8 = vld [vmem:[%s11003_s3 + $0x188] sm:$0xff]  }
 0x14a   : > { %8080 = vmatpush3.bf16.msra.mxu0 %v8891_v9  ;;  %v8937_v9 = vld [vmem:[%s11003_s3 + $0x140] sm:$0xff]  }
 0x14b   : > { %8102 = vmatpush3.bf16.msra.mxu1 %v8892_v10  ;;  %8081 = vmatprep.subr.bf16.mxu0 %v8893_v12  ;;  %v8938_v10 = vld [vmem:[%s11003_s3 + $0x1c0] sm:$0xff]  }
 0x14c   : > { %8103 = vmatprep.subr.bf16.mxu1 %v8894_v14  ;;  %v8939_v12 = vld [vmem:[%s11003_s3 + $0x100] sm:$0xff]  }
 0x14e   : > { %8082 = vmatpush3.bf16.msra.mxu0 %v8895_v15  ;;  %v8940_v15 = vld [vmem:[%s11003_s3 + $0x180] sm:$0xff]  }
 0x14f   : > { %8104 = vmatpush3.bf16.msra.mxu1 %v8896_v16  ;;  %8083 = vmatprep.subr.bf16.mxu0 %v8897_v17  ;;  %v8941_v17 = vld [vmem:[%s9258_s21 + $0x10] ss:$16 sps:$4 sm:$0x1f]  }
 0x150   : > { %8105 = vmatprep.subr.bf16.mxu1 %v8898_v18  ;;  %v4467_v29 = vshrl.u32 %v8941_v17, 16  ;;  %v4469_v30 = vshll.u32 %v8941_v17, 16 }
 0x152   : > { %8084 = vmatpush3.bf16.msra.mxu0 %v8899_v19  ;;  %v8943_v19 = vld [vmem:[%s9258_s21 + $0x14] ss:$16 sps:$4 sm:$0x1f]  }
 0x153   : > { %8106 = vmatpush3.bf16.msra.mxu1 %v8900_v20  ;;  %8085 = vmatprep.subr.bf16.mxu0 %v8901_v21  ;;  %v8947_v20 = vld [vmem:[%s11003_s3 + $0x78] sm:$0xff]   ;;  %v4474_v27 = vshrl.u32 %v8943_v19, 16 }
 0x154   : > { %8107 = vmatprep.subr.bf16.mxu1 %v8902_v22 }
 0x156   : > { %8086 = vmatpush3.bf16.msra.mxu0 %v8903_v23  ;;  %v8944_v23 = vld [vmem:[%s9258_s21 + $0x18] ss:$16 sps:$4 sm:$0x1f]  }
 0x157   : > { %8108 = vmatpush3.bf16.msra.mxu1 %v8904_v24  ;;  %8115 = vmatprep.subr.bf16.mxu0 %v8909_v37  ;;  %v8946_v24 = vld [vmem:[%s9258_s21 + $0x1c] ss:$16 sps:$4 sm:$0x1f]  }
 0x158   : > { %8137 = vmatprep.subr.bf16.mxu1 %v8910_v39  ;;  %v4490_v37 = vshll.u32 %v8946_v24, 16  ;;  %v4483_v39 = vshll.u32 %v8944_v23, 16 }
 0x159   : > { %v7823_v25 = vpop.f32.mrf.mxu0  ;;  %4394 = vmatmul.mubr.bf16.vlgmr.msra.gmra.mxu0 %v7404_v31 }
 0x15a   : > { %v7845_v28 = vpop.f32.mrf.mxu1  ;;  %4434 = vmatmul.mubr.bf16.vlgmr.msra.gmra.mxu1 %v7406_v35  ;;  %8116 = vmatpush3.bf16.msra.mxu0 %v8911_v32  ;;  %v4488_v35 = vshrl.u32 %v8946_v24, 16  ;;  %v4471_v32 = vrot.slane %v4469_v30, 1 }
 0x15b   : > { %v7824_v38 = vpop.f32.mrf.mxu0  ;;  %8138 = vmatpush3.bf16.msra.mxu1 %v8912_v34  ;;  %8117 = vmatprep.subr.bf16.mxu0 %v8913_v49  ;;  %v4492_v34 = vrot.slane %v4490_v37, 1  ;;  %v8949_v49 = vld [vmem:[%s11003_s3 + $0x38] sm:$0xff]  }
 0x15c   : > { %v7825_v40 = vadd.f32 %v7824_v38, %v7823_v25  ;;  %v7846_v41 = vpop.f32.mrf.mxu1  ;;  %8139 = vmatprep.subr.bf16.mxu1 %v8914_v52  ;;  %v4481_v38 = vshrl.u32 %v8944_v23, 16  ;;  %v4472_v52 = vor.u32 %v4471_v32, %v4467_v29  ;;  %v8977_v23 = vld [vmem:[%s11003_s3] sm:$0xff]  }
 0x15d   : > { %v7847_v42 = vadd.f32 %v7846_v41, %v7845_v28  ;;  %v7826_v43 = vpop.f32.mrf.mxu0  ;;  %v4476_v28 = vshll.u32 %v8943_v19, 16  ;;  %v8981_v29 = vld [vmem:[%s9258_s21 + $0x4] ss:$16 sps:$4 sm:$0x1e]  }
 0x15e   : > { %v7848_v44 = vpop.f32.mrf.mxu1  ;;  %8118 = vmatpush3.bf16.msra.mxu0 %v8915_v54  ;;  %v4493_v54 = vor.u32 %v4492_v34, %v4488_v35  ;;  %v4787_v37 = vrot.slane %v8981_v29, 1  ;;  %v8988_v34 = vld [vmem:[%s11003_s3 + $0x2b8] sm:$0xff]   ;;  %v9027_v29 = vld [vmem:[%s11003_s3 + $0x328] sm:$0xff]  }
 0x15f   : > { %v2692_v46 = vadd.f32 %v7847_v42, %v7825_v40  ;;  %v7827_v50 = vpop.f32.mrf.mxu0  ;;  %8140 = vmatpush3.bf16.msra.mxu1 %v8916_v55  ;;  %8119 = vmatprep.subr.bf16.mxu0 %v8917_v51  ;;  %v4478_v41 = vrot.slane %v4476_v28, 1  ;;  %v4485_v44 = vrot.slane %v4483_v39, 1  ;;  %v8950_v51 = vld [vmem:[%s11003_s3 + $0xb8] sm:$0xff]   ;;  %v8979_v28 = vld [vmem:[%s9258_s21] ss:$16 sps:$4 sm:$0x1e]  }
 0x160   : > { %v7849_v48 = vpop.f32.mrf.mxu1  ;;  %8141 = vmatprep.subr.bf16.mxu1 %v8918_v56  ;;  %v8951_v56 = vld [vmem:[%s11003_s3 + $0x70] sm:$0xff]   ;;  %4762 = vmatprep.mubr.bf16.mxu1 %v4493_v54  ;;  %v4786_v35 = vrot.slane %v8979_v28, 1  ;;  %v8985_v39 = vld [vmem:[%s11003_s3 + $0x278] sm:$0xff]   ;;  %v8995_v54 = vld [vmem:[%s11003_s3 + $0x228] sm:$0xff]  }
 0x161   : > { %v10355_v53 = vadd.f32 %v2692_v46, %v10248_v59  ;;  %v8922_v59 = vld [vmem:[%s11003_s3 + $0x1e0] sm:$0xff]   ;;  %v8948_v46 = vld [vmem:[%s11003_s3 + $0xf8] sm:$0xff]   ;;  %v4479_v50 = vor.u32 %v4478_v41, %v4474_v27  ;;  %v4486_v55 = vor.u32 %v4485_v44, %v4481_v38  ;;  %v8989_v44 = vld [vmem:[%s11003_s3 + $0x270] sm:$0xff]  }
 0x162   : > { %8120 = vmatpush3.bf16.msra.mxu0 %v8919_v57  ;;  %v8952_v57 = vld [vmem:[%s11003_s3 + $0xf0] sm:$0xff]   ;;  %v8982_v38 = vld [vmem:[%s9258_s21 + $0x8] ss:$16 sps:$4 sm:$0x1e]  }
 0x163   : > { %8142 = vmatpush3.bf16.msra.mxu1 %v8920_v58  ;;  %8121 = vmatprep.subr.bf16.mxu0 %v8921_v33  ;;  %v8954_v58 = vld [vmem:[%s11003_s3 + $0xb0] sm:$0xff]   ;;  %v8955_v33 = vld [vmem:[%s11003_s3 + $0x68] sm:$0xff]   ;;  %v8986_v41 = vld [vmem:[%s11003_s3 + $0x2f8] sm:$0xff]   ;;  %v4788_v32 = vrot.slane %v8982_v38, 1 }
 0x164   : > { %8143 = vmatprep.subr.bf16.mxu1 %v8922_v59  ;;  %4722 = vmatprep.mubr.bf16.mxu0 %v4479_v50  ;;  %v8956_v59 = vld [vmem:[%s11003_s3 + $0xe8] sm:$0xff]   ;;  %v9032_v38 = vld [vmem:[%s11003_s3 + $0x3a0] sm:$0xff]  }
 0x165   : > { %v8993_v50 = vld [vmem:[%s11003_s3 + $0x268] sm:$0xff]  }
 0x166   : > { %8122 = vmatpush3.bf16.msra.mxu0 %v8923_v60  ;;  %v8957_v60 = vld [vmem:[%s11003_s3 + $0x28] sm:$0xff]  }
 0x167   : > { %8144 = vmatpush3.bf16.msra.mxu1 %v8924_v61  ;;  %8123 = vmatprep.subr.bf16.mxu0 %v8925_v62  ;;  %v8958_v61 = vld [vmem:[%s11003_s3 + $0xa8] sm:$0xff]   ;;  %v8959_v62 = vld [vmem:[%s11003_s3 + $0x60] sm:$0xff]  }
 0x168   : > { %8145 = vmatprep.subr.bf16.mxu1 %v8926_v36  ;;  %v8960_v36 = vld [vmem:[%s11003_s3 + $0xe0] sm:$0xff]   ;;  %v9026_v28 = vld [vmem:[%s11003_s3 + $0x3e8] sm:$0xff]  }
 0x16a   : > { %8124 = vmatpush3.bf16.msra.mxu0 %v8927_v63  ;;  %v8961_v63 = vld [vmem:[%s11003_s3 + $0x20] sm:$0xff]  }
 0x16b   : > { %8146 = vmatpush3.bf16.msra.mxu1 %v8928_v0  ;;  %8125 = vmatprep.subr.bf16.mxu0 %v8929_v1  ;;  %v8962_v0 = vld [vmem:[%s11003_s3 + $0xa0] sm:$0xff]   ;;  %v8963_v1 = vld [vmem:[%s11003_s3 + $0x58] sm:$0xff]  }
 0x16c   : > { %8147 = vmatprep.subr.bf16.mxu1 %v8930_v2  ;;  %v8964_v2 = vld [vmem:[%s11003_s3 + $0xd8] sm:$0xff]  }
 0x16e   : > { %8126 = vmatpush3.bf16.msra.mxu0 %v8931_v3  ;;  %v8965_v3 = vld [vmem:[%s11003_s3 + $0x18] sm:$0xff]  }
 0x16f   : > { %8148 = vmatpush3.bf16.msra.mxu1 %v8932_v4  ;;  %8127 = vmatprep.subr.bf16.mxu0 %v8933_v5  ;;  %v8966_v4 = vld [vmem:[%s11003_s3 + $0x98] sm:$0xff]   ;;  %v8967_v5 = vld [vmem:[%s11003_s3 + $0x50] sm:$0xff]  }
 0x170   : > { %8149 = vmatprep.subr.bf16.mxu1 %v8934_v6  ;;  %v8968_v6 = vld [vmem:[%s11003_s3 + $0xd0] sm:$0xff]  }
 0x172   : > { %8128 = vmatpush3.bf16.msra.mxu0 %v8935_v7  ;;  %v8969_v7 = vld [vmem:[%s11003_s3 + $0x10] sm:$0xff]  }
 0x173   : > { %8150 = vmatpush3.bf16.msra.mxu1 %v8936_v8  ;;  %8129 = vmatprep.subr.bf16.mxu0 %v8937_v9  ;;  %v8970_v8 = vld [vmem:[%s11003_s3 + $0x90] sm:$0xff]   ;;  %v8971_v9 = vld [vmem:[%s11003_s3 + $0x48] sm:$0xff]  }
 0x174   : > { %8151 = vmatprep.subr.bf16.mxu1 %v8938_v10  ;;  %v8972_v10 = vld [vmem:[%s11003_s3 + $0xc8] sm:$0xff]  }
 0x176   : > { %8130 = vmatpush3.bf16.msra.mxu0 %v8939_v12 }
 0x177   : > { %8152 = vmatpush3.bf16.msra.mxu1 %v8940_v15  ;;  %8159 = vmatprep.subr.bf16.mxu0 %v8947_v20  ;;  %v8974_v15 = vld [vmem:[%s11003_s3 + $0x88] sm:$0xff]   ;;  %v8976_v20 = vld [vmem:[%s11003_s3 + $0xc0] sm:$0xff]  }
 0x178   : > { %8181 = vmatprep.subr.bf16.mxu1 %v8948_v46  ;;  %v8990_v46 = vld [vmem:[%s11003_s3 + $0x2f0] sm:$0xff]  }
 0x179   : > { %v7867_v14 = vpop.f32.mrf.mxu0  ;;  %4723 = vmatmul.mubr.bf16.vlgmr.msra.gmra.mxu0 %v4472_v52  ;;  %v8994_v52 = vld [vmem:[%s11003_s3 + $0x2e8] sm:$0xff]  }
 0x17a   : > { %v7889_v16 = vpop.f32.mrf.mxu1  ;;  %4763 = vmatmul.mubr.bf16.vlgmr.msra.gmra.mxu1 %v4486_v55  ;;  %8160 = vmatpush3.bf16.msra.mxu0 %v8949_v49  ;;  %v8991_v49 = vld [vmem:[%s11003_s3 + $0x230] sm:$0xff]   ;;  %v8997_v55 = vld [vmem:[%s11003_s3 + $0x260] sm:$0xff]  }
 0x17b   : > { %v7868_v18 = vpop.f32.mrf.mxu0  ;;  %8182 = vmatpush3.bf16.msra.mxu1 %v8950_v51  ;;  %8161 = vmatprep.subr.bf16.mxu0 %v8951_v56  ;;  %v8998_v51 = vld [vmem:[%s11003_s3 + $0x2e0] sm:$0xff]  }
 0x17c   : > { %v7869_v21 = vadd.f32 %v7868_v18, %v7867_v14  ;;  %v7890_v22 = vpop.f32.mrf.mxu1  ;;  %8183 = vmatprep.subr.bf16.mxu1 %v8952_v57  ;;  %v8973_v14 = vld [vmem:[%s11003_s3 + $0x8] sm:$0xff]   ;;  %v8975_v18 = vld [vmem:[%s11003_s3 + $0x40] sm:$0xff]   ;;  %5018 = vmatprep.mubr.bf16.mxu0 %v4787_v37 }
 0x17d   : > { %v7891_v25 = vadd.f32 %v7890_v22, %v7889_v16  ;;  %v7870_v26 = vpop.f32.mrf.mxu0  ;;  %v8999_v56 = vld [vmem:[%s11003_s3 + $0x220] sm:$0xff]  }
 0x17e   : > { %v7892_v31 = vpop.f32.mrf.mxu1  ;;  %v9000_v57 = vld [vmem:[%s11003_s3 + $0x2a0] sm:$0xff]  }
 0x17f   : > { %v7871_v40 = vpop.f32.mrf.mxu0  ;;  %v2985_v42 = vadd.f32 %v7891_v25, %v7869_v21  ;;  %8184 = vmatpush3.bf16.msra.mxu1 %v8954_v58  ;;  %v8978_v25 = vld [vmem:[%s11003_s3 + $0x80] sm:$0xff]   ;;  %v9002_v58 = vld [vmem:[%s11003_s3 + $0x2d8] sm:$0xff]  }
 0x180   : > { %v7893_v43 = vpop.f32.mrf.mxu1  ;;  %8185 = vmatprep.subr.bf16.mxu1 %v8956_v59  ;;  %v8984_v40 = vld [vmem:[%s9258_s21 + $0xc] ss:$16 sps:$4 sm:$0x1e]   ;;  %v9031_v37 = vld [vmem:[%s11003_s3 + $0x320] sm:$0xff]  }
 0x181   : > { %v10449_v48 = vadd.f32 %v2985_v42, %v10355_v53  ;;  %v8953_v53 = vld [vmem:[%s11003_s3 + $0x30] sm:$0xff]   ;;  %v8987_v42 = vld [vmem:[%s11003_s3 + $0x238] sm:$0xff]   ;;  %v4789_v43 = vrot.slane %v8984_v40, 1 }
 0x182   : > { %8162 = vmatpush3.bf16.msra.mxu0 %v8953_v53  ;;  %v9001_v53 = vld [vmem:[%s11003_s3 + $0x258] sm:$0xff]  }
 0x183   : > { %8163 = vmatprep.subr.bf16.mxu0 %v8955_v33  ;;  %8186 = vmatpush3.bf16.msra.mxu1 %v8958_v61  ;;  %v9003_v33 = vld [vmem:[%s11003_s3 + $0x218] sm:$0xff]   ;;  %v9006_v61 = vld [vmem:[%s11003_s3 + $0x2d0] sm:$0xff]  }
 0x184   : > { %8187 = vmatprep.subr.bf16.mxu1 %v8960_v36  ;;  %5058 = vmatprep.mubr.bf16.mxu1 %v4789_v43  ;;  %v9004_v59 = vld [vmem:[%s11003_s3 + $0x298] sm:$0xff]   ;;  %v9008_v36 = vld [vmem:[%s11003_s3 + $0x290] sm:$0xff]  }
 0x185   : > { %v9034_v40 = vld [vmem:[%s11003_s3 + $0x3d8] sm:$0xff]   ;;  %v9038_v43 = vld [vmem:[%s11003_s3 + $0x3d0] sm:$0xff]  }
 0x186   : > { %8164 = vmatpush3.bf16.msra.mxu0 %v8957_v60  ;;  %v9005_v60 = vld [vmem:[%s11003_s3 + $0x250] sm:$0xff]  }
 0x187   : > { %8165 = vmatprep.subr.bf16.mxu0 %v8959_v62  ;;  %8188 = vmatpush3.bf16.msra.mxu1 %v8962_v0  ;;  %v9007_v62 = vld [vmem:[%s11003_s3 + $0x210] sm:$0xff]   ;;  %v9009_v0 = vld [vmem:[%s11003_s3 + $0x248] sm:$0xff]  }
 0x188   : > { %8189 = vmatprep.subr.bf16.mxu1 %v8964_v2  ;;  %v9010_v2 = vld [vmem:[%s11003_s3 + $0x2c8] sm:$0xff]  }
 0x18a   : > { %8166 = vmatpush3.bf16.msra.mxu0 %v8961_v63 }
 0x18b   : > { %8167 = vmatprep.subr.bf16.mxu0 %v8963_v1  ;;  %8190 = vmatpush3.bf16.msra.mxu1 %v8966_v4  ;;  %v9011_v4 = vld [vmem:[%s11003_s3 + $0x208] sm:$0xff]  }
 0x18c   : > { %8191 = vmatprep.subr.bf16.mxu1 %v8968_v6 }
 0x18e   : > { %8168 = vmatpush3.bf16.msra.mxu0 %v8965_v3 }
 0x18f   : > { %8169 = vmatprep.subr.bf16.mxu0 %v8967_v5  ;;  %8192 = vmatpush3.bf16.msra.mxu1 %v8970_v8 }
 0x190   : > { %8193 = vmatprep.subr.bf16.mxu1 %v8972_v10  ;;  %v9013_v10 = vld [vmem:[%s11003_s3 + $0x240] sm:$0xff]  }
 0x192   : > { %8170 = vmatpush3.bf16.msra.mxu0 %v8969_v7  ;;  %v9012_v7 = vld [vmem:[%s11003_s3 + $0x288] sm:$0xff]  }
 0x193   : > { %8171 = vmatprep.subr.bf16.mxu0 %v8971_v9  ;;  %8194 = vmatpush3.bf16.msra.mxu1 %v8974_v15  ;;  %v9014_v15 = vld [vmem:[%s11003_s3 + $0x2c0] sm:$0xff]  }
 0x194   : > { %8195 = vmatprep.subr.bf16.mxu1 %v8976_v20  ;;  %v9016_v20 = vld [vmem:[%s11003_s3 + $0x280] sm:$0xff]  }
 0x196   : > { %8172 = vmatpush3.bf16.msra.mxu0 %v8973_v14 }
 0x197   : > { %8173 = vmatprep.subr.bf16.mxu0 %v8975_v18  ;;  %8196 = vmatpush3.bf16.msra.mxu1 %v8978_v25  ;;  %v9021_v25 = vld [vmem:[%s11003_s3 + $0x370] sm:$0xff]  }
 0x198   : > { %8225 = vmatprep.subr.bf16.mxu1 %v8986_v41  ;;  %v9035_v41 = vld [vmem:[%s11003_s3 + $0x318] sm:$0xff]  }
 0x199   : > { %v7911_v12 = vpop.f32.mrf.mxu0 }
 0x19a   : > { %v7933_v16 = vpop.f32.mrf.mxu1  ;;  %8174 = vmatpush3.bf16.msra.mxu0 %v8977_v23  ;;  %5059 = vmatmul.mubr.bf16.vlgmr.msra.gmra.mxu1 %v4788_v32  ;;  %v9019_v23 = vld [vmem:[%s11003_s3 + $0x338] sm:$0xff]  }
 0x19b   : > { %v7912_v17 = vpop.f32.mrf.mxu0  ;;  %8203 = vmatprep.subr.bf16.mxu0 %v8985_v39  ;;  %8226 = vmatpush3.bf16.msra.mxu1 %v8988_v34  ;;  %v9033_v39 = vld [vmem:[%s11003_s3 + $0x358] sm:$0xff]   ;;  %v9039_v34 = vld [vmem:[%s11003_s3 + $0x310] sm:$0xff]  }
 0x19c   : > { %v7913_v19 = vadd.f32 %v7912_v17, %v7911_v12  ;;  %v7934_v21 = vpop.f32.mrf.mxu1  ;;  %8227 = vmatprep.subr.bf16.mxu1 %v8990_v46  ;;  %5330 = vmatprep.mubr.bf16.mxu1 %v9528_v47  ;;  %v8996_v47 = vld [vmem:[%s11003_s3 + $0x2a8] sm:$0xff]   ;;  %v9015_v17 = vld [vmem:[%s11003_s3 + $0x200] sm:$0xff]   ;;  %v9036_v32 = vld [vmem:[%s11003_s3 + $0x398] sm:$0xff]  }
 0x19d   : > { %v7914_v22 = vpop.f32.mrf.mxu0  ;;  %v7935_v24 = vadd.f32 %v7934_v21, %v7933_v16  ;;  %5019 = vmatmul.mubr.bf16.vlgmr.msra.gmra.mxu0 %v4786_v35  ;;  %v9017_v21 = vld [vmem:[%s11003_s3 + $0x378] sm:$0xff]   ;;  %v9030_v35 = vld [vmem:[%s11003_s3 + $0x3e0] sm:$0xff]   ;;  %v9041_v46 = vld [vmem:[%s11003_s3 + $0x348] sm:$0xff]  }
 0x19e   : > { %v7936_v26 = vpop.f32.mrf.mxu1  ;;  %8204 = vmatpush3.bf16.msra.mxu0 %v8987_v42  ;;  %5290 = vmatprep.mubr.bf16.mxu0 %v9521_v45  ;;  %v8992_v45 = vld [vmem:[%s11003_s3 + $0x2b0] sm:$0xff]   ;;  %v9018_v22 = vld [vmem:[%s11003_s3 + $0x3f8] sm:$0xff]  }
 0x19f   : > { %v7915_v27 = vpop.f32.mrf.mxu0  ;;  %v10540_v30 = vadd.f32 %v7935_v24, %v7913_v19  ;;  %8205 = vmatprep.subr.bf16.mxu0 %v8989_v44  ;;  %8228 = vmatpush3.bf16.msra.mxu1 %v8992_v45  ;;  %v9020_v24 = vld [vmem:[%s11003_s3 + $0x3b8] sm:$0xff]   ;;  %v9022_v26 = vld [vmem:[%s11003_s3 + $0x3f0] sm:$0xff]  }
 0x1a0   : > { %v7937_v31 = vpop.f32.mrf.mxu1  ;;  %8229 = vmatprep.subr.bf16.mxu1 %v8994_v52  ;;  %v9024_v27 = vld [vmem:[%s11003_s3 + $0x3b0] sm:$0xff]   ;;  %v9043_v52 = vld [vmem:[%s11003_s3 + $0x308] sm:$0xff]  }
 0x1a1   : > { %v9029_v31 = vld [vmem:[%s11003_s3 + $0x360] sm:$0xff]   ;;  %v9037_v42 = vld [vmem:[%s11003_s3 + $0x350] sm:$0xff]  }
 0x1a2   : > { %8206 = vmatpush3.bf16.msra.mxu0 %v8991_v49  ;;  %v9040_v44 = vld [vmem:[%s11003_s3 + $0x390] sm:$0xff]  }
 0x1a3   : > { %8207 = vmatprep.subr.bf16.mxu0 %v8993_v50  ;;  %8230 = vmatpush3.bf16.msra.mxu1 %v8996_v47  ;;  %v9042_v50 = vld [vmem:[%s11003_s3 + $0x3c8] sm:$0xff]  }
 0x1a4   : > { %8231 = vmatprep.subr.bf16.mxu1 %v8998_v51 }
 0x1a6   : > { %8208 = vmatpush3.bf16.msra.mxu0 %v8995_v54 }
 0x1a7   : > { %8209 = vmatprep.subr.bf16.mxu0 %v8997_v55  ;;  %8232 = vmatpush3.bf16.msra.mxu1 %v9000_v57  ;;  %v9044_v55 = vld [vmem:[%s11003_s3 + $0x388] sm:$0xff]   ;;  %v9045_v57 = vld [vmem:[%s11003_s3 + $0x340] sm:$0xff]  }
 0x1a8   : > { %8233 = vmatprep.subr.bf16.mxu1 %v9002_v58 }
 0x1aa   : > { %8210 = vmatpush3.bf16.msra.mxu0 %v8999_v56 }
 0x1ab   : > { %8211 = vmatprep.subr.bf16.mxu0 %v9001_v53  ;;  %8234 = vmatpush3.bf16.msra.mxu1 %v9004_v59 }
 0x1ac   : > { %8235 = vmatprep.subr.bf16.mxu1 %v9006_v61 }
 0x1ae   : > { %8212 = vmatpush3.bf16.msra.mxu0 %v9003_v33  ;;  %v9046_v33 = vld [vmem:[%s11003_s3 + $0x3c0] sm:$0xff]  }
 0x1af   : > { %8213 = vmatprep.subr.bf16.mxu0 %v9005_v60  ;;  %8236 = vmatpush3.bf16.msra.mxu1 %v9008_v36  ;;  %v9047_v60 = vld [vmem:[%s11003_s3 + $0x300] sm:$0xff]  }
 0x1b0   : > { %8237 = vmatprep.subr.bf16.mxu1 %v9010_v2  ;;  %v9048_v36 = vld [vmem:[%s11003_s3 + $0x380] sm:$0xff]  }
 0x1b2   : > { %8214 = vmatpush3.bf16.msra.mxu0 %v9007_v62 }
 0x1b3   : > { %8215 = vmatprep.subr.bf16.mxu0 %v9009_v0  ;;  %8238 = vmatpush3.bf16.msra.mxu1 %v9012_v7 }
 0x1b4   : > { %8239 = vmatprep.subr.bf16.mxu1 %v9014_v15  ;;  %v9054_v15 = vld [vmem:[%s11003_s3 + $0x4f8] sm:$0xff]  }
 0x1b6   : > { %8216 = vmatpush3.bf16.msra.mxu0 %v9011_v4  ;;  %v5340_v4 = vld [vmem:[%s9258_s21 + $0x28] sm:$0x88] }
 0x1b7   : > { %8217 = vmatprep.subr.bf16.mxu0 %v9013_v10  ;;  %8240 = vmatpush3.bf16.msra.mxu1 %v9016_v20 }
 0x1b8   : > { %8269 = vmatprep.subr.bf16.mxu1 %v9018_v22 }
 0x1b9   : > { %v7955_v63 = vpop.f32.mrf.mxu0 }
 0x1ba   : > { %v7977_v1 = vpop.f32.mrf.mxu1  ;;  %8218 = vmatpush3.bf16.msra.mxu0 %v9015_v17  ;;  %5331 = vmatmul.mubr.bf16.vlgmr.msra.gmra.mxu1 %v9622_v13  ;;  %v9025_v13 = vld [vmem:[%s11003_s3 + $0x368] sm:$0xff]  }
 0x1bb   : > { %v7956_v3 = vpop.f32.mrf.mxu0  ;;  %8247 = vmatprep.subr.bf16.mxu0 %v9017_v21  ;;  %8270 = vmatpush3.bf16.msra.mxu1 %v9020_v24  ;;  %v9055_v24 = vld [vmem:[%s11003_s3 + $0x438] sm:$0xff]  }
 0x1bc   : > { %v7957_v5 = vadd.f32 %v7956_v3, %v7955_v63  ;;  %v7978_v6 = vpop.f32.mrf.mxu1  ;;  %8271 = vmatprep.subr.bf16.mxu1 %v9022_v26  ;;  %v5339_v63 = vld [vmem:[%s9258_s21 + $0x20] sm:$0x88] }
 0x1bd   : > { %v7979_v8 = vadd.f32 %v7978_v6, %v7977_v1  ;;  %v7958_v9 = vpop.f32.mrf.mxu0  ;;  %5291 = vmatmul.mubr.bf16.vlgmr.msra.gmra.mxu0 %v9615_v11  ;;  %v9023_v11 = vld [vmem:[%s11003_s3 + $0x330] sm:$0xff]  }
 0x1be   : > { %v3534_v12 = vadd.f32 %v7957_v5, %v10540_v30  ;;  %v7980_v14 = vpop.f32.mrf.mxu1  ;;  %8248 = vmatpush3.bf16.msra.mxu0 %v9019_v23  ;;  %v9028_v30 = vld [vmem:[%s11003_s3 + $0x3a8] sm:$0xff]   ;;  %v9091_v1 = vld [vmem:[%s9258_s21 + $0x30] sm:$0xff]  ;;  %v9092_v5 = vld [vmem:[%s9258_s21 + $0x38] sm:$0xff] }
 0x1bf   : > { %v7959_v16 = vpop.f32.mrf.mxu0  ;;  %8249 = vmatprep.subr.bf16.mxu0 %v9021_v25  ;;  %8272 = vmatpush3.bf16.msra.mxu1 %v9024_v27  ;;  %v7544_v2 = vcombine.low %v5339_v63, %v9091_v1  ;;  %v7545_v3 = vcombine.high %v5339_v63, %v9091_v1  ;;  %v7546_v6 = vcombine.low %v5340_v4, %v9092_v5  ;;  %v9082_v63 = vld [vmem:[%s11003_s3 + $0x4c0] sm:$0xff]  }
 0x1c0   : > { %v10640_v18 = vadd.f32 %v7979_v8, %v3534_v12  ;;  %v7981_v19 = vpop.f32.mrf.mxu1  ;;  %8273 = vmatprep.subr.bf16.mxu1 %v9026_v28  ;;  %v7547_v7 = vcombine.high %v5340_v4, %v9092_v5  ;;  %v9053_v8 = vld [vmem:[%s11003_s3 + $0x478] sm:$0xff]   ;;  %v9084_v5 = vld [vmem:[%s11003_s3 + $0x480] sm:$0xff]  }
 0x1c1   : > { %v5360_v9 = vshrl.u32 %v7545_v3, 16  ;;  %v5363_v10 = vshll.u32 %v7545_v3, 16  ;;  %v5352_v12 = vshrl.u32 %v7544_v2, 16  ;;  %v5355_v14 = vshll.u32 %v7544_v2, 16  ;;  %v9083_v3 = vld [vmem:[%s11003_s3 + $0x400] sm:$0xff]  }
 0x1c2   : > { %8250 = vmatpush3.bf16.msra.mxu0 %v9023_v11  ;;  %v5376_v16 = vshrl.u32 %v7547_v7, 16  ;;  %v5379_v17 = vshll.u32 %v7547_v7, 16  ;;  %v5371_v19 = vshll.u32 %v7546_v6, 16  ;;  %v9087_v7 = vld [vmem:[%s9258_s21 + $0x34] ss:$16 sps:$4 sm:$0x78]  }
 0x1c3   : > { %8251 = vmatprep.subr.bf16.mxu0 %v9025_v13  ;;  %8274 = vmatpush3.bf16.msra.mxu1 %v9028_v30  ;;  %v5362_v20 = vrot.slane %v5360_v9, 3  ;;  %v5365_v21 = vrot.slane %v5363_v10, 4  ;;  %v5354_v22 = vrot.slane %v5352_v12, 3  ;;  %v5357_v23 = vrot.slane %v5355_v14, 4 }
 0x1c4   : > { %8275 = vmatprep.subr.bf16.mxu1 %v9030_v35  ;;  %v5378_v25 = vrot.slane %v5376_v16, 3  ;;  %v5381_v26 = vrot.slane %v5379_v17, 4  ;;  %v5373_v27 = vrot.slane %v5371_v19, 4  ;;  %v9057_v35 = vld [vmem:[%s11003_s3 + $0x470] sm:$0xff]   ;;  %v5681_v10 = vrot.slane %v9087_v7, 3 }
 0x1c5   : > { %v5366_v13 = vor.u32 %v5365_v21, %v5362_v20  ;;  %v5358_v28 = vor.u32 %v5357_v23, %v5354_v22  ;;  %v9088_v9 = vld [vmem:[%s9258_s21 + $0x38] ss:$16 sps:$4 sm:$0x78]   ;;  %v9090_v12 = vld [vmem:[%s9258_s21 + $0x3c] ss:$16 sps:$4 sm:$0x78]  }
 0x1c6   : > { %8252 = vmatpush3.bf16.msra.mxu0 %v9027_v29  ;;  %v9056_v29 = vld [vmem:[%s11003_s3 + $0x4b8] sm:$0xff]   ;;  %v5382_v30 = vor.u32 %v5381_v26, %v5378_v25  ;;  %v5682_v14 = vrot.slane %v9088_v9, 3 }
 0x1c7   : > { %8253 = vmatprep.subr.bf16.mxu0 %v9029_v31  ;;  %8276 = vmatpush3.bf16.msra.mxu1 %v9032_v38  ;;  %v9059_v38 = vld [vmem:[%s11003_s3 + $0x430] sm:$0xff]  }
 0x1c8   : > { %8277 = vmatprep.subr.bf16.mxu1 %v9034_v40  ;;  %5611 = vmatprep.mubr.bf16.mxu0 %v5366_v13  ;;  %v9061_v40 = vld [vmem:[%s11003_s3 + $0x468] sm:$0xff]  }
 0x1c9   : > { %5651 = vmatprep.mubr.bf16.mxu1 %v5382_v30 }
 0x1ca   : > { %8254 = vmatpush3.bf16.msra.mxu0 %v9031_v37  ;;  %v9058_v37 = vld [vmem:[%s11003_s3 + $0x4f0] sm:$0xff]  }
 0x1cb   : > { %8255 = vmatprep.subr.bf16.mxu0 %v9033_v39  ;;  %8278 = vmatpush3.bf16.msra.mxu1 %v9036_v32  ;;  %v9060_v39 = vld [vmem:[%s11003_s3 + $0x4b0] sm:$0xff]   ;;  %v9063_v32 = vld [vmem:[%s11003_s3 + $0x428] sm:$0xff]  }
 0x1cc   : > { %8279 = vmatprep.subr.bf16.mxu1 %v9038_v43  ;;  %v9065_v43 = vld [vmem:[%s11003_s3 + $0x460] sm:$0xff]  }
 0x1ce   : > { %8256 = vmatpush3.bf16.msra.mxu0 %v9035_v41  ;;  %v9062_v41 = vld [vmem:[%s11003_s3 + $0x4e8] sm:$0xff]  }
 0x1cf   : > { %8257 = vmatprep.subr.bf16.mxu0 %v9037_v42  ;;  %8280 = vmatpush3.bf16.msra.mxu1 %v9040_v44  ;;  %v9064_v42 = vld [vmem:[%s11003_s3 + $0x4a8] sm:$0xff]   ;;  %v9067_v44 = vld [vmem:[%s11003_s3 + $0x420] sm:$0xff]  }
 0x1d0   : > { %8281 = vmatprep.subr.bf16.mxu1 %v9042_v50  ;;  %v9071_v50 = vld [vmem:[%s11003_s3 + $0x418] sm:$0xff]  }
 0x1d2   : > { %8258 = vmatpush3.bf16.msra.mxu0 %v9039_v34  ;;  %v9066_v34 = vld [vmem:[%s11003_s3 + $0x4e0] sm:$0xff]  }
 0x1d3   : > { %8259 = vmatprep.subr.bf16.mxu0 %v9041_v46  ;;  %8282 = vmatpush3.bf16.msra.mxu1 %v9044_v55  ;;  %v9068_v46 = vld [vmem:[%s11003_s3 + $0x4a0] sm:$0xff]   ;;  %v9075_v55 = vld [vmem:[%s11003_s3 + $0x410] sm:$0xff]  }
 0x1d4   : > { %8283 = vmatprep.subr.bf16.mxu1 %v9046_v33 }
 0x1d6   : > { %8260 = vmatpush3.bf16.msra.mxu0 %v9043_v52  ;;  %v9072_v52 = vld [vmem:[%s11003_s3 + $0x498] sm:$0xff]  }
 0x1d7   : > { %8261 = vmatprep.subr.bf16.mxu0 %v9045_v57  ;;  %8284 = vmatpush3.bf16.msra.mxu1 %v9048_v36  ;;  %v9077_v57 = vld [vmem:[%s11003_s3 + $0x448] sm:$0xff]   ;;  %v9081_v36 = vld [vmem:[%s11003_s3 + $0x440] sm:$0xff]  }
 0x1d8   : > { %8313 = vmatprep.subr.bf16.mxu1 %v9054_v15  ;;  %v5683_v15 = vrot.slane %v9090_v12, 3 }
 0x1d9   : > { %v7999_v49 = vpop.f32.mrf.mxu0 }
 0x1da   : > { %v8021_v45 = vpop.f32.mrf.mxu1  ;;  %8262 = vmatpush3.bf16.msra.mxu0 %v9047_v60  ;;  %v9080_v60 = vld [vmem:[%s11003_s3 + $0x488] sm:$0xff]  }
 0x1db   : > { %v8000_v54 = vpop.f32.mrf.mxu0  ;;  %8291 = vmatprep.subr.bf16.mxu0 %v9053_v8 }
 0x1dc   : > { %v8022_v47 = vpop.f32.mrf.mxu1  ;;  %v8001_v51 = vadd.f32 %v8000_v54, %v7999_v49  ;;  %v9069_v49 = vld [vmem:[%s11003_s3 + $0x458] sm:$0xff]   ;;  %v9073_v54 = vld [vmem:[%s11003_s3 + $0x450] sm:$0xff]  }
 0x1dd   : > { %v8023_v56 = vadd.f32 %v8022_v47, %v8021_v45  ;;  %v8002_v53 = vpop.f32.mrf.mxu0  ;;  %5612 = vmatmul.mubr.bf16.vlgmr.msra.gmra.mxu0 %v5358_v28  ;;  %v9070_v45 = vld [vmem:[%s11003_s3 + $0x4d8] sm:$0xff]   ;;  %v9074_v47 = vld [vmem:[%s11003_s3 + $0x4d0] sm:$0xff]  }
 0x1de   : > { %v8024_v58 = vpop.f32.mrf.mxu1  ;;  %8292 = vmatpush3.bf16.msra.mxu0 %v9055_v24  ;;  %v9078_v53 = vld [vmem:[%s11003_s3 + $0x4c8] sm:$0xff]   ;;  %5912 = vmatprep.mubr.bf16.mxu0 %v5681_v10  ;;  %v9164_v10 = vmov 0.0  }
 0x1df   : > { %v3846_v59 = vadd.f32 %v8023_v56, %v8001_v51  ;;  %v8003_v61 = vpop.f32.mrf.mxu0  ;;  %8293 = vmatprep.subr.bf16.mxu0 %v9057_v35  ;;  %v9076_v51 = vld [vmem:[%s11003_s3 + $0x490] sm:$0xff]   ;;  %507 = vst.msk [vmem:[#allocation2] sm:$0xff] %vm506_vm0, %v9164_v10  ;;  %508 = vst.msk [vmem:[#allocation2 + $0x8] sm:$0xff] %vm506_vm0, %v9164_v10 }
 0x1e0   : > { %v8025_v62 = vpop.f32.mrf.mxu1  ;;  %509 = vst.msk [vmem:[#allocation2 + $0x10] sm:$0xff] %vm506_vm0, %v9164_v10  ;;  %510 = vst.msk [vmem:[#allocation2 + $0x18] sm:$0xff] %vm506_vm0, %v9164_v10 }
 0x1e1   : > { %v10745_v0 = vadd.f32 %v3846_v59, %v10640_v18  ;;  %v5368_v18 = vshrl.u32 %v7546_v6, 16  ;;  %v9079_v59 = vld [vmem:[%s11003_s3 + $0x408] sm:$0xff]   ;;  %v9085_v6 = vld [vmem:[%s9258_s21 + $0x30] ss:$16 sps:$4 sm:$0x78]   ;;  %s9163_s21 = smov 16  }
 0x1e2   : > { %8294 = vmatpush3.bf16.msra.mxu0 %v9059_v38  ;;  %v5680_v8 = vrot.slane %v9085_v6, 3  ;;  %511 = vst.msk [vmem:[#allocation2 + $0x20] sm:$0xff] %vm506_vm0, %v9164_v10 }
 0x1e3   : > { %v5370_v11 = vrot.slane %v5368_v18, 3  ;;  %8295 = vmatprep.subr.bf16.mxu0 %v9061_v40 }
 0x1e5   : > { %v5374_v31 = vor.u32 %v5373_v27, %v5370_v11 }
 0x1e6   : > { %8296 = vmatpush3.bf16.msra.mxu0 %v9063_v32 }
 0x1e7   : > { %5652 = vmatmul.mubr.bf16.vlgmr.msra.gmra.mxu1 %v5374_v31  ;;  %8297 = vmatprep.subr.bf16.mxu0 %v9065_v43 }
 0x1e8   : > { %8314 = vmatpush3.bf16.msra.mxu1 %v9056_v29  ;;  %5952 = vmatprep.mubr.bf16.mxu1 %v5683_v15 }
 0x1e9   : > { %8315 = vmatprep.subr.bf16.mxu1 %v9058_v37 }
 0x1ea   : > { %8298 = vmatpush3.bf16.msra.mxu0 %v9067_v44 }
 0x1eb   : > { %8299 = vmatprep.subr.bf16.mxu0 %v9069_v49 }
 0x1ec   : > { %8316 = vmatpush3.bf16.msra.mxu1 %v9060_v39 }
 0x1ed   : > { %8317 = vmatprep.subr.bf16.mxu1 %v9062_v41 }
 0x1ee   : > { %8300 = vmatpush3.bf16.msra.mxu0 %v9071_v50 }
 0x1ef   : > { %8301 = vmatprep.subr.bf16.mxu0 %v9073_v54 }
 0x1f0   : > { %8318 = vmatpush3.bf16.msra.mxu1 %v9064_v42 }
 0x1f1   : > { %8319 = vmatprep.subr.bf16.mxu1 %v9066_v34 }
 0x1f2   : > { %8302 = vmatpush3.bf16.msra.mxu0 %v9075_v55 }
 0x1f3   : > { %8303 = vmatprep.subr.bf16.mxu0 %v9077_v57 }
 0x1f4   : > { %8320 = vmatpush3.bf16.msra.mxu1 %v9068_v46 }
 0x1f5   : > { %8321 = vmatprep.subr.bf16.mxu1 %v9070_v45 }
 0x1f6   : > { %8304 = vmatpush3.bf16.msra.mxu0 %v9079_v59 }
 0x1f7   : > { %8305 = vmatprep.subr.bf16.mxu0 %v9081_v36 }
 0x1f8   : > { %8322 = vmatpush3.bf16.msra.mxu1 %v9072_v52 }
 0x1f9   : > { %v8043_v56 = vpop.f32.mrf.mxu0  ;;  %8323 = vmatprep.subr.bf16.mxu1 %v9074_v47 }
 0x1fa   : > { %v8065_v58 = vpop.f32.mrf.mxu1  ;;  %8306 = vmatpush3.bf16.msra.mxu0 %v9083_v3 }
 0x1fb   : > { %v8044_v33 = vpop.f32.mrf.mxu0 }
 0x1fc   : > { %v8066_v61 = vpop.f32.mrf.mxu1  ;;  %8324 = vmatpush3.bf16.msra.mxu1 %v9076_v51  ;;  %v8045_v16 = vadd.f32 %v8044_v33, %v8043_v56 }
 0x1fd   : > { %v8046_v62 = vpop.f32.mrf.mxu0  ;;  %8325 = vmatprep.subr.bf16.mxu1 %v9078_v53  ;;  %5913 = vmatmul.mubr.bf16.vlgmr.msra.gmra.mxu0 %v5680_v8  ;;  %v8067_v17 = vadd.f32 %v8066_v61, %v8065_v58 }
 0x1fe   : > { %v8068_v1 = vpop.f32.mrf.mxu1 }
 0x1ff   : > { %v8047_v2 = vpop.f32.mrf.mxu0  ;;  %v4147_v20 = vadd.f32 %v8067_v17, %v8045_v16 }
 0x200   : > { %v8069_v4 = vpop.f32.mrf.mxu1  ;;  %8326 = vmatpush3.bf16.msra.mxu1 %v9080_v60 }
 0x201   : > { %8327 = vmatprep.subr.bf16.mxu1 %v9082_v63  ;;  %v4152_v13 = vadd.f32 %v4147_v20, %v10745_v0 }
 0x204   : > { %8328 = vmatpush3.bf16.msra.mxu1 %v9084_v5 }
 0x207   : > { %5953 = vmatmul.mubr.bf16.vlgmr.msra.gmra.mxu1 %v5682_v14 }
 0x219   : > { %v8087_v18 = vpop.f32.mrf.mxu0 }
 0x21a   : > { %v8109_v19 = vpop.f32.mrf.mxu1 }
 0x21b   : > { %v8088_v21 = vpop.f32.mrf.mxu0 }
 0x21c   : > { %v8089_v22 = vadd.f32 %v8088_v21, %v8087_v18  ;;  %v8110_v23 = vpop.f32.mrf.mxu1 }
 0x21d   : > { %v8111_v24 = vadd.f32 %v8110_v23, %v8109_v19  ;;  %v8090_v25 = vpop.f32.mrf.mxu0 }
 0x21e   : > { %v8112_v26 = vpop.f32.mrf.mxu1 }
 0x21f   : > { %v4436_v11 = vadd.f32 %v8111_v24, %v8089_v22  ;;  %v8091_v27 = vpop.f32.mrf.mxu0 }
 0x220   : > { %v8113_v28 = vpop.f32.mrf.mxu1 }
 0x221   : > { %v4441_v29 = vadd.f32 %v4436_v11, %v4152_v13  ;;  %v7616_v28 = vld [vmem:[%s11004_s4] ss:$0 sm:$0xff] }
 0x223   : > { %5962 = vrot.lane.b32.xlu0 %v4441_v29, %s9163_s21 }
 0x239   : > { %v8131_v30 = vpop.f32.mrf.mxu0 }
 0x23a   : > { %v8153_v31 = vpop.f32.mrf.mxu1 }
 0x23b   : > { %v8132_v35 = vpop.f32.mrf.mxu0 }
 0x23c   : > { %v8133_v37 = vadd.f32 %v8132_v35, %v8131_v30  ;;  %v8154_v38 = vpop.f32.mrf.mxu1 }
 0x23d   : > { %v8155_v39 = vadd.f32 %v8154_v38, %v8153_v31  ;;  %v8134_v40 = vpop.f32.mrf.mxu0 }
 0x23e   : > { %v8156_v41 = vpop.f32.mrf.mxu1 }
 0x23f   : > { %v4765_v32 = vadd.f32 %v8155_v39, %v8133_v37  ;;  %v8135_v42 = vpop.f32.mrf.mxu0 }
 0x240   : > { %v8157_v43 = vpop.f32.mrf.mxu1 }
 0x25a   : > { %v8197_v46 = vpop.f32.mrf.mxu1 }
 0x25c   : > { %v8198_v50 = vpop.f32.mrf.mxu1 }
 0x25d   : > { %v8175_v34 = vpop.f32.mrf.mxu0  ;;  %v8199_v52 = vadd.f32 %v8198_v50, %v8197_v46 }
 0x25e   : > { %v8200_v47 = vpop.f32.mrf.mxu1 }
 0x25f   : > { %v8176_v44 = vpop.f32.mrf.mxu0 }
 0x260   : > { %v8177_v49 = vadd.f32 %v8176_v44, %v8175_v34  ;;  %v8201_v51 = vpop.f32.mrf.mxu1 }
 0x261   : > { %v8178_v0 = vpop.f32.mrf.mxu0 }
 0x262   : > { %v5021_v45 = vadd.f32 %v8177_v49, %v4765_v32 }
 0x263   : > { %v8179_v54 = vpop.f32.mrf.mxu0 }
 0x264   : > { %v5061_v55 = vadd.f32 %v8199_v52, %v5021_v45 }
 0x27a   : > { %v8241_v57 = vpop.f32.mrf.mxu1 }
 0x27c   : > { %v8242_v33 = vpop.f32.mrf.mxu1 }
 0x27d   : > { %v8219_v56 = vpop.f32.mrf.mxu0  ;;  %v8243_v60 = vadd.f32 %v8242_v33, %v8241_v57 }
 0x27e   : > { %v8244_v61 = vpop.f32.mrf.mxu1 }
 0x27f   : > { %v8220_v53 = vpop.f32.mrf.mxu0 }
 0x280   : > { %v8221_v58 = vadd.f32 %v8220_v53, %v8219_v56  ;;  %v8245_v63 = vpop.f32.mrf.mxu1 }
 0x281   : > { %v8222_v59 = vpop.f32.mrf.mxu0 }
 0x282   : > { %v5333_v36 = vadd.f32 %v8243_v60, %v8221_v58 }
 0x283   : > { %v8223_v62 = vpop.f32.mrf.mxu0 }
 0x284   : > { %v5338_v1 = vadd.f32 %v5333_v36, %v5061_v55 }
 0x295   : > { %v5963_v13 = vpop.permute.xlu0 %5962 }
 0x296   : > { %v5970_v29 = vsel %vm5969_vm1, %v10449_v48, %v5963_v13 }
 0x29d   : > { %v8263_v2 = vpop.f32.mrf.mxu0 }
 0x29f   : > { %v8264_v4 = vpop.f32.mrf.mxu0 }
 0x2a0   : > { %v8265_v12 = vadd.f32 %v8264_v4, %v8263_v2 }
 0x2a1   : > { %v8266_v6 = vpop.f32.mrf.mxu0 }
 0x2a3   : > { %v8267_v8 = vpop.f32.mrf.mxu0 }
 0x2a7   : > { %v8285_v3 = vpop.f32.mrf.mxu1 }
 0x2a9   : > { %v8286_v5 = vpop.f32.mrf.mxu1 }
 0x2aa   : > { %v8287_v14 = vadd.f32 %v8286_v5, %v8285_v3 }
 0x2ab   : > { %v8288_v7 = vpop.f32.mrf.mxu1 }
 0x2ac   : > { %v5654_v18 = vadd.f32 %v8287_v14, %v8265_v12 }
 0x2ad   : > { %v8289_v9 = vpop.f32.mrf.mxu1 }
 0x2ae   : > { %v5659_v25 = vadd.f32 %v5654_v18, %v5338_v1 }
 0x2bd   : > { %v8307_v15 = vpop.f32.mrf.mxu0 }
 0x2bf   : > { %v8308_v17 = vpop.f32.mrf.mxu0 }
 0x2c0   : > { %v8309_v19 = vadd.f32 %v8308_v17, %v8307_v15 }
 0x2c1   : > { %v8310_v21 = vpop.f32.mrf.mxu0 }
 0x2c3   : > { %v8311_v24 = vpop.f32.mrf.mxu0 }
 0x2c7   : > { %v8329_v16 = vpop.f32.mrf.mxu1 }
 0x2c9   : > { %v8330_v20 = vpop.f32.mrf.mxu1 }
 0x2ca   : > { %v8331_v22 = vadd.f32 %v8330_v20, %v8329_v16 }
 0x2cb   : > { %v8332_v23 = vpop.f32.mrf.mxu1 }
 0x2cc   : > { %v5955_v26 = vadd.f32 %v8331_v22, %v8309_v19 }
 0x2cd   : > { %v8333_v11 = vpop.f32.mrf.mxu1 }
 0x2ce   : > { %v5960_v27 = vadd.f32 %v5955_v26, %v5659_v25 }
 0x2d0   : > { %5966 = vrot.lane.b32.xlu0 %v5960_v27, %s9165_s27 }
 0x342   : > { %v5967_v30 = vpop.permute.xlu0 %5966 }
 0x343   : > { %v5972_v31 = vsel %vm5971_vm2, %v5970_v29, %v5967_v30 }
 0x344   : > { %v5980_v35 = vadd.f32 %v7616_v28, %v5972_v31 }
 0x346   : > { %v5981_v37 = vmax.f32 %v5980_v35, 0.0 }
 0x348   : > { %5982 = vst.msk [vmem:[#allocation2 + $0x10] sm:$0xff] %vm506_vm0, %v5981_v37 }
 0x349 PF: > { %p7617_p9 = scmp.le.s32.totalorder %s9145_s30, 0 }
 0x34b   : > { %5986 = sbr.rel (%p7617_p9) target bundleno = 1231 (0x4cf), region = 64 }
 0x350   : > { %v9093_v38 = vld [vmem:[%s9273_s15 + $0x18] sm:$0xff]   ;;  %v9166_v39 = vmov 0.0   ;;  %v9094_v48 = vld [vmem:[%s9273_s15 + $0x8] sm:$0xff]   ;;  %v9095_v40 = vld [vmem:[%s9273_s15 + $0x10] sm:$0xff]   ;;  %vm9167_vm3 = vmmov 0   ;;  %vm6063_vm4 = vcmask 261120  }
 0x351   : > { %8380 = vmatprep.subr.bf16.mxu0 %v9166_v39  ;;  %8388 = vmatprep.subr.bf16.mxu1 %v9166_v39  ;;  %v9096_v41 = vld [vmem:[%s9273_s15] sm:$0xff]   ;;  %v6049_v32 = vld [vmem:[#allocation2 + $0xf] sm:$0xff]  ;;  %v9098_v46 = vld [vmem:[%s9273_s15 + $0x38] sm:$0xff]   ;;  %vm6910_vm5 = vcmask 130048   ;;  %vm6912_vm6 = vcmask 195584  }
 0x352   : > { %8381 = vmatpush3.bf16.msra.mxu0 %v9093_v38  ;;  %8384 = vmatprep.mubr.msk.bf16.mxu0 %vm9167_vm3, %v9166_v39  ;;  %v6047_v42 = vld [vmem:[#allocation2 + $0xe] sm:$0xff]  ;;  %v6050_v43 = vpack.c.bf16 %v6049_v32, %v6049_v32  ;;  %v9099_v49 = vld [vmem:[%s9273_s15 + $0x20] sm:$0xff]   ;;  %v9102_v55 = vld [vmem:[%s9278_s17 + $0x18] sm:$0xff]  }
 0x353   : > { %8389 = vmatpush3.bf16.msra.mxu1 %v9094_v48  ;;  %8382 = vmatprep.subr.bf16.mxu0 %v9166_v39  ;;  %v6048_v34 = vpack.c.bf16 %v6047_v42, %v6047_v42  ;;  %v9097_v44 = vld [vmem:[%s9273_s15 + $0x28] sm:$0xff]   ;;  %v9100_v0 = vld [vmem:[%s9273_s15 + $0x30] sm:$0xff]   ;;  %v9103_v51 = vld [vmem:[%s9273_s15 + $0x40] sm:$0xff]  }
 0x354   : > { %8390 = vmatprep.subr.bf16.mxu1 %v9166_v39  ;;  %8392 = vmatprep.mubr.msk.bf16.mxu1 %vm9167_vm3, %v9166_v39  ;;  %v10882_v45 = vld [vmem:[#allocation2 + $0x10] sm:$0xff]  ;;  %v9101_v47 = vld [vmem:[%s9273_s15 + $0x48] sm:$0xff]   ;;  %v9107_v61 = vld [vmem:[%s9278_s17] sm:$0xff]   ;;  %s9168_s15 = smov 16  }
 0x355   : > { %v6220_v50 = vld [vmem:[#allocation2 + $0x11] sm:$0xff]  ;;  %v10890_v52 = vpack.c.bf16 %v10882_v45, %v10882_v45  ;;  %v9105_v59 = vld [vmem:[%s9278_s17 + $0x8] sm:$0xff]   ;;  %v9108_v36 = vld [vmem:[%s9278_s17 + $0x20] sm:$0xff]  }
 0x356   : > { %8383 = vmatpush3.bf16.msra.mxu0 %v9095_v40  ;;  %v6221_v54 = vpack.c.bf16 %v6220_v50, %v6220_v50  ;;  %v9104_v56 = vld [vmem:[%s9278_s17 + $0x10] sm:$0xff]   ;;  %v9106_v60 = vld [vmem:[%s9278_s17 + $0x28] sm:$0xff]   ;;  %v9109_v1 = vld [vmem:[%s9278_s17 + $0x38] sm:$0xff]  }
 0x357   : > { %8391 = vmatpush3.bf16.msra.mxu1 %v9096_v41  ;;  %8396 = vmatprep.subr.bf16.mxu0 %v9166_v39  ;;  %v6278_v57 = vld [vmem:[#allocation2 + $0x12] sm:$0xff]  ;;  %v6336_v62 = vld [vmem:[#allocation2 + $0x8] sm:$0xff]  ;;  %v9112_v5 = vld [vmem:[%s9278_s17 + $0x40] sm:$0xff]  }
 0x358   : > { %8404 = vmatprep.subr.bf16.mxu1 %v9166_v39  ;;  %v6338_v53 = vld [vmem:[#allocation2 + $0xc] sm:$0xff]  ;;  %v6279_v58 = vpack.c.bf16 %v6278_v57, %v6278_v57  ;;  %v6337_v63 = vpack.c.bf16 %v6336_v62, %v6336_v62  ;;  %v6503_v4 = vld [vmem:[#allocation2 + $0x14] sm:$0xff]  ;;  %v9116_v15 = vld [vmem:[%s9283_s18] sm:$0xff]  }
 0x359   : > { %8385 = vmatmul.mubr.msk.bf16.vlgmr.msra.gmra.mxu0 %vm6063_vm4, %v6050_v43  ;;  %v6339_v33 = vpack.c.bf16 %v6338_v53, %v6338_v53  ;;  %v9110_v2 = vld [vmem:[%s9278_s17 + $0x48] sm:$0xff]   ;;  %v9111_v3 = vld [vmem:[%s9278_s17 + $0x30] sm:$0xff]   ;;  %v6561_v6 = vld [vmem:[#allocation2 + $0x18] sm:$0xff]  ;;  %v6504_v7 = vpack.c.bf16 %v6503_v4, %v6503_v4  ;;  %s9169_s17 = smov 24  }
 0x35a   : > { %8393 = vmatmul.mubr.msk.bf16.vlgmr.msra.gmra.mxu1 %vm6063_vm4, %v6048_v34  ;;  %8397 = vmatpush3.bf16.msra.mxu0 %v9097_v44  ;;  %v6562_v8 = vpack.c.bf16 %v6561_v6, %v6561_v6  ;;  %v9113_v9 = vld [vmem:[%s9283_s18 + $0x18] sm:$0xff]   ;;  %v9114_v10 = vld [vmem:[%s9283_s18 + $0x8] sm:$0xff]   ;;  %v9115_v12 = vld [vmem:[%s9283_s18 + $0x10] sm:$0xff]  }
 0x35b   : > { %8405 = vmatpush3.bf16.msra.mxu1 %v9098_v46  ;;  %8398 = vmatprep.subr.bf16.mxu0 %v9166_v39  ;;  %v6621_v14 = vld [vmem:[#allocation2 + $0x9] sm:$0xff]  ;;  %v9118_v20 = vld [vmem:[%s9283_s18 + $0x38] sm:$0xff]   ;;  %v9119_v21 = vld [vmem:[%s9283_s18 + $0x20] sm:$0xff]  }
 0x35c   : > { %8406 = vmatprep.subr.bf16.mxu1 %v9166_v39  ;;  %8400 = vmatprep.mubr.msk.bf16.mxu0 %vm9167_vm3, %v9166_v39  ;;  %v6619_v16 = vld [vmem:[#allocation2 + $0x2] sm:$0xff]  ;;  %v6622_v17 = vpack.c.bf16 %v6621_v14, %v6621_v14  ;;  %v9120_v22 = vld [vmem:[%s9283_s18 + $0x30] sm:$0xff]  }
 0x35d   : > { %8408 = vmatprep.mubr.msk.bf16.mxu1 %vm9167_vm3, %v9166_v39  ;;  %v6620_v18 = vpack.c.bf16 %v6619_v16, %v6619_v16  ;;  %v9117_v19 = vld [vmem:[%s9283_s18 + $0x28] sm:$0xff]   ;;  %v6786_v23 = vld [vmem:[#allocation2 + $0x17] sm:$0xff]  ;;  %v9122_v26 = vld [vmem:[%s9283_s18 + $0x40] sm:$0xff]  }
 0x35e   : > { %8399 = vmatpush3.bf16.msra.mxu0 %v9099_v49  ;;  %v6787_v24 = vpack.c.bf16 %v6786_v23, %v6786_v23  ;;  %v9121_v25 = vld [vmem:[%s9283_s18 + $0x48] sm:$0xff]   ;;  %v6844_v11 = vld [vmem:[#allocation2 + $0x1e] sm:$0xff] }
 0x35f   : > { %8407 = vmatpush3.bf16.msra.mxu1 %v9100_v0  ;;  %8412 = vmatprep.subr.bf16.mxu0 %v9166_v39  ;;  %v6845_v27 = vpack.c.bf16 %v6844_v11, %v6844_v11 }
 0x360   : > { %8420 = vmatprep.subr.bf16.mxu1 %v9166_v39 }
 0x361   : > { %8401 = vmatmul.mubr.msk.bf16.vlgmr.msra.gmra.mxu0 %vm6063_vm4, %v10890_v52 }
 0x362   : > { %8409 = vmatmul.mubr.msk.bf16.vlgmr.msra.gmra.mxu1 %vm6063_vm4, %v6221_v54  ;;  %8413 = vmatpush3.bf16.msra.mxu0 %v9101_v47 }
 0x363   : > { %8421 = vmatpush3.bf16.msra.mxu1 %v9102_v55  ;;  %8414 = vmatprep.subr.bf16.mxu0 %v9166_v39 }
 0x364   : > { %8422 = vmatprep.subr.bf16.mxu1 %v9166_v39  ;;  %8416 = vmatprep.mubr.msk.bf16.mxu0 %vm9167_vm3, %v9166_v39 }
 0x365   : > { %8424 = vmatprep.mubr.msk.bf16.mxu1 %vm9167_vm3, %v9166_v39 }
 0x366   : > { %8415 = vmatpush3.bf16.msra.mxu0 %v9103_v51 }
 0x367   : > { %8423 = vmatpush3.bf16.msra.mxu1 %v9104_v56  ;;  %8428 = vmatprep.subr.bf16.mxu0 %v9166_v39 }
 0x368   : > { %8436 = vmatprep.subr.bf16.mxu1 %v9166_v39 }
 0x369   : > { %8417 = vmatmul.mubr.msk.bf16.vlgmr.msra.gmra.mxu0 %vm6063_vm4, %v6279_v58 }
 0x36a   : > { %8425 = vmatmul.mubr.msk.bf16.vlgmr.msra.gmra.mxu1 %vm6063_vm4, %v6339_v33  ;;  %8429 = vmatpush3.bf16.msra.mxu0 %v9105_v59 }
 0x36b   : > { %8437 = vmatpush3.bf16.msra.mxu1 %v9106_v60  ;;  %8430 = vmatprep.subr.bf16.mxu0 %v9166_v39 }
 0x36c   : > { %8438 = vmatprep.subr.bf16.mxu1 %v9166_v39  ;;  %8432 = vmatprep.mubr.msk.bf16.mxu0 %vm9167_vm3, %v9166_v39 }
 0x36d   : > { %8440 = vmatprep.mubr.msk.bf16.mxu1 %vm9167_vm3, %v9166_v39 }
 0x36e   : > { %8431 = vmatpush3.bf16.msra.mxu0 %v9107_v61 }
 0x36f   : > { %8439 = vmatpush3.bf16.msra.mxu1 %v9108_v36  ;;  %8444 = vmatprep.subr.bf16.mxu0 %v9166_v39 }
 0x370   : > { %8452 = vmatprep.subr.bf16.mxu1 %v9166_v39 }
 0x371   : > { %8433 = vmatmul.mubr.msk.bf16.vlgmr.msra.gmra.mxu0 %vm6063_vm4, %v6337_v63 }
 0x372   : > { %8441 = vmatmul.mubr.msk.bf16.vlgmr.msra.gmra.mxu1 %vm6063_vm4, %v10890_v52  ;;  %8445 = vmatpush3.bf16.msra.mxu0 %v9109_v1 }
 0x373   : > { %8453 = vmatpush3.bf16.msra.mxu1 %v9110_v2  ;;  %8446 = vmatprep.subr.bf16.mxu0 %v9166_v39 }
 0x374   : > { %8454 = vmatprep.subr.bf16.mxu1 %v9166_v39  ;;  %8448 = vmatprep.mubr.msk.bf16.mxu0 %vm9167_vm3, %v9166_v39 }
 0x375   : > { %8456 = vmatprep.mubr.msk.bf16.mxu1 %vm9167_vm3, %v9166_v39 }
 0x376   : > { %8447 = vmatpush3.bf16.msra.mxu0 %v9111_v3 }
 0x377   : > { %8455 = vmatpush3.bf16.msra.mxu1 %v9112_v5  ;;  %8460 = vmatprep.subr.bf16.mxu0 %v9166_v39 }
 0x378   : > { %8468 = vmatprep.subr.bf16.mxu1 %v9166_v39 }
 0x379   : > { %8449 = vmatmul.mubr.msk.bf16.vlgmr.msra.gmra.mxu0 %vm6063_vm4, %v6504_v7 }
 0x37a   : > { %8457 = vmatmul.mubr.msk.bf16.vlgmr.msra.gmra.mxu1 %vm6063_vm4, %v6562_v8  ;;  %8461 = vmatpush3.bf16.msra.mxu0 %v9113_v9 }
 0x37b   : > { %8469 = vmatpush3.bf16.msra.mxu1 %v9114_v10  ;;  %8462 = vmatprep.subr.bf16.mxu0 %v9166_v39 }
 0x37c   : > { %8470 = vmatprep.subr.bf16.mxu1 %v9166_v39  ;;  %8464 = vmatprep.mubr.msk.bf16.mxu0 %vm9167_vm3, %v9166_v39 }
 0x37d   : > { %8472 = vmatprep.mubr.msk.bf16.mxu1 %vm9167_vm3, %v9166_v39 }
 0x37e   : > { %8463 = vmatpush3.bf16.msra.mxu0 %v9115_v12 }
 0x37f   : > { %8471 = vmatpush3.bf16.msra.mxu1 %v9116_v15  ;;  %8476 = vmatprep.subr.bf16.mxu0 %v9166_v39 }
 0x380   : > { %8484 = vmatprep.subr.bf16.mxu1 %v9166_v39 }
 0x381   : > { %8465 = vmatmul.mubr.msk.bf16.vlgmr.msra.gmra.mxu0 %vm6063_vm4, %v6622_v17 }
 0x382   : > { %8473 = vmatmul.mubr.msk.bf16.vlgmr.msra.gmra.mxu1 %vm6063_vm4, %v6620_v18  ;;  %8477 = vmatpush3.bf16.msra.mxu0 %v9117_v19 }
 0x383   : > { %8485 = vmatpush3.bf16.msra.mxu1 %v9118_v20  ;;  %8478 = vmatprep.subr.bf16.mxu0 %v9166_v39 }
 0x384   : > { %8486 = vmatprep.subr.bf16.mxu1 %v9166_v39  ;;  %8480 = vmatprep.mubr.msk.bf16.mxu0 %vm9167_vm3, %v9166_v39 }
 0x385   : > { %8488 = vmatprep.mubr.msk.bf16.mxu1 %vm9167_vm3, %v9166_v39 }
 0x386   : > { %8479 = vmatpush3.bf16.msra.mxu0 %v9119_v21 }
 0x387   : > { %8487 = vmatpush3.bf16.msra.mxu1 %v9120_v22  ;;  %8492 = vmatprep.subr.bf16.mxu0 %v9166_v39 }
 0x389   : > { %8481 = vmatmul.mubr.msk.bf16.vlgmr.msra.gmra.mxu0 %vm6063_vm4, %v10890_v52 }
 0x38a   : > { %8489 = vmatmul.mubr.msk.bf16.vlgmr.msra.gmra.mxu1 %vm6063_vm4, %v6787_v24  ;;  %8493 = vmatpush3.bf16.msra.mxu0 %v9121_v25 }
 0x38b   : > { %8494 = vmatprep.subr.bf16.mxu0 %v9166_v39  ;;  %8496 = vmatprep.mubr.msk.bf16.mxu0 %vm9167_vm3, %v9166_v39 }
 0x38e   : > { %8495 = vmatpush3.bf16.msra.mxu0 %v9122_v26 }
 0x391   : > { %8497 = vmatmul.mubr.msk.bf16.vlgmr.msra.gmra.mxu0 %vm6063_vm4, %v6845_v27 }
 0x419   : > { %v6101_v13 = vpop.f32.mrf.mxu0 }
 0x41a   : > { %v6156_v28 = vpop.f32.mrf.mxu1 }
 0x41b   : > { %v6157_v29 = vadd.f32 %v6156_v28, %v6101_v13  ;;  %v8386_v30 = vpop.f32.mrf.mxu0 }
 0x41c   : > { %v8394_v31 = vpop.f32.mrf.mxu1 }
 0x41d   : > { %v6104_v35 = vpop.f32.mrf.mxu0 }
 0x41e   : > { %v6159_v37 = vpop.f32.mrf.mxu1 }
 0x41f   : > { %v8387_v38 = vpop.f32.mrf.mxu0 }
 0x420   : > { %v8395_v48 = vpop.f32.mrf.mxu1 }
 0x421   : > { %v6213_v40 = vpop.f32.mrf.mxu0 }
 0x422   : > { %v6219_v41 = vadd.f32 %v6213_v40, %v6157_v29  ;;  %v6271_v32 = vpop.f32.mrf.mxu1 }
 0x423   : > { %v8402_v42 = vpop.f32.mrf.mxu0 }
 0x424   : > { %v6277_v43 = vadd.f32 %v6271_v32, %v6219_v41  ;;  %v8410_v34 = vpop.f32.mrf.mxu1  ;;  %v7663_v42 = vld [vmem:[%s493_s28] ss:$0 sm:$0xff] }
 0x425   : > { %v6216_v39 = vpop.f32.mrf.mxu0 }
 0x426   : > { %v6274_v44 = vpop.f32.mrf.mxu1 }
 0x427   : > { %v8403_v46 = vpop.f32.mrf.mxu0 }
 0x428   : > { %v8411_v49 = vpop.f32.mrf.mxu1 }
 0x429   : > { %v6329_v0 = vpop.f32.mrf.mxu0 }
 0x42a   : > { %v6335_v50 = vadd.f32 %v6329_v0, %v6277_v43  ;;  %v6389_v52 = vpop.f32.mrf.mxu1 }
 0x42b   : > { %v8418_v54 = vpop.f32.mrf.mxu0 }
 0x42c   : > { %v8426_v47 = vpop.f32.mrf.mxu1 }
 0x42d   : > { %v6332_v55 = vpop.f32.mrf.mxu0 }
 0x42e   : > { %v6392_v51 = vpop.f32.mrf.mxu1 }
 0x42f   : > { %v8419_v56 = vpop.f32.mrf.mxu0 }
 0x430   : > { %v8427_v57 = vpop.f32.mrf.mxu1 }
 0x431   : > { %v6444_v53 = vpop.f32.mrf.mxu0 }
 0x432   : > { %v6496_v58 = vpop.f32.mrf.mxu1  ;;  %v6445_v59 = vadd.f32 %v6444_v53, %v6389_v52 }
 0x433   : > { %v8434_v33 = vpop.f32.mrf.mxu0 }
 0x434   : > { %v8442_v60 = vpop.f32.mrf.mxu1  ;;  %v6502_v63 = vadd.f32 %v6496_v58, %v6445_v59 }
 0x435   : > { %v6447_v61 = vpop.f32.mrf.mxu0 }
 0x436   : > { %v6499_v62 = vpop.f32.mrf.mxu1 }
 0x437   : > { %v8435_v36 = vpop.f32.mrf.mxu0 }
 0x438   : > { %v8443_v1 = vpop.f32.mrf.mxu1 }
 0x439   : > { %v6554_v2 = vpop.f32.mrf.mxu0 }
 0x43a   : > { %v6560_v3 = vadd.f32 %v6554_v2, %v6502_v63  ;;  %v6612_v4 = vpop.f32.mrf.mxu1 }
 0x43b   : > { %v8450_v5 = vpop.f32.mrf.mxu0 }
 0x43c   : > { %v6618_v6 = vadd.f32 %v6612_v4, %v6560_v3  ;;  %v8458_v7 = vpop.f32.mrf.mxu1 }
 0x43d   : > { %v6557_v8 = vpop.f32.mrf.mxu0 }
 0x43e   : > { %6903 = vrot.lane.b32.xlu0 %v6618_v6, %s9168_s15  ;;  %v6615_v9 = vpop.f32.mrf.mxu1 }
 0x43f   : > { %v8451_v10 = vpop.f32.mrf.mxu0 }
 0x440   : > { %v8459_v12 = vpop.f32.mrf.mxu1 }
 0x441   : > { %v6672_v14 = vpop.f32.mrf.mxu0 }
 0x442   : > { %v6727_v15 = vpop.f32.mrf.mxu1 }
 0x443   : > { %v8466_v16 = vpop.f32.mrf.mxu0  ;;  %v6728_v23 = vadd.f32 %v6727_v15, %v6672_v14 }
 0x444   : > { %v8474_v17 = vpop.f32.mrf.mxu1 }
 0x445   : > { %v6675_v18 = vpop.f32.mrf.mxu0 }
 0x446   : > { %v6730_v19 = vpop.f32.mrf.mxu1 }
 0x447   : > { %v8467_v20 = vpop.f32.mrf.mxu0 }
 0x448   : > { %v8475_v21 = vpop.f32.mrf.mxu1 }
 0x449   : > { %v6779_v22 = vpop.f32.mrf.mxu0 }
 0x44a   : > { %v6837_v24 = vpop.f32.mrf.mxu1  ;;  %v6785_v26 = vadd.f32 %v6779_v22, %v6728_v23 }
 0x44b   : > { %v8482_v25 = vpop.f32.mrf.mxu0 }
 0x44c   : > { %v8490_v11 = vpop.f32.mrf.mxu1  ;;  %v6843_v29 = vadd.f32 %v6837_v24, %v6785_v26 }
 0x44d   : > { %v6782_v27 = vpop.f32.mrf.mxu0 }
 0x44e   : > { %v6840_v13 = vpop.f32.mrf.mxu1 }
 0x44f   : > { %v8483_v28 = vpop.f32.mrf.mxu0 }
 0x450   : > { %v8491_v30 = vpop.f32.mrf.mxu1 }
 0x451   : > { %v6895_v31 = vpop.f32.mrf.mxu0 }
 0x452   : > { %v6901_v35 = vadd.f32 %v6895_v31, %v6843_v29 }
 0x453   : > { %v8498_v37 = vpop.f32.mrf.mxu0 }
 0x454   : > { %6907 = vrot.lane.b32.xlu0 %v6901_v35, %s9169_s17 }
 0x455   : > { %v6898_v38 = vpop.f32.mrf.mxu0 }
 0x457   : > { %v8499_v48 = vpop.f32.mrf.mxu0 }
 0x4b0   : > { %v6904_v40 = vpop.permute.xlu0 %6903 }
 0x4b1   : > { %v6911_v41 = vsel %vm6910_vm5, %v6335_v50, %v6904_v40 }
 0x4c6   : > { %v6908_v32 = vpop.permute.xlu0 %6907 }
 0x4c7   : > { %v6913_v43 = vsel %vm6912_vm6, %v6911_v41, %v6908_v32 }
 0x4c8   : > { %v6914_v34 = vadd.f32 %v6913_v43, %v10882_v45 }
 0x4ca   : > { %v6922_v39 = vadd.f32 %v7663_v42, %v6914_v34 }
 0x4cc   : > { %v6923_v44 = vmax.f32 %v6922_v39, 0.0 }
 0x4ce   : > { %6924 = vst.msk [vmem:[#allocation2 + $0x10] sm:$0xff] %vm6063_vm4, %v6923_v44 }
 0x4cf PF: > { %p7664_p10 = scmp.ne.s32.totalorder %s9145_s30, 14 }
 0x4d1   : > { %6928 = sbr.rel (%p7664_p10) target bundleno = 1240 (0x4d8), region = 68 }
 0x4d6   : > { %v6929_v46 = vld [vmem:[#allocation2 + $0x10] sm:$0xff]  ;;  %vm6930_vm7 = vcmask 261120  }
 0x4d7   : > { %6931 = vst.msk [vmem:[%s9263_s24] sm:$0xff] %vm6930_vm7, %v6929_v46 }
 0x4d8 PF: > { %s19_s13 = sadd.s32 1, %s9161_s13   ;;  %s11014_s16 = sld [smem:[#allocation3_spill]] }
 0x4d9   : > { %p16_p11 = scmp.ge.s32.totalorder %s19_s13, 32   ;;  %s11015_s28 = sld [smem:[#allocation4_spill]] }
 0x4da   : > { %s11016_s30 = smov %s9153_s11  ;;  %s11017_s10 = smov %s9157_s12 }
 0x4db   :  { %18 = sbr.rel (!%p16_p11) target bundleno = 3 (0x3), region = 110 }
 0x4de   : > { %s11018_s11 = smov %s11014_s16 }
 0x4df   : > { %s11019_s12 = smov %s11015_s28 }

</bundles_post_ra>
